<compile_context>
chip_gen: v7x
topology: tpu7x:2x2x1
jax: 0.10.0
libtpu: 0.0.40
codegen_flags: <defaults>
</compile_context>

<pallas_src>
import jax
import jax.numpy as jnp
from jax.experimental import pallas as pl
from jax.experimental.pallas import tpu as pltpu

_BN_EPS = 1e-5


# ----------------------------------------------------------------------------
# Kernels
# ----------------------------------------------------------------------------
def _activate(x, act):
    if act == "leaky":
        return jnp.where(x > 0, x, 0.2 * x)                  # VPU select
    if act == "sigmoid":
        # Exact sigmoid (output is 2 elements): stays in [0,1], no BCE NaNs.
        return 1.0 / (1.0 + jnp.exp(-x))
    return x


def _make_conv_kernel(act):
    """conv-as-matmul + activation, no BatchNorm.  Gridded over M tiles."""
    def kernel(p_ref, w_ref, o_ref):
        x = jnp.dot(p_ref[...], w_ref[...], preferred_element_type=jnp.float32)
        o_ref[...] = _activate(x, act).astype(o_ref.dtype)
    return kernel


def _make_conv_bn_kernel(act, eps=_BN_EPS):
    """conv-as-matmul (K-tiled, f32 acc) + training-mode BN + activation.

    Grid = (Cout tiles ["parallel"], K tiles ["arbitrary", last]).  Per-channel
    batch statistics are over the FULL M = N*OH*OW axis, so M is not tiled;
    Cout tiling keeps the stats exact.  Stats are computed in one pass
    (sum, sum-of-squares) in f32 on the final K step.
    """
    def kernel(p_ref, w_ref, g_ref, b_ref, o_ref, acc_ref):
        k = pl.program_id(1)

        @pl.when(k == 0)
        def _():
            acc_ref[...] = jnp.zeros_like(acc_ref)

        acc_ref[...] += jnp.dot(p_ref[...], w_ref[...],
                                preferred_element_type=jnp.float32)

        @pl.when(k == pl.num_programs(1) - 1)
        def _():
            x = acc_ref[...]
            inv_m = 1.0 / x.shape[0]
            s1 = jnp.sum(x, axis=0, keepdims=True)            # XLU sublane reduce
            s2 = jnp.sum(x * x, axis=0, keepdims=True)
            mean = s1 * inv_m
            var = s2 * inv_m - mean * mean                    # biased, train-mode
            y = (x - mean) * jax.lax.rsqrt(var + eps) * g_ref[...] + b_ref[...]
            o_ref[...] = _activate(y, act).astype(o_ref.dtype)
    return kernel


# ----------------------------------------------------------------------------
# im2col glue (bf16, pure strided slices fused by XLA — no compute)
# ----------------------------------------------------------------------------
def _im2col(x_nhwc, k, stride, pad):
    if pad > 0:
        x_nhwc = jnp.pad(x_nhwc, ((0, 0), (pad, pad), (pad, pad), (0, 0)))
    n, h, w, c = x_nhwc.shape
    oh = (h - k) // stride + 1
    ow = (w - k) // stride + 1
    pieces = []
    for i in range(k):
        for j in range(k):
            pieces.append(
                x_nhwc[:, i:i + stride * oh:stride, j:j + stride * ow:stride, :])
    # (N, OH, OW, kh*kw, C) -> (N*OH*OW, kh*kw*C); flatten order = (kh, kw, Cin)
    p = jnp.stack(pieces, axis=3).reshape(n, oh, ow, k * k * c)
    return p.reshape(n * oh * ow, k * k * c), (n, oh, ow)


# ----------------------------------------------------------------------------
# Tile selection (generation-aware but safe defaults everywhere)
# ----------------------------------------------------------------------------
def _tpu_kind():
    try:
        return jax.devices()[0].device_kind.lower()
    except Exception:
        return ""


def _pick_m_tile(m):
    # 512 is ~85% of the HBM roofline already and keeps >=2 grid steps per core
    # on v7x's two TensorCores (1024 would leave one step per core).
    for t in (512, 256, 128):
        if m >= t and m % t == 0:
            return t
    return m


def _pick_cout_tile(c_out):
    # v6e: 2x256x256 MXU -> tn=256 when it divides Cout.
    # v5e (128x128 MXU) / v7x (want grid >= 2 on the parallel axis): tn=128.
    pref = 256 if "v6" in _tpu_kind() else 128
    if c_out % pref == 0:
        return pref
    if c_out % 128 == 0:
        return 128
    return c_out


def _pick_k_tile(k_dim):
    for t in (512, 256, 128):
        if k_dim % t == 0:
            return t
    return k_dim


# ----------------------------------------------------------------------------
# One fused Conv2d(bias=False) [+ BatchNorm2d(train)] + activation layer
# ----------------------------------------------------------------------------
def _fused_conv_layer(x_nhwc, w_oihw, gamma=None, beta=None, *,
                      stride, pad, act, out_dtype=jnp.bfloat16):
    c_out, c_in, kh, kw = w_oihw.shape
    assert x_nhwc.shape[-1] == c_in

    patches, (n, oh, ow) = _im2col(x_nhwc.astype(jnp.bfloat16), kh, stride, pad)
    m_rows, k_dim = patches.shape
    # (Cout, Cin, kh, kw) -> (kh, kw, Cin, Cout) -> (kh*kw*Cin, Cout)
    w2d = (jnp.transpose(w_oihw, (2, 3, 1, 0))
           .reshape(kh * kw * c_in, c_out).astype(jnp.bfloat16))

    if gamma is None:
        # No BatchNorm: tile over M ("parallel") so DMA/compute pipeline and,
        # on v7x, both TensorCores split the rows.
        tm = _pick_m_tile(m_rows)
        out = pl.pallas_call(
            _make_conv_kernel(act),
            out_shape=jax.ShapeDtypeStruct((m_rows, c_out), out_dtype),
            grid=(m_rows // tm,),
            in_specs=[
                pl.BlockSpec((tm, k_dim), lambda i: (i, 0)),
                pl.BlockSpec((k_dim, c_out), lambda i: (0, 0)),
            ],
            out_specs=pl.BlockSpec((tm, c_out), lambda i: (i, 0)),
            compiler_params=pltpu.CompilerParams(
                dimension_semantics=("parallel",)),
        )(patches, w2d)
    else:
        # BatchNorm: Cout tiles ("parallel") x K tiles ("arbitrary", last) with
        # an f32 accumulator.  Full M per block keeps per-channel stats exact.
        # NOTE: patch block is (N*OH*OW, tk) bf16 and scales with batch; fine at
        # small N (conv2 @ N=2 ~ 0.5 MiB) — switch to a two-pass / accumulated-
        # stats BN before scaling batch (v7x scoped VMEM default is 32 MiB).
        tn = _pick_cout_tile(c_out)
        tk = _pick_k_tile(k_dim)
        g = gamma.reshape(1, c_out).astype(jnp.float32)
        b = beta.reshape(1, c_out).astype(jnp.float32)
        out = pl.pallas_call(
            _make_conv_bn_kernel(act),
            out_shape=jax.ShapeDtypeStruct((m_rows, c_out), out_dtype),
            grid=(c_out // tn, k_dim // tk),
            in_specs=[
                pl.BlockSpec((m_rows, tk), lambda j, k: (0, k)),
                pl.BlockSpec((tk, tn), lambda j, k: (k, j)),
                pl.BlockSpec((1, tn), lambda j, k: (0, j)),
                pl.BlockSpec((1, tn), lambda j, k: (0, j)),
            ],
            out_specs=pl.BlockSpec((m_rows, tn), lambda j, k: (0, j)),
            scratch_shapes=[pltpu.VMEM((m_rows, tn), jnp.float32)],
            compiler_params=pltpu.CompilerParams(
                dimension_semantics=("parallel", "arbitrary")),
        )(patches, w2d, g, b)

    return out.reshape(n, oh, ow, c_out)


# ----------------------------------------------------------------------------
# Parameter initialization (deterministic, PyTorch-default-like)
# ----------------------------------------------------------------------------
def init_params(key):
    def conv_w(key, c_out, c_in, k):
        fan_in = c_in * k * k
        bound = 1.0 / jnp.sqrt(fan_in)  # kaiming_uniform(a=sqrt(5)) bound
        return jax.random.uniform(key, (c_out, c_in, k, k), jnp.float32,
                                  -bound, bound)

    ks = jax.random.split(key, 5)
    return {
        "w1": conv_w(ks[0], 64, 3, 4),
        "w2": conv_w(ks[1], 128, 64, 4),
        "w3": conv_w(ks[2], 256, 128, 4),
        "w4": conv_w(ks[3], 512, 256, 4),
        "w5": conv_w(ks[4], 1, 512, 4),
        # BatchNorm2d defaults: gamma = 1, beta = 0
        "g2": jnp.ones((128,), jnp.float32), "b2": jnp.zeros((128,), jnp.float32),
        "g3": jnp.ones((256,), jnp.float32), "b3": jnp.zeros((256,), jnp.float32),
        "g4": jnp.ones((512,), jnp.float32), "b4": jnp.zeros((512,), jnp.float32),
    }


# ----------------------------------------------------------------------------
# Discriminator forward (matches the PyTorch module semantics)
# ----------------------------------------------------------------------------
def discriminator_forward(x_nchw, params):
    x = jnp.transpose(x_nchw, (0, 2, 3, 1)).astype(jnp.bfloat16)  # NCHW -> NHWC
    # Pad Cin 3 -> 8 so conv1's contraction dim is 4*4*8 = 128 (lane aligned).
    x = jnp.pad(x, ((0, 0), (0, 0), (0, 0), (0, 5)))
    # conv1 Cout padded 64 -> 128 (lane-dense stores) with zero filters; conv5
    # Cout padded only 1 -> 8 (output is 2 elements; big pads were pure DMA
    # waste).  Extra channels are exactly zero and sliced off in glue.
    w1p = jnp.pad(params["w1"], ((0, 64), (0, 5), (0, 0), (0, 0)))   # (128,8,4,4)
    w5p = jnp.pad(params["w5"], ((0, 7), (0, 0), (0, 0), (0, 0)))    # (8,512,4,4)

    # conv1 + LeakyReLU(0.2)   (no BN)
    h1 = _fused_conv_layer(x, w1p, stride=2, pad=1, act="leaky")
    h1 = h1[..., :64]   # drop zero pad channels (fused into next im2col slices)

    # conv2..4 + BatchNorm(train) + LeakyReLU(0.2)
    h2 = _fused_conv_layer(h1, params["w2"], params["g2"], params["b2"],
                           stride=2, pad=1, act="leaky")
    h3 = _fused_conv_layer(h2, params["w3"], params["g3"], params["b3"],
                           stride=2, pad=1, act="leaky")
    h4 = _fused_conv_layer(h3, params["w4"], params["g4"], params["b4"],
                           stride=2, pad=1, act="leaky")

    # conv5 + exact sigmoid (no BN); the real output is column 0 of the 8.
    out = _fused_conv_layer(h4, w5p, stride=1, pad=0, act="sigmoid",
                            out_dtype=jnp.float32)
    out = out[..., :1]

    to_nchw_f32 = lambda t: jnp.transpose(t, (0, 3, 1, 2)).astype(jnp.float32)
    return to_nchw_f32(out), [to_nchw_f32(h2), to_nchw_f32(h3), to_nchw_f32(h4)]


if __name__ == "__main__":
    key = jax.random.PRNGKey(0)
    k_x, k_p = jax.random.split(key)

    # Smallest input for which conv5 (4x4, stride 1, pad 0) is valid: 64x64.
    x = jax.random.normal(k_x, (2, 3, 64, 64), jnp.float32)
    params = init_params(k_p)

    fwd = jax.jit(discriminator_forward)
    sig, feats = fwd(x, params)
    jax.block_until_ready((sig, feats))

    assert sig.shape == (2, 1, 1, 1)
    assert feats[0].shape == (2, 128, 16, 16)
    assert feats[1].shape == (2, 256, 8, 8)
    assert feats[2].shape == (2, 512, 4, 4)
    assert bool(jnp.all(jnp.isfinite(sig)))
    assert bool(jnp.all((sig >= 0.0) & (sig <= 1.0)))   # exact sigmoid

    print("KERNEL_OK")
</pallas_src>

<mosaic_0001>
module attributes {stable_mosaic.version = 11 : i64} {
  func.func @kernel(%arg0: i32, %arg1: memref<512x128xbf16, #tpu.memory_space<vmem>>, %arg2: memref<128x128xbf16, #tpu.memory_space<vmem>>, %arg3: memref<512x128xbf16, #tpu.memory_space<vmem>>) attributes {dimension_semantics = [#tpu.dimension_semantics<parallel>], iteration_bounds = array<i64: 4>, scalar_prefetch = 0 : i64, scratch_operands = 0 : i64, tpu.core_type = #tpu.core_type<tc>, window_params = [{transform_indices = @transform_0, window_bounds = array<i64: 512, 128>}, {pipeline_mode = #tpu.pipeline_mode<synchronous>, transform_indices = @transform_1, window_bounds = array<i64: 128, 128>}, {transform_indices = @transform_2, window_bounds = array<i64: 512, 128>}]} {
    %c0 = arith.constant 0 : index
    %c0_0 = arith.constant 0 : index
    %0 = vector.load %arg1[%c0, %c0_0] : memref<512x128xbf16, #tpu.memory_space<vmem>>, vector<512x128xbf16>
    %c0_1 = arith.constant 0 : index
    %c0_2 = arith.constant 0 : index
    %1 = vector.load %arg2[%c0_1, %c0_2] : memref<128x128xbf16, #tpu.memory_space<vmem>>, vector<128x128xbf16>
    %cst = arith.constant dense<0.000000e+00> : vector<512x128xf32>
    %2 = tpu.matmul %0, %1, %cst {dimension_numbers = #tpu.dot_dimension_numbers<[1], [0], [0], [1], [0, 0, 1, 1], [], []>} : vector<512x128xbf16>, vector<128x128xbf16>, vector<512x128xf32> -> vector<512x128xf32>
    %cst_3 = arith.constant 0.000000e+00 : f32
    %3 = vector.broadcast %cst_3 : f32 to vector<512x128xf32>
    %4 = arith.cmpf ogt, %2, %3 : vector<512x128xf32>
    %cst_4 = arith.constant 2.000000e-01 : f32
    %5 = vector.broadcast %cst_4 : f32 to vector<512x128xf32>
    %6 = arith.mulf %5, %2 : vector<512x128xf32>
    %7 = arith.select %4, %2, %6 : vector<512x128xi1>, vector<512x128xf32>
    %8 = arith.truncf %7 : vector<512x128xf32> to vector<512x128xbf16>
    %c0_5 = arith.constant 0 : index
    %c0_6 = arith.constant 0 : index
    %9 = vector.load %arg3[%c0_5, %c0_6] : memref<512x128xbf16, #tpu.memory_space<vmem>>, vector<512x128xbf16>
    tpu.vector_store %arg3[%c0_5, %c0_6], %8 {strides = array<i32>} : memref<512x128xbf16, #tpu.memory_space<vmem>>, vector<512x128xbf16>,
    return
  }
  func.func @transform_0(%arg0: i32) -> (i32, i32) {
    %c0_i32 = arith.constant 0 : i32
    %c0_i32_0 = arith.constant 0 : i32
    return %arg0, %c0_i32 : i32, i32
  }
  func.func @transform_1(%arg0: i32) -> (i32, i32) {
    %c0_i32 = arith.constant 0 : i32
    %c0_i32_0 = arith.constant 0 : i32
    %c0_i32_1 = arith.constant 0 : i32
    return %c0_i32, %c0_i32_0 : i32, i32
  }
  func.func @transform_2(%arg0: i32) -> (i32, i32) {
    %c0_i32 = arith.constant 0 : i32
    %c0_i32_0 = arith.constant 0 : i32
    return %arg0, %c0_i32 : i32, i32
  }
}

module attributes {stable_mosaic.version = 11 : i64} {
  func.func @kernel(%arg0: i32, %arg1: i32, %arg2: memref<512x512xbf16, #tpu.memory_space<vmem>>, %arg3: memref<512x128xbf16, #tpu.memory_space<vmem>>, %arg4: memref<1x128xf32, #tpu.memory_space<vmem>>, %arg5: memref<1x128xf32, #tpu.memory_space<vmem>>, %arg6: memref<512x128xbf16, #tpu.memory_space<vmem>>, %arg7: memref<512x128xf32, #tpu.memory_space<vmem>>) attributes {dimension_semantics = [#tpu.dimension_semantics<parallel>, #tpu.dimension_semantics<arbitrary>], iteration_bounds = array<i64: 1, 2>, scalar_prefetch = 0 : i64, scratch_operands = 1 : i64, tpu.core_type = #tpu.core_type<tc>, window_params = [{transform_indices = @transform_0, window_bounds = array<i64: 512, 512>}, {transform_indices = @transform_1, window_bounds = array<i64: 512, 128>}, {transform_indices = @transform_2, window_bounds = array<i64: 1, 128>}, {transform_indices = @transform_3, window_bounds = array<i64: 1, 128>}, {transform_indices = @transform_4, window_bounds = array<i64: 512, 128>}]} {
    %c0_i32 = arith.constant 0 : i32
    %0 = arith.cmpi eq, %arg1, %c0_i32 : i32
    %1 = arith.extui %0 : i1 to i32
    %c0_i32_0 = arith.constant 0 : i32
    %2 = arith.cmpi ne, %1, %c0_i32_0 : i32
    scf.if %2 {
      %cst_9 = arith.constant 0.000000e+00 : f32
      %12 = vector.broadcast %cst_9 : f32 to vector<512x128xf32>
      %c0_10 = arith.constant 0 : index
      %c0_11 = arith.constant 0 : index
      %13 = vector.load %arg7[%c0_10, %c0_11] : memref<512x128xf32, #tpu.memory_space<vmem>>, vector<512x128xf32>
      tpu.vector_store %arg7[%c0_10, %c0_11], %12 {strides = array<i32>} : memref<512x128xf32, #tpu.memory_space<vmem>>, vector<512x128xf32>,
    } else {
    }
    %c0 = arith.constant 0 : index
    %c0_1 = arith.constant 0 : index
    %3 = vector.load %arg7[%c0, %c0_1] : memref<512x128xf32, #tpu.memory_space<vmem>>, vector<512x128xf32>
    %c0_2 = arith.constant 0 : index
    %c0_3 = arith.constant 0 : index
    %4 = vector.load %arg2[%c0_2, %c0_3] : memref<512x512xbf16, #tpu.memory_space<vmem>>, vector<512x512xbf16>
    %c0_4 = arith.constant 0 : index
    %c0_5 = arith.constant 0 : index
    %5 = vector.load %arg3[%c0_4, %c0_5] : memref<512x128xbf16, #tpu.memory_space<vmem>>, vector<512x128xbf16>
    %cst = arith.constant dense<0.000000e+00> : vector<512x128xf32>
    %6 = tpu.matmul %4, %5, %cst {dimension_numbers = #tpu.dot_dimension_numbers<[1], [0], [0], [1], [0, 0, 1, 1], [], []>} : vector<512x512xbf16>, vector<512x128xbf16>, vector<512x128xf32> -> vector<512x128xf32>
    %7 = arith.addf %3, %6 : vector<512x128xf32>
    %c0_6 = arith.constant 0 : index
    %c0_7 = arith.constant 0 : index
    %8 = vector.load %arg7[%c0_6, %c0_7] : memref<512x128xf32, #tpu.memory_space<vmem>>, vector<512x128xf32>
    tpu.vector_store %arg7[%c0_6, %c0_7], %7 {strides = array<i32>} : memref<512x128xf32, #tpu.memory_space<vmem>>, vector<512x128xf32>,
    %c1_i32 = arith.constant 1 : i32
    %9 = arith.cmpi eq, %arg1, %c1_i32 : i32
    %10 = arith.extui %9 : i1 to i32
    %c0_i32_8 = arith.constant 0 : i32
    %11 = arith.cmpi ne, %10, %c0_i32_8 : i32
    scf.if %11 {
      %c0_9 = arith.constant 0 : index
      %c0_10 = arith.constant 0 : index
      %12 = vector.load %arg7[%c0_9, %c0_10] : memref<512x128xf32, #tpu.memory_space<vmem>>, vector<512x128xf32>
      %cst_11 = arith.constant dense<0.000000e+00> : vector<128xf32>
      %13 = vector.multi_reduction <add>, %12, %cst_11 [0] : vector<512x128xf32> to vector<128xf32>
      %14 = vector.shape_cast %13 : vector<128xf32> to vector<1x128xf32>
      %15 = arith.mulf %12, %12 : vector<512x128xf32>
      %cst_12 = arith.constant dense<0.000000e+00> : vector<128xf32>
      %16 = vector.multi_reduction <add>, %15, %cst_12 [0] : vector<512x128xf32> to vector<128xf32>
      %17 = vector.shape_cast %16 : vector<128xf32> to vector<1x128xf32>
      %cst_13 = arith.constant 0.001953125 : f32
      %18 = vector.broadcast %cst_13 : f32 to vector<1x128xf32>
      %19 = arith.mulf %14, %18 : vector<1x128xf32>
      %cst_14 = arith.constant 0.001953125 : f32
      %20 = vector.broadcast %cst_14 : f32 to vector<1x128xf32>
      %21 = arith.mulf %17, %20 : vector<1x128xf32>
      %22 = arith.mulf %19, %19 : vector<1x128xf32>
      %23 = arith.subf %21, %22 : vector<1x128xf32>
      %24 = vector.broadcast %19 : vector<1x128xf32> to vector<512x128xf32>
      %25 = arith.subf %12, %24 : vector<512x128xf32>
      %cst_15 = arith.constant 9.99999974E-6 : f32
      %26 = vector.broadcast %cst_15 : f32 to vector<1x128xf32>
      %27 = arith.addf %23, %26 : vector<1x128xf32>
      %28 = math.rsqrt %27 : vector<1x128xf32>
      %29 = vector.broadcast %28 : vector<1x128xf32> to vector<512x128xf32>
      %30 = arith.mulf %25, %29 : vector<512x128xf32>
      %c0_16 = arith.constant 0 : index
      %c0_17 = arith.constant 0 : index
      %31 = vector.load %arg4[%c0_16, %c0_17] : memref<1x128xf32, #tpu.memory_space<vmem>>, vector<1x128xf32>
      %32 = vector.broadcast %31 : vector<1x128xf32> to vector<512x128xf32>
      %33 = arith.mulf %30, %32 : vector<512x128xf32>
      %c0_18 = arith.constant 0 : index
      %c0_19 = arith.constant 0 : index
      %34 = vector.load %arg5[%c0_18, %c0_19] : memref<1x128xf32, #tpu.memory_space<vmem>>, vector<1x128xf32>
      %35 = vector.broadcast %34 : vector<1x128xf32> to vector<512x128xf32>
      %36 = arith.addf %33, %35 : vector<512x128xf32>
      %cst_20 = arith.constant 0.000000e+00 : f32
      %37 = vector.broadcast %cst_20 : f32 to vector<512x128xf32>
      %38 = arith.cmpf ogt, %36, %37 : vector<512x128xf32>
      %cst_21 = arith.constant 2.000000e-01 : f32
      %39 = vector.broadcast %cst_21 : f32 to vector<512x128xf32>
      %40 = arith.mulf %39, %36 : vector<512x128xf32>
      %41 = arith.select %38, %36, %40 : vector<512x128xi1>, vector<512x128xf32>
      %42 = arith.truncf %41 : vector<512x128xf32> to vector<512x128xbf16>
      %c0_22 = arith.constant 0 : index
      %c0_23 = arith.constant 0 : index
      %43 = vector.load %arg6[%c0_22, %c0_23] : memref<512x128xbf16, #tpu.memory_space<vmem>>, vector<512x128xbf16>
      tpu.vector_store %arg6[%c0_22, %c0_23], %42 {strides = array<i32>} : memref<512x128xbf16, #tpu.memory_space<vmem>>, vector<512x128xbf16>,
    } else {
    }
    return
  }
  func.func @transform_0(%arg0: i32, %arg1: i32) -> (i32, i32) {
    %c0_i32 = arith.constant 0 : i32
    %c0_i32_0 = arith.constant 0 : i32
    return %c0_i32, %arg1 : i32, i32
  }
  func.func @transform_1(%arg0: i32, %arg1: i32) -> (i32, i32) {
    %c0_i32 = arith.constant 0 : i32
    return %arg1, %arg0 : i32, i32
  }
  func.func @transform_2(%arg0: i32, %arg1: i32) -> (i32, i32) {
    %c0_i32 = arith.constant 0 : i32
    %c0_i32_0 = arith.constant 0 : i32
    return %c0_i32, %arg0 : i32, i32
  }
  func.func @transform_3(%arg0: i32, %arg1: i32) -> (i32, i32) {
    %c0_i32 = arith.constant 0 : i32
    %c0_i32_0 = arith.constant 0 : i32
    return %c0_i32, %arg0 : i32, i32
  }
  func.func @transform_4(%arg0: i32, %arg1: i32) -> (i32, i32) {
    %c0_i32 = arith.constant 0 : i32
    %c0_i32_0 = arith.constant 0 : i32
    return %c0_i32, %arg0 : i32, i32
  }
}

module attributes {stable_mosaic.version = 11 : i64} {
  func.func @kernel(%arg0: i32, %arg1: i32, %arg2: memref<128x512xbf16, #tpu.memory_space<vmem>>, %arg3: memref<512x128xbf16, #tpu.memory_space<vmem>>, %arg4: memref<1x128xf32, #tpu.memory_space<vmem>>, %arg5: memref<1x128xf32, #tpu.memory_space<vmem>>, %arg6: memref<128x128xbf16, #tpu.memory_space<vmem>>, %arg7: memref<128x128xf32, #tpu.memory_space<vmem>>) attributes {dimension_semantics = [#tpu.dimension_semantics<parallel>, #tpu.dimension_semantics<arbitrary>], iteration_bounds = array<i64: 2, 4>, scalar_prefetch = 0 : i64, scratch_operands = 1 : i64, tpu.core_type = #tpu.core_type<tc>, window_params = [{transform_indices = @transform_0, window_bounds = array<i64: 128, 512>}, {transform_indices = @transform_1, window_bounds = array<i64: 512, 128>}, {transform_indices = @transform_2, window_bounds = array<i64: 1, 128>}, {transform_indices = @transform_3, window_bounds = array<i64: 1, 128>}, {transform_indices = @transform_4, window_bounds = array<i64: 128, 128>}]} {
    %c0_i32 = arith.constant 0 : i32
    %0 = arith.cmpi eq, %arg1, %c0_i32 : i32
    %1 = arith.extui %0 : i1 to i32
    %c0_i32_0 = arith.constant 0 : i32
    %2 = arith.cmpi ne, %1, %c0_i32_0 : i32
    scf.if %2 {
      %cst_9 = arith.constant 0.000000e+00 : f32
      %12 = vector.broadcast %cst_9 : f32 to vector<128x128xf32>
      %c0_10 = arith.constant 0 : index
      %c0_11 = arith.constant 0 : index
      %13 = vector.load %arg7[%c0_10, %c0_11] : memref<128x128xf32, #tpu.memory_space<vmem>>, vector<128x128xf32>
      tpu.vector_store %arg7[%c0_10, %c0_11], %12 {strides = array<i32>} : memref<128x128xf32, #tpu.memory_space<vmem>>, vector<128x128xf32>,
    } else {
    }
    %c0 = arith.constant 0 : index
    %c0_1 = arith.constant 0 : index
    %3 = vector.load %arg7[%c0, %c0_1] : memref<128x128xf32, #tpu.memory_space<vmem>>, vector<128x128xf32>
    %c0_2 = arith.constant 0 : index
    %c0_3 = arith.constant 0 : index
    %4 = vector.load %arg2[%c0_2, %c0_3] : memref<128x512xbf16, #tpu.memory_space<vmem>>, vector<128x512xbf16>
    %c0_4 = arith.constant 0 : index
    %c0_5 = arith.constant 0 : index
    %5 = vector.load %arg3[%c0_4, %c0_5] : memref<512x128xbf16, #tpu.memory_space<vmem>>, vector<512x128xbf16>
    %cst = arith.constant dense<0.000000e+00> : vector<128x128xf32>
    %6 = tpu.matmul %4, %5, %cst {dimension_numbers = #tpu.dot_dimension_numbers<[1], [0], [0], [1], [0, 0, 1, 1], [], []>} : vector<128x512xbf16>, vector<512x128xbf16>, vector<128x128xf32> -> vector<128x128xf32>
    %7 = arith.addf %3, %6 : vector<128x128xf32>
    %c0_6 = arith.constant 0 : index
    %c0_7 = arith.constant 0 : index
    %8 = vector.load %arg7[%c0_6, %c0_7] : memref<128x128xf32, #tpu.memory_space<vmem>>, vector<128x128xf32>
    tpu.vector_store %arg7[%c0_6, %c0_7], %7 {strides = array<i32>} : memref<128x128xf32, #tpu.memory_space<vmem>>, vector<128x128xf32>,
    %c3_i32 = arith.constant 3 : i32
    %9 = arith.cmpi eq, %arg1, %c3_i32 : i32
    %10 = arith.extui %9 : i1 to i32
    %c0_i32_8 = arith.constant 0 : i32
    %11 = arith.cmpi ne, %10, %c0_i32_8 : i32
    scf.if %11 {
      %c0_9 = arith.constant 0 : index
      %c0_10 = arith.constant 0 : index
      %12 = vector.load %arg7[%c0_9, %c0_10] : memref<128x128xf32, #tpu.memory_space<vmem>>, vector<128x128xf32>
      %cst_11 = arith.constant dense<0.000000e+00> : vector<128xf32>
      %13 = vector.multi_reduction <add>, %12, %cst_11 [0] : vector<128x128xf32> to vector<128xf32>
      %14 = vector.shape_cast %13 : vector<128xf32> to vector<1x128xf32>
      %15 = arith.mulf %12, %12 : vector<128x128xf32>
      %cst_12 = arith.constant dense<0.000000e+00> : vector<128xf32>
      %16 = vector.multi_reduction <add>, %15, %cst_12 [0] : vector<128x128xf32> to vector<128xf32>
      %17 = vector.shape_cast %16 : vector<128xf32> to vector<1x128xf32>
      %cst_13 = arith.constant 7.812500e-03 : f32
      %18 = vector.broadcast %cst_13 : f32 to vector<1x128xf32>
      %19 = arith.mulf %14, %18 : vector<1x128xf32>
      %cst_14 = arith.constant 7.812500e-03 : f32
      %20 = vector.broadcast %cst_14 : f32 to vector<1x128xf32>
      %21 = arith.mulf %17, %20 : vector<1x128xf32>
      %22 = arith.mulf %19, %19 : vector<1x128xf32>
      %23 = arith.subf %21, %22 : vector<1x128xf32>
      %24 = vector.broadcast %19 : vector<1x128xf32> to vector<128x128xf32>
      %25 = arith.subf %12, %24 : vector<128x128xf32>
      %cst_15 = arith.constant 9.99999974E-6 : f32
      %26 = vector.broadcast %cst_15 : f32 to vector<1x128xf32>
      %27 = arith.addf %23, %26 : vector<1x128xf32>
      %28 = math.rsqrt %27 : vector<1x128xf32>
      %29 = vector.broadcast %28 : vector<1x128xf32> to vector<128x128xf32>
      %30 = arith.mulf %25, %29 : vector<128x128xf32>
      %c0_16 = arith.constant 0 : index
      %c0_17 = arith.constant 0 : index
      %31 = vector.load %arg4[%c0_16, %c0_17] : memref<1x128xf32, #tpu.memory_space<vmem>>, vector<1x128xf32>
      %32 = vector.broadcast %31 : vector<1x128xf32> to vector<128x128xf32>
      %33 = arith.mulf %30, %32 : vector<128x128xf32>
      %c0_18 = arith.constant 0 : index
      %c0_19 = arith.constant 0 : index
      %34 = vector.load %arg5[%c0_18, %c0_19] : memref<1x128xf32, #tpu.memory_space<vmem>>, vector<1x128xf32>
      %35 = vector.broadcast %34 : vector<1x128xf32> to vector<128x128xf32>
      %36 = arith.addf %33, %35 : vector<128x128xf32>
      %cst_20 = arith.constant 0.000000e+00 : f32
      %37 = vector.broadcast %cst_20 : f32 to vector<128x128xf32>
      %38 = arith.cmpf ogt, %36, %37 : vector<128x128xf32>
      %cst_21 = arith.constant 2.000000e-01 : f32
      %39 = vector.broadcast %cst_21 : f32 to vector<128x128xf32>
      %40 = arith.mulf %39, %36 : vector<128x128xf32>
      %41 = arith.select %38, %36, %40 : vector<128x128xi1>, vector<128x128xf32>
      %42 = arith.truncf %41 : vector<128x128xf32> to vector<128x128xbf16>
      %c0_22 = arith.constant 0 : index
      %c0_23 = arith.constant 0 : index
      %43 = vector.load %arg6[%c0_22, %c0_23] : memref<128x128xbf16, #tpu.memory_space<vmem>>, vector<128x128xbf16>
      tpu.vector_store %arg6[%c0_22, %c0_23], %42 {strides = array<i32>} : memref<128x128xbf16, #tpu.memory_space<vmem>>, vector<128x128xbf16>,
    } else {
    }
    return
  }
  func.func @transform_0(%arg0: i32, %arg1: i32) -> (i32, i32) {
    %c0_i32 = arith.constant 0 : i32
    %c0_i32_0 = arith.constant 0 : i32
    return %c0_i32, %arg1 : i32, i32
  }
  func.func @transform_1(%arg0: i32, %arg1: i32) -> (i32, i32) {
    %c0_i32 = arith.constant 0 : i32
    return %arg1, %arg0 : i32, i32
  }
  func.func @transform_2(%arg0: i32, %arg1: i32) -> (i32, i32) {
    %c0_i32 = arith.constant 0 : i32
    %c0_i32_0 = arith.constant 0 : i32
    return %c0_i32, %arg0 : i32, i32
  }
  func.func @transform_3(%arg0: i32, %arg1: i32) -> (i32, i32) {
    %c0_i32 = arith.constant 0 : i32
    %c0_i32_0 = arith.constant 0 : i32
    return %c0_i32, %arg0 : i32, i32
  }
  func.func @transform_4(%arg0: i32, %arg1: i32) -> (i32, i32) {
    %c0_i32 = arith.constant 0 : i32
    %c0_i32_0 = arith.constant 0 : i32
    return %c0_i32, %arg0 : i32, i32
  }
}

module attributes {stable_mosaic.version = 11 : i64} {
  func.func @kernel(%arg0: i32, %arg1: i32, %arg2: memref<32x512xbf16, #tpu.memory_space<vmem>>, %arg3: memref<512x128xbf16, #tpu.memory_space<vmem>>, %arg4: memref<1x128xf32, #tpu.memory_space<vmem>>, %arg5: memref<1x128xf32, #tpu.memory_space<vmem>>, %arg6: memref<32x128xbf16, #tpu.memory_space<vmem>>, %arg7: memref<32x128xf32, #tpu.memory_space<vmem>>) attributes {dimension_semantics = [#tpu.dimension_semantics<parallel>, #tpu.dimension_semantics<arbitrary>], iteration_bounds = array<i64: 4, 8>, scalar_prefetch = 0 : i64, scratch_operands = 1 : i64, tpu.core_type = #tpu.core_type<tc>, window_params = [{transform_indices = @transform_0, window_bounds = array<i64: 32, 512>}, {transform_indices = @transform_1, window_bounds = array<i64: 512, 128>}, {transform_indices = @transform_2, window_bounds = array<i64: 1, 128>}, {transform_indices = @transform_3, window_bounds = array<i64: 1, 128>}, {transform_indices = @transform_4, window_bounds = array<i64: 32, 128>}]} {
    %c0_i32 = arith.constant 0 : i32
    %0 = arith.cmpi eq, %arg1, %c0_i32 : i32
    %1 = arith.extui %0 : i1 to i32
    %c0_i32_0 = arith.constant 0 : i32
    %2 = arith.cmpi ne, %1, %c0_i32_0 : i32
    scf.if %2 {
      %cst_9 = arith.constant 0.000000e+00 : f32
      %12 = vector.broadcast %cst_9 : f32 to vector<32x128xf32>
      %c0_10 = arith.constant 0 : index
      %c0_11 = arith.constant 0 : index
      %13 = vector.load %arg7[%c0_10, %c0_11] : memref<32x128xf32, #tpu.memory_space<vmem>>, vector<32x128xf32>
      tpu.vector_store %arg7[%c0_10, %c0_11], %12 {strides = array<i32>} : memref<32x128xf32, #tpu.memory_space<vmem>>, vector<32x128xf32>,
    } else {
    }
    %c0 = arith.constant 0 : index
    %c0_1 = arith.constant 0 : index
    %3 = vector.load %arg7[%c0, %c0_1] : memref<32x128xf32, #tpu.memory_space<vmem>>, vector<32x128xf32>
    %c0_2 = arith.constant 0 : index
    %c0_3 = arith.constant 0 : index
    %4 = vector.load %arg2[%c0_2, %c0_3] : memref<32x512xbf16, #tpu.memory_space<vmem>>, vector<32x512xbf16>
    %c0_4 = arith.constant 0 : index
    %c0_5 = arith.constant 0 : index
    %5 = vector.load %arg3[%c0_4, %c0_5] : memref<512x128xbf16, #tpu.memory_space<vmem>>, vector<512x128xbf16>
    %cst = arith.constant dense<0.000000e+00> : vector<32x128xf32>
    %6 = tpu.matmul %4, %5, %cst {dimension_numbers = #tpu.dot_dimension_numbers<[1], [0], [0], [1], [0, 0, 1, 1], [], []>} : vector<32x512xbf16>, vector<512x128xbf16>, vector<32x128xf32> -> vector<32x128xf32>
    %7 = arith.addf %3, %6 : vector<32x128xf32>
    %c0_6 = arith.constant 0 : index
    %c0_7 = arith.constant 0 : index
    %8 = vector.load %arg7[%c0_6, %c0_7] : memref<32x128xf32, #tpu.memory_space<vmem>>, vector<32x128xf32>
    tpu.vector_store %arg7[%c0_6, %c0_7], %7 {strides = array<i32>} : memref<32x128xf32, #tpu.memory_space<vmem>>, vector<32x128xf32>,
    %c7_i32 = arith.constant 7 : i32
    %9 = arith.cmpi eq, %arg1, %c7_i32 : i32
    %10 = arith.extui %9 : i1 to i32
    %c0_i32_8 = arith.constant 0 : i32
    %11 = arith.cmpi ne, %10, %c0_i32_8 : i32
    scf.if %11 {
      %c0_9 = arith.constant 0 : index
      %c0_10 = arith.constant 0 : index
      %12 = vector.load %arg7[%c0_9, %c0_10] : memref<32x128xf32, #tpu.memory_space<vmem>>, vector<32x128xf32>
      %cst_11 = arith.constant dense<0.000000e+00> : vector<128xf32>
      %13 = vector.multi_reduction <add>, %12, %cst_11 [0] : vector<32x128xf32> to vector<128xf32>
      %14 = vector.shape_cast %13 : vector<128xf32> to vector<1x128xf32>
      %15 = arith.mulf %12, %12 : vector<32x128xf32>
      %cst_12 = arith.constant dense<0.000000e+00> : vector<128xf32>
      %16 = vector.multi_reduction <add>, %15, %cst_12 [0] : vector<32x128xf32> to vector<128xf32>
      %17 = vector.shape_cast %16 : vector<128xf32> to vector<1x128xf32>
      %cst_13 = arith.constant 3.125000e-02 : f32
      %18 = vector.broadcast %cst_13 : f32 to vector<1x128xf32>
      %19 = arith.mulf %14, %18 : vector<1x128xf32>
      %cst_14 = arith.constant 3.125000e-02 : f32
      %20 = vector.broadcast %cst_14 : f32 to vector<1x128xf32>
      %21 = arith.mulf %17, %20 : vector<1x128xf32>
      %22 = arith.mulf %19, %19 : vector<1x128xf32>
      %23 = arith.subf %21, %22 : vector<1x128xf32>
      %24 = vector.broadcast %19 : vector<1x128xf32> to vector<32x128xf32>
      %25 = arith.subf %12, %24 : vector<32x128xf32>
      %cst_15 = arith.constant 9.99999974E-6 : f32
      %26 = vector.broadcast %cst_15 : f32 to vector<1x128xf32>
      %27 = arith.addf %23, %26 : vector<1x128xf32>
      %28 = math.rsqrt %27 : vector<1x128xf32>
      %29 = vector.broadcast %28 : vector<1x128xf32> to vector<32x128xf32>
      %30 = arith.mulf %25, %29 : vector<32x128xf32>
      %c0_16 = arith.constant 0 : index
      %c0_17 = arith.constant 0 : index
      %31 = vector.load %arg4[%c0_16, %c0_17] : memref<1x128xf32, #tpu.memory_space<vmem>>, vector<1x128xf32>
      %32 = vector.broadcast %31 : vector<1x128xf32> to vector<32x128xf32>
      %33 = arith.mulf %30, %32 : vector<32x128xf32>
      %c0_18 = arith.constant 0 : index
      %c0_19 = arith.constant 0 : index
      %34 = vector.load %arg5[%c0_18, %c0_19] : memref<1x128xf32, #tpu.memory_space<vmem>>, vector<1x128xf32>
      %35 = vector.broadcast %34 : vector<1x128xf32> to vector<32x128xf32>
      %36 = arith.addf %33, %35 : vector<32x128xf32>
      %cst_20 = arith.constant 0.000000e+00 : f32
      %37 = vector.broadcast %cst_20 : f32 to vector<32x128xf32>
      %38 = arith.cmpf ogt, %36, %37 : vector<32x128xf32>
      %cst_21 = arith.constant 2.000000e-01 : f32
      %39 = vector.broadcast %cst_21 : f32 to vector<32x128xf32>
      %40 = arith.mulf %39, %36 : vector<32x128xf32>
      %41 = arith.select %38, %36, %40 : vector<32x128xi1>, vector<32x128xf32>
      %42 = arith.truncf %41 : vector<32x128xf32> to vector<32x128xbf16>
      %c0_22 = arith.constant 0 : index
      %c0_23 = arith.constant 0 : index
      %43 = vector.load %arg6[%c0_22, %c0_23] : memref<32x128xbf16, #tpu.memory_space<vmem>>, vector<32x128xbf16>
      tpu.vector_store %arg6[%c0_22, %c0_23], %42 {strides = array<i32>} : memref<32x128xbf16, #tpu.memory_space<vmem>>, vector<32x128xbf16>,
    } else {
    }
    return
  }
  func.func @transform_0(%arg0: i32, %arg1: i32) -> (i32, i32) {
    %c0_i32 = arith.constant 0 : i32
    %c0_i32_0 = arith.constant 0 : i32
    return %c0_i32, %arg1 : i32, i32
  }
  func.func @transform_1(%arg0: i32, %arg1: i32) -> (i32, i32) {
    %c0_i32 = arith.constant 0 : i32
    return %arg1, %arg0 : i32, i32
  }
  func.func @transform_2(%arg0: i32, %arg1: i32) -> (i32, i32) {
    %c0_i32 = arith.constant 0 : i32
    %c0_i32_0 = arith.constant 0 : i32
    return %c0_i32, %arg0 : i32, i32
  }
  func.func @transform_3(%arg0: i32, %arg1: i32) -> (i32, i32) {
    %c0_i32 = arith.constant 0 : i32
    %c0_i32_0 = arith.constant 0 : i32
    return %c0_i32, %arg0 : i32, i32
  }
  func.func @transform_4(%arg0: i32, %arg1: i32) -> (i32, i32) {
    %c0_i32 = arith.constant 0 : i32
    %c0_i32_0 = arith.constant 0 : i32
    return %c0_i32, %arg0 : i32, i32
  }
}

module attributes {stable_mosaic.version = 11 : i64} {
  func.func @kernel(%arg0: i32, %arg1: memref<2x8192xbf16, #tpu.memory_space<vmem>>, %arg2: memref<8192x8xbf16, #tpu.memory_space<vmem>>, %arg3: memref<2x8xf32, #tpu.memory_space<vmem>>) attributes {dimension_semantics = [#tpu.dimension_semantics<parallel>], iteration_bounds = array<i64: 1>, scalar_prefetch = 0 : i64, scratch_operands = 0 : i64, tpu.core_type = #tpu.core_type<tc>, window_params = [{transform_indices = @transform_0, window_bounds = array<i64: 2, 8192>}, {pipeline_mode = #tpu.pipeline_mode<synchronous>, transform_indices = @transform_1, window_bounds = array<i64: 8192, 8>}, {transform_indices = @transform_2, window_bounds = array<i64: 2, 8>}]} {
    %c0 = arith.constant 0 : index
    %c0_0 = arith.constant 0 : index
    %0 = vector.load %arg1[%c0, %c0_0] : memref<2x8192xbf16, #tpu.memory_space<vmem>>, vector<2x8192xbf16>
    %c0_1 = arith.constant 0 : index
    %c0_2 = arith.constant 0 : index
    %1 = vector.load %arg2[%c0_1, %c0_2] : memref<8192x8xbf16, #tpu.memory_space<vmem>>, vector<8192x8xbf16>
    %cst = arith.constant dense<0.000000e+00> : vector<2x8xf32>
    %2 = tpu.matmul %0, %1, %cst {dimension_numbers = #tpu.dot_dimension_numbers<[1], [0], [0], [1], [0, 0, 1, 1], [], []>} : vector<2x8192xbf16>, vector<8192x8xbf16>, vector<2x8xf32> -> vector<2x8xf32>
    %cst_3 = arith.constant 0.000000e+00 : f32
    %3 = vector.broadcast %cst_3 : f32 to vector<2x8xf32>
    %4 = arith.subf %3, %2 : vector<2x8xf32>
    %5 = math.exp %4 : vector<2x8xf32>
    %cst_4 = arith.constant 1.000000e+00 : f32
    %6 = vector.broadcast %cst_4 : f32 to vector<2x8xf32>
    %7 = arith.addf %6, %5 : vector<2x8xf32>
    %cst_5 = arith.constant 1.000000e+00 : f32
    %8 = vector.broadcast %cst_5 : f32 to vector<2x8xf32>
    %9 = arith.divf %8, %7 : vector<2x8xf32>
    %c0_6 = arith.constant 0 : index
    %c0_7 = arith.constant 0 : index
    %10 = vector.load %arg3[%c0_6, %c0_7] : memref<2x8xf32, #tpu.memory_space<vmem>>, vector<2x8xf32>
    tpu.vector_store %arg3[%c0_6, %c0_7], %9 {strides = array<i32>} : memref<2x8xf32, #tpu.memory_space<vmem>>, vector<2x8xf32>,
    return
  }
  func.func @transform_0(%arg0: i32) -> (i32, i32) {
    %c0_i32 = arith.constant 0 : i32
    %c0_i32_0 = arith.constant 0 : i32
    return %arg0, %c0_i32 : i32, i32
  }
  func.func @transform_1(%arg0: i32) -> (i32, i32) {
    %c0_i32 = arith.constant 0 : i32
    %c0_i32_0 = arith.constant 0 : i32
    %c0_i32_1 = arith.constant 0 : i32
    return %c0_i32, %c0_i32_0 : i32, i32
  }
  func.func @transform_2(%arg0: i32) -> (i32, i32) {
    %c0_i32 = arith.constant 0 : i32
    %c0_i32_0 = arith.constant 0 : i32
    return %arg0, %c0_i32 : i32, i32
  }
}

</mosaic_0001>

<bundles_post_ra>
// kernel: discriminator_forward.5
= control target key start
LH: loop header
LB: loop body
LE: loop exit
PB: predicated region body
PF: predicated region fallthrough
CT: control target
= control target key end

     0   :  { %s1902_s9 = smov 0   ;;  %s2025_s0 = inlined_call_operand.vmem [shape: bf16[2048,128], index: 0, kind: input, shape index: {}]   ;;  %s2026_s1 = inlined_call_operand.vmem [shape: bf16[128,128], index: 1, kind: input, shape index: {}]   ;;  %s2027_s2 = inlined_call_operand.vmem [shape: bf16[2048,128], index: 2, kind: output, shape index: {}]  }
   0x1 LB: > { %s1325_s10 = sadd.s32 4294967295, %s1885_s9   ;;  %p1329_p0 = scmp.ge.s32.totalorder %s1885_s9, 1  ;;  %s1885_s9 = sphi %s1902_s9, %s12_s9  }
   0x2   : > { %p113_p1 = scmp.lt.s32.totalorder %s1885_s9, 5 }
   0x4   : > { %p114_p2 = pnand %p1329_p0, %p113_p1 }
   0x5   : > { %v1839_v0 = vld [vmem:[%s2026_s1] sm:$0xff] (!%p114_p2)   ;;  %s1330_s13 = sshll.u32 (!%p114_p2), %s1325_s10, 6  ;;  %v1840_v1 = vld [vmem:[%s2026_s1 + $0x8] sm:$0xff] (!%p114_p2)   ;;  %v1841_v2 = vld [vmem:[%s2026_s1 + $0x10] sm:$0xff] (!%p114_p2)  }
   0x6   : > { %117 = sbr.rel (%p114_p2) target bundleno = 317 (0x13d), region = 28  ;;  %p136_p3 = scmp.lt.s32.totalorder (!%p114_p2), %s1330_s13, 255  ;;  %1735 = vmatprep.subr.bf16.mxu0 (!%p114_p2), %v1839_v0  ;;  %1815 = vmatprep.subr.bf16.mxu1 (!%p114_p2), %v1839_v0  ;;  %v1842_v3 = vld [vmem:[%s2026_s1 + $0x18] sm:$0xff] (!%p114_p2)   ;;  %v1843_v6 = vld [vmem:[%s2026_s1 + $0x20] sm:$0xff] (!%p114_p2)   ;;  %v1844_v7 = vld [vmem:[%s2026_s1 + $0x28] sm:$0xff] (!%p114_p2)  }
   0x7   : > { %1736 = vmatpush3.bf16.msra.mxu0 (!%p114_p2), %v1839_v0  ;;  %1823 = vmatpush3.bf16.msra.mxu1 (!%p114_p2), %v1839_v0  ;;  %v1845_v8 = vld [vmem:[%s2026_s1 + $0x30] sm:$0xff] (!%p114_p2)   ;;  %v1846_v9 = vld [vmem:[%s2026_s1 + $0x38] sm:$0xff] (!%p114_p2)  }
   0x8   : > { %1737 = vmatprep.subr.bf16.mxu0 (!%p114_p2), %v1840_v1  ;;  %1816 = vmatprep.subr.bf16.mxu1 (!%p114_p2), %v1840_v1 }
   0xb   : > { %1738 = vmatpush3.bf16.msra.mxu0 (!%p114_p2), %v1840_v1  ;;  %1824 = vmatpush3.bf16.msra.mxu1 (!%p114_p2), %v1840_v1 }
   0xc   : > { %1739 = vmatprep.subr.bf16.mxu0 (!%p114_p2), %v1841_v2  ;;  %1817 = vmatprep.subr.bf16.mxu1 (!%p114_p2), %v1841_v2 }
   0xd   : > { %s2029_s13 = smov (!%p136_p3, %s1330_s13), 255 }
   0xe   : > { %s1331_s18 = sshll.u32 %s2029_s13, 2 }
   0xf   : > { %s1927_s21 = scalar_lea.vmem %s2025_s0, %s1331_s18  ;;  %1740 = vmatpush3.bf16.msra.mxu0 %v1841_v2  ;;  %1825 = vmatpush3.bf16.msra.mxu1 %v1841_v2  ;;  %s1981_s6 = scalar_lea.vmem %s2027_s2, %s1331_s18 }
  0x10   : > { %v1847_v4 = vld [vmem:[%s1927_s21] sm:$0xff]   ;;  %1741 = vmatprep.subr.bf16.mxu0 %v1842_v3  ;;  %1818 = vmatprep.subr.bf16.mxu1 %v1842_v3  ;;  %v1849_v10 = vld [vmem:[%s1927_s21 + $0x8] sm:$0xff]   ;;  %v1851_v12 = vld [vmem:[%s1927_s21 + $0x10] sm:$0xff]  }
  0x11   : > { %v1848_v5 = vld [vmem:[%s1927_s21 + $0x80] sm:$0xff]   ;;  %1751 = vmatprep.mubr.bf16.mxu0 %v1847_v4  ;;  %v1850_v11 = vld [vmem:[%s1927_s21 + $0x88] sm:$0xff]   ;;  %v1852_v13 = vld [vmem:[%s1927_s21 + $0x90] sm:$0xff]  }
  0x12   : > { %1783 = vmatprep.mubr.bf16.mxu1 %v1848_v5  ;;  %v1853_v14 = vld [vmem:[%s1927_s21 + $0x18] sm:$0xff]   ;;  %v1855_v16 = vld [vmem:[%s1927_s21 + $0x20] sm:$0xff]   ;;  %v1857_v18 = vld [vmem:[%s1927_s21 + $0x28] sm:$0xff]  }
  0x13   : > { %1742 = vmatpush3.bf16.msra.mxu0 %v1842_v3  ;;  %1826 = vmatpush3.bf16.msra.mxu1 %v1842_v3  ;;  %v1854_v15 = vld [vmem:[%s1927_s21 + $0x98] sm:$0xff]   ;;  %v1856_v17 = vld [vmem:[%s1927_s21 + $0xa0] sm:$0xff]   ;;  %v1858_v19 = vld [vmem:[%s1927_s21 + $0xa8] sm:$0xff]  }
  0x14   : > { %1743 = vmatprep.subr.bf16.mxu0 %v1843_v6  ;;  %1819 = vmatprep.subr.bf16.mxu1 %v1843_v6  ;;  %v1859_v20 = vld [vmem:[%s1927_s21 + $0x30] sm:$0xff]   ;;  %v1861_v22 = vld [vmem:[%s1927_s21 + $0x38] sm:$0xff]   ;;  %v1863_v24 = vld [vmem:[%s1927_s21 + $0x40] sm:$0xff]  }
  0x15   : > { %v1860_v21 = vld [vmem:[%s1927_s21 + $0xb0] sm:$0xff]   ;;  %v1862_v23 = vld [vmem:[%s1927_s21 + $0xb8] sm:$0xff]   ;;  %v1864_v25 = vld [vmem:[%s1927_s21 + $0xc0] sm:$0xff]  }
  0x16   : > { %v1865_v26 = vld [vmem:[%s1927_s21 + $0x48] sm:$0xff]   ;;  %v1867_v28 = vld [vmem:[%s1927_s21 + $0x50] sm:$0xff]   ;;  %v1869_v30 = vld [vmem:[%s1927_s21 + $0x58] sm:$0xff]  }
  0x17   : > { %1744 = vmatpush3.bf16.msra.mxu0 %v1843_v6  ;;  %1827 = vmatpush3.bf16.msra.mxu1 %v1843_v6  ;;  %v1866_v27 = vld [vmem:[%s1927_s21 + $0xc8] sm:$0xff]   ;;  %v1868_v29 = vld [vmem:[%s1927_s21 + $0xd0] sm:$0xff]   ;;  %v1870_v31 = vld [vmem:[%s1927_s21 + $0xd8] sm:$0xff]  }
  0x18   : > { %1745 = vmatprep.subr.bf16.mxu0 %v1844_v7  ;;  %1820 = vmatprep.subr.bf16.mxu1 %v1844_v7  ;;  %v1871_v32 = vld [vmem:[%s1927_s21 + $0x60] sm:$0xff]   ;;  %v1873_v34 = vld [vmem:[%s1927_s21 + $0x68] sm:$0xff]   ;;  %v1875_v36 = vld [vmem:[%s1927_s21 + $0x70] sm:$0xff]  }
  0x19   : > { %v1872_v33 = vld [vmem:[%s1927_s21 + $0xe0] sm:$0xff]   ;;  %v1874_v35 = vld [vmem:[%s1927_s21 + $0xe8] sm:$0xff]   ;;  %v1876_v37 = vld [vmem:[%s1927_s21 + $0xf0] sm:$0xff]  }
  0x1a   : > { %v1877_v38 = vld [vmem:[%s1927_s21 + $0x78] sm:$0xff]  }
  0x1b   : > { %1746 = vmatpush3.bf16.msra.mxu0 %v1844_v7  ;;  %1828 = vmatpush3.bf16.msra.mxu1 %v1844_v7  ;;  %v1878_v39 = vld [vmem:[%s1927_s21 + $0xf8] sm:$0xff]  }
  0x1c   : > { %1747 = vmatprep.subr.bf16.mxu0 %v1845_v8  ;;  %1821 = vmatprep.subr.bf16.mxu1 %v1845_v8 }
  0x1f   : > { %1748 = vmatpush3.bf16.msra.mxu0 %v1845_v8  ;;  %1829 = vmatpush3.bf16.msra.mxu1 %v1845_v8 }
  0x20   : > { %1749 = vmatprep.subr.bf16.mxu0 %v1846_v9  ;;  %1822 = vmatprep.subr.bf16.mxu1 %v1846_v9 }
  0x23   : > { %1750 = vmatpush3.bf16.msra.mxu0 %v1846_v9  ;;  %1830 = vmatpush3.bf16.msra.mxu1 %v1846_v9 }
  0x26   : > { %1752 = vmatmul.mubr.bf16.vlgmr.msra.gmra.mrb[0].mxu0 %v1849_v10  ;;  %1784 = vmatmul.mubr.bf16.vlgmr.msra.gmra.mrb[0].mxu1 %v1850_v11 }
  0x27   : > { %1755 = vmatprep.mubr.bf16.mxu0 %v1851_v12  ;;  %1787 = vmatprep.mubr.bf16.mxu1 %v1852_v13 }
  0x2e   : > { %1756 = vmatmul.mubr.bf16.gmra.mrb[4].mxu0 %v1853_v14  ;;  %1788 = vmatmul.mubr.bf16.gmra.mrb[4].mxu1 %v1854_v15 }
  0x2f   : > { %1759 = vmatprep.mubr.bf16.mxu0 %v1855_v16  ;;  %1791 = vmatprep.mubr.bf16.mxu1 %v1856_v17 }
  0x36   : > { %1760 = vmatmul.mubr.bf16.gmra.mrb[8].mxu0 %v1857_v18  ;;  %1792 = vmatmul.mubr.bf16.gmra.mrb[8].mxu1 %v1858_v19 }
  0x37   : > { %1763 = vmatprep.mubr.bf16.mxu0 %v1859_v20  ;;  %1795 = vmatprep.mubr.bf16.mxu1 %v1860_v21 }
  0x3e   : > { %1764 = vmatmul.mubr.bf16.gmra.mrb[12].mxu0 %v1861_v22  ;;  %1796 = vmatmul.mubr.bf16.gmra.mrb[12].mxu1 %v1862_v23 }
  0x3f   : > { %1767 = vmatprep.mubr.bf16.mxu0 %v1863_v24  ;;  %1799 = vmatprep.mubr.bf16.mxu1 %v1864_v25 }
  0x46   : > { %1768 = vmatmul.mubr.bf16.gmra.mrb[16].mxu0 %v1865_v26  ;;  %1800 = vmatmul.mubr.bf16.gmra.mrb[16].mxu1 %v1866_v27 }
  0x47   : > { %1771 = vmatprep.mubr.bf16.mxu0 %v1867_v28  ;;  %1803 = vmatprep.mubr.bf16.mxu1 %v1868_v29 }
  0x4e   : > { %1772 = vmatmul.mubr.bf16.gmra.mrb[20].mxu0 %v1869_v30  ;;  %1804 = vmatmul.mubr.bf16.gmra.mrb[20].mxu1 %v1870_v31 }
  0x4f   : > { %1775 = vmatprep.mubr.bf16.mxu0 %v1871_v32  ;;  %1807 = vmatprep.mubr.bf16.mxu1 %v1872_v33 }
  0x56   : > { %1776 = vmatmul.mubr.bf16.gmra.mrb[24].mxu0 %v1873_v34  ;;  %1808 = vmatmul.mubr.bf16.gmra.mrb[24].mxu1 %v1874_v35 }
  0x57   : > { %1779 = vmatprep.mubr.bf16.mxu0 %v1875_v36  ;;  %1811 = vmatprep.mubr.bf16.mxu1 %v1876_v37 }
  0x5e   : > { %1780 = vmatmul.mubr.bf16.gmra.mrb[28].mxu0 %v1877_v38  ;;  %1812 = vmatmul.mubr.bf16.gmra.mrb[28].mxu1 %v1878_v39 }
  0xf9   : > { %v1753_v40 = vpop.f32.mrb[0].mxu0  ;;  %v1785_v41 = vpop.f32.mrb[0].mxu1 }
  0xfa   : > { %vm759_vm0 = vcmp.gt.f32.partialorder %v1753_v40, 0.0  ;;  %v823_v42 = vmul.f32 0.2, %v1753_v40  ;;  %v855_v43 = vmul.f32 0.2, %v1785_v41  ;;  %vm791_vm1 = vcmp.gt.f32.partialorder %v1785_v41, 0.0 }
  0xfb   : > { %v502_v44 = vpop.f32.mrb[1].mxu0  ;;  %v630_v45 = vpop.f32.mrb[1].mxu1 }
  0xfc   : > { %v821_v46 = vmul.f32 0.2, %v502_v44  ;;  %v1754_v47 = vpop.f32.mrb[2].mxu0  ;;  %v1786_v48 = vpop.f32.mrb[2].mxu1  ;;  %v887_v49 = vsel %vm759_vm0, %v1753_v40, %v823_v42  ;;  %v853_v50 = vmul.f32 0.2, %v630_v45  ;;  %v919_v52 = vsel %vm791_vm1, %v1785_v41, %v855_v43 }
  0xfd   : > { %vm760_vm2 = vcmp.gt.f32.partialorder %v1754_v47, 0.0  ;;  %v824_v51 = vmul.f32 0.2, %v1754_v47  ;;  %vm757_vm3 = vcmp.gt.f32.partialorder %v502_v44, 0.0  ;;  %vm792_vm4 = vcmp.gt.f32.partialorder %v1786_v48, 0.0  ;;  %v505_v54 = vpop.f32.mrb[3].mxu0 }
  0xfe   : > { %v856_v53 = vmul.f32 0.2, %v1786_v48  ;;  %v633_v55 = vpop.f32.mrb[3].mxu1  ;;  %vm789_vm5 = vcmp.gt.f32.partialorder %v630_v45, 0.0  ;;  %vm758_vm6 = vcmp.gt.f32.partialorder %v505_v54, 0.0  ;;  %v885_v61 = vsel %vm757_vm3, %v502_v44, %v821_v46 }
  0xff   : > { %v888_v56 = vsel %vm760_vm2, %v1754_v47, %v824_v51  ;;  %v822_v57 = vmul.f32 0.2, %v505_v54  ;;  %vm790_vm7 = vcmp.gt.f32.partialorder %v633_v55, 0.0  ;;  %v854_v60 = vmul.f32 0.2, %v633_v55 }
 0x100   : > { %v1512_v58 = vpack.c.bf16 %v888_v56, %v887_v49  ;;  %v920_v59 = vsel %vm792_vm4, %v1786_v48, %v856_v53  ;;  %v917_v2 = vsel %vm789_vm5, %v630_v45, %v853_v50 }
 0x101   : > { %v1592_v62 = vpack.c.bf16 %v920_v59, %v919_v52  ;;  %v886_v63 = vsel %vm758_vm6, %v505_v54, %v822_v57  ;;  %v1757_v0 = vpop.f32.mrb[4].mxu0  ;;  %v1789_v1 = vpop.f32.mrb[4].mxu1  ;;  %v918_v4 = vsel %vm790_vm7, %v633_v55, %v854_v60 }
 0x102   : > { %1664 = vst [vmem:[%s1981_s6 + $0x8] sm:$0xff] %v1512_v58   ;;  %v1507_v3 = vpack.c.bf16 %v886_v63, %v885_v61  ;;  %v827_v5 = vmul.f32 0.2, %v1757_v0  ;;  %v518_v6 = vpop.f32.mrb[5].mxu0  ;;  %v646_v7 = vpop.f32.mrb[5].mxu1  ;;  %v1587_v8 = vpack.c.bf16 %v918_v4, %v917_v2  ;;  %vm763_vm8 = vcmp.gt.f32.partialorder %v1757_v0, 0.0 }
 0x103   : > { %1680 = vst [vmem:[%s1981_s6 + $0x88] sm:$0xff] %v1592_v62   ;;  %v859_v9 = vmul.f32 0.2, %v1789_v1  ;;  %v1758_v10 = vpop.f32.mrb[6].mxu0  ;;  %v1790_v11 = vpop.f32.mrb[6].mxu1  ;;  %vm795_vm9 = vcmp.gt.f32.partialorder %v1789_v1, 0.0 }
 0x104   : > { %1508 = vst [vmem:[%s1981_s6] sm:$0xff] %v1507_v3   ;;  %v825_v12 = vmul.f32 0.2, %v518_v6  ;;  %v857_v13 = vmul.f32 0.2, %v646_v7  ;;  %v521_v14 = vpop.f32.mrb[7].mxu0  ;;  %1679 = vst [vmem:[%s1981_s6 + $0x80] sm:$0xff] %v1587_v8   ;;  %v891_v17 = vsel %vm763_vm8, %v1757_v0, %v827_v5 }
 0x105   : > { %vm761_vm10 = vcmp.gt.f32.partialorder %v518_v6, 0.0  ;;  %vm764_vm11 = vcmp.gt.f32.partialorder %v1758_v10, 0.0  ;;  %v828_v15 = vmul.f32 0.2, %v1758_v10  ;;  %vm796_vm12 = vcmp.gt.f32.partialorder %v1790_v11, 0.0  ;;  %v649_v16 = vpop.f32.mrb[7].mxu1 }
 0x106   : > { %vm793_vm13 = vcmp.gt.f32.partialorder %v646_v7, 0.0  ;;  %v860_v18 = vmul.f32 0.2, %v1790_v11  ;;  %vm762_vm14 = vcmp.gt.f32.partialorder %v521_v14, 0.0  ;;  %v826_v20 = vmul.f32 0.2, %v521_v14 }
 0x107   : > { %v892_v19 = vsel %vm764_vm11, %v1758_v10, %v828_v15  ;;  %vm794_vm15 = vcmp.gt.f32.partialorder %v649_v16, 0.0  ;;  %v858_v21 = vmul.f32 0.2, %v649_v16  ;;  %v923_v22 = vsel %vm795_vm9, %v1789_v1, %v859_v9 }
 0x108   : > { %v889_v23 = vsel %vm761_vm10, %v518_v6, %v825_v12  ;;  %v1522_v24 = vpack.c.bf16 %v892_v19, %v891_v17  ;;  %v924_v25 = vsel %vm796_vm12, %v1790_v11, %v860_v18  ;;  %v921_v26 = vsel %vm793_vm13, %v646_v7, %v857_v13 }
 0x109   : > { %v1602_v27 = vpack.c.bf16 %v924_v25, %v923_v22  ;;  %v890_v28 = vsel %vm762_vm14, %v521_v14, %v826_v20  ;;  %v922_v29 = vsel %vm794_vm15, %v649_v16, %v858_v21  ;;  %v1761_v30 = vpop.f32.mrb[8].mxu0  ;;  %v1793_v31 = vpop.f32.mrb[8].mxu1 }
 0x10a   : > { %1666 = vst [vmem:[%s1981_s6 + $0x18] sm:$0xff] %v1522_v24   ;;  %v1517_v32 = vpack.c.bf16 %v890_v28, %v889_v23  ;;  %v1597_v33 = vpack.c.bf16 %v922_v29, %v921_v26  ;;  %vm767_vm0 = vcmp.gt.f32.partialorder %v1761_v30, 0.0  ;;  %v831_v34 = vmul.f32 0.2, %v1761_v30  ;;  %v534_v35 = vpop.f32.mrb[9].mxu0  ;;  %v662_v36 = vpop.f32.mrb[9].mxu1 }
 0x10b   : > { %1682 = vst [vmem:[%s1981_s6 + $0x98] sm:$0xff] %v1602_v27   ;;  %vm799_vm1 = vcmp.gt.f32.partialorder %v1793_v31, 0.0  ;;  %v863_v37 = vmul.f32 0.2, %v1793_v31  ;;  %v829_v38 = vmul.f32 0.2, %v534_v35 }
 0x10c   : > { %1665 = vst [vmem:[%s1981_s6 + $0x10] sm:$0xff] %v1517_v32   ;;  %1681 = vst [vmem:[%s1981_s6 + $0x90] sm:$0xff] %v1597_v33   ;;  %v861_v39 = vmul.f32 0.2, %v662_v36  ;;  %v1762_v40 = vpop.f32.mrb[10].mxu0  ;;  %v1794_v41 = vpop.f32.mrb[10].mxu1  ;;  %v895_v42 = vsel %vm767_vm0, %v1761_v30, %v831_v34 }
 0x10d   : > { %vm765_vm2 = vcmp.gt.f32.partialorder %v534_v35, 0.0  ;;  %vm768_vm3 = vcmp.gt.f32.partialorder %v1762_v40, 0.0  ;;  %v832_v43 = vmul.f32 0.2, %v1762_v40  ;;  %v537_v44 = vpop.f32.mrb[11].mxu0  ;;  %v665_v45 = vpop.f32.mrb[11].mxu1  ;;  %v927_v50 = vsel %vm799_vm1, %v1793_v31, %v863_v37 }
 0x10e   : > { %vm797_vm4 = vcmp.gt.f32.partialorder %v662_v36, 0.0  ;;  %vm800_vm5 = vcmp.gt.f32.partialorder %v1794_v41, 0.0  ;;  %v864_v46 = vmul.f32 0.2, %v1794_v41  ;;  %vm766_vm6 = vcmp.gt.f32.partialorder %v537_v44, 0.0 }
 0x10f   : > { %v896_v47 = vsel %vm768_vm3, %v1762_v40, %v832_v43  ;;  %v830_v48 = vmul.f32 0.2, %v537_v44  ;;  %vm798_vm7 = vcmp.gt.f32.partialorder %v665_v45, 0.0  ;;  %v862_v49 = vmul.f32 0.2, %v665_v45 }
 0x110   : > { %v893_v51 = vsel %vm765_vm2, %v534_v35, %v829_v38  ;;  %v1532_v52 = vpack.c.bf16 %v896_v47, %v895_v42  ;;  %v928_v53 = vsel %vm800_vm5, %v1794_v41, %v864_v46  ;;  %v925_v54 = vsel %vm797_vm4, %v662_v36, %v861_v39 }
 0x111   : > { %v1612_v55 = vpack.c.bf16 %v928_v53, %v927_v50  ;;  %v894_v56 = vsel %vm766_vm6, %v537_v44, %v830_v48  ;;  %v926_v57 = vsel %vm798_vm7, %v665_v45, %v862_v49  ;;  %v1765_v58 = vpop.f32.mrb[12].mxu0  ;;  %v1797_v59 = vpop.f32.mrb[12].mxu1 }
 0x112   : > { %1668 = vst [vmem:[%s1981_s6 + $0x28] sm:$0xff] %v1532_v52   ;;  %v1527_v60 = vpack.c.bf16 %v894_v56, %v893_v51  ;;  %v1607_v61 = vpack.c.bf16 %v926_v57, %v925_v54  ;;  %vm771_vm8 = vcmp.gt.f32.partialorder %v1765_v58, 0.0  ;;  %v835_v62 = vmul.f32 0.2, %v1765_v58  ;;  %v550_v63 = vpop.f32.mrb[13].mxu0  ;;  %v678_v0 = vpop.f32.mrb[13].mxu1 }
 0x113   : > { %1684 = vst [vmem:[%s1981_s6 + $0xa8] sm:$0xff] %v1612_v55   ;;  %vm803_vm9 = vcmp.gt.f32.partialorder %v1797_v59, 0.0  ;;  %v867_v1 = vmul.f32 0.2, %v1797_v59  ;;  %v833_v2 = vmul.f32 0.2, %v550_v63 }
 0x114   : > { %1667 = vst [vmem:[%s1981_s6 + $0x20] sm:$0xff] %v1527_v60   ;;  %1683 = vst [vmem:[%s1981_s6 + $0xa0] sm:$0xff] %v1607_v61   ;;  %v865_v3 = vmul.f32 0.2, %v678_v0  ;;  %v1766_v4 = vpop.f32.mrb[14].mxu0  ;;  %v1798_v5 = vpop.f32.mrb[14].mxu1  ;;  %v899_v6 = vsel %vm771_vm8, %v1765_v58, %v835_v62 }
 0x115   : > { %vm769_vm10 = vcmp.gt.f32.partialorder %v550_v63, 0.0  ;;  %vm772_vm11 = vcmp.gt.f32.partialorder %v1766_v4, 0.0  ;;  %v836_v7 = vmul.f32 0.2, %v1766_v4  ;;  %v553_v8 = vpop.f32.mrb[15].mxu0  ;;  %v681_v9 = vpop.f32.mrb[15].mxu1  ;;  %v931_v14 = vsel %vm803_vm9, %v1797_v59, %v867_v1 }
 0x116   : > { %vm801_vm12 = vcmp.gt.f32.partialorder %v678_v0, 0.0  ;;  %vm804_vm13 = vcmp.gt.f32.partialorder %v1798_v5, 0.0  ;;  %v868_v10 = vmul.f32 0.2, %v1798_v5  ;;  %vm770_vm14 = vcmp.gt.f32.partialorder %v553_v8, 0.0 }
 0x117   : > { %v900_v11 = vsel %vm772_vm11, %v1766_v4, %v836_v7  ;;  %v834_v12 = vmul.f32 0.2, %v553_v8  ;;  %vm802_vm15 = vcmp.gt.f32.partialorder %v681_v9, 0.0  ;;  %v866_v13 = vmul.f32 0.2, %v681_v9 }
 0x118   : > { %v897_v15 = vsel %vm769_vm10, %v550_v63, %v833_v2  ;;  %v1542_v16 = vpack.c.bf16 %v900_v11, %v899_v6  ;;  %v932_v17 = vsel %vm804_vm13, %v1798_v5, %v868_v10  ;;  %v929_v18 = vsel %vm801_vm12, %v678_v0, %v865_v3 }
 0x119   : > { %v1622_v19 = vpack.c.bf16 %v932_v17, %v931_v14  ;;  %v898_v20 = vsel %vm770_vm14, %v553_v8, %v834_v12  ;;  %v930_v21 = vsel %vm802_vm15, %v681_v9, %v866_v13  ;;  %v1769_v22 = vpop.f32.mrb[16].mxu0  ;;  %v1801_v23 = vpop.f32.mrb[16].mxu1 }
 0x11a   : > { %1670 = vst [vmem:[%s1981_s6 + $0x38] sm:$0xff] %v1542_v16   ;;  %v1537_v24 = vpack.c.bf16 %v898_v20, %v897_v15  ;;  %v1617_v25 = vpack.c.bf16 %v930_v21, %v929_v18  ;;  %vm775_vm0 = vcmp.gt.f32.partialorder %v1769_v22, 0.0  ;;  %v839_v26 = vmul.f32 0.2, %v1769_v22  ;;  %v566_v27 = vpop.f32.mrb[17].mxu0  ;;  %v694_v28 = vpop.f32.mrb[17].mxu1 }
 0x11b   : > { %1686 = vst [vmem:[%s1981_s6 + $0xb8] sm:$0xff] %v1622_v19   ;;  %vm807_vm1 = vcmp.gt.f32.partialorder %v1801_v23, 0.0  ;;  %v871_v29 = vmul.f32 0.2, %v1801_v23  ;;  %v837_v30 = vmul.f32 0.2, %v566_v27 }
 0x11c   : > { %1669 = vst [vmem:[%s1981_s6 + $0x30] sm:$0xff] %v1537_v24   ;;  %1685 = vst [vmem:[%s1981_s6 + $0xb0] sm:$0xff] %v1617_v25   ;;  %v869_v31 = vmul.f32 0.2, %v694_v28  ;;  %v1770_v32 = vpop.f32.mrb[18].mxu0  ;;  %v1802_v33 = vpop.f32.mrb[18].mxu1  ;;  %v903_v34 = vsel %vm775_vm0, %v1769_v22, %v839_v26 }
 0x11d   : > { %vm773_vm2 = vcmp.gt.f32.partialorder %v566_v27, 0.0  ;;  %vm776_vm3 = vcmp.gt.f32.partialorder %v1770_v32, 0.0  ;;  %v840_v35 = vmul.f32 0.2, %v1770_v32  ;;  %v569_v36 = vpop.f32.mrb[19].mxu0  ;;  %v697_v37 = vpop.f32.mrb[19].mxu1  ;;  %v935_v42 = vsel %vm807_vm1, %v1801_v23, %v871_v29 }
 0x11e   : > { %vm805_vm4 = vcmp.gt.f32.partialorder %v694_v28, 0.0  ;;  %vm808_vm5 = vcmp.gt.f32.partialorder %v1802_v33, 0.0  ;;  %v872_v38 = vmul.f32 0.2, %v1802_v33  ;;  %vm774_vm6 = vcmp.gt.f32.partialorder %v569_v36, 0.0 }
 0x11f   : > { %v904_v39 = vsel %vm776_vm3, %v1770_v32, %v840_v35  ;;  %v838_v40 = vmul.f32 0.2, %v569_v36  ;;  %vm806_vm7 = vcmp.gt.f32.partialorder %v697_v37, 0.0  ;;  %v870_v41 = vmul.f32 0.2, %v697_v37 }
 0x120   : > { %v901_v43 = vsel %vm773_vm2, %v566_v27, %v837_v30  ;;  %v1552_v44 = vpack.c.bf16 %v904_v39, %v903_v34  ;;  %v936_v45 = vsel %vm808_vm5, %v1802_v33, %v872_v38  ;;  %v933_v46 = vsel %vm805_vm4, %v694_v28, %v869_v31 }
 0x121   : > { %v1632_v47 = vpack.c.bf16 %v936_v45, %v935_v42  ;;  %v902_v48 = vsel %vm774_vm6, %v569_v36, %v838_v40  ;;  %v934_v49 = vsel %vm806_vm7, %v697_v37, %v870_v41  ;;  %v1773_v50 = vpop.f32.mrb[20].mxu0  ;;  %v1805_v51 = vpop.f32.mrb[20].mxu1 }
 0x122   : > { %1672 = vst [vmem:[%s1981_s6 + $0x48] sm:$0xff] %v1552_v44   ;;  %v1547_v52 = vpack.c.bf16 %v902_v48, %v901_v43  ;;  %v1627_v53 = vpack.c.bf16 %v934_v49, %v933_v46  ;;  %vm779_vm8 = vcmp.gt.f32.partialorder %v1773_v50, 0.0  ;;  %v843_v54 = vmul.f32 0.2, %v1773_v50  ;;  %v582_v55 = vpop.f32.mrb[21].mxu0  ;;  %v710_v56 = vpop.f32.mrb[21].mxu1 }
 0x123   : > { %1688 = vst [vmem:[%s1981_s6 + $0xc8] sm:$0xff] %v1632_v47   ;;  %vm811_vm9 = vcmp.gt.f32.partialorder %v1805_v51, 0.0  ;;  %v875_v57 = vmul.f32 0.2, %v1805_v51  ;;  %v841_v58 = vmul.f32 0.2, %v582_v55 }
 0x124   : > { %1671 = vst [vmem:[%s1981_s6 + $0x40] sm:$0xff] %v1547_v52   ;;  %1687 = vst [vmem:[%s1981_s6 + $0xc0] sm:$0xff] %v1627_v53   ;;  %v873_v59 = vmul.f32 0.2, %v710_v56  ;;  %v1774_v60 = vpop.f32.mrb[22].mxu0  ;;  %v1806_v61 = vpop.f32.mrb[22].mxu1  ;;  %v907_v62 = vsel %vm779_vm8, %v1773_v50, %v843_v54 }
 0x125   : > { %vm777_vm10 = vcmp.gt.f32.partialorder %v582_v55, 0.0  ;;  %vm780_vm11 = vcmp.gt.f32.partialorder %v1774_v60, 0.0  ;;  %v844_v63 = vmul.f32 0.2, %v1774_v60  ;;  %v585_v0 = vpop.f32.mrb[23].mxu0  ;;  %v713_v1 = vpop.f32.mrb[23].mxu1  ;;  %v939_v6 = vsel %vm811_vm9, %v1805_v51, %v875_v57 }
 0x126   : > { %vm809_vm12 = vcmp.gt.f32.partialorder %v710_v56, 0.0  ;;  %vm812_vm13 = vcmp.gt.f32.partialorder %v1806_v61, 0.0  ;;  %v876_v2 = vmul.f32 0.2, %v1806_v61  ;;  %vm778_vm14 = vcmp.gt.f32.partialorder %v585_v0, 0.0 }
 0x127   : > { %v908_v3 = vsel %vm780_vm11, %v1774_v60, %v844_v63  ;;  %v842_v4 = vmul.f32 0.2, %v585_v0  ;;  %vm810_vm15 = vcmp.gt.f32.partialorder %v713_v1, 0.0  ;;  %v874_v5 = vmul.f32 0.2, %v713_v1 }
 0x128   : > { %v905_v7 = vsel %vm777_vm10, %v582_v55, %v841_v58  ;;  %v1562_v8 = vpack.c.bf16 %v908_v3, %v907_v62  ;;  %v940_v9 = vsel %vm812_vm13, %v1806_v61, %v876_v2  ;;  %v937_v10 = vsel %vm809_vm12, %v710_v56, %v873_v59 }
 0x129   : > { %v1642_v11 = vpack.c.bf16 %v940_v9, %v939_v6  ;;  %v906_v12 = vsel %vm778_vm14, %v585_v0, %v842_v4  ;;  %v938_v13 = vsel %vm810_vm15, %v713_v1, %v874_v5  ;;  %v1777_v14 = vpop.f32.mrb[24].mxu0  ;;  %v1809_v15 = vpop.f32.mrb[24].mxu1 }
 0x12a   : > { %1674 = vst [vmem:[%s1981_s6 + $0x58] sm:$0xff] %v1562_v8   ;;  %v1557_v16 = vpack.c.bf16 %v906_v12, %v905_v7  ;;  %v1637_v17 = vpack.c.bf16 %v938_v13, %v937_v10  ;;  %vm783_vm0 = vcmp.gt.f32.partialorder %v1777_v14, 0.0  ;;  %v847_v18 = vmul.f32 0.2, %v1777_v14  ;;  %v598_v19 = vpop.f32.mrb[25].mxu0  ;;  %v726_v20 = vpop.f32.mrb[25].mxu1 }
 0x12b   : > { %1690 = vst [vmem:[%s1981_s6 + $0xd8] sm:$0xff] %v1642_v11   ;;  %vm815_vm1 = vcmp.gt.f32.partialorder %v1809_v15, 0.0  ;;  %v879_v21 = vmul.f32 0.2, %v1809_v15  ;;  %v845_v22 = vmul.f32 0.2, %v598_v19 }
 0x12c   : > { %1673 = vst [vmem:[%s1981_s6 + $0x50] sm:$0xff] %v1557_v16   ;;  %1689 = vst [vmem:[%s1981_s6 + $0xd0] sm:$0xff] %v1637_v17   ;;  %v877_v23 = vmul.f32 0.2, %v726_v20  ;;  %v1778_v24 = vpop.f32.mrb[26].mxu0  ;;  %v1810_v25 = vpop.f32.mrb[26].mxu1  ;;  %v911_v26 = vsel %vm783_vm0, %v1777_v14, %v847_v18 }
 0x12d   : > { %vm781_vm2 = vcmp.gt.f32.partialorder %v598_v19, 0.0  ;;  %vm784_vm3 = vcmp.gt.f32.partialorder %v1778_v24, 0.0  ;;  %v848_v27 = vmul.f32 0.2, %v1778_v24  ;;  %v601_v28 = vpop.f32.mrb[27].mxu0  ;;  %v729_v29 = vpop.f32.mrb[27].mxu1  ;;  %v943_v34 = vsel %vm815_vm1, %v1809_v15, %v879_v21 }
 0x12e   : > { %vm813_vm4 = vcmp.gt.f32.partialorder %v726_v20, 0.0  ;;  %vm816_vm5 = vcmp.gt.f32.partialorder %v1810_v25, 0.0  ;;  %v880_v30 = vmul.f32 0.2, %v1810_v25  ;;  %vm782_vm6 = vcmp.gt.f32.partialorder %v601_v28, 0.0 }
 0x12f   : > { %v912_v31 = vsel %vm784_vm3, %v1778_v24, %v848_v27  ;;  %v846_v32 = vmul.f32 0.2, %v601_v28  ;;  %vm814_vm7 = vcmp.gt.f32.partialorder %v729_v29, 0.0  ;;  %v878_v33 = vmul.f32 0.2, %v729_v29 }
 0x130   : > { %v909_v35 = vsel %vm781_vm2, %v598_v19, %v845_v22  ;;  %v1572_v36 = vpack.c.bf16 %v912_v31, %v911_v26  ;;  %v944_v37 = vsel %vm816_vm5, %v1810_v25, %v880_v30  ;;  %v941_v38 = vsel %vm813_vm4, %v726_v20, %v877_v23 }
 0x131   : > { %v1652_v39 = vpack.c.bf16 %v944_v37, %v943_v34  ;;  %v910_v40 = vsel %vm782_vm6, %v601_v28, %v846_v32  ;;  %v942_v41 = vsel %vm814_vm7, %v729_v29, %v878_v33  ;;  %v1781_v42 = vpop.f32.mrb[28].mxu0  ;;  %v1813_v43 = vpop.f32.mrb[28].mxu1 }
 0x132   : > { %1676 = vst [vmem:[%s1981_s6 + $0x68] sm:$0xff] %v1572_v36   ;;  %v1567_v44 = vpack.c.bf16 %v910_v40, %v909_v35  ;;  %v1647_v45 = vpack.c.bf16 %v942_v41, %v941_v38  ;;  %vm787_vm8 = vcmp.gt.f32.partialorder %v1781_v42, 0.0  ;;  %v851_v46 = vmul.f32 0.2, %v1781_v42  ;;  %v614_v47 = vpop.f32.mrb[29].mxu0  ;;  %v742_v48 = vpop.f32.mrb[29].mxu1 }
 0x133   : > { %1692 = vst [vmem:[%s1981_s6 + $0xe8] sm:$0xff] %v1652_v39   ;;  %vm819_vm9 = vcmp.gt.f32.partialorder %v1813_v43, 0.0  ;;  %v883_v49 = vmul.f32 0.2, %v1813_v43  ;;  %v849_v50 = vmul.f32 0.2, %v614_v47 }
 0x134   : > { %1675 = vst [vmem:[%s1981_s6 + $0x60] sm:$0xff] %v1567_v44   ;;  %1691 = vst [vmem:[%s1981_s6 + $0xe0] sm:$0xff] %v1647_v45   ;;  %v881_v51 = vmul.f32 0.2, %v742_v48  ;;  %v1782_v52 = vpop.f32.mrb[30].mxu0  ;;  %v1814_v53 = vpop.f32.mrb[30].mxu1  ;;  %v915_v54 = vsel %vm787_vm8, %v1781_v42, %v851_v46 }
 0x135   : > { %vm785_vm10 = vcmp.gt.f32.partialorder %v614_v47, 0.0  ;;  %vm788_vm11 = vcmp.gt.f32.partialorder %v1782_v52, 0.0  ;;  %v852_v55 = vmul.f32 0.2, %v1782_v52  ;;  %v617_v56 = vpop.f32.mrb[31].mxu0  ;;  %v745_v57 = vpop.f32.mrb[31].mxu1  ;;  %v947_v62 = vsel %vm819_vm9, %v1813_v43, %v883_v49 }
 0x136   : > { %vm817_vm12 = vcmp.gt.f32.partialorder %v742_v48, 0.0  ;;  %vm820_vm13 = vcmp.gt.f32.partialorder %v1814_v53, 0.0  ;;  %v884_v58 = vmul.f32 0.2, %v1814_v53  ;;  %vm786_vm14 = vcmp.gt.f32.partialorder %v617_v56, 0.0 }
 0x137   : > { %v916_v59 = vsel %vm788_vm11, %v1782_v52, %v852_v55  ;;  %v850_v60 = vmul.f32 0.2, %v617_v56  ;;  %vm818_vm15 = vcmp.gt.f32.partialorder %v745_v57, 0.0  ;;  %v882_v61 = vmul.f32 0.2, %v745_v57 }
 0x138   : > { %v913_v63 = vsel %vm785_vm10, %v614_v47, %v849_v50  ;;  %v1582_v0 = vpack.c.bf16 %v916_v59, %v915_v54  ;;  %v948_v1 = vsel %vm820_vm13, %v1814_v53, %v884_v58  ;;  %v945_v2 = vsel %vm817_vm12, %v742_v48, %v881_v51 }
 0x139   : > { %v1662_v3 = vpack.c.bf16 %v948_v1, %v947_v62  ;;  %v914_v4 = vsel %vm786_vm14, %v617_v56, %v850_v60  ;;  %v946_v5 = vsel %vm818_vm15, %v745_v57, %v882_v61 }
 0x13a   : > { %1678 = vst [vmem:[%s1981_s6 + $0x78] sm:$0xff] %v1582_v0   ;;  %v1577_v6 = vpack.c.bf16 %v914_v4, %v913_v63  ;;  %v1657_v7 = vpack.c.bf16 %v946_v5, %v945_v2 }
 0x13b   : > { %1694 = vst [vmem:[%s1981_s6 + $0xf8] sm:$0xff] %v1662_v3  }
 0x13c   : > { %1677 = vst [vmem:[%s1981_s6 + $0x70] sm:$0xff] %v1577_v6   ;;  %1693 = vst [vmem:[%s1981_s6 + $0xf0] sm:$0xff] %v1657_v7  }
 0x13d PF: > { %s12_s9 = sadd.s32 1, %s1885_s9  }
 0x13e   : > { %p9_p4 = scmp.ge.s32.totalorder %s12_s9, 6  }
 0x140   :  { %11 = sbr.rel (!%p9_p4) target bundleno = 1 (0x1), region = 58 }

// kernel: discriminator_forward.6
= control target key start
LH: loop header
LB: loop body
LE: loop exit
PB: predicated region body
PF: predicated region fallthrough
CT: control target
= control target key end

     0   :  { %s4403_s15 = smov 0   ;;  %s4405_s16 = smov 0   ;;  %s5934_s0 = inlined_call_operand.vmem [shape: bf16[512,1024], index: 0, kind: input, shape index: {}]   ;;  %s5935_s1 = inlined_call_operand.vmem [shape: bf16[1024,128], index: 1, kind: input, shape index: {}]   ;;  %s5936_s2 = inlined_call_operand.vmem [shape: f32[1,128], index: 2, kind: input, shape index: {}]   ;;  %s5937_s3 = inlined_call_operand.vmem [shape: f32[1,128], index: 3, kind: input, shape index: {}]   ;;  %s5938_s4 = inlined_call_operand.vmem [shape: bf16[512,128], index: 4, kind: output, shape index: {}]  }
   0x1   :  { %s4407_s17 = smov 0   ;;  %s4409_s18 = smov 0  }
   0x2   :  { %s4411_s19 = smov 0  }
   0x3 LB: > { %s23_s20 = sadd.s32 1, %s4370_s18  ;;  %p40_p1 = scmp.ne.s32.totalorder %s4362_s16, %s4358_s15  ;;  %s4374_s19 = sphi %s4411_s19, %s14_s19   ;;  %s4370_s18 = sphi %s4409_s18, %s6115_s18   ;;  %s4366_s17 = sphi %s4407_s17, %s6114_s17   ;;  %s4362_s16 = sphi %s4405_s16, %s6113_s16   ;;  %s4358_s15 = sphi %s4403_s15, %s6112_s15  }
   0x4   : > { %p24_p0 = scmp.ge.s32.totalorder %s23_s20, 2  ;;  %p41_p2 = scmp.eq.s32.totalorder %s4374_s19, 0 }
   0x5   : > { %s33_s22 = sadd.s32 1, %s4362_s16  ;;  %p3573_p5 = scmp.ge.s32.totalorder %s4374_s19, 2 }
   0x6   : > { %s6117_s20 = smov (%p24_p0, %s23_s20), 0  ;;  %p42_p3 = por %p41_p2, %p40_p1 }
   0x7   : > { %s30_s21 = ssub.s32 %s4370_s18, %s6117_s20  ;;  %184 = sbr.rel (%p3573_p5) target bundleno = 82 (0x52), region = 24 }
   0x8   : > { %p31_p4 = scmp.eq.s32.totalorder %s30_s21, 0 }
   0xa   : > { %s4438_s23 = scalar_select %p31_p4, %s4362_s16, %s33_s22  }
   0xe   : > { %187 = sbr.rel (!%p42_p3) target bundleno = 82 (0x52), region = 28  ;;  %s189_s24 = sand.u32 (%p42_p3), 1, %s4362_s16  }
   0xf   : > { %s3812_s25 = sshll.u32 (%p42_p3), %s4370_s18, 4  ;;  %s3574_s26 = sshll.u32 (%p42_p3), %s189_s24, 10 }
  0x10   : > { %s4446_s29 = scalar_lea.vmem (%p42_p3), %s5934_s0, %s3812_s25  ;;  %s4451_s30 = scalar_lea.vmem (%p42_p3), [#allocation3], %s3574_s26 }
  0x11   : > { %v207_v0 = vld [vmem:[%s4446_s29] sm:$0xff] (%p42_p3)  ;;  %v209_v1 = vld [vmem:[%s4446_s29 + $0x8] sm:$0xff] (%p42_p3) }
  0x12   : > { %v211_v2 = vld [vmem:[%s4446_s29 + $0x20] sm:$0xff] (%p42_p3)  ;;  %208 = vst [vmem:[%s4451_s30] sm:$0xff] (%p42_p3), %v207_v0  ;;  %210 = vst [vmem:[%s4451_s30 + $0x8] sm:$0xff] (%p42_p3), %v209_v1  ;;  %v213_v3 = vld [vmem:[%s4446_s29 + $0x28] sm:$0xff] (%p42_p3) }
  0x13   : > { %212 = vst [vmem:[%s4451_s30 + $0x10] sm:$0xff] (%p42_p3), %v211_v2  ;;  %v215_v4 = vld [vmem:[%s4446_s29 + $0x40] sm:$0xff] (%p42_p3)  ;;  %v217_v5 = vld [vmem:[%s4446_s29 + $0x48] sm:$0xff] (%p42_p3)  ;;  %214 = vst [vmem:[%s4451_s30 + $0x18] sm:$0xff] (%p42_p3), %v213_v3 }
  0x14   : > { %216 = vst [vmem:[%s4451_s30 + $0x20] sm:$0xff] (%p42_p3), %v215_v4  ;;  %218 = vst [vmem:[%s4451_s30 + $0x28] sm:$0xff] (%p42_p3), %v217_v5  ;;  %v219_v6 = vld [vmem:[%s4446_s29 + $0x60] sm:$0xff] (%p42_p3)  ;;  %v221_v7 = vld [vmem:[%s4446_s29 + $0x68] sm:$0xff] (%p42_p3) }
  0x15   : > { %v223_v8 = vld [vmem:[%s4446_s29 + $0x80] sm:$0xff]  ;;  %220 = vst [vmem:[%s4451_s30 + $0x30] sm:$0xff] %v219_v6  ;;  %222 = vst [vmem:[%s4451_s30 + $0x38] sm:$0xff] %v221_v7  ;;  %v225_v9 = vld [vmem:[%s4446_s29 + $0x88] sm:$0xff] }
  0x16   : > { %224 = vst [vmem:[%s4451_s30 + $0x40] sm:$0xff] %v223_v8  ;;  %v227_v10 = vld [vmem:[%s4446_s29 + $0xa0] sm:$0xff]  ;;  %v229_v11 = vld [vmem:[%s4446_s29 + $0xa8] sm:$0xff]  ;;  %226 = vst [vmem:[%s4451_s30 + $0x48] sm:$0xff] %v225_v9 }
  0x17   : > { %228 = vst [vmem:[%s4451_s30 + $0x50] sm:$0xff] %v227_v10  ;;  %230 = vst [vmem:[%s4451_s30 + $0x58] sm:$0xff] %v229_v11  ;;  %v231_v12 = vld [vmem:[%s4446_s29 + $0xc0] sm:$0xff]  ;;  %v233_v13 = vld [vmem:[%s4446_s29 + $0xc8] sm:$0xff] }
  0x18   : > { %v235_v14 = vld [vmem:[%s4446_s29 + $0xe0] sm:$0xff]  ;;  %232 = vst [vmem:[%s4451_s30 + $0x60] sm:$0xff] %v231_v12  ;;  %234 = vst [vmem:[%s4451_s30 + $0x68] sm:$0xff] %v233_v13  ;;  %v237_v15 = vld [vmem:[%s4446_s29 + $0xe8] sm:$0xff] }
  0x19   : > { %236 = vst [vmem:[%s4451_s30 + $0x70] sm:$0xff] %v235_v14  ;;  %v239_v16 = vld [vmem:[%s4446_s29 + $0x100] sm:$0xff]  ;;  %v241_v17 = vld [vmem:[%s4446_s29 + $0x108] sm:$0xff]  ;;  %238 = vst [vmem:[%s4451_s30 + $0x78] sm:$0xff] %v237_v15 }
  0x1a   : > { %240 = vst [vmem:[%s4451_s30 + $0x80] sm:$0xff] %v239_v16  ;;  %242 = vst [vmem:[%s4451_s30 + $0x88] sm:$0xff] %v241_v17  ;;  %v243_v18 = vld [vmem:[%s4446_s29 + $0x120] sm:$0xff]  ;;  %v245_v19 = vld [vmem:[%s4446_s29 + $0x128] sm:$0xff] }
  0x1b   : > { %v247_v20 = vld [vmem:[%s4446_s29 + $0x140] sm:$0xff]  ;;  %244 = vst [vmem:[%s4451_s30 + $0x90] sm:$0xff] %v243_v18  ;;  %246 = vst [vmem:[%s4451_s30 + $0x98] sm:$0xff] %v245_v19  ;;  %v249_v21 = vld [vmem:[%s4446_s29 + $0x148] sm:$0xff] }
  0x1c   : > { %248 = vst [vmem:[%s4451_s30 + $0xa0] sm:$0xff] %v247_v20  ;;  %v251_v22 = vld [vmem:[%s4446_s29 + $0x160] sm:$0xff]  ;;  %v253_v23 = vld [vmem:[%s4446_s29 + $0x168] sm:$0xff]  ;;  %250 = vst [vmem:[%s4451_s30 + $0xa8] sm:$0xff] %v249_v21 }
  0x1d   : > { %252 = vst [vmem:[%s4451_s30 + $0xb0] sm:$0xff] %v251_v22  ;;  %254 = vst [vmem:[%s4451_s30 + $0xb8] sm:$0xff] %v253_v23  ;;  %v255_v24 = vld [vmem:[%s4446_s29 + $0x180] sm:$0xff]  ;;  %v257_v25 = vld [vmem:[%s4446_s29 + $0x188] sm:$0xff] }
  0x1e   : > { %v259_v26 = vld [vmem:[%s4446_s29 + $0x1a0] sm:$0xff]  ;;  %256 = vst [vmem:[%s4451_s30 + $0xc0] sm:$0xff] %v255_v24  ;;  %258 = vst [vmem:[%s4451_s30 + $0xc8] sm:$0xff] %v257_v25  ;;  %v261_v27 = vld [vmem:[%s4446_s29 + $0x1a8] sm:$0xff] }
  0x1f   : > { %260 = vst [vmem:[%s4451_s30 + $0xd0] sm:$0xff] %v259_v26  ;;  %v263_v28 = vld [vmem:[%s4446_s29 + $0x1c0] sm:$0xff]  ;;  %v265_v29 = vld [vmem:[%s4446_s29 + $0x1c8] sm:$0xff]  ;;  %262 = vst [vmem:[%s4451_s30 + $0xd8] sm:$0xff] %v261_v27 }
  0x20   : > { %264 = vst [vmem:[%s4451_s30 + $0xe0] sm:$0xff] %v263_v28  ;;  %266 = vst [vmem:[%s4451_s30 + $0xe8] sm:$0xff] %v265_v29  ;;  %v267_v30 = vld [vmem:[%s4446_s29 + $0x1e0] sm:$0xff]  ;;  %v269_v31 = vld [vmem:[%s4446_s29 + $0x1e8] sm:$0xff] }
  0x21   : > { %v271_v32 = vld [vmem:[%s4446_s29 + $0x200] sm:$0xff]  ;;  %268 = vst [vmem:[%s4451_s30 + $0xf0] sm:$0xff] %v267_v30  ;;  %270 = vst [vmem:[%s4451_s30 + $0xf8] sm:$0xff] %v269_v31  ;;  %v273_v33 = vld [vmem:[%s4446_s29 + $0x208] sm:$0xff] }
  0x22   : > { %272 = vst [vmem:[%s4451_s30 + $0x100] sm:$0xff] %v271_v32  ;;  %v275_v34 = vld [vmem:[%s4446_s29 + $0x220] sm:$0xff]  ;;  %v277_v35 = vld [vmem:[%s4446_s29 + $0x228] sm:$0xff]  ;;  %274 = vst [vmem:[%s4451_s30 + $0x108] sm:$0xff] %v273_v33 }
  0x23   : > { %276 = vst [vmem:[%s4451_s30 + $0x110] sm:$0xff] %v275_v34  ;;  %278 = vst [vmem:[%s4451_s30 + $0x118] sm:$0xff] %v277_v35  ;;  %v279_v36 = vld [vmem:[%s4446_s29 + $0x240] sm:$0xff]  ;;  %v281_v37 = vld [vmem:[%s4446_s29 + $0x248] sm:$0xff] }
  0x24   : > { %v283_v38 = vld [vmem:[%s4446_s29 + $0x260] sm:$0xff]  ;;  %280 = vst [vmem:[%s4451_s30 + $0x120] sm:$0xff] %v279_v36  ;;  %282 = vst [vmem:[%s4451_s30 + $0x128] sm:$0xff] %v281_v37  ;;  %v285_v39 = vld [vmem:[%s4446_s29 + $0x268] sm:$0xff] }
  0x25   : > { %284 = vst [vmem:[%s4451_s30 + $0x130] sm:$0xff] %v283_v38  ;;  %v287_v40 = vld [vmem:[%s4446_s29 + $0x280] sm:$0xff]  ;;  %v289_v41 = vld [vmem:[%s4446_s29 + $0x288] sm:$0xff]  ;;  %286 = vst [vmem:[%s4451_s30 + $0x138] sm:$0xff] %v285_v39 }
  0x26   : > { %288 = vst [vmem:[%s4451_s30 + $0x140] sm:$0xff] %v287_v40  ;;  %290 = vst [vmem:[%s4451_s30 + $0x148] sm:$0xff] %v289_v41  ;;  %v291_v42 = vld [vmem:[%s4446_s29 + $0x2a0] sm:$0xff]  ;;  %v293_v43 = vld [vmem:[%s4446_s29 + $0x2a8] sm:$0xff] }
  0x27   : > { %v295_v44 = vld [vmem:[%s4446_s29 + $0x2c0] sm:$0xff]  ;;  %292 = vst [vmem:[%s4451_s30 + $0x150] sm:$0xff] %v291_v42  ;;  %294 = vst [vmem:[%s4451_s30 + $0x158] sm:$0xff] %v293_v43  ;;  %v297_v45 = vld [vmem:[%s4446_s29 + $0x2c8] sm:$0xff] }
  0x28   : > { %296 = vst [vmem:[%s4451_s30 + $0x160] sm:$0xff] %v295_v44  ;;  %v299_v46 = vld [vmem:[%s4446_s29 + $0x2e0] sm:$0xff]  ;;  %v301_v47 = vld [vmem:[%s4446_s29 + $0x2e8] sm:$0xff]  ;;  %298 = vst [vmem:[%s4451_s30 + $0x168] sm:$0xff] %v297_v45 }
  0x29   : > { %300 = vst [vmem:[%s4451_s30 + $0x170] sm:$0xff] %v299_v46  ;;  %302 = vst [vmem:[%s4451_s30 + $0x178] sm:$0xff] %v301_v47  ;;  %v303_v48 = vld [vmem:[%s4446_s29 + $0x300] sm:$0xff]  ;;  %v305_v49 = vld [vmem:[%s4446_s29 + $0x308] sm:$0xff] }
  0x2a   : > { %v307_v50 = vld [vmem:[%s4446_s29 + $0x320] sm:$0xff]  ;;  %304 = vst [vmem:[%s4451_s30 + $0x180] sm:$0xff] %v303_v48  ;;  %306 = vst [vmem:[%s4451_s30 + $0x188] sm:$0xff] %v305_v49  ;;  %v309_v51 = vld [vmem:[%s4446_s29 + $0x328] sm:$0xff] }
  0x2b   : > { %308 = vst [vmem:[%s4451_s30 + $0x190] sm:$0xff] %v307_v50  ;;  %v311_v52 = vld [vmem:[%s4446_s29 + $0x340] sm:$0xff]  ;;  %v313_v53 = vld [vmem:[%s4446_s29 + $0x348] sm:$0xff]  ;;  %310 = vst [vmem:[%s4451_s30 + $0x198] sm:$0xff] %v309_v51 }
  0x2c   : > { %312 = vst [vmem:[%s4451_s30 + $0x1a0] sm:$0xff] %v311_v52  ;;  %314 = vst [vmem:[%s4451_s30 + $0x1a8] sm:$0xff] %v313_v53  ;;  %v315_v54 = vld [vmem:[%s4446_s29 + $0x360] sm:$0xff]  ;;  %v317_v55 = vld [vmem:[%s4446_s29 + $0x368] sm:$0xff] }
  0x2d   : > { %v319_v56 = vld [vmem:[%s4446_s29 + $0x380] sm:$0xff]  ;;  %316 = vst [vmem:[%s4451_s30 + $0x1b0] sm:$0xff] %v315_v54  ;;  %318 = vst [vmem:[%s4451_s30 + $0x1b8] sm:$0xff] %v317_v55  ;;  %v321_v57 = vld [vmem:[%s4446_s29 + $0x388] sm:$0xff] }
  0x2e   : > { %320 = vst [vmem:[%s4451_s30 + $0x1c0] sm:$0xff] %v319_v56  ;;  %v323_v58 = vld [vmem:[%s4446_s29 + $0x3a0] sm:$0xff]  ;;  %v325_v59 = vld [vmem:[%s4446_s29 + $0x3a8] sm:$0xff]  ;;  %322 = vst [vmem:[%s4451_s30 + $0x1c8] sm:$0xff] %v321_v57 }
  0x2f   : > { %324 = vst [vmem:[%s4451_s30 + $0x1d0] sm:$0xff] %v323_v58  ;;  %326 = vst [vmem:[%s4451_s30 + $0x1d8] sm:$0xff] %v325_v59  ;;  %v327_v60 = vld [vmem:[%s4446_s29 + $0x3c0] sm:$0xff]  ;;  %v329_v61 = vld [vmem:[%s4446_s29 + $0x3c8] sm:$0xff] }
  0x30   : > { %v331_v62 = vld [vmem:[%s4446_s29 + $0x3e0] sm:$0xff]  ;;  %328 = vst [vmem:[%s4451_s30 + $0x1e0] sm:$0xff] %v327_v60  ;;  %330 = vst [vmem:[%s4451_s30 + $0x1e8] sm:$0xff] %v329_v61  ;;  %v333_v63 = vld [vmem:[%s4446_s29 + $0x3e8] sm:$0xff] }
  0x31   : > { %332 = vst [vmem:[%s4451_s30 + $0x1f0] sm:$0xff] %v331_v62  ;;  %v335_v0 = vld [vmem:[%s4446_s29 + $0x400] sm:$0xff]  ;;  %v337_v1 = vld [vmem:[%s4446_s29 + $0x408] sm:$0xff]  ;;  %334 = vst [vmem:[%s4451_s30 + $0x1f8] sm:$0xff] %v333_v63 }
  0x32   : > { %336 = vst [vmem:[%s4451_s30 + $0x200] sm:$0xff] %v335_v0  ;;  %338 = vst [vmem:[%s4451_s30 + $0x208] sm:$0xff] %v337_v1  ;;  %v339_v2 = vld [vmem:[%s4446_s29 + $0x420] sm:$0xff]  ;;  %v341_v3 = vld [vmem:[%s4446_s29 + $0x428] sm:$0xff] }
  0x33   : > { %v343_v4 = vld [vmem:[%s4446_s29 + $0x440] sm:$0xff]  ;;  %340 = vst [vmem:[%s4451_s30 + $0x210] sm:$0xff] %v339_v2  ;;  %342 = vst [vmem:[%s4451_s30 + $0x218] sm:$0xff] %v341_v3  ;;  %v345_v5 = vld [vmem:[%s4446_s29 + $0x448] sm:$0xff] }
  0x34   : > { %344 = vst [vmem:[%s4451_s30 + $0x220] sm:$0xff] %v343_v4  ;;  %v347_v6 = vld [vmem:[%s4446_s29 + $0x460] sm:$0xff]  ;;  %v349_v7 = vld [vmem:[%s4446_s29 + $0x468] sm:$0xff]  ;;  %346 = vst [vmem:[%s4451_s30 + $0x228] sm:$0xff] %v345_v5 }
  0x35   : > { %348 = vst [vmem:[%s4451_s30 + $0x230] sm:$0xff] %v347_v6  ;;  %350 = vst [vmem:[%s4451_s30 + $0x238] sm:$0xff] %v349_v7  ;;  %v351_v8 = vld [vmem:[%s4446_s29 + $0x480] sm:$0xff]  ;;  %v353_v9 = vld [vmem:[%s4446_s29 + $0x488] sm:$0xff] }
  0x36   : > { %v355_v10 = vld [vmem:[%s4446_s29 + $0x4a0] sm:$0xff]  ;;  %352 = vst [vmem:[%s4451_s30 + $0x240] sm:$0xff] %v351_v8  ;;  %354 = vst [vmem:[%s4451_s30 + $0x248] sm:$0xff] %v353_v9  ;;  %v357_v11 = vld [vmem:[%s4446_s29 + $0x4a8] sm:$0xff] }
  0x37   : > { %356 = vst [vmem:[%s4451_s30 + $0x250] sm:$0xff] %v355_v10  ;;  %v359_v12 = vld [vmem:[%s4446_s29 + $0x4c0] sm:$0xff]  ;;  %v361_v13 = vld [vmem:[%s4446_s29 + $0x4c8] sm:$0xff]  ;;  %358 = vst [vmem:[%s4451_s30 + $0x258] sm:$0xff] %v357_v11 }
  0x38   : > { %360 = vst [vmem:[%s4451_s30 + $0x260] sm:$0xff] %v359_v12  ;;  %362 = vst [vmem:[%s4451_s30 + $0x268] sm:$0xff] %v361_v13  ;;  %v363_v14 = vld [vmem:[%s4446_s29 + $0x4e0] sm:$0xff]  ;;  %v365_v15 = vld [vmem:[%s4446_s29 + $0x4e8] sm:$0xff] }
  0x39   : > { %v367_v16 = vld [vmem:[%s4446_s29 + $0x500] sm:$0xff]  ;;  %364 = vst [vmem:[%s4451_s30 + $0x270] sm:$0xff] %v363_v14  ;;  %366 = vst [vmem:[%s4451_s30 + $0x278] sm:$0xff] %v365_v15  ;;  %v369_v17 = vld [vmem:[%s4446_s29 + $0x508] sm:$0xff] }
  0x3a   : > { %368 = vst [vmem:[%s4451_s30 + $0x280] sm:$0xff] %v367_v16  ;;  %v371_v18 = vld [vmem:[%s4446_s29 + $0x520] sm:$0xff]  ;;  %v373_v19 = vld [vmem:[%s4446_s29 + $0x528] sm:$0xff]  ;;  %370 = vst [vmem:[%s4451_s30 + $0x288] sm:$0xff] %v369_v17 }
  0x3b   : > { %372 = vst [vmem:[%s4451_s30 + $0x290] sm:$0xff] %v371_v18  ;;  %374 = vst [vmem:[%s4451_s30 + $0x298] sm:$0xff] %v373_v19  ;;  %v375_v20 = vld [vmem:[%s4446_s29 + $0x540] sm:$0xff]  ;;  %v377_v21 = vld [vmem:[%s4446_s29 + $0x548] sm:$0xff] }
  0x3c   : > { %v379_v22 = vld [vmem:[%s4446_s29 + $0x560] sm:$0xff]  ;;  %376 = vst [vmem:[%s4451_s30 + $0x2a0] sm:$0xff] %v375_v20  ;;  %378 = vst [vmem:[%s4451_s30 + $0x2a8] sm:$0xff] %v377_v21  ;;  %v381_v23 = vld [vmem:[%s4446_s29 + $0x568] sm:$0xff] }
  0x3d   : > { %380 = vst [vmem:[%s4451_s30 + $0x2b0] sm:$0xff] %v379_v22  ;;  %v383_v24 = vld [vmem:[%s4446_s29 + $0x580] sm:$0xff]  ;;  %v385_v25 = vld [vmem:[%s4446_s29 + $0x588] sm:$0xff]  ;;  %382 = vst [vmem:[%s4451_s30 + $0x2b8] sm:$0xff] %v381_v23 }
  0x3e   : > { %384 = vst [vmem:[%s4451_s30 + $0x2c0] sm:$0xff] %v383_v24  ;;  %386 = vst [vmem:[%s4451_s30 + $0x2c8] sm:$0xff] %v385_v25  ;;  %v387_v26 = vld [vmem:[%s4446_s29 + $0x5a0] sm:$0xff]  ;;  %v389_v27 = vld [vmem:[%s4446_s29 + $0x5a8] sm:$0xff] }
  0x3f   : > { %v391_v28 = vld [vmem:[%s4446_s29 + $0x5c0] sm:$0xff]  ;;  %388 = vst [vmem:[%s4451_s30 + $0x2d0] sm:$0xff] %v387_v26  ;;  %390 = vst [vmem:[%s4451_s30 + $0x2d8] sm:$0xff] %v389_v27  ;;  %v393_v29 = vld [vmem:[%s4446_s29 + $0x5c8] sm:$0xff] }
  0x40   : > { %392 = vst [vmem:[%s4451_s30 + $0x2e0] sm:$0xff] %v391_v28  ;;  %v395_v30 = vld [vmem:[%s4446_s29 + $0x5e0] sm:$0xff]  ;;  %v397_v31 = vld [vmem:[%s4446_s29 + $0x5e8] sm:$0xff]  ;;  %394 = vst [vmem:[%s4451_s30 + $0x2e8] sm:$0xff] %v393_v29 }
  0x41   : > { %396 = vst [vmem:[%s4451_s30 + $0x2f0] sm:$0xff] %v395_v30  ;;  %398 = vst [vmem:[%s4451_s30 + $0x2f8] sm:$0xff] %v397_v31  ;;  %v399_v32 = vld [vmem:[%s4446_s29 + $0x600] sm:$0xff]  ;;  %v401_v33 = vld [vmem:[%s4446_s29 + $0x608] sm:$0xff] }
  0x42   : > { %v403_v34 = vld [vmem:[%s4446_s29 + $0x620] sm:$0xff]  ;;  %400 = vst [vmem:[%s4451_s30 + $0x300] sm:$0xff] %v399_v32  ;;  %402 = vst [vmem:[%s4451_s30 + $0x308] sm:$0xff] %v401_v33  ;;  %v405_v35 = vld [vmem:[%s4446_s29 + $0x628] sm:$0xff] }
  0x43   : > { %404 = vst [vmem:[%s4451_s30 + $0x310] sm:$0xff] %v403_v34  ;;  %v407_v36 = vld [vmem:[%s4446_s29 + $0x640] sm:$0xff]  ;;  %v409_v37 = vld [vmem:[%s4446_s29 + $0x648] sm:$0xff]  ;;  %406 = vst [vmem:[%s4451_s30 + $0x318] sm:$0xff] %v405_v35 }
  0x44   : > { %408 = vst [vmem:[%s4451_s30 + $0x320] sm:$0xff] %v407_v36  ;;  %410 = vst [vmem:[%s4451_s30 + $0x328] sm:$0xff] %v409_v37  ;;  %v411_v38 = vld [vmem:[%s4446_s29 + $0x660] sm:$0xff]  ;;  %v413_v39 = vld [vmem:[%s4446_s29 + $0x668] sm:$0xff] }
  0x45   : > { %v415_v40 = vld [vmem:[%s4446_s29 + $0x680] sm:$0xff]  ;;  %412 = vst [vmem:[%s4451_s30 + $0x330] sm:$0xff] %v411_v38  ;;  %414 = vst [vmem:[%s4451_s30 + $0x338] sm:$0xff] %v413_v39  ;;  %v417_v41 = vld [vmem:[%s4446_s29 + $0x688] sm:$0xff] }
  0x46   : > { %416 = vst [vmem:[%s4451_s30 + $0x340] sm:$0xff] %v415_v40  ;;  %v419_v42 = vld [vmem:[%s4446_s29 + $0x6a0] sm:$0xff]  ;;  %v421_v43 = vld [vmem:[%s4446_s29 + $0x6a8] sm:$0xff]  ;;  %418 = vst [vmem:[%s4451_s30 + $0x348] sm:$0xff] %v417_v41 }
  0x47   : > { %420 = vst [vmem:[%s4451_s30 + $0x350] sm:$0xff] %v419_v42  ;;  %422 = vst [vmem:[%s4451_s30 + $0x358] sm:$0xff] %v421_v43  ;;  %v423_v44 = vld [vmem:[%s4446_s29 + $0x6c0] sm:$0xff]  ;;  %v425_v45 = vld [vmem:[%s4446_s29 + $0x6c8] sm:$0xff] }
  0x48   : > { %v427_v46 = vld [vmem:[%s4446_s29 + $0x6e0] sm:$0xff]  ;;  %424 = vst [vmem:[%s4451_s30 + $0x360] sm:$0xff] %v423_v44  ;;  %426 = vst [vmem:[%s4451_s30 + $0x368] sm:$0xff] %v425_v45  ;;  %v429_v47 = vld [vmem:[%s4446_s29 + $0x6e8] sm:$0xff] }
  0x49   : > { %428 = vst [vmem:[%s4451_s30 + $0x370] sm:$0xff] %v427_v46  ;;  %v431_v48 = vld [vmem:[%s4446_s29 + $0x700] sm:$0xff]  ;;  %v433_v49 = vld [vmem:[%s4446_s29 + $0x708] sm:$0xff]  ;;  %430 = vst [vmem:[%s4451_s30 + $0x378] sm:$0xff] %v429_v47 }
  0x4a   : > { %432 = vst [vmem:[%s4451_s30 + $0x380] sm:$0xff] %v431_v48  ;;  %434 = vst [vmem:[%s4451_s30 + $0x388] sm:$0xff] %v433_v49  ;;  %v435_v50 = vld [vmem:[%s4446_s29 + $0x720] sm:$0xff]  ;;  %v437_v51 = vld [vmem:[%s4446_s29 + $0x728] sm:$0xff] }
  0x4b   : > { %v439_v52 = vld [vmem:[%s4446_s29 + $0x740] sm:$0xff]  ;;  %436 = vst [vmem:[%s4451_s30 + $0x390] sm:$0xff] %v435_v50  ;;  %438 = vst [vmem:[%s4451_s30 + $0x398] sm:$0xff] %v437_v51  ;;  %v441_v53 = vld [vmem:[%s4446_s29 + $0x748] sm:$0xff] }
  0x4c   : > { %440 = vst [vmem:[%s4451_s30 + $0x3a0] sm:$0xff] %v439_v52  ;;  %v443_v54 = vld [vmem:[%s4446_s29 + $0x760] sm:$0xff]  ;;  %v445_v55 = vld [vmem:[%s4446_s29 + $0x768] sm:$0xff]  ;;  %442 = vst [vmem:[%s4451_s30 + $0x3a8] sm:$0xff] %v441_v53 }
  0x4d   : > { %444 = vst [vmem:[%s4451_s30 + $0x3b0] sm:$0xff] %v443_v54  ;;  %446 = vst [vmem:[%s4451_s30 + $0x3b8] sm:$0xff] %v445_v55  ;;  %v447_v56 = vld [vmem:[%s4446_s29 + $0x780] sm:$0xff]  ;;  %v449_v57 = vld [vmem:[%s4446_s29 + $0x788] sm:$0xff] }
  0x4e   : > { %v451_v58 = vld [vmem:[%s4446_s29 + $0x7a0] sm:$0xff]  ;;  %448 = vst [vmem:[%s4451_s30 + $0x3c0] sm:$0xff] %v447_v56  ;;  %450 = vst [vmem:[%s4451_s30 + $0x3c8] sm:$0xff] %v449_v57  ;;  %v453_v59 = vld [vmem:[%s4446_s29 + $0x7a8] sm:$0xff] }
  0x4f   : > { %452 = vst [vmem:[%s4451_s30 + $0x3d0] sm:$0xff] %v451_v58  ;;  %v455_v60 = vld [vmem:[%s4446_s29 + $0x7c0] sm:$0xff]  ;;  %v457_v61 = vld [vmem:[%s4446_s29 + $0x7c8] sm:$0xff]  ;;  %454 = vst [vmem:[%s4451_s30 + $0x3d8] sm:$0xff] %v453_v59 }
  0x50   : > { %456 = vst [vmem:[%s4451_s30 + $0x3e0] sm:$0xff] %v455_v60  ;;  %458 = vst [vmem:[%s4451_s30 + $0x3e8] sm:$0xff] %v457_v61  ;;  %v459_v62 = vld [vmem:[%s4446_s29 + $0x7e0] sm:$0xff]  ;;  %v461_v63 = vld [vmem:[%s4446_s29 + $0x7e8] sm:$0xff] }
  0x51   : > { %460 = vst [vmem:[%s4451_s30 + $0x3f0] sm:$0xff] %v459_v62  ;;  %462 = vst [vmem:[%s4451_s30 + $0x3f8] sm:$0xff] %v461_v63 }
  0x52 PF: > { %p3577_p6 = scmp.ge.s32.totalorder %s4374_s19, 1  ;;  %p479_p7 = scmp.lt.s32.totalorder %s4374_s19, 3 }
  0x54   : > { %p480_p8 = pnand %p3577_p6, %p479_p7 }
  0x55   : > { %s486_s5 = sand.u32 (!%p480_p8), 1, %s4358_s15   ;;  %s3579_s6 = sshll.u32 (!%p480_p8), %s4366_s17, 6 }
  0x56   : > { %483 = sbr.rel (%p480_p8) target bundleno = 943 (0x3af), region = 55  ;;  %s3578_s7 = sshll.u32 (!%p480_p8), %s486_s5, 10 }
  0x57   : > { %p526_p9 = scmp.lt.s32.totalorder (!%p480_p8), %s3579_s6, 127  ;;  %s4715_s12 = scalar_lea.vmem (!%p480_p8), [#allocation3], %s3578_s7 }
  0x58   : > { %p3581_p10 = scmp.ne.s32.totalorder (!%p480_p8), %s4366_s17, 0 }
  0x5d   : > { %s6119_s6 = smov (!%p526_p9, %s3579_s6), 127  ;;  %548 = sbr.rel (%p3581_p10) target bundleno = 127 (0x7f), region = 63 }
  0x5e   : > { %s3580_s8 = sshll.u32 %s6119_s6, 2  ;;  %v4376_v0 = vmov (!%p3581_p10), 0.0  }
  0x5f   : > { %s4713_s11 = scalar_lea.vmem %s5935_s1, %s3580_s8  ;;  %549 = vst [vmem:[#allocation2] sm:$0xff] (!%p3581_p10), %v4376_v0  ;;  %550 = vst [vmem:[#allocation2 + $0x8] sm:$0xff] (!%p3581_p10), %v4376_v0 }
  0x60   : > { %551 = vst [vmem:[#allocation2 + $0x10] sm:$0xff] (!%p3581_p10), %v4376_v0  ;;  %552 = vst [vmem:[#allocation2 + $0x18] sm:$0xff] (!%p3581_p10), %v4376_v0 }
  0x61   : > { %553 = vst [vmem:[#allocation2 + $0x20] sm:$0xff] (!%p3581_p10), %v4376_v0  ;;  %554 = vst [vmem:[#allocation2 + $0x28] sm:$0xff] (!%p3581_p10), %v4376_v0 }
  0x62   : > { %555 = vst [vmem:[#allocation2 + $0x30] sm:$0xff] (!%p3581_p10), %v4376_v0  ;;  %556 = vst [vmem:[#allocation2 + $0x38] sm:$0xff] (!%p3581_p10), %v4376_v0 }
  0x63   : > { %557 = vst [vmem:[#allocation2 + $0x40] sm:$0xff] (!%p3581_p10), %v4376_v0  ;;  %558 = vst [vmem:[#allocation2 + $0x48] sm:$0xff] (!%p3581_p10), %v4376_v0 }
  0x64   : > { %559 = vst [vmem:[#allocation2 + $0x50] sm:$0xff] %v4376_v0  ;;  %560 = vst [vmem:[#allocation2 + $0x58] sm:$0xff] %v4376_v0 }
  0x65   : > { %561 = vst [vmem:[#allocation2 + $0x60] sm:$0xff] %v4376_v0  ;;  %562 = vst [vmem:[#allocation2 + $0x68] sm:$0xff] %v4376_v0 }
  0x66   : > { %563 = vst [vmem:[#allocation2 + $0x70] sm:$0xff] %v4376_v0  ;;  %564 = vst [vmem:[#allocation2 + $0x78] sm:$0xff] %v4376_v0 }
  0x67   : > { %565 = vst [vmem:[#allocation2 + $0x80] sm:$0xff] %v4376_v0  ;;  %566 = vst [vmem:[#allocation2 + $0x88] sm:$0xff] %v4376_v0 }
  0x68   : > { %567 = vst [vmem:[#allocation2 + $0x90] sm:$0xff] %v4376_v0  ;;  %568 = vst [vmem:[#allocation2 + $0x98] sm:$0xff] %v4376_v0 }
  0x69   : > { %569 = vst [vmem:[#allocation2 + $0xa0] sm:$0xff] %v4376_v0  ;;  %570 = vst [vmem:[#allocation2 + $0xa8] sm:$0xff] %v4376_v0 }
  0x6a   : > { %571 = vst [vmem:[#allocation2 + $0xb0] sm:$0xff] %v4376_v0  ;;  %572 = vst [vmem:[#allocation2 + $0xb8] sm:$0xff] %v4376_v0 }
  0x6b   : > { %573 = vst [vmem:[#allocation2 + $0xc0] sm:$0xff] %v4376_v0  ;;  %574 = vst [vmem:[#allocation2 + $0xc8] sm:$0xff] %v4376_v0 }
  0x6c   : > { %575 = vst [vmem:[#allocation2 + $0xd0] sm:$0xff] %v4376_v0  ;;  %576 = vst [vmem:[#allocation2 + $0xd8] sm:$0xff] %v4376_v0 }
  0x6d   : > { %577 = vst [vmem:[#allocation2 + $0xe0] sm:$0xff] %v4376_v0  ;;  %578 = vst [vmem:[#allocation2 + $0xe8] sm:$0xff] %v4376_v0 }
  0x6e   : > { %579 = vst [vmem:[#allocation2 + $0xf0] sm:$0xff] %v4376_v0  ;;  %580 = vst [vmem:[#allocation2 + $0xf8] sm:$0xff] %v4376_v0 }
  0x6f   : > { %581 = vst [vmem:[#allocation2 + $0x100] sm:$0xff] %v4376_v0  ;;  %582 = vst [vmem:[#allocation2 + $0x108] sm:$0xff] %v4376_v0 }
  0x70   : > { %583 = vst [vmem:[#allocation2 + $0x110] sm:$0xff] %v4376_v0  ;;  %584 = vst [vmem:[#allocation2 + $0x118] sm:$0xff] %v4376_v0 }
  0x71   : > { %585 = vst [vmem:[#allocation2 + $0x120] sm:$0xff] %v4376_v0  ;;  %586 = vst [vmem:[#allocation2 + $0x128] sm:$0xff] %v4376_v0 }
  0x72   : > { %587 = vst [vmem:[#allocation2 + $0x130] sm:$0xff] %v4376_v0  ;;  %588 = vst [vmem:[#allocation2 + $0x138] sm:$0xff] %v4376_v0 }
  0x73   : > { %589 = vst [vmem:[#allocation2 + $0x140] sm:$0xff] %v4376_v0  ;;  %590 = vst [vmem:[#allocation2 + $0x148] sm:$0xff] %v4376_v0 }
  0x74   : > { %591 = vst [vmem:[#allocation2 + $0x150] sm:$0xff] %v4376_v0  ;;  %592 = vst [vmem:[#allocation2 + $0x158] sm:$0xff] %v4376_v0 }
  0x75   : > { %593 = vst [vmem:[#allocation2 + $0x160] sm:$0xff] %v4376_v0  ;;  %594 = vst [vmem:[#allocation2 + $0x168] sm:$0xff] %v4376_v0 }
  0x76   : > { %595 = vst [vmem:[#allocation2 + $0x170] sm:$0xff] %v4376_v0  ;;  %596 = vst [vmem:[#allocation2 + $0x178] sm:$0xff] %v4376_v0 }
  0x77   : > { %597 = vst [vmem:[#allocation2 + $0x180] sm:$0xff] %v4376_v0  ;;  %598 = vst [vmem:[#allocation2 + $0x188] sm:$0xff] %v4376_v0 }
  0x78   : > { %599 = vst [vmem:[#allocation2 + $0x190] sm:$0xff] %v4376_v0  ;;  %600 = vst [vmem:[#allocation2 + $0x198] sm:$0xff] %v4376_v0 }
  0x79   : > { %601 = vst [vmem:[#allocation2 + $0x1a0] sm:$0xff] %v4376_v0  ;;  %602 = vst [vmem:[#allocation2 + $0x1a8] sm:$0xff] %v4376_v0 }
  0x7a   : > { %603 = vst [vmem:[#allocation2 + $0x1b0] sm:$0xff] %v4376_v0  ;;  %604 = vst [vmem:[#allocation2 + $0x1b8] sm:$0xff] %v4376_v0 }
  0x7b   : > { %605 = vst [vmem:[#allocation2 + $0x1c0] sm:$0xff] %v4376_v0  ;;  %606 = vst [vmem:[#allocation2 + $0x1c8] sm:$0xff] %v4376_v0 }
  0x7c   : > { %607 = vst [vmem:[#allocation2 + $0x1d0] sm:$0xff] %v4376_v0  ;;  %608 = vst [vmem:[#allocation2 + $0x1d8] sm:$0xff] %v4376_v0 }
  0x7d   : > { %609 = vst [vmem:[#allocation2 + $0x1e0] sm:$0xff] %v4376_v0  ;;  %610 = vst [vmem:[#allocation2 + $0x1e8] sm:$0xff] %v4376_v0 }
  0x7e   : > { %611 = vst [vmem:[#allocation2 + $0x1f0] sm:$0xff] %v4376_v0  ;;  %612 = vst [vmem:[#allocation2 + $0x1f8] sm:$0xff] %v4376_v0 }
  0x7f PF: > { %v4110_v1 = vld [vmem:[%s4713_s11] sm:$0xff]   ;;  %v4377_v2 = vmov 0   ;;  %v4112_v4 = vld [vmem:[%s4713_s11 + $0x8] sm:$0xff]   ;;  %v4114_v6 = vld [vmem:[%s4713_s11 + $0x10] sm:$0xff]   ;;  %p3742_p11 = scmp.ne.s32.totalorder %s4366_s17, 1 }
  0x80   : > { %1701 = vmatprep.subr.bf16.mxu0 %v4377_v2  ;;  %1990 = vmatprep.subr.bf16.mxu1 %v4377_v2  ;;  %v4111_v3 = vld [vmem:[%s4713_s11 + $0x80] sm:$0xff]   ;;  %v4113_v5 = vld [vmem:[%s4713_s11 + $0x88] sm:$0xff]   ;;  %v4115_v7 = vld [vmem:[%s4713_s11 + $0x90] sm:$0xff]  }
  0x81   : > { %1702 = vmatpush1.bf16.msra.mxu0 %v4110_v1  ;;  %1991 = vmatpush1.bf16.msra.mxu1 %v4111_v3  ;;  %v4116_v8 = vld [vmem:[%s4713_s11 + $0x18] sm:$0xff]   ;;  %v4118_v10 = vld [vmem:[%s4713_s11 + $0x20] sm:$0xff]   ;;  %v4120_v12 = vld [vmem:[%s4713_s11 + $0x28] sm:$0xff]  }
  0x82   : > { %1703 = vmatprep.subr.bf16.mxu0 %v4377_v2  ;;  %1992 = vmatprep.subr.bf16.mxu1 %v4377_v2  ;;  %v4117_v9 = vld [vmem:[%s4713_s11 + $0x98] sm:$0xff]   ;;  %v4119_v11 = vld [vmem:[%s4713_s11 + $0xa0] sm:$0xff]   ;;  %v4121_v13 = vld [vmem:[%s4713_s11 + $0xa8] sm:$0xff]  }
  0x83   : > { %v4122_v14 = vld [vmem:[%s4713_s11 + $0x30] sm:$0xff]   ;;  %v4124_v16 = vld [vmem:[%s4713_s11 + $0x38] sm:$0xff]   ;;  %v4126_v18 = vld [vmem:[%s4713_s11 + $0x40] sm:$0xff]  }
  0x84   : > { %v4123_v15 = vld [vmem:[%s4713_s11 + $0xb0] sm:$0xff]   ;;  %v4125_v17 = vld [vmem:[%s4713_s11 + $0xb8] sm:$0xff]   ;;  %v4127_v19 = vld [vmem:[%s4713_s11 + $0xc0] sm:$0xff]  }
  0x85   : > { %1704 = vmatpush1.bf16.msra.mxu0 %v4112_v4  ;;  %1993 = vmatpush1.bf16.msra.mxu1 %v4113_v5  ;;  %v4144_v20 = vld [vmem:[%s4715_s12 + $0x4] ss:$16 sps:$4 sm:$0xff]   ;;  %v4128_v21 = vld [vmem:[%s4713_s11 + $0x48] sm:$0xff]   ;;  %v4132_v26 = vld [vmem:[%s4713_s11 + $0x58] sm:$0xff]  }
  0x86   : > { %1705 = vmatprep.subr.bf16.mxu0 %v4377_v2  ;;  %1994 = vmatprep.subr.bf16.mxu1 %v4377_v2  ;;  %v4147_v22 = vld [vmem:[%s4715_s12 + $0xc] ss:$16 sps:$4 sm:$0xff]   ;;  %v4130_v24 = vld [vmem:[%s4713_s11 + $0x50] sm:$0xff]   ;;  %v4134_v28 = vld [vmem:[%s4713_s11 + $0x60] sm:$0xff]  }
  0x87   : > { %v4129_v23 = vld [vmem:[%s4713_s11 + $0xc8] sm:$0xff]   ;;  %1733 = vmatprep.mubr.bf16.mxu0 %v4144_v20  ;;  %2022 = vmatprep.mubr.bf16.mxu1 %v4147_v22  ;;  %v4131_v25 = vld [vmem:[%s4713_s11 + $0xd0] sm:$0xff]   ;;  %v4133_v27 = vld [vmem:[%s4713_s11 + $0xd8] sm:$0xff]  }
  0x88   : > { %v4135_v29 = vld [vmem:[%s4713_s11 + $0xe0] sm:$0xff]   ;;  %v4136_v30 = vld [vmem:[%s4713_s11 + $0x68] sm:$0xff]   ;;  %v4138_v32 = vld [vmem:[%s4713_s11 + $0x70] sm:$0xff]  }
  0x89   : > { %1706 = vmatpush1.bf16.msra.mxu0 %v4114_v6  ;;  %1995 = vmatpush1.bf16.msra.mxu1 %v4115_v7  ;;  %v4137_v31 = vld [vmem:[%s4713_s11 + $0xe8] sm:$0xff]   ;;  %v4139_v33 = vld [vmem:[%s4713_s11 + $0xf0] sm:$0xff]   ;;  %v4140_v34 = vld [vmem:[%s4713_s11 + $0x78] sm:$0xff]  }
  0x8a   : > { %1707 = vmatprep.subr.bf16.mxu0 %v4377_v2  ;;  %1996 = vmatprep.subr.bf16.mxu1 %v4377_v2  ;;  %v4141_v35 = vld [vmem:[%s4713_s11 + $0xf8] sm:$0xff]   ;;  %v4142_v36 = vld [vmem:[%s4715_s12] ss:$16 sps:$4 sm:$0xff]   ;;  %v4148_v38 = vld [vmem:[%s4715_s12 + $0x24] ss:$16 sps:$4 sm:$0xff]  }
  0x8b   : > { %v4145_v37 = vld [vmem:[%s4715_s12 + $0x8] ss:$16 sps:$4 sm:$0xff]   ;;  %v4150_v39 = vld [vmem:[%s4715_s12 + $0x2c] ss:$16 sps:$4 sm:$0xff]   ;;  %v4152_v40 = vld [vmem:[%s4715_s12 + $0x20] ss:$16 sps:$4 sm:$0xff]  }
  0x8c   : > { %v4153_v41 = vld [vmem:[%s4715_s12 + $0x28] ss:$16 sps:$4 sm:$0xff]   ;;  %v4154_v42 = vld [vmem:[%s4715_s12 + $0x44] ss:$16 sps:$4 sm:$0xff]   ;;  %v4156_v43 = vld [vmem:[%s4715_s12 + $0x4c] ss:$16 sps:$4 sm:$0xff]  }
  0x8d   : > { %1708 = vmatpush1.bf16.msra.mxu0 %v4116_v8  ;;  %1997 = vmatpush1.bf16.msra.mxu1 %v4117_v9  ;;  %v4158_v44 = vld [vmem:[%s4715_s12 + $0x40] ss:$16 sps:$4 sm:$0xff]   ;;  %v4159_v45 = vld [vmem:[%s4715_s12 + $0x48] ss:$16 sps:$4 sm:$0xff]   ;;  %v4160_v46 = vld [vmem:[%s4715_s12 + $0x64] ss:$16 sps:$4 sm:$0xff]  }
  0x8e   : > { %1709 = vmatprep.subr.bf16.mxu0 %v4377_v2  ;;  %1998 = vmatprep.subr.bf16.mxu1 %v4377_v2  ;;  %v4162_v47 = vld [vmem:[%s4715_s12 + $0x6c] ss:$16 sps:$4 sm:$0xff]   ;;  %v4164_v48 = vld [vmem:[%s4715_s12 + $0x60] ss:$16 sps:$4 sm:$0xff]   ;;  %v4165_v49 = vld [vmem:[%s4715_s12 + $0x68] ss:$16 sps:$4 sm:$0xff]  }
  0x8f   : > { %v4166_v50 = vld [vmem:[%s4715_s12 + $0x84] ss:$16 sps:$4 sm:$0xff]   ;;  %v4168_v51 = vld [vmem:[%s4715_s12 + $0x8c] ss:$16 sps:$4 sm:$0xff]   ;;  %v4170_v52 = vld [vmem:[%s4715_s12 + $0x80] ss:$16 sps:$4 sm:$0xff]  }
  0x90   : > { %v4171_v53 = vld [vmem:[%s4715_s12 + $0x88] ss:$16 sps:$4 sm:$0xff]   ;;  %v4172_v54 = vld [vmem:[%s4715_s12 + $0xa4] ss:$16 sps:$4 sm:$0xff]   ;;  %v4174_v55 = vld [vmem:[%s4715_s12 + $0xac] ss:$16 sps:$4 sm:$0xff]  }
  0x91   : > { %1710 = vmatpush1.bf16.msra.mxu0 %v4118_v10  ;;  %1999 = vmatpush1.bf16.msra.mxu1 %v4119_v11  ;;  %v4176_v56 = vld [vmem:[%s4715_s12 + $0xa0] ss:$16 sps:$4 sm:$0xff]   ;;  %v4177_v57 = vld [vmem:[%s4715_s12 + $0xa8] ss:$16 sps:$4 sm:$0xff]   ;;  %v4178_v58 = vld [vmem:[%s4715_s12 + $0xc4] ss:$16 sps:$4 sm:$0xff]  }
  0x92   : > { %1711 = vmatprep.subr.bf16.mxu0 %v4377_v2  ;;  %2000 = vmatprep.subr.bf16.mxu1 %v4377_v2  ;;  %v4180_v59 = vld [vmem:[%s4715_s12 + $0xcc] ss:$16 sps:$4 sm:$0xff]   ;;  %v4182_v60 = vld [vmem:[%s4715_s12 + $0xc0] ss:$16 sps:$4 sm:$0xff]   ;;  %v4183_v61 = vld [vmem:[%s4715_s12 + $0xc8] ss:$16 sps:$4 sm:$0xff]  }
  0x93   : > { %v4184_v62 = vld [vmem:[%s4715_s12 + $0xe4] ss:$16 sps:$4 sm:$0xff]   ;;  %v4186_v63 = vld [vmem:[%s4715_s12 + $0xec] ss:$16 sps:$4 sm:$0xff]   ;;  %v4188_v0 = vld [vmem:[%s4715_s12 + $0xe0] ss:$16 sps:$4 sm:$0xff]  }
  0x94   : > { %v4189_v1 = vld [vmem:[%s4715_s12 + $0xe8] ss:$16 sps:$4 sm:$0xff]   ;;  %v4192_v3 = vld [vmem:[%s4715_s12 + $0x10c] ss:$16 sps:$4 sm:$0xff]   ;;  %v4194_v4 = vld [vmem:[%s4715_s12 + $0x100] ss:$16 sps:$4 sm:$0xff]  }
  0x95   : > { %1712 = vmatpush1.bf16.msra.mxu0 %v4120_v12  ;;  %2001 = vmatpush1.bf16.msra.mxu1 %v4121_v13  ;;  %v4195_v5 = vld [vmem:[%s4715_s12 + $0x108] ss:$16 sps:$4 sm:$0xff]   ;;  %v4196_v6 = vld [vmem:[%s4715_s12 + $0x124] ss:$16 sps:$4 sm:$0xff]   ;;  %v4198_v7 = vld [vmem:[%s4715_s12 + $0x12c] ss:$16 sps:$4 sm:$0xff]  }
  0x96   : > { %1713 = vmatprep.subr.bf16.mxu0 %v4377_v2  ;;  %2002 = vmatprep.subr.bf16.mxu1 %v4377_v2  ;;  %v4200_v8 = vld [vmem:[%s4715_s12 + $0x120] ss:$16 sps:$4 sm:$0xff]   ;;  %v4201_v9 = vld [vmem:[%s4715_s12 + $0x128] ss:$16 sps:$4 sm:$0xff]   ;;  %v4202_v10 = vld [vmem:[%s4715_s12 + $0x144] ss:$16 sps:$4 sm:$0xff]  }
  0x97   : > { %v4204_v11 = vld [vmem:[%s4715_s12 + $0x14c] ss:$16 sps:$4 sm:$0xff]   ;;  %v4206_v12 = vld [vmem:[%s4715_s12 + $0x140] ss:$16 sps:$4 sm:$0xff]   ;;  %v4207_v13 = vld [vmem:[%s4715_s12 + $0x148] ss:$16 sps:$4 sm:$0xff]  }
  0x98   : > { %v4218_v20 = vld [vmem:[%s4715_s12 + $0x180] ss:$16 sps:$4 sm:$0xff]   ;;  %v4220_v22 = vld [vmem:[%s4715_s12 + $0x1a4] ss:$16 sps:$4 sm:$0xff]  }
  0x99   : > { %1714 = vmatpush1.bf16.msra.mxu0 %v4122_v14  ;;  %2003 = vmatpush1.bf16.msra.mxu1 %v4123_v15  ;;  %v4208_v14 = vld [vmem:[%s4715_s12 + $0x164] ss:$16 sps:$4 sm:$0xff]   ;;  %v4210_v15 = vld [vmem:[%s4715_s12 + $0x16c] ss:$16 sps:$4 sm:$0xff]  }
  0x9a   : > { %1715 = vmatprep.subr.bf16.mxu0 %v4377_v2  ;;  %2004 = vmatprep.subr.bf16.mxu1 %v4377_v2 }
  0x9d   : > { %1716 = vmatpush1.bf16.msra.mxu0 %v4124_v16  ;;  %2005 = vmatpush1.bf16.msra.mxu1 %v4125_v17  ;;  %v4212_v16 = vld [vmem:[%s4715_s12 + $0x160] ss:$16 sps:$4 sm:$0xff]   ;;  %v4213_v17 = vld [vmem:[%s4715_s12 + $0x168] ss:$16 sps:$4 sm:$0xff]  }
  0x9e   : > { %1717 = vmatprep.subr.bf16.mxu0 %v4377_v2  ;;  %2006 = vmatprep.subr.bf16.mxu1 %v4377_v2 }
  0xa1   : > { %1718 = vmatpush1.bf16.msra.mxu0 %v4126_v18  ;;  %2007 = vmatpush1.bf16.msra.mxu1 %v4127_v19  ;;  %v4214_v18 = vld [vmem:[%s4715_s12 + $0x184] ss:$16 sps:$4 sm:$0xff]   ;;  %v4216_v19 = vld [vmem:[%s4715_s12 + $0x18c] ss:$16 sps:$4 sm:$0xff]  }
  0xa2   : > { %1719 = vmatprep.subr.bf16.mxu0 %v4377_v2  ;;  %2008 = vmatprep.subr.bf16.mxu1 %v4377_v2 }
  0xa5   : > { %1720 = vmatpush1.bf16.msra.mxu0 %v4128_v21  ;;  %2009 = vmatpush1.bf16.msra.mxu1 %v4129_v23  ;;  %v4219_v21 = vld [vmem:[%s4715_s12 + $0x188] ss:$16 sps:$4 sm:$0xff]   ;;  %v4222_v23 = vld [vmem:[%s4715_s12 + $0x1ac] ss:$16 sps:$4 sm:$0xff]  }
  0xa6   : > { %1721 = vmatprep.subr.bf16.mxu0 %v4377_v2  ;;  %2010 = vmatprep.subr.bf16.mxu1 %v4377_v2 }
  0xa9   : > { %1722 = vmatpush1.bf16.msra.mxu0 %v4130_v24  ;;  %2011 = vmatpush1.bf16.msra.mxu1 %v4131_v25  ;;  %v4224_v24 = vld [vmem:[%s4715_s12 + $0x1a0] ss:$16 sps:$4 sm:$0xff]   ;;  %v4225_v25 = vld [vmem:[%s4715_s12 + $0x1a8] ss:$16 sps:$4 sm:$0xff]  }
  0xaa   : > { %1723 = vmatprep.subr.bf16.mxu0 %v4377_v2  ;;  %2012 = vmatprep.subr.bf16.mxu1 %v4377_v2 }
  0xad   : > { %1724 = vmatpush1.bf16.msra.mxu0 %v4132_v26  ;;  %2013 = vmatpush1.bf16.msra.mxu1 %v4133_v27  ;;  %v4226_v26 = vld [vmem:[%s4715_s12 + $0x1c4] ss:$16 sps:$4 sm:$0xff]   ;;  %v4228_v27 = vld [vmem:[%s4715_s12 + $0x1cc] ss:$16 sps:$4 sm:$0xff]  }
  0xae   : > { %1725 = vmatprep.subr.bf16.mxu0 %v4377_v2  ;;  %2014 = vmatprep.subr.bf16.mxu1 %v4377_v2 }
  0xb1   : > { %1726 = vmatpush1.bf16.msra.mxu0 %v4134_v28  ;;  %2015 = vmatpush1.bf16.msra.mxu1 %v4135_v29  ;;  %v4230_v28 = vld [vmem:[%s4715_s12 + $0x1c0] ss:$16 sps:$4 sm:$0xff]   ;;  %v4231_v29 = vld [vmem:[%s4715_s12 + $0x1c8] ss:$16 sps:$4 sm:$0xff]  }
  0xb2   : > { %1727 = vmatprep.subr.bf16.mxu0 %v4377_v2  ;;  %2016 = vmatprep.subr.bf16.mxu1 %v4377_v2 }
  0xb5   : > { %1728 = vmatpush1.bf16.msra.mxu0 %v4136_v30  ;;  %2017 = vmatpush1.bf16.msra.mxu1 %v4137_v31  ;;  %v4232_v30 = vld [vmem:[%s4715_s12 + $0x1e4] ss:$16 sps:$4 sm:$0xff]   ;;  %v4234_v31 = vld [vmem:[%s4715_s12 + $0x1ec] ss:$16 sps:$4 sm:$0xff]  }
  0xb6   : > { %1729 = vmatprep.subr.bf16.mxu0 %v4377_v2  ;;  %2018 = vmatprep.subr.bf16.mxu1 %v4377_v2 }
  0xb9   : > { %1730 = vmatpush1.bf16.msra.mxu0 %v4138_v32  ;;  %2019 = vmatpush1.bf16.msra.mxu1 %v4139_v33  ;;  %v4236_v32 = vld [vmem:[%s4715_s12 + $0x1e0] ss:$16 sps:$4 sm:$0xff]   ;;  %v4237_v33 = vld [vmem:[%s4715_s12 + $0x1e8] ss:$16 sps:$4 sm:$0xff]  }
  0xba   : > { %1731 = vmatprep.subr.bf16.mxu0 %v4377_v2  ;;  %2020 = vmatprep.subr.bf16.mxu1 %v4377_v2  ;;  %v4190_v2 = vld [vmem:[%s4715_s12 + $0x104] ss:$16 sps:$4 sm:$0xff]  }
  0xbd   : > { %1732 = vmatpush1.bf16.msra.mxu0 %v4140_v34  ;;  %2021 = vmatpush1.bf16.msra.mxu1 %v4141_v35  ;;  %v4238_v34 = vld [vmem:[%s4715_s12 + $0x204] ss:$16 sps:$4 sm:$0xff]   ;;  %v4240_v35 = vld [vmem:[%s4715_s12 + $0x20c] ss:$16 sps:$4 sm:$0xff]  }
  0xc0   : > { %1734 = vmatmul.mubr.bf16.vlgmr.msra.gmra.mrb[0].mxu0 %v4142_v36  ;;  %2023 = vmatmul.mubr.bf16.vlgmr.msra.gmra.mrb[0].mxu1 %v4145_v37  ;;  %v4242_v36 = vld [vmem:[%s4715_s12 + $0x200] ss:$16 sps:$4 sm:$0xff]   ;;  %v4243_v37 = vld [vmem:[%s4715_s12 + $0x208] ss:$16 sps:$4 sm:$0xff]  }
  0xc1   : > { %1741 = vmatprep.mubr.bf16.mxu0 %v4148_v38  ;;  %2030 = vmatprep.mubr.bf16.mxu1 %v4150_v39  ;;  %v4244_v38 = vld [vmem:[%s4715_s12 + $0x224] ss:$16 sps:$4 sm:$0xff]   ;;  %v4246_v39 = vld [vmem:[%s4715_s12 + $0x22c] ss:$16 sps:$4 sm:$0xff]  }
  0xc8   : > { %1742 = vmatmul.mubr.bf16.gmra.mrb[4].mxu0 %v4152_v40  ;;  %2031 = vmatmul.mubr.bf16.gmra.mrb[4].mxu1 %v4153_v41  ;;  %v4248_v40 = vld [vmem:[%s4715_s12 + $0x220] ss:$16 sps:$4 sm:$0xff]   ;;  %v4249_v41 = vld [vmem:[%s4715_s12 + $0x228] ss:$16 sps:$4 sm:$0xff]  }
  0xc9   : > { %1749 = vmatprep.mubr.bf16.mxu0 %v4154_v42  ;;  %2038 = vmatprep.mubr.bf16.mxu1 %v4156_v43  ;;  %v4250_v42 = vld [vmem:[%s4715_s12 + $0x244] ss:$16 sps:$4 sm:$0xff]   ;;  %v4252_v43 = vld [vmem:[%s4715_s12 + $0x24c] ss:$16 sps:$4 sm:$0xff]  }
  0xd0   : > { %1750 = vmatmul.mubr.bf16.gmra.mrb[8].mxu0 %v4158_v44  ;;  %2039 = vmatmul.mubr.bf16.gmra.mrb[8].mxu1 %v4159_v45  ;;  %v4254_v44 = vld [vmem:[%s4715_s12 + $0x240] ss:$16 sps:$4 sm:$0xff]   ;;  %v4255_v45 = vld [vmem:[%s4715_s12 + $0x248] ss:$16 sps:$4 sm:$0xff]  }
  0xd1   : > { %1757 = vmatprep.mubr.bf16.mxu0 %v4160_v46  ;;  %2046 = vmatprep.mubr.bf16.mxu1 %v4162_v47  ;;  %v4256_v46 = vld [vmem:[%s4715_s12 + $0x264] ss:$16 sps:$4 sm:$0xff]   ;;  %v4258_v47 = vld [vmem:[%s4715_s12 + $0x26c] ss:$16 sps:$4 sm:$0xff]  }
  0xd8   : > { %1758 = vmatmul.mubr.bf16.gmra.mrb[12].mxu0 %v4164_v48  ;;  %2047 = vmatmul.mubr.bf16.gmra.mrb[12].mxu1 %v4165_v49  ;;  %v4260_v48 = vld [vmem:[%s4715_s12 + $0x260] ss:$16 sps:$4 sm:$0xff]   ;;  %v4261_v49 = vld [vmem:[%s4715_s12 + $0x268] ss:$16 sps:$4 sm:$0xff]  }
  0xd9   : > { %1765 = vmatprep.mubr.bf16.mxu0 %v4166_v50  ;;  %2054 = vmatprep.mubr.bf16.mxu1 %v4168_v51  ;;  %v4262_v50 = vld [vmem:[%s4715_s12 + $0x284] ss:$16 sps:$4 sm:$0xff]   ;;  %v4264_v51 = vld [vmem:[%s4715_s12 + $0x28c] ss:$16 sps:$4 sm:$0xff]  }
  0xe0   : > { %1766 = vmatmul.mubr.bf16.gmra.mrb[16].mxu0 %v4170_v52  ;;  %2055 = vmatmul.mubr.bf16.gmra.mrb[16].mxu1 %v4171_v53  ;;  %v4266_v52 = vld [vmem:[%s4715_s12 + $0x280] ss:$16 sps:$4 sm:$0xff]   ;;  %v4267_v53 = vld [vmem:[%s4715_s12 + $0x288] ss:$16 sps:$4 sm:$0xff]  }
  0xe1   : > { %1773 = vmatprep.mubr.bf16.mxu0 %v4172_v54  ;;  %2062 = vmatprep.mubr.bf16.mxu1 %v4174_v55  ;;  %v4268_v54 = vld [vmem:[%s4715_s12 + $0x2a4] ss:$16 sps:$4 sm:$0xff]   ;;  %v4270_v55 = vld [vmem:[%s4715_s12 + $0x2ac] ss:$16 sps:$4 sm:$0xff]  }
  0xe8   : > { %1774 = vmatmul.mubr.bf16.gmra.mrb[20].mxu0 %v4176_v56  ;;  %2063 = vmatmul.mubr.bf16.gmra.mrb[20].mxu1 %v4177_v57  ;;  %v4272_v56 = vld [vmem:[%s4715_s12 + $0x2a0] ss:$16 sps:$4 sm:$0xff]   ;;  %v4273_v57 = vld [vmem:[%s4715_s12 + $0x2a8] ss:$16 sps:$4 sm:$0xff]  }
  0xe9   : > { %1781 = vmatprep.mubr.bf16.mxu0 %v4178_v58  ;;  %2070 = vmatprep.mubr.bf16.mxu1 %v4180_v59  ;;  %v4274_v58 = vld [vmem:[%s4715_s12 + $0x2c4] ss:$16 sps:$4 sm:$0xff]   ;;  %v4276_v59 = vld [vmem:[%s4715_s12 + $0x2cc] ss:$16 sps:$4 sm:$0xff]  }
  0xf0   : > { %1782 = vmatmul.mubr.bf16.gmra.mrb[24].mxu0 %v4182_v60  ;;  %2071 = vmatmul.mubr.bf16.gmra.mrb[24].mxu1 %v4183_v61  ;;  %v4278_v60 = vld [vmem:[%s4715_s12 + $0x2c0] ss:$16 sps:$4 sm:$0xff]   ;;  %v4279_v61 = vld [vmem:[%s4715_s12 + $0x2c8] ss:$16 sps:$4 sm:$0xff]  }
  0xf1   : > { %1789 = vmatprep.mubr.bf16.mxu0 %v4184_v62  ;;  %2078 = vmatprep.mubr.bf16.mxu1 %v4186_v63  ;;  %v4280_v62 = vld [vmem:[%s4715_s12 + $0x2e4] ss:$16 sps:$4 sm:$0xff]   ;;  %v4282_v63 = vld [vmem:[%s4715_s12 + $0x2ec] ss:$16 sps:$4 sm:$0xff]  }
  0xf8   : > { %1790 = vmatmul.mubr.bf16.gmra.mrb[28].mxu0 %v4188_v0  ;;  %2079 = vmatmul.mubr.bf16.gmra.mrb[28].mxu1 %v4189_v1  ;;  %v4284_v0 = vld [vmem:[%s4715_s12 + $0x2e0] ss:$16 sps:$4 sm:$0xff]   ;;  %v4285_v1 = vld [vmem:[%s4715_s12 + $0x2e8] ss:$16 sps:$4 sm:$0xff]  }
  0xf9   : > { %1797 = vmatprep.mubr.bf16.mxu0 %v4190_v2  ;;  %2086 = vmatprep.mubr.bf16.mxu1 %v4192_v3  ;;  %v4286_v2 = vld [vmem:[%s4715_s12 + $0x304] ss:$16 sps:$4 sm:$0xff]   ;;  %v4288_v3 = vld [vmem:[%s4715_s12 + $0x30c] ss:$16 sps:$4 sm:$0xff]  }
 0x100   : > { %1798 = vmatmul.mubr.bf16.gmra.mrb[32].mxu0 %v4194_v4  ;;  %2087 = vmatmul.mubr.bf16.gmra.mrb[32].mxu1 %v4195_v5  ;;  %v4290_v4 = vld [vmem:[%s4715_s12 + $0x300] ss:$16 sps:$4 sm:$0xff]   ;;  %v4291_v5 = vld [vmem:[%s4715_s12 + $0x308] ss:$16 sps:$4 sm:$0xff]  }
 0x101   : > { %1805 = vmatprep.mubr.bf16.mxu0 %v4196_v6  ;;  %2094 = vmatprep.mubr.bf16.mxu1 %v4198_v7  ;;  %v4292_v6 = vld [vmem:[%s4715_s12 + $0x324] ss:$16 sps:$4 sm:$0xff]   ;;  %v4294_v7 = vld [vmem:[%s4715_s12 + $0x32c] ss:$16 sps:$4 sm:$0xff]  }
 0x108   : > { %1806 = vmatmul.mubr.bf16.gmra.mrb[36].mxu0 %v4200_v8  ;;  %2095 = vmatmul.mubr.bf16.gmra.mrb[36].mxu1 %v4201_v9  ;;  %v4296_v8 = vld [vmem:[%s4715_s12 + $0x320] ss:$16 sps:$4 sm:$0xff]   ;;  %v4297_v9 = vld [vmem:[%s4715_s12 + $0x328] ss:$16 sps:$4 sm:$0xff]  }
 0x109   : > { %1813 = vmatprep.mubr.bf16.mxu0 %v4202_v10  ;;  %2102 = vmatprep.mubr.bf16.mxu1 %v4204_v11  ;;  %v4298_v10 = vld [vmem:[%s4715_s12 + $0x344] ss:$16 sps:$4 sm:$0xff]   ;;  %v4300_v11 = vld [vmem:[%s4715_s12 + $0x34c] ss:$16 sps:$4 sm:$0xff]  }
 0x110   : > { %1814 = vmatmul.mubr.bf16.gmra.mrb[40].mxu0 %v4206_v12  ;;  %2103 = vmatmul.mubr.bf16.gmra.mrb[40].mxu1 %v4207_v13  ;;  %v4302_v12 = vld [vmem:[%s4715_s12 + $0x340] ss:$16 sps:$4 sm:$0xff]   ;;  %v4303_v13 = vld [vmem:[%s4715_s12 + $0x348] ss:$16 sps:$4 sm:$0xff]  }
 0x111   : > { %1821 = vmatprep.mubr.bf16.mxu0 %v4208_v14  ;;  %2110 = vmatprep.mubr.bf16.mxu1 %v4210_v15  ;;  %v4304_v14 = vld [vmem:[%s4715_s12 + $0x364] ss:$16 sps:$4 sm:$0xff]   ;;  %v4306_v15 = vld [vmem:[%s4715_s12 + $0x36c] ss:$16 sps:$4 sm:$0xff]  }
 0x118   : > { %1822 = vmatmul.mubr.bf16.gmra.mrb[44].mxu0 %v4212_v16  ;;  %2111 = vmatmul.mubr.bf16.gmra.mrb[44].mxu1 %v4213_v17  ;;  %v613_v17 = vld [vmem:[#allocation2] sm:$0xff] }
 0x119   : > { %1829 = vmatprep.mubr.bf16.mxu0 %v4214_v18  ;;  %2118 = vmatprep.mubr.bf16.mxu1 %v4216_v19 }
 0x120   : > { %1830 = vmatmul.mubr.bf16.gmra.mrb[48].mxu0 %v4218_v20  ;;  %2119 = vmatmul.mubr.bf16.gmra.mrb[48].mxu1 %v4219_v21  ;;  %v4308_v20 = vld [vmem:[%s4715_s12 + $0x360] ss:$16 sps:$4 sm:$0xff]  }
 0x121   : > { %1837 = vmatprep.mubr.bf16.mxu0 %v4220_v22  ;;  %2126 = vmatprep.mubr.bf16.mxu1 %v4222_v23 }
 0x128   : > { %1838 = vmatmul.mubr.bf16.gmra.mrb[52].mxu0 %v4224_v24  ;;  %2127 = vmatmul.mubr.bf16.gmra.mrb[52].mxu1 %v4225_v25  ;;  %v4309_v24 = vld [vmem:[%s4715_s12 + $0x368] ss:$16 sps:$4 sm:$0xff]   ;;  %v4310_v25 = vld [vmem:[%s4715_s12 + $0x384] ss:$16 sps:$4 sm:$0xff]  }
 0x129   : > { %1845 = vmatprep.mubr.bf16.mxu0 %v4226_v26  ;;  %2134 = vmatprep.mubr.bf16.mxu1 %v4228_v27  ;;  %v614_v26 = vld [vmem:[#allocation2 + $0x8] sm:$0xff] }
 0x130   : > { %1846 = vmatmul.mubr.bf16.gmra.mrb[56].mxu0 %v4230_v28  ;;  %2135 = vmatmul.mubr.bf16.gmra.mrb[56].mxu1 %v4231_v29  ;;  %v4312_v29 = vld [vmem:[%s4715_s12 + $0x38c] ss:$16 sps:$4 sm:$0xff]  }
 0x131   : > { %1853 = vmatprep.mubr.bf16.mxu0 %v4232_v30  ;;  %2142 = vmatprep.mubr.bf16.mxu1 %v4234_v31 }
 0x138   : > { %1854 = vmatmul.mubr.bf16.gmra.mrb[60].mxu0 %v4236_v32  ;;  %2143 = vmatmul.mubr.bf16.gmra.mrb[60].mxu1 %v4237_v33 }
 0x139   : > { %1861 = vmatprep.mubr.bf16.mxu0 %v4238_v34  ;;  %2150 = vmatprep.mubr.bf16.mxu1 %v4240_v35  ;;  %v615_v35 = vld [vmem:[#allocation2 + $0x10] sm:$0xff] }
 0x140   : > { %1862 = vmatmul.mubr.bf16.gmra.mrb[64].mxu0 %v4242_v36  ;;  %2151 = vmatmul.mubr.bf16.gmra.mrb[64].mxu1 %v4243_v37 }
 0x141   : > { %1869 = vmatprep.mubr.bf16.mxu0 %v4244_v38  ;;  %2158 = vmatprep.mubr.bf16.mxu1 %v4246_v39  ;;  %v4314_v38 = vld [vmem:[%s4715_s12 + $0x380] ss:$16 sps:$4 sm:$0xff]  }
 0x148   : > { %1870 = vmatmul.mubr.bf16.gmra.mrb[68].mxu0 %v4248_v40  ;;  %2159 = vmatmul.mubr.bf16.gmra.mrb[68].mxu1 %v4249_v41 }
 0x149   : > { %1877 = vmatprep.mubr.bf16.mxu0 %v4250_v42  ;;  %2166 = vmatprep.mubr.bf16.mxu1 %v4252_v43  ;;  %v4315_v42 = vld [vmem:[%s4715_s12 + $0x388] ss:$16 sps:$4 sm:$0xff]   ;;  %v4316_v43 = vld [vmem:[%s4715_s12 + $0x3a4] ss:$16 sps:$4 sm:$0xff]  }
 0x150   : > { %1878 = vmatmul.mubr.bf16.gmra.mrb[72].mxu0 %v4254_v44  ;;  %2167 = vmatmul.mubr.bf16.gmra.mrb[72].mxu1 %v4255_v45  ;;  %v616_v44 = vld [vmem:[#allocation2 + $0x18] sm:$0xff] }
 0x151   : > { %1885 = vmatprep.mubr.bf16.mxu0 %v4256_v46  ;;  %2174 = vmatprep.mubr.bf16.mxu1 %v4258_v47  ;;  %v4318_v47 = vld [vmem:[%s4715_s12 + $0x3ac] ss:$16 sps:$4 sm:$0xff]  }
 0x158   : > { %1886 = vmatmul.mubr.bf16.gmra.mrb[76].mxu0 %v4260_v48  ;;  %2175 = vmatmul.mubr.bf16.gmra.mrb[76].mxu1 %v4261_v49 }
 0x159   : > { %1893 = vmatprep.mubr.bf16.mxu0 %v4262_v50  ;;  %2182 = vmatprep.mubr.bf16.mxu1 %v4264_v51 }
 0x160   : > { %1894 = vmatmul.mubr.bf16.gmra.mrb[80].mxu0 %v4266_v52  ;;  %2183 = vmatmul.mubr.bf16.gmra.mrb[80].mxu1 %v4267_v53  ;;  %v617_v53 = vld [vmem:[#allocation2 + $0x20] sm:$0xff] }
 0x161   : > { %1901 = vmatprep.mubr.bf16.mxu0 %v4268_v54  ;;  %2190 = vmatprep.mubr.bf16.mxu1 %v4270_v55 }
 0x168   : > { %1902 = vmatmul.mubr.bf16.gmra.mrb[84].mxu0 %v4272_v56  ;;  %2191 = vmatmul.mubr.bf16.gmra.mrb[84].mxu1 %v4273_v57  ;;  %v4320_v56 = vld [vmem:[%s4715_s12 + $0x3a0] ss:$16 sps:$4 sm:$0xff]  }
 0x169   : > { %1909 = vmatprep.mubr.bf16.mxu0 %v4274_v58  ;;  %2198 = vmatprep.mubr.bf16.mxu1 %v4276_v59 }
 0x170   : > { %1910 = vmatmul.mubr.bf16.gmra.mrb[88].mxu0 %v4278_v60  ;;  %2199 = vmatmul.mubr.bf16.gmra.mrb[88].mxu1 %v4279_v61  ;;  %v4321_v60 = vld [vmem:[%s4715_s12 + $0x3a8] ss:$16 sps:$4 sm:$0xff]   ;;  %v4322_v61 = vld [vmem:[%s4715_s12 + $0x3c4] ss:$16 sps:$4 sm:$0xff]  }
 0x171   : > { %1917 = vmatprep.mubr.bf16.mxu0 %v4280_v62  ;;  %2206 = vmatprep.mubr.bf16.mxu1 %v4282_v63  ;;  %v618_v62 = vld [vmem:[#allocation2 + $0x28] sm:$0xff] }
 0x178   : > { %1918 = vmatmul.mubr.bf16.gmra.mrb[92].mxu0 %v4284_v0  ;;  %2207 = vmatmul.mubr.bf16.gmra.mrb[92].mxu1 %v4285_v1  ;;  %v4324_v1 = vld [vmem:[%s4715_s12 + $0x3cc] ss:$16 sps:$4 sm:$0xff]  }
 0x179   : > { %1925 = vmatprep.mubr.bf16.mxu0 %v4286_v2  ;;  %2214 = vmatprep.mubr.bf16.mxu1 %v4288_v3 }
 0x180   : > { %1926 = vmatmul.mubr.bf16.gmra.mrb[96].mxu0 %v4290_v4  ;;  %2215 = vmatmul.mubr.bf16.gmra.mrb[96].mxu1 %v4291_v5 }
 0x181   : > { %1933 = vmatprep.mubr.bf16.mxu0 %v4292_v6  ;;  %2222 = vmatprep.mubr.bf16.mxu1 %v4294_v7  ;;  %v619_v7 = vld [vmem:[#allocation2 + $0x30] sm:$0xff] }
 0x188   : > { %1934 = vmatmul.mubr.bf16.gmra.mrb[100].mxu0 %v4296_v8  ;;  %2223 = vmatmul.mubr.bf16.gmra.mrb[100].mxu1 %v4297_v9 }
 0x189   : > { %1941 = vmatprep.mubr.bf16.mxu0 %v4298_v10  ;;  %2230 = vmatprep.mubr.bf16.mxu1 %v4300_v11  ;;  %v4326_v10 = vld [vmem:[%s4715_s12 + $0x3c0] ss:$16 sps:$4 sm:$0xff]  }
 0x190   : > { %1942 = vmatmul.mubr.bf16.gmra.mrb[104].mxu0 %v4302_v12  ;;  %2231 = vmatmul.mubr.bf16.gmra.mrb[104].mxu1 %v4303_v13 }
 0x191   : > { %1949 = vmatprep.mubr.bf16.mxu0 %v4304_v14  ;;  %2238 = vmatprep.mubr.bf16.mxu1 %v4306_v15  ;;  %v4327_v14 = vld [vmem:[%s4715_s12 + $0x3c8] ss:$16 sps:$4 sm:$0xff]   ;;  %v4328_v15 = vld [vmem:[%s4715_s12 + $0x3e4] ss:$16 sps:$4 sm:$0xff]  }
 0x193   : > { %v1735_v16 = vpop.f32.mrb[0].mxu0  ;;  %v2024_v18 = vpop.f32.mrb[0].mxu1 }
 0x194   : > { %v1737_v19 = vpop.f32.mrb[1].mxu0  ;;  %v2025_v21 = vadd.f32 %v2024_v18, %v1735_v16  ;;  %v2026_v22 = vpop.f32.mrb[1].mxu1  ;;  %v620_v16 = vld [vmem:[#allocation2 + $0x38] sm:$0xff] }
 0x195   : > { %v1738_v23 = vpop.f32.mrb[2].mxu0  ;;  %v2027_v27 = vpop.f32.mrb[2].mxu1  ;;  %v4330_v19 = vld [vmem:[%s4715_s12 + $0x3ec] ss:$16 sps:$4 sm:$0xff]  }
 0x196   : > { %v1740_v28 = vpop.f32.mrb[3].mxu0  ;;  %v2279_v30 = vadd.f32 %v2025_v21, %v613_v17  ;;  %v2028_v31 = vadd.f32 %v2027_v27, %v1738_v23  ;;  %v2029_v32 = vpop.f32.mrb[3].mxu1 }
 0x197   : > { %v4332_v28 = vld [vmem:[%s4715_s12 + $0x3e0] ss:$16 sps:$4 sm:$0xff]   ;;  %v4333_v32 = vld [vmem:[%s4715_s12 + $0x3e8] ss:$16 sps:$4 sm:$0xff]  }
 0x198   : > { %1950 = vmatmul.mubr.bf16.gmra.mrb[108].mxu0 %v4308_v20  ;;  %2343 = vst [vmem:[#allocation2] sm:$0xff] %v2279_v30  ;;  %v2280_v33 = vadd.f32 %v2028_v31, %v614_v26  ;;  %2239 = vmatmul.mubr.bf16.gmra.mrb[108].mxu1 %v4309_v24 }
 0x199   : > { %1957 = vmatprep.mubr.bf16.mxu0 %v4310_v25  ;;  %2246 = vmatprep.mubr.bf16.mxu1 %v4312_v29  ;;  %v621_v25 = vld [vmem:[#allocation2 + $0x40] sm:$0xff] }
 0x19a   : > { %2344 = vst [vmem:[#allocation2 + $0x8] sm:$0xff] %v2280_v33  ;;  %v622_v33 = vld [vmem:[#allocation2 + $0x48] sm:$0xff] }
 0x19b   : > { %v1743_v34 = vpop.f32.mrb[4].mxu0  ;;  %v2032_v36 = vpop.f32.mrb[4].mxu1 }
 0x19c   : > { %v1745_v37 = vpop.f32.mrb[5].mxu0  ;;  %v2033_v39 = vadd.f32 %v2032_v36, %v1743_v34  ;;  %v2034_v40 = vpop.f32.mrb[5].mxu1 }
 0x19d   : > { %v1746_v41 = vpop.f32.mrb[6].mxu0  ;;  %v2035_v45 = vpop.f32.mrb[6].mxu1 }
 0x19e   : > { %v1748_v46 = vpop.f32.mrb[7].mxu0  ;;  %v2281_v48 = vadd.f32 %v2033_v39, %v615_v35  ;;  %v2036_v49 = vadd.f32 %v2035_v45, %v1746_v41  ;;  %v2037_v50 = vpop.f32.mrb[7].mxu1  ;;  %v623_v41 = vld [vmem:[#allocation2 + $0x50] sm:$0xff] }
 0x1a0   : > { %1958 = vmatmul.mubr.bf16.gmra.mrb[112].mxu0 %v4314_v38  ;;  %2345 = vst [vmem:[#allocation2 + $0x10] sm:$0xff] %v2281_v48  ;;  %v2282_v51 = vadd.f32 %v2036_v49, %v616_v44  ;;  %2247 = vmatmul.mubr.bf16.gmra.mrb[112].mxu1 %v4315_v42 }
 0x1a1   : > { %1965 = vmatprep.mubr.bf16.mxu0 %v4316_v43  ;;  %2254 = vmatprep.mubr.bf16.mxu1 %v4318_v47  ;;  %v624_v47 = vld [vmem:[#allocation2 + $0x58] sm:$0xff] }
 0x1a2   : > { %2346 = vst [vmem:[#allocation2 + $0x18] sm:$0xff] %v2282_v51 }
 0x1a3   : > { %v1751_v52 = vpop.f32.mrb[8].mxu0  ;;  %v2040_v54 = vpop.f32.mrb[8].mxu1 }
 0x1a4   : > { %v1753_v55 = vpop.f32.mrb[9].mxu0  ;;  %v2041_v57 = vadd.f32 %v2040_v54, %v1751_v52  ;;  %v2042_v58 = vpop.f32.mrb[9].mxu1 }
 0x1a5   : > { %v1754_v59 = vpop.f32.mrb[10].mxu0  ;;  %v2043_v63 = vpop.f32.mrb[10].mxu1  ;;  %v625_v55 = vld [vmem:[#allocation2 + $0x60] sm:$0xff] }
 0x1a6   : > { %v1756_v0 = vpop.f32.mrb[11].mxu0  ;;  %v2283_v2 = vadd.f32 %v2041_v57, %v617_v53  ;;  %v2044_v3 = vadd.f32 %v2043_v63, %v1754_v59  ;;  %v2045_v4 = vpop.f32.mrb[11].mxu1 }
 0x1a8   : > { %1966 = vmatmul.mubr.bf16.gmra.mrb[116].mxu0 %v4320_v56  ;;  %2347 = vst [vmem:[#allocation2 + $0x20] sm:$0xff] %v2283_v2  ;;  %v2284_v5 = vadd.f32 %v2044_v3, %v618_v62  ;;  %2255 = vmatmul.mubr.bf16.gmra.mrb[116].mxu1 %v4321_v60 }
 0x1a9   : > { %1973 = vmatprep.mubr.bf16.mxu0 %v4322_v61  ;;  %2262 = vmatprep.mubr.bf16.mxu1 %v4324_v1  ;;  %v626_v61 = vld [vmem:[#allocation2 + $0x68] sm:$0xff] }
 0x1aa   : > { %2348 = vst [vmem:[#allocation2 + $0x28] sm:$0xff] %v2284_v5  ;;  %v627_v5 = vld [vmem:[#allocation2 + $0x70] sm:$0xff] }
 0x1ab   : > { %v1759_v6 = vpop.f32.mrb[12].mxu0  ;;  %v2048_v8 = vpop.f32.mrb[12].mxu1 }
 0x1ac   : > { %v1761_v9 = vpop.f32.mrb[13].mxu0  ;;  %v2049_v11 = vadd.f32 %v2048_v8, %v1759_v6  ;;  %v2050_v12 = vpop.f32.mrb[13].mxu1 }
 0x1ad   : > { %v1762_v13 = vpop.f32.mrb[14].mxu0  ;;  %v2051_v17 = vpop.f32.mrb[14].mxu1 }
 0x1ae   : > { %v1764_v18 = vpop.f32.mrb[15].mxu0  ;;  %v2285_v20 = vadd.f32 %v2049_v11, %v619_v7  ;;  %v2052_v21 = vadd.f32 %v2051_v17, %v1762_v13  ;;  %v2053_v22 = vpop.f32.mrb[15].mxu1  ;;  %v628_v11 = vld [vmem:[#allocation2 + $0x78] sm:$0xff] }
 0x1b0   : > { %1974 = vmatmul.mubr.bf16.gmra.mrb[120].mxu0 %v4326_v10  ;;  %2349 = vst [vmem:[#allocation2 + $0x30] sm:$0xff] %v2285_v20  ;;  %v2286_v23 = vadd.f32 %v2052_v21, %v620_v16  ;;  %2263 = vmatmul.mubr.bf16.gmra.mrb[120].mxu1 %v4327_v14 }
 0x1b1   : > { %1981 = vmatprep.mubr.bf16.mxu0 %v4328_v15  ;;  %2270 = vmatprep.mubr.bf16.mxu1 %v4330_v19  ;;  %v629_v19 = vld [vmem:[#allocation2 + $0x80] sm:$0xff] }
 0x1b2   : > { %2350 = vst [vmem:[#allocation2 + $0x38] sm:$0xff] %v2286_v23 }
 0x1b3   : > { %v1767_v24 = vpop.f32.mrb[16].mxu0  ;;  %v2056_v26 = vpop.f32.mrb[16].mxu1 }
 0x1b4   : > { %v1769_v27 = vpop.f32.mrb[17].mxu0  ;;  %v2057_v29 = vadd.f32 %v2056_v26, %v1767_v24  ;;  %v2058_v30 = vpop.f32.mrb[17].mxu1 }
 0x1b5   : > { %v1770_v31 = vpop.f32.mrb[18].mxu0  ;;  %v2059_v34 = vpop.f32.mrb[18].mxu1 }
 0x1b6   : > { %v1772_v35 = vpop.f32.mrb[19].mxu0  ;;  %v2287_v36 = vadd.f32 %v2057_v29, %v621_v25  ;;  %v2060_v37 = vadd.f32 %v2059_v34, %v1770_v31  ;;  %v2061_v38 = vpop.f32.mrb[19].mxu1  ;;  %v630_v25 = vld [vmem:[#allocation2 + $0x88] sm:$0xff] }
 0x1b8   : > { %1982 = vmatmul.mubr.bf16.gmra.mrb[124].mxu0 %v4332_v28  ;;  %2351 = vst [vmem:[#allocation2 + $0x40] sm:$0xff] %v2287_v36  ;;  %v2288_v39 = vadd.f32 %v2060_v37, %v622_v33  ;;  %2271 = vmatmul.mubr.bf16.gmra.mrb[124].mxu1 %v4333_v32  ;;  %v631_v33 = vld [vmem:[#allocation2 + $0x90] sm:$0xff] }
 0x1ba   : > { %2352 = vst [vmem:[#allocation2 + $0x48] sm:$0xff] %v2288_v39  ;;  %v632_v39 = vld [vmem:[#allocation2 + $0x98] sm:$0xff] }
 0x1bb   : > { %v1775_v40 = vpop.f32.mrb[20].mxu0  ;;  %v2064_v42 = vpop.f32.mrb[20].mxu1 }
 0x1bc   : > { %v1777_v43 = vpop.f32.mrb[21].mxu0  ;;  %v2065_v44 = vadd.f32 %v2064_v42, %v1775_v40  ;;  %v2066_v45 = vpop.f32.mrb[21].mxu1 }
 0x1bd   : > { %v1778_v46 = vpop.f32.mrb[22].mxu0  ;;  %v2067_v48 = vpop.f32.mrb[22].mxu1 }
 0x1be   : > { %v1780_v49 = vpop.f32.mrb[23].mxu0  ;;  %v2289_v50 = vadd.f32 %v2065_v44, %v623_v41  ;;  %v2068_v51 = vadd.f32 %v2067_v48, %v1778_v46  ;;  %v2069_v52 = vpop.f32.mrb[23].mxu1 }
 0x1c0   : > { %2353 = vst [vmem:[#allocation2 + $0x50] sm:$0xff] %v2289_v50  ;;  %v2290_v53 = vadd.f32 %v2068_v51, %v624_v47  ;;  %v633_v47 = vld [vmem:[#allocation2 + $0xa0] sm:$0xff] }
 0x1c2   : > { %2354 = vst [vmem:[#allocation2 + $0x58] sm:$0xff] %v2290_v53  ;;  %v634_v53 = vld [vmem:[#allocation2 + $0xa8] sm:$0xff] }
 0x1c3   : > { %v1783_v54 = vpop.f32.mrb[24].mxu0  ;;  %v2072_v56 = vpop.f32.mrb[24].mxu1 }
 0x1c4   : > { %v1785_v57 = vpop.f32.mrb[25].mxu0  ;;  %v2073_v58 = vadd.f32 %v2072_v56, %v1783_v54  ;;  %v2074_v59 = vpop.f32.mrb[25].mxu1 }
 0x1c5   : > { %v1786_v60 = vpop.f32.mrb[26].mxu0  ;;  %v2075_v62 = vpop.f32.mrb[26].mxu1 }
 0x1c6   : > { %v1788_v63 = vpop.f32.mrb[27].mxu0  ;;  %v2291_v0 = vadd.f32 %v2073_v58, %v625_v55  ;;  %v2076_v1 = vadd.f32 %v2075_v62, %v1786_v60  ;;  %v2077_v2 = vpop.f32.mrb[27].mxu1 }
 0x1c8   : > { %2355 = vst [vmem:[#allocation2 + $0x60] sm:$0xff] %v2291_v0  ;;  %v2292_v3 = vadd.f32 %v2076_v1, %v626_v61  ;;  %v635_v61 = vld [vmem:[#allocation2 + $0xb0] sm:$0xff] }
 0x1ca   : > { %2356 = vst [vmem:[#allocation2 + $0x68] sm:$0xff] %v2292_v3  ;;  %v636_v3 = vld [vmem:[#allocation2 + $0xb8] sm:$0xff] }
 0x1cb   : > { %v1791_v4 = vpop.f32.mrb[28].mxu0  ;;  %v2080_v6 = vpop.f32.mrb[28].mxu1 }
 0x1cc   : > { %v1793_v7 = vpop.f32.mrb[29].mxu0  ;;  %v2081_v8 = vadd.f32 %v2080_v6, %v1791_v4  ;;  %v2082_v9 = vpop.f32.mrb[29].mxu1 }
 0x1cd   : > { %v1794_v10 = vpop.f32.mrb[30].mxu0  ;;  %v2083_v12 = vpop.f32.mrb[30].mxu1 }
 0x1ce   : > { %v1796_v13 = vpop.f32.mrb[31].mxu0  ;;  %v2293_v14 = vadd.f32 %v2081_v8, %v627_v5  ;;  %v2084_v15 = vadd.f32 %v2083_v12, %v1794_v10  ;;  %v2085_v16 = vpop.f32.mrb[31].mxu1 }
 0x1d0   : > { %2357 = vst [vmem:[#allocation2 + $0x70] sm:$0xff] %v2293_v14  ;;  %v2294_v17 = vadd.f32 %v2084_v15, %v628_v11  ;;  %v637_v11 = vld [vmem:[#allocation2 + $0xc0] sm:$0xff] }
 0x1d2   : > { %2358 = vst [vmem:[#allocation2 + $0x78] sm:$0xff] %v2294_v17  ;;  %v638_v17 = vld [vmem:[#allocation2 + $0xc8] sm:$0xff] }
 0x1d3   : > { %v1799_v18 = vpop.f32.mrb[32].mxu0  ;;  %v2088_v20 = vpop.f32.mrb[32].mxu1 }
 0x1d4   : > { %v1801_v21 = vpop.f32.mrb[33].mxu0  ;;  %v2089_v22 = vadd.f32 %v2088_v20, %v1799_v18  ;;  %v2090_v23 = vpop.f32.mrb[33].mxu1 }
 0x1d5   : > { %v1802_v24 = vpop.f32.mrb[34].mxu0  ;;  %v2091_v26 = vpop.f32.mrb[34].mxu1 }
 0x1d6   : > { %v1804_v27 = vpop.f32.mrb[35].mxu0  ;;  %v2295_v28 = vadd.f32 %v2089_v22, %v629_v19  ;;  %v2092_v29 = vadd.f32 %v2091_v26, %v1802_v24  ;;  %v2093_v30 = vpop.f32.mrb[35].mxu1 }
 0x1d8   : > { %2359 = vst [vmem:[#allocation2 + $0x80] sm:$0xff] %v2295_v28  ;;  %v2296_v31 = vadd.f32 %v2092_v29, %v630_v25  ;;  %v639_v25 = vld [vmem:[#allocation2 + $0xd0] sm:$0xff] }
 0x1da   : > { %2360 = vst [vmem:[#allocation2 + $0x88] sm:$0xff] %v2296_v31  ;;  %v640_v31 = vld [vmem:[#allocation2 + $0xd8] sm:$0xff] }
 0x1db   : > { %v1807_v32 = vpop.f32.mrb[36].mxu0  ;;  %v2096_v34 = vpop.f32.mrb[36].mxu1 }
 0x1dc   : > { %v1809_v35 = vpop.f32.mrb[37].mxu0  ;;  %v2097_v36 = vadd.f32 %v2096_v34, %v1807_v32  ;;  %v2098_v37 = vpop.f32.mrb[37].mxu1 }
 0x1dd   : > { %v1810_v38 = vpop.f32.mrb[38].mxu0  ;;  %v2099_v40 = vpop.f32.mrb[38].mxu1 }
 0x1de   : > { %v1812_v41 = vpop.f32.mrb[39].mxu0  ;;  %v2297_v42 = vadd.f32 %v2097_v36, %v631_v33  ;;  %v2100_v43 = vadd.f32 %v2099_v40, %v1810_v38  ;;  %v2101_v44 = vpop.f32.mrb[39].mxu1 }
 0x1e0   : > { %2361 = vst [vmem:[#allocation2 + $0x90] sm:$0xff] %v2297_v42  ;;  %v2298_v45 = vadd.f32 %v2100_v43, %v632_v39  ;;  %v641_v39 = vld [vmem:[#allocation2 + $0xe0] sm:$0xff] }
 0x1e2   : > { %2362 = vst [vmem:[#allocation2 + $0x98] sm:$0xff] %v2298_v45  ;;  %v642_v45 = vld [vmem:[#allocation2 + $0xe8] sm:$0xff] }
 0x1e3   : > { %v1815_v46 = vpop.f32.mrb[40].mxu0  ;;  %v2104_v48 = vpop.f32.mrb[40].mxu1 }
 0x1e4   : > { %v1817_v49 = vpop.f32.mrb[41].mxu0  ;;  %v2105_v50 = vadd.f32 %v2104_v48, %v1815_v46  ;;  %v2106_v51 = vpop.f32.mrb[41].mxu1 }
 0x1e5   : > { %v1818_v52 = vpop.f32.mrb[42].mxu0  ;;  %v2107_v54 = vpop.f32.mrb[42].mxu1 }
 0x1e6   : > { %v1820_v55 = vpop.f32.mrb[43].mxu0  ;;  %v2299_v56 = vadd.f32 %v2105_v50, %v633_v47  ;;  %v2108_v57 = vadd.f32 %v2107_v54, %v1818_v52  ;;  %v2109_v58 = vpop.f32.mrb[43].mxu1 }
 0x1e8   : > { %2363 = vst [vmem:[#allocation2 + $0xa0] sm:$0xff] %v2299_v56  ;;  %v2300_v59 = vadd.f32 %v2108_v57, %v634_v53  ;;  %v643_v53 = vld [vmem:[#allocation2 + $0xf0] sm:$0xff] }
 0x1ea   : > { %2364 = vst [vmem:[#allocation2 + $0xa8] sm:$0xff] %v2300_v59  ;;  %v644_v59 = vld [vmem:[#allocation2 + $0xf8] sm:$0xff] }
 0x1eb   : > { %v1823_v60 = vpop.f32.mrb[44].mxu0  ;;  %v2112_v62 = vpop.f32.mrb[44].mxu1 }
 0x1ec   : > { %v1825_v63 = vpop.f32.mrb[45].mxu0  ;;  %v2113_v0 = vadd.f32 %v2112_v62, %v1823_v60  ;;  %v2114_v1 = vpop.f32.mrb[45].mxu1 }
 0x1ed   : > { %v1826_v2 = vpop.f32.mrb[46].mxu0  ;;  %v2115_v4 = vpop.f32.mrb[46].mxu1 }
 0x1ee   : > { %v1828_v5 = vpop.f32.mrb[47].mxu0  ;;  %v2301_v6 = vadd.f32 %v2113_v0, %v635_v61  ;;  %v2116_v7 = vadd.f32 %v2115_v4, %v1826_v2  ;;  %v2117_v8 = vpop.f32.mrb[47].mxu1 }
 0x1f0   : > { %2365 = vst [vmem:[#allocation2 + $0xb0] sm:$0xff] %v2301_v6  ;;  %v2302_v9 = vadd.f32 %v2116_v7, %v636_v3  ;;  %v645_v3 = vld [vmem:[#allocation2 + $0x100] sm:$0xff] }
 0x1f2   : > { %2366 = vst [vmem:[#allocation2 + $0xb8] sm:$0xff] %v2302_v9  ;;  %v646_v9 = vld [vmem:[#allocation2 + $0x108] sm:$0xff] }
 0x1f3   : > { %v1831_v10 = vpop.f32.mrb[48].mxu0  ;;  %v2120_v12 = vpop.f32.mrb[48].mxu1 }
 0x1f4   : > { %v1833_v13 = vpop.f32.mrb[49].mxu0  ;;  %v2121_v14 = vadd.f32 %v2120_v12, %v1831_v10  ;;  %v2122_v15 = vpop.f32.mrb[49].mxu1 }
 0x1f5   : > { %v1834_v16 = vpop.f32.mrb[50].mxu0  ;;  %v2123_v18 = vpop.f32.mrb[50].mxu1 }
 0x1f6   : > { %v1836_v19 = vpop.f32.mrb[51].mxu0  ;;  %v2303_v20 = vadd.f32 %v2121_v14, %v637_v11  ;;  %v2124_v21 = vadd.f32 %v2123_v18, %v1834_v16  ;;  %v2125_v22 = vpop.f32.mrb[51].mxu1 }
 0x1f8   : > { %2367 = vst [vmem:[#allocation2 + $0xc0] sm:$0xff] %v2303_v20  ;;  %v2304_v23 = vadd.f32 %v2124_v21, %v638_v17  ;;  %v647_v17 = vld [vmem:[#allocation2 + $0x110] sm:$0xff] }
 0x1fa   : > { %2368 = vst [vmem:[#allocation2 + $0xc8] sm:$0xff] %v2304_v23  ;;  %v648_v23 = vld [vmem:[#allocation2 + $0x118] sm:$0xff] }
 0x1fb   : > { %v1839_v24 = vpop.f32.mrb[52].mxu0  ;;  %v2128_v26 = vpop.f32.mrb[52].mxu1 }
 0x1fc   : > { %v1841_v27 = vpop.f32.mrb[53].mxu0  ;;  %v2129_v28 = vadd.f32 %v2128_v26, %v1839_v24  ;;  %v2130_v29 = vpop.f32.mrb[53].mxu1 }
 0x1fd   : > { %v1842_v30 = vpop.f32.mrb[54].mxu0  ;;  %v2131_v32 = vpop.f32.mrb[54].mxu1 }
 0x1fe   : > { %v1844_v33 = vpop.f32.mrb[55].mxu0  ;;  %v2305_v34 = vadd.f32 %v2129_v28, %v639_v25  ;;  %v2132_v35 = vadd.f32 %v2131_v32, %v1842_v30  ;;  %v2133_v36 = vpop.f32.mrb[55].mxu1 }
 0x200   : > { %2369 = vst [vmem:[#allocation2 + $0xd0] sm:$0xff] %v2305_v34  ;;  %v2306_v37 = vadd.f32 %v2132_v35, %v640_v31  ;;  %v649_v31 = vld [vmem:[#allocation2 + $0x120] sm:$0xff] }
 0x202   : > { %2370 = vst [vmem:[#allocation2 + $0xd8] sm:$0xff] %v2306_v37  ;;  %v650_v37 = vld [vmem:[#allocation2 + $0x128] sm:$0xff] }
 0x203   : > { %v1847_v38 = vpop.f32.mrb[56].mxu0  ;;  %v2136_v40 = vpop.f32.mrb[56].mxu1 }
 0x204   : > { %v1849_v41 = vpop.f32.mrb[57].mxu0  ;;  %v2137_v42 = vadd.f32 %v2136_v40, %v1847_v38  ;;  %v2138_v43 = vpop.f32.mrb[57].mxu1 }
 0x205   : > { %v1850_v44 = vpop.f32.mrb[58].mxu0  ;;  %v2139_v46 = vpop.f32.mrb[58].mxu1 }
 0x206   : > { %v1852_v47 = vpop.f32.mrb[59].mxu0  ;;  %v2307_v48 = vadd.f32 %v2137_v42, %v641_v39  ;;  %v2140_v49 = vadd.f32 %v2139_v46, %v1850_v44  ;;  %v2141_v50 = vpop.f32.mrb[59].mxu1 }
 0x208   : > { %2371 = vst [vmem:[#allocation2 + $0xe0] sm:$0xff] %v2307_v48  ;;  %v2308_v51 = vadd.f32 %v2140_v49, %v642_v45  ;;  %v651_v45 = vld [vmem:[#allocation2 + $0x130] sm:$0xff] }
 0x20a   : > { %2372 = vst [vmem:[#allocation2 + $0xe8] sm:$0xff] %v2308_v51  ;;  %v652_v51 = vld [vmem:[#allocation2 + $0x138] sm:$0xff] }
 0x20b   : > { %v1855_v52 = vpop.f32.mrb[60].mxu0  ;;  %v2144_v54 = vpop.f32.mrb[60].mxu1 }
 0x20c   : > { %v1857_v55 = vpop.f32.mrb[61].mxu0  ;;  %v2145_v56 = vadd.f32 %v2144_v54, %v1855_v52  ;;  %v2146_v57 = vpop.f32.mrb[61].mxu1 }
 0x20d   : > { %v1858_v58 = vpop.f32.mrb[62].mxu0  ;;  %v2147_v60 = vpop.f32.mrb[62].mxu1 }
 0x20e   : > { %v1860_v61 = vpop.f32.mrb[63].mxu0  ;;  %v2309_v62 = vadd.f32 %v2145_v56, %v643_v53  ;;  %v2148_v63 = vadd.f32 %v2147_v60, %v1858_v58  ;;  %v2149_v0 = vpop.f32.mrb[63].mxu1 }
 0x210   : > { %2373 = vst [vmem:[#allocation2 + $0xf0] sm:$0xff] %v2309_v62  ;;  %v2310_v1 = vadd.f32 %v2148_v63, %v644_v59  ;;  %v653_v59 = vld [vmem:[#allocation2 + $0x140] sm:$0xff] }
 0x212   : > { %2374 = vst [vmem:[#allocation2 + $0xf8] sm:$0xff] %v2310_v1  ;;  %v654_v1 = vld [vmem:[#allocation2 + $0x148] sm:$0xff] }
 0x213   : > { %v1863_v2 = vpop.f32.mrb[64].mxu0  ;;  %v2152_v4 = vpop.f32.mrb[64].mxu1 }
 0x214   : > { %v1865_v5 = vpop.f32.mrb[65].mxu0  ;;  %v2153_v6 = vadd.f32 %v2152_v4, %v1863_v2  ;;  %v2154_v7 = vpop.f32.mrb[65].mxu1 }
 0x215   : > { %v1866_v8 = vpop.f32.mrb[66].mxu0  ;;  %v2155_v10 = vpop.f32.mrb[66].mxu1 }
 0x216   : > { %v1868_v11 = vpop.f32.mrb[67].mxu0  ;;  %v2311_v12 = vadd.f32 %v2153_v6, %v645_v3  ;;  %v2156_v13 = vadd.f32 %v2155_v10, %v1866_v8  ;;  %v2157_v14 = vpop.f32.mrb[67].mxu1 }
 0x218   : > { %2375 = vst [vmem:[#allocation2 + $0x100] sm:$0xff] %v2311_v12  ;;  %v2312_v15 = vadd.f32 %v2156_v13, %v646_v9  ;;  %v655_v9 = vld [vmem:[#allocation2 + $0x150] sm:$0xff] }
 0x21a   : > { %2376 = vst [vmem:[#allocation2 + $0x108] sm:$0xff] %v2312_v15  ;;  %v656_v15 = vld [vmem:[#allocation2 + $0x158] sm:$0xff] }
 0x21b   : > { %v1871_v16 = vpop.f32.mrb[68].mxu0  ;;  %v2160_v18 = vpop.f32.mrb[68].mxu1 }
 0x21c   : > { %v1873_v19 = vpop.f32.mrb[69].mxu0  ;;  %v2161_v20 = vadd.f32 %v2160_v18, %v1871_v16  ;;  %v2162_v21 = vpop.f32.mrb[69].mxu1 }
 0x21d   : > { %v1874_v22 = vpop.f32.mrb[70].mxu0  ;;  %v2163_v24 = vpop.f32.mrb[70].mxu1 }
 0x21e   : > { %v1876_v25 = vpop.f32.mrb[71].mxu0  ;;  %v2313_v26 = vadd.f32 %v2161_v20, %v647_v17  ;;  %v2164_v27 = vadd.f32 %v2163_v24, %v1874_v22  ;;  %v2165_v28 = vpop.f32.mrb[71].mxu1 }
 0x220   : > { %2377 = vst [vmem:[#allocation2 + $0x110] sm:$0xff] %v2313_v26  ;;  %v2314_v29 = vadd.f32 %v2164_v27, %v648_v23  ;;  %v657_v23 = vld [vmem:[#allocation2 + $0x160] sm:$0xff] }
 0x222   : > { %2378 = vst [vmem:[#allocation2 + $0x118] sm:$0xff] %v2314_v29  ;;  %v658_v29 = vld [vmem:[#allocation2 + $0x168] sm:$0xff] }
 0x223   : > { %v1879_v30 = vpop.f32.mrb[72].mxu0  ;;  %v2168_v32 = vpop.f32.mrb[72].mxu1 }
 0x224   : > { %v1881_v33 = vpop.f32.mrb[73].mxu0  ;;  %v2169_v34 = vadd.f32 %v2168_v32, %v1879_v30  ;;  %v2170_v35 = vpop.f32.mrb[73].mxu1 }
 0x225   : > { %v1882_v36 = vpop.f32.mrb[74].mxu0  ;;  %v2171_v38 = vpop.f32.mrb[74].mxu1 }
 0x226   : > { %v1884_v39 = vpop.f32.mrb[75].mxu0  ;;  %v2315_v40 = vadd.f32 %v2169_v34, %v649_v31  ;;  %v2172_v41 = vadd.f32 %v2171_v38, %v1882_v36  ;;  %v2173_v42 = vpop.f32.mrb[75].mxu1 }
 0x228   : > { %2379 = vst [vmem:[#allocation2 + $0x120] sm:$0xff] %v2315_v40  ;;  %v2316_v43 = vadd.f32 %v2172_v41, %v650_v37  ;;  %v659_v37 = vld [vmem:[#allocation2 + $0x170] sm:$0xff] }
 0x22a   : > { %2380 = vst [vmem:[#allocation2 + $0x128] sm:$0xff] %v2316_v43  ;;  %v660_v43 = vld [vmem:[#allocation2 + $0x178] sm:$0xff] }
 0x22b   : > { %v1887_v44 = vpop.f32.mrb[76].mxu0  ;;  %v2176_v46 = vpop.f32.mrb[76].mxu1 }
 0x22c   : > { %v1889_v47 = vpop.f32.mrb[77].mxu0  ;;  %v2177_v48 = vadd.f32 %v2176_v46, %v1887_v44  ;;  %v2178_v49 = vpop.f32.mrb[77].mxu1 }
 0x22d   : > { %v1890_v50 = vpop.f32.mrb[78].mxu0  ;;  %v2179_v52 = vpop.f32.mrb[78].mxu1 }
 0x22e   : > { %v1892_v53 = vpop.f32.mrb[79].mxu0  ;;  %v2317_v54 = vadd.f32 %v2177_v48, %v651_v45  ;;  %v2180_v55 = vadd.f32 %v2179_v52, %v1890_v50  ;;  %v2181_v56 = vpop.f32.mrb[79].mxu1 }
 0x230   : > { %2381 = vst [vmem:[#allocation2 + $0x130] sm:$0xff] %v2317_v54  ;;  %v2318_v57 = vadd.f32 %v2180_v55, %v652_v51  ;;  %v661_v51 = vld [vmem:[#allocation2 + $0x180] sm:$0xff] }
 0x232   : > { %2382 = vst [vmem:[#allocation2 + $0x138] sm:$0xff] %v2318_v57  ;;  %v662_v57 = vld [vmem:[#allocation2 + $0x188] sm:$0xff] }
 0x233   : > { %v1895_v58 = vpop.f32.mrb[80].mxu0  ;;  %v2184_v60 = vpop.f32.mrb[80].mxu1 }
 0x234   : > { %v1897_v61 = vpop.f32.mrb[81].mxu0  ;;  %v2185_v62 = vadd.f32 %v2184_v60, %v1895_v58  ;;  %v2186_v63 = vpop.f32.mrb[81].mxu1 }
 0x235   : > { %v1898_v0 = vpop.f32.mrb[82].mxu0  ;;  %v2187_v2 = vpop.f32.mrb[82].mxu1 }
 0x236   : > { %v1900_v3 = vpop.f32.mrb[83].mxu0  ;;  %v2319_v4 = vadd.f32 %v2185_v62, %v653_v59  ;;  %v2188_v5 = vadd.f32 %v2187_v2, %v1898_v0  ;;  %v2189_v6 = vpop.f32.mrb[83].mxu1 }
 0x238   : > { %2383 = vst [vmem:[#allocation2 + $0x140] sm:$0xff] %v2319_v4  ;;  %v2320_v7 = vadd.f32 %v2188_v5, %v654_v1  ;;  %v663_v1 = vld [vmem:[#allocation2 + $0x190] sm:$0xff] }
 0x23a   : > { %2384 = vst [vmem:[#allocation2 + $0x148] sm:$0xff] %v2320_v7  ;;  %v664_v7 = vld [vmem:[#allocation2 + $0x198] sm:$0xff] }
 0x23b   : > { %v1903_v8 = vpop.f32.mrb[84].mxu0  ;;  %v2192_v10 = vpop.f32.mrb[84].mxu1 }
 0x23c   : > { %v1905_v11 = vpop.f32.mrb[85].mxu0  ;;  %v2193_v12 = vadd.f32 %v2192_v10, %v1903_v8  ;;  %v2194_v13 = vpop.f32.mrb[85].mxu1 }
 0x23d   : > { %v1906_v14 = vpop.f32.mrb[86].mxu0  ;;  %v2195_v16 = vpop.f32.mrb[86].mxu1 }
 0x23e   : > { %v1908_v17 = vpop.f32.mrb[87].mxu0  ;;  %v2321_v18 = vadd.f32 %v2193_v12, %v655_v9  ;;  %v2196_v19 = vadd.f32 %v2195_v16, %v1906_v14  ;;  %v2197_v20 = vpop.f32.mrb[87].mxu1 }
 0x240   : > { %2385 = vst [vmem:[#allocation2 + $0x150] sm:$0xff] %v2321_v18  ;;  %v2322_v21 = vadd.f32 %v2196_v19, %v656_v15  ;;  %v665_v15 = vld [vmem:[#allocation2 + $0x1a0] sm:$0xff] }
 0x242   : > { %2386 = vst [vmem:[#allocation2 + $0x158] sm:$0xff] %v2322_v21  ;;  %v666_v21 = vld [vmem:[#allocation2 + $0x1a8] sm:$0xff] }
 0x243   : > { %v1911_v22 = vpop.f32.mrb[88].mxu0  ;;  %v2200_v24 = vpop.f32.mrb[88].mxu1 }
 0x244   : > { %v1913_v25 = vpop.f32.mrb[89].mxu0  ;;  %v2201_v26 = vadd.f32 %v2200_v24, %v1911_v22  ;;  %v2202_v27 = vpop.f32.mrb[89].mxu1 }
 0x245   : > { %v1914_v28 = vpop.f32.mrb[90].mxu0  ;;  %v2203_v30 = vpop.f32.mrb[90].mxu1 }
 0x246   : > { %v1916_v31 = vpop.f32.mrb[91].mxu0  ;;  %v2323_v32 = vadd.f32 %v2201_v26, %v657_v23  ;;  %v2204_v33 = vadd.f32 %v2203_v30, %v1914_v28  ;;  %v2205_v34 = vpop.f32.mrb[91].mxu1 }
 0x248   : > { %2387 = vst [vmem:[#allocation2 + $0x160] sm:$0xff] %v2323_v32  ;;  %v2324_v35 = vadd.f32 %v2204_v33, %v658_v29  ;;  %v667_v29 = vld [vmem:[#allocation2 + $0x1b0] sm:$0xff] }
 0x24a   : > { %2388 = vst [vmem:[#allocation2 + $0x168] sm:$0xff] %v2324_v35  ;;  %v668_v35 = vld [vmem:[#allocation2 + $0x1b8] sm:$0xff] }
 0x24b   : > { %v1919_v36 = vpop.f32.mrb[92].mxu0  ;;  %v2208_v38 = vpop.f32.mrb[92].mxu1 }
 0x24c   : > { %v1921_v39 = vpop.f32.mrb[93].mxu0  ;;  %v2209_v40 = vadd.f32 %v2208_v38, %v1919_v36  ;;  %v2210_v41 = vpop.f32.mrb[93].mxu1 }
 0x24d   : > { %v1922_v42 = vpop.f32.mrb[94].mxu0  ;;  %v2211_v44 = vpop.f32.mrb[94].mxu1 }
 0x24e   : > { %v1924_v45 = vpop.f32.mrb[95].mxu0  ;;  %v2325_v46 = vadd.f32 %v2209_v40, %v659_v37  ;;  %v2212_v47 = vadd.f32 %v2211_v44, %v1922_v42  ;;  %v2213_v48 = vpop.f32.mrb[95].mxu1 }
 0x250   : > { %2389 = vst [vmem:[#allocation2 + $0x170] sm:$0xff] %v2325_v46  ;;  %v2326_v49 = vadd.f32 %v2212_v47, %v660_v43  ;;  %v669_v43 = vld [vmem:[#allocation2 + $0x1c0] sm:$0xff] }
 0x252   : > { %2390 = vst [vmem:[#allocation2 + $0x178] sm:$0xff] %v2326_v49  ;;  %v670_v49 = vld [vmem:[#allocation2 + $0x1c8] sm:$0xff] }
 0x253   : > { %v1927_v50 = vpop.f32.mrb[96].mxu0  ;;  %v2216_v52 = vpop.f32.mrb[96].mxu1 }
 0x254   : > { %v1929_v53 = vpop.f32.mrb[97].mxu0  ;;  %v2217_v54 = vadd.f32 %v2216_v52, %v1927_v50  ;;  %v2218_v55 = vpop.f32.mrb[97].mxu1 }
 0x255   : > { %v1930_v56 = vpop.f32.mrb[98].mxu0  ;;  %v2219_v58 = vpop.f32.mrb[98].mxu1 }
 0x256   : > { %v1932_v59 = vpop.f32.mrb[99].mxu0  ;;  %v2327_v60 = vadd.f32 %v2217_v54, %v661_v51  ;;  %v2220_v61 = vadd.f32 %v2219_v58, %v1930_v56  ;;  %v2221_v62 = vpop.f32.mrb[99].mxu1 }
 0x258   : > { %2391 = vst [vmem:[#allocation2 + $0x180] sm:$0xff] %v2327_v60  ;;  %v2328_v63 = vadd.f32 %v2220_v61, %v662_v57  ;;  %v671_v57 = vld [vmem:[#allocation2 + $0x1d0] sm:$0xff] }
 0x25a   : > { %2392 = vst [vmem:[#allocation2 + $0x188] sm:$0xff] %v2328_v63  ;;  %v672_v63 = vld [vmem:[#allocation2 + $0x1d8] sm:$0xff] }
 0x25b   : > { %v1935_v0 = vpop.f32.mrb[100].mxu0  ;;  %v2224_v2 = vpop.f32.mrb[100].mxu1 }
 0x25c   : > { %v1937_v3 = vpop.f32.mrb[101].mxu0  ;;  %v2225_v4 = vadd.f32 %v2224_v2, %v1935_v0  ;;  %v2226_v5 = vpop.f32.mrb[101].mxu1 }
 0x25d   : > { %v1938_v6 = vpop.f32.mrb[102].mxu0  ;;  %v2227_v8 = vpop.f32.mrb[102].mxu1 }
 0x25e   : > { %v1940_v9 = vpop.f32.mrb[103].mxu0  ;;  %v2329_v10 = vadd.f32 %v2225_v4, %v663_v1  ;;  %v2228_v11 = vadd.f32 %v2227_v8, %v1938_v6  ;;  %v2229_v12 = vpop.f32.mrb[103].mxu1 }
 0x260   : > { %2393 = vst [vmem:[#allocation2 + $0x190] sm:$0xff] %v2329_v10  ;;  %v2330_v13 = vadd.f32 %v2228_v11, %v664_v7  ;;  %v673_v7 = vld [vmem:[#allocation2 + $0x1e0] sm:$0xff] }
 0x262   : > { %2394 = vst [vmem:[#allocation2 + $0x198] sm:$0xff] %v2330_v13  ;;  %v674_v13 = vld [vmem:[#allocation2 + $0x1e8] sm:$0xff] }
 0x263   : > { %v1943_v14 = vpop.f32.mrb[104].mxu0  ;;  %v2232_v16 = vpop.f32.mrb[104].mxu1 }
 0x264   : > { %v1945_v17 = vpop.f32.mrb[105].mxu0  ;;  %v2233_v18 = vadd.f32 %v2232_v16, %v1943_v14  ;;  %v2234_v19 = vpop.f32.mrb[105].mxu1 }
 0x265   : > { %v1946_v20 = vpop.f32.mrb[106].mxu0  ;;  %v2235_v22 = vpop.f32.mrb[106].mxu1 }
 0x266   : > { %v1948_v23 = vpop.f32.mrb[107].mxu0  ;;  %v2331_v24 = vadd.f32 %v2233_v18, %v665_v15  ;;  %v2236_v25 = vadd.f32 %v2235_v22, %v1946_v20  ;;  %v2237_v26 = vpop.f32.mrb[107].mxu1 }
 0x268   : > { %2395 = vst [vmem:[#allocation2 + $0x1a0] sm:$0xff] %v2331_v24  ;;  %v2332_v27 = vadd.f32 %v2236_v25, %v666_v21  ;;  %v675_v21 = vld [vmem:[#allocation2 + $0x1f0] sm:$0xff] }
 0x26a   : > { %2396 = vst [vmem:[#allocation2 + $0x1a8] sm:$0xff] %v2332_v27  ;;  %v676_v27 = vld [vmem:[#allocation2 + $0x1f8] sm:$0xff] }
 0x26b   : > { %v1951_v28 = vpop.f32.mrb[108].mxu0  ;;  %v2240_v30 = vpop.f32.mrb[108].mxu1 }
 0x26c   : > { %v1953_v31 = vpop.f32.mrb[109].mxu0  ;;  %v2241_v32 = vadd.f32 %v2240_v30, %v1951_v28  ;;  %v2242_v33 = vpop.f32.mrb[109].mxu1 }
 0x26d   : > { %v1954_v34 = vpop.f32.mrb[110].mxu0  ;;  %v2243_v36 = vpop.f32.mrb[110].mxu1 }
 0x26e   : > { %v1956_v37 = vpop.f32.mrb[111].mxu0  ;;  %v2333_v38 = vadd.f32 %v2241_v32, %v667_v29  ;;  %v2244_v39 = vadd.f32 %v2243_v36, %v1954_v34  ;;  %v2245_v40 = vpop.f32.mrb[111].mxu1 }
 0x270   : > { %2397 = vst [vmem:[#allocation2 + $0x1b0] sm:$0xff] %v2333_v38  ;;  %v2334_v41 = vadd.f32 %v2244_v39, %v668_v35 }
 0x272   : > { %2398 = vst [vmem:[#allocation2 + $0x1b8] sm:$0xff] %v2334_v41 }
 0x273   : > { %v1959_v42 = vpop.f32.mrb[112].mxu0  ;;  %v2248_v44 = vpop.f32.mrb[112].mxu1 }
 0x274   : > { %v1961_v45 = vpop.f32.mrb[113].mxu0  ;;  %v2249_v46 = vadd.f32 %v2248_v44, %v1959_v42  ;;  %v2250_v47 = vpop.f32.mrb[113].mxu1 }
 0x275   : > { %v1962_v48 = vpop.f32.mrb[114].mxu0  ;;  %v2251_v50 = vpop.f32.mrb[114].mxu1 }
 0x276   : > { %v1964_v51 = vpop.f32.mrb[115].mxu0  ;;  %v2335_v52 = vadd.f32 %v2249_v46, %v669_v43  ;;  %v2252_v53 = vadd.f32 %v2251_v50, %v1962_v48  ;;  %v2253_v54 = vpop.f32.mrb[115].mxu1 }
 0x278   : > { %2399 = vst [vmem:[#allocation2 + $0x1c0] sm:$0xff] %v2335_v52  ;;  %v2336_v55 = vadd.f32 %v2252_v53, %v670_v49 }
 0x27a   : > { %2400 = vst [vmem:[#allocation2 + $0x1c8] sm:$0xff] %v2336_v55 }
 0x27b   : > { %v1967_v56 = vpop.f32.mrb[116].mxu0  ;;  %v2256_v58 = vpop.f32.mrb[116].mxu1 }
 0x27c   : > { %v1969_v59 = vpop.f32.mrb[117].mxu0  ;;  %v2257_v60 = vadd.f32 %v2256_v58, %v1967_v56  ;;  %v2258_v61 = vpop.f32.mrb[117].mxu1 }
 0x27d   : > { %v1970_v62 = vpop.f32.mrb[118].mxu0  ;;  %v2259_v0 = vpop.f32.mrb[118].mxu1 }
 0x27e   : > { %v1972_v1 = vpop.f32.mrb[119].mxu0  ;;  %v2337_v2 = vadd.f32 %v2257_v60, %v671_v57  ;;  %v2260_v3 = vadd.f32 %v2259_v0, %v1970_v62  ;;  %v2261_v4 = vpop.f32.mrb[119].mxu1 }
 0x280   : > { %2401 = vst [vmem:[#allocation2 + $0x1d0] sm:$0xff] %v2337_v2  ;;  %v2338_v5 = vadd.f32 %v2260_v3, %v672_v63 }
 0x282   : > { %2402 = vst [vmem:[#allocation2 + $0x1d8] sm:$0xff] %v2338_v5 }
 0x283   : > { %v1975_v6 = vpop.f32.mrb[120].mxu0  ;;  %v2264_v8 = vpop.f32.mrb[120].mxu1 }
 0x284   : > { %v1977_v9 = vpop.f32.mrb[121].mxu0  ;;  %v2265_v10 = vadd.f32 %v2264_v8, %v1975_v6  ;;  %v2266_v11 = vpop.f32.mrb[121].mxu1 }
 0x285   : > { %v1978_v12 = vpop.f32.mrb[122].mxu0  ;;  %v2267_v14 = vpop.f32.mrb[122].mxu1 }
 0x286   : > { %v1980_v15 = vpop.f32.mrb[123].mxu0  ;;  %v2339_v16 = vadd.f32 %v2265_v10, %v673_v7  ;;  %v2268_v17 = vadd.f32 %v2267_v14, %v1978_v12  ;;  %v2269_v18 = vpop.f32.mrb[123].mxu1 }
 0x288   : > { %2403 = vst [vmem:[#allocation2 + $0x1e0] sm:$0xff] %v2339_v16  ;;  %v2340_v19 = vadd.f32 %v2268_v17, %v674_v13 }
 0x28a   : > { %2404 = vst [vmem:[#allocation2 + $0x1e8] sm:$0xff] %v2340_v19 }
 0x28b   : > { %v1983_v20 = vpop.f32.mrb[124].mxu0  ;;  %v2272_v22 = vpop.f32.mrb[124].mxu1 }
 0x28c   : > { %v1985_v23 = vpop.f32.mrb[125].mxu0  ;;  %v2273_v24 = vadd.f32 %v2272_v22, %v1983_v20  ;;  %v2274_v25 = vpop.f32.mrb[125].mxu1  ;;  %2410 = sbr.rel (%p3742_p11) target bundleno = 943 (0x3af), region = 67 }
 0x28d   : > { %v1986_v26 = vpop.f32.mrb[126].mxu0  ;;  %v2275_v28 = vpop.f32.mrb[126].mxu1 }
 0x28e   : > { %v1988_v29 = vpop.f32.mrb[127].mxu0  ;;  %v2341_v30 = vadd.f32 %v2273_v24, %v675_v21  ;;  %v2276_v31 = vadd.f32 %v2275_v28, %v1986_v26  ;;  %v2277_v32 = vpop.f32.mrb[127].mxu1 }
 0x290   : > { %2405 = vst [vmem:[#allocation2 + $0x1f0] sm:$0xff] %v2341_v30  ;;  %v2342_v33 = vadd.f32 %v2276_v31, %v676_v27 }
 0x292   : > { %2406 = vst [vmem:[#allocation2 + $0x1f8] sm:$0xff] %v2342_v33 }
 0x293   : > { %v4975_v34 = vld [vmem:[#allocation2] sm:$0xff]  ;;  %v4977_v35 = vld [vmem:[#allocation2 + $0x8] sm:$0xff]  ;;  %v4979_v36 = vld [vmem:[#allocation2 + $0x10] sm:$0xff] }
 0x294   : > { %v4981_v37 = vld [vmem:[#allocation2 + $0x18] sm:$0xff]  ;;  %v2475_v38 = vadd.f32 %v4977_v35, %v4975_v34  ;;  %v2544_v39 = vmul.f32 %v4975_v34, %v4975_v34  ;;  %v2545_v40 = vmul.f32 %v4977_v35, %v4977_v35  ;;  %v2546_v41 = vmul.f32 %v4979_v36, %v4979_v36  ;;  %v4991_v42 = vld [vmem:[#allocation2 + $0x20] sm:$0xff]  ;;  %v4996_v46 = vld [vmem:[#allocation2 + $0x28] sm:$0xff] }
 0x295   : > { %v2547_v44 = vmul.f32 %v4981_v37, %v4981_v37  ;;  %v2548_v48 = vmul.f32 %v4991_v42, %v4991_v42  ;;  %v5001_v50 = vld [vmem:[#allocation2 + $0x30] sm:$0xff]  ;;  %v2549_v52 = vmul.f32 %v4996_v46, %v4996_v46  ;;  %v5006_v54 = vld [vmem:[#allocation2 + $0x38] sm:$0xff]  ;;  %v5011_v58 = vld [vmem:[#allocation2 + $0x40] sm:$0xff] }
 0x296   : > { %v2476_v43 = vadd.f32 %v2475_v38, %v4979_v36  ;;  %v2608_v45 = vadd.f32 %v2545_v40, %v2544_v39  ;;  %v2550_v56 = vmul.f32 %v5001_v50, %v5001_v50  ;;  %v2551_v60 = vmul.f32 %v5006_v54, %v5006_v54  ;;  %v5016_v62 = vld [vmem:[#allocation2 + $0x48] sm:$0xff]  ;;  %v5021_v2 = vld [vmem:[#allocation2 + $0x50] sm:$0xff]  ;;  %v5026_v6 = vld [vmem:[#allocation2 + $0x58] sm:$0xff] }
 0x297   : > { %v2552_v0 = vmul.f32 %v5011_v58, %v5011_v58  ;;  %v2553_v4 = vmul.f32 %v5016_v62, %v5016_v62  ;;  %v2554_v8 = vmul.f32 %v5021_v2, %v5021_v2  ;;  %v5031_v10 = vld [vmem:[#allocation2 + $0x60] sm:$0xff]  ;;  %v2555_v12 = vmul.f32 %v5026_v6, %v5026_v6  ;;  %v5036_v14 = vld [vmem:[#allocation2 + $0x68] sm:$0xff]  ;;  %v5041_v18 = vld [vmem:[#allocation2 + $0x70] sm:$0xff] }
 0x298   : > { %v2477_v47 = vadd.f32 %v2476_v43, %v4981_v37  ;;  %v2609_v49 = vadd.f32 %v2608_v45, %v2546_v41  ;;  %v2556_v16 = vmul.f32 %v5031_v10, %v5031_v10  ;;  %v2557_v20 = vmul.f32 %v5036_v14, %v5036_v14  ;;  %v5046_v22 = vld [vmem:[#allocation2 + $0x78] sm:$0xff]  ;;  %v5051_v26 = vld [vmem:[#allocation2 + $0x80] sm:$0xff]  ;;  %v5056_v30 = vld [vmem:[#allocation2 + $0x88] sm:$0xff] }
 0x299   : > { %v2558_v24 = vmul.f32 %v5041_v18, %v5041_v18  ;;  %v2559_v28 = vmul.f32 %v5046_v22, %v5046_v22  ;;  %v2560_v32 = vmul.f32 %v5051_v26, %v5051_v26  ;;  %v5061_v38 = vld [vmem:[#allocation2 + $0x90] sm:$0xff]  ;;  %v2561_v40 = vmul.f32 %v5056_v30, %v5056_v30  ;;  %v5066_v43 = vld [vmem:[#allocation2 + $0x98] sm:$0xff] }
 0x29a   : > { %v2478_v51 = vadd.f32 %v2477_v47, %v4991_v42  ;;  %v2610_v53 = vadd.f32 %v2609_v49, %v2547_v44  ;;  %v2562_v45 = vmul.f32 %v5061_v38, %v5061_v38 }
 0x29c   : > { %v2479_v55 = vadd.f32 %v2478_v51, %v4996_v46  ;;  %v2611_v57 = vadd.f32 %v2610_v53, %v2548_v48  ;;  %v5071_v48 = vld [vmem:[#allocation2 + $0xa0] sm:$0xff]  ;;  %v2563_v51 = vmul.f32 %v5066_v43, %v5066_v43  ;;  %v5076_v53 = vld [vmem:[#allocation2 + $0xa8] sm:$0xff] }
 0x29e   : > { %v2480_v59 = vadd.f32 %v2479_v55, %v5001_v50  ;;  %v2612_v61 = vadd.f32 %v2611_v57, %v2549_v52 }
 0x2a0   : > { %v2481_v63 = vadd.f32 %v2480_v59, %v5006_v54  ;;  %v2613_v1 = vadd.f32 %v2612_v61, %v2550_v56  ;;  %v2564_v56 = vmul.f32 %v5071_v48, %v5071_v48  ;;  %v5081_v59 = vld [vmem:[#allocation2 + $0xb0] sm:$0xff]  ;;  %v2565_v61 = vmul.f32 %v5076_v53, %v5076_v53 }
 0x2a2   : > { %v2482_v3 = vadd.f32 %v2481_v63, %v5011_v58  ;;  %v2614_v5 = vadd.f32 %v2613_v1, %v2551_v60 }
 0x2a4   : > { %v2483_v7 = vadd.f32 %v2482_v3, %v5016_v62  ;;  %v2615_v9 = vadd.f32 %v2614_v5, %v2552_v0  ;;  %v5086_v0 = vld [vmem:[#allocation2 + $0xb8] sm:$0xff]  ;;  %v2566_v3 = vmul.f32 %v5081_v59, %v5081_v59  ;;  %v5091_v5 = vld [vmem:[#allocation2 + $0xc0] sm:$0xff] }
 0x2a6   : > { %v2484_v11 = vadd.f32 %v2483_v7, %v5021_v2  ;;  %v2616_v13 = vadd.f32 %v2615_v9, %v2553_v4 }
 0x2a8   : > { %v2485_v15 = vadd.f32 %v2484_v11, %v5026_v6  ;;  %v2617_v17 = vadd.f32 %v2616_v13, %v2554_v8  ;;  %v2567_v8 = vmul.f32 %v5086_v0, %v5086_v0  ;;  %v5096_v11 = vld [vmem:[#allocation2 + $0xc8] sm:$0xff]  ;;  %v2568_v13 = vmul.f32 %v5091_v5, %v5091_v5 }
 0x2aa   : > { %v2486_v19 = vadd.f32 %v2485_v15, %v5031_v10  ;;  %v2618_v21 = vadd.f32 %v2617_v17, %v2555_v12 }
 0x2ac   : > { %v2487_v23 = vadd.f32 %v2486_v19, %v5036_v14  ;;  %v2619_v25 = vadd.f32 %v2618_v21, %v2556_v16  ;;  %v5101_v16 = vld [vmem:[#allocation2 + $0xd0] sm:$0xff]  ;;  %v2569_v19 = vmul.f32 %v5096_v11, %v5096_v11  ;;  %v5106_v21 = vld [vmem:[#allocation2 + $0xd8] sm:$0xff] }
 0x2ae   : > { %v2488_v27 = vadd.f32 %v2487_v23, %v5041_v18  ;;  %v2620_v29 = vadd.f32 %v2619_v25, %v2557_v20 }
 0x2b0   : > { %v2489_v31 = vadd.f32 %v2488_v27, %v5046_v22  ;;  %v2621_v33 = vadd.f32 %v2620_v29, %v2558_v24  ;;  %v2570_v24 = vmul.f32 %v5101_v16, %v5101_v16  ;;  %v5111_v27 = vld [vmem:[#allocation2 + $0xe0] sm:$0xff]  ;;  %v2571_v29 = vmul.f32 %v5106_v21, %v5106_v21 }
 0x2b2   : > { %v2490_v39 = vadd.f32 %v2489_v31, %v5051_v26  ;;  %v2622_v41 = vadd.f32 %v2621_v33, %v2559_v28 }
 0x2b4   : > { %v2491_v44 = vadd.f32 %v2490_v39, %v5056_v30  ;;  %v2623_v47 = vadd.f32 %v2622_v41, %v2560_v32  ;;  %v5116_v32 = vld [vmem:[#allocation2 + $0xe8] sm:$0xff]  ;;  %v2572_v39 = vmul.f32 %v5111_v27, %v5111_v27  ;;  %v5121_v41 = vld [vmem:[#allocation2 + $0xf0] sm:$0xff] }
 0x2b6   : > { %v2492_v49 = vadd.f32 %v2491_v44, %v5061_v38  ;;  %v2624_v52 = vadd.f32 %v2623_v47, %v2561_v40 }
 0x2b8   : > { %v2493_v55 = vadd.f32 %v2492_v49, %v5066_v43  ;;  %v2625_v57 = vadd.f32 %v2624_v52, %v2562_v45  ;;  %v2573_v45 = vmul.f32 %v5116_v32, %v5116_v32  ;;  %v5126_v49 = vld [vmem:[#allocation2 + $0xf8] sm:$0xff]  ;;  %v2574_v52 = vmul.f32 %v5121_v41, %v5121_v41 }
 0x2ba   : > { %v2494_v60 = vadd.f32 %v2493_v55, %v5071_v48  ;;  %v2626_v63 = vadd.f32 %v2625_v57, %v2563_v51 }
 0x2bc   : > { %v2495_v1 = vadd.f32 %v2494_v60, %v5076_v53  ;;  %v2627_v4 = vadd.f32 %v2626_v63, %v2564_v56  ;;  %v5131_v56 = vld [vmem:[#allocation2 + $0x100] sm:$0xff]  ;;  %v2575_v60 = vmul.f32 %v5126_v49, %v5126_v49  ;;  %v5136_v63 = vld [vmem:[#allocation2 + $0x108] sm:$0xff] }
 0x2be   : > { %v2496_v7 = vadd.f32 %v2495_v1, %v5081_v59  ;;  %v2628_v9 = vadd.f32 %v2627_v4, %v2565_v61 }
 0x2c0   : > { %v2497_v12 = vadd.f32 %v2496_v7, %v5086_v0  ;;  %v2629_v15 = vadd.f32 %v2628_v9, %v2566_v3  ;;  %v2576_v3 = vmul.f32 %v5131_v56, %v5131_v56  ;;  %v5141_v7 = vld [vmem:[#allocation2 + $0x110] sm:$0xff]  ;;  %v2577_v9 = vmul.f32 %v5136_v63, %v5136_v63 }
 0x2c2   : > { %v2498_v17 = vadd.f32 %v2497_v12, %v5091_v5  ;;  %v2630_v20 = vadd.f32 %v2629_v15, %v2567_v8 }
 0x2c4   : > { %v2499_v23 = vadd.f32 %v2498_v17, %v5096_v11  ;;  %v2631_v25 = vadd.f32 %v2630_v20, %v2568_v13  ;;  %v5146_v13 = vld [vmem:[#allocation2 + $0x118] sm:$0xff]  ;;  %v2578_v17 = vmul.f32 %v5141_v7, %v5141_v7  ;;  %v5151_v20 = vld [vmem:[#allocation2 + $0x120] sm:$0xff] }
 0x2c6   : > { %v2500_v28 = vadd.f32 %v2499_v23, %v5101_v16  ;;  %v2632_v31 = vadd.f32 %v2631_v25, %v2569_v19 }
 0x2c8   : > { %v2501_v33 = vadd.f32 %v2500_v28, %v5106_v21  ;;  %v2633_v40 = vadd.f32 %v2632_v31, %v2570_v24  ;;  %v2579_v24 = vmul.f32 %v5146_v13, %v5146_v13  ;;  %v5156_v28 = vld [vmem:[#allocation2 + $0x128] sm:$0xff]  ;;  %v2580_v31 = vmul.f32 %v5151_v20, %v5151_v20 }
 0x2ca   : > { %v2502_v44 = vadd.f32 %v2501_v33, %v5111_v27  ;;  %v2634_v47 = vadd.f32 %v2633_v40, %v2571_v29 }
 0x2cc   : > { %v2503_v51 = vadd.f32 %v2502_v44, %v5116_v32  ;;  %v2635_v55 = vadd.f32 %v2634_v47, %v2572_v39  ;;  %v5161_v39 = vld [vmem:[#allocation2 + $0x130] sm:$0xff]  ;;  %v2581_v44 = vmul.f32 %v5156_v28, %v5156_v28  ;;  %v5166_v47 = vld [vmem:[#allocation2 + $0x138] sm:$0xff] }
 0x2ce   : > { %v2504_v57 = vadd.f32 %v2503_v51, %v5121_v41  ;;  %v2636_v61 = vadd.f32 %v2635_v55, %v2573_v45 }
 0x2d0   : > { %v2505_v1 = vadd.f32 %v2504_v57, %v5126_v49  ;;  %v2637_v4 = vadd.f32 %v2636_v61, %v2574_v52  ;;  %v2582_v52 = vmul.f32 %v5161_v39, %v5161_v39  ;;  %v5171_v57 = vld [vmem:[#allocation2 + $0x140] sm:$0xff]  ;;  %v2583_v61 = vmul.f32 %v5166_v47, %v5166_v47 }
 0x2d2   : > { %v2506_v8 = vadd.f32 %v2505_v1, %v5131_v56  ;;  %v2638_v12 = vadd.f32 %v2637_v4, %v2575_v60 }
 0x2d4   : > { %v2507_v15 = vadd.f32 %v2506_v8, %v5136_v63  ;;  %v2639_v19 = vadd.f32 %v2638_v12, %v2576_v3  ;;  %v5176_v3 = vld [vmem:[#allocation2 + $0x148] sm:$0xff]  ;;  %v2584_v8 = vmul.f32 %v5171_v57, %v5171_v57  ;;  %v5181_v12 = vld [vmem:[#allocation2 + $0x150] sm:$0xff] }
 0x2d5   : > { %5984 = vst [vmem:[#allocation4_spill] sm:$0xff] %v5176_v3  ;;  %5985 = vst [vmem:[#allocation5_spill] sm:$0xff] %v5181_v12 }
 0x2d6   : > { %v2508_v23 = vadd.f32 %v2507_v15, %v5141_v7  ;;  %v2640_v25 = vadd.f32 %v2639_v19, %v2577_v9 }
 0x2d8   : > { %v2509_v29 = vadd.f32 %v2508_v23, %v5146_v13  ;;  %v2641_v33 = vadd.f32 %v2640_v25, %v2578_v17  ;;  %v2585_v17 = vmul.f32 %v5176_v3, %v5176_v3  ;;  %v5186_v23 = vld [vmem:[#allocation2 + $0x158] sm:$0xff]  ;;  %v2586_v25 = vmul.f32 %v5181_v12, %v5181_v12 }
 0x2d9   : > { %5986 = vst [vmem:[#allocation6_spill] sm:$0xff] %v5186_v23 }
 0x2da   : > { %v2510_v40 = vadd.f32 %v2509_v29, %v5151_v20  ;;  %v2642_v45 = vadd.f32 %v2641_v33, %v2579_v24 }
 0x2dc   : > { %v2511_v51 = vadd.f32 %v2510_v40, %v5156_v28  ;;  %v2643_v55 = vadd.f32 %v2642_v45, %v2580_v31  ;;  %v5191_v31 = vld [vmem:[#allocation2 + $0x160] sm:$0xff]  ;;  %v2587_v40 = vmul.f32 %v5186_v23, %v5186_v23  ;;  %v5196_v45 = vld [vmem:[#allocation2 + $0x168] sm:$0xff] }
 0x2dd   : > { %5987 = vst [vmem:[#allocation7_spill] sm:$0xff] %v5191_v31  ;;  %5988 = vst [vmem:[#allocation8_spill] sm:$0xff] %v5196_v45 }
 0x2de   : > { %v2512_v60 = vadd.f32 %v2511_v51, %v5161_v39  ;;  %v2644_v1 = vadd.f32 %v2643_v55, %v2581_v44 }
 0x2e0   : > { %v2513_v4 = vadd.f32 %v2512_v60, %v5166_v47  ;;  %v2645_v9 = vadd.f32 %v2644_v1, %v2582_v52  ;;  %v2588_v52 = vmul.f32 %v5191_v31, %v5191_v31  ;;  %v5201_v60 = vld [vmem:[#allocation2 + $0x170] sm:$0xff]  ;;  %v2589_v1 = vmul.f32 %v5196_v45, %v5196_v45 }
 0x2e1   : > { %5989 = vst [vmem:[#allocation9_spill] sm:$0xff] %v5201_v60 }
 0x2e2   : > { %v2514_v15 = vadd.f32 %v2513_v4, %v5171_v57  ;;  %v2646_v19 = vadd.f32 %v2645_v9, %v2583_v61 }
 0x2e4   : > { %v2515_v24 = vadd.f32 %v2514_v15, %v5176_v3  ;;  %v2647_v29 = vadd.f32 %v2646_v19, %v2584_v8  ;;  %v5206_v8 = vld [vmem:[#allocation2 + $0x178] sm:$0xff]  ;;  %v2590_v15 = vmul.f32 %v5201_v60, %v5201_v60  ;;  %v5211_v19 = vld [vmem:[#allocation2 + $0x180] sm:$0xff] }
 0x2e5   : > { %5990 = vst [vmem:[#allocation10_spill] sm:$0xff] %v5206_v8  ;;  %5991 = vst [vmem:[#allocation11_spill] sm:$0xff] %v5211_v19 }
 0x2e6   : > { %v2516_v33 = vadd.f32 %v2515_v24, %v5181_v12  ;;  %v2648_v44 = vadd.f32 %v2647_v29, %v2585_v17 }
 0x2e8   : > { %v2517_v51 = vadd.f32 %v2516_v33, %v5186_v23  ;;  %v2649_v55 = vadd.f32 %v2648_v44, %v2586_v25  ;;  %v2591_v25 = vmul.f32 %v5206_v8, %v5206_v8  ;;  %v5216_v33 = vld [vmem:[#allocation2 + $0x188] sm:$0xff]  ;;  %v2592_v44 = vmul.f32 %v5211_v19, %v5211_v19 }
 0x2e9   : > { %5992 = vst [vmem:[#allocation12_spill] sm:$0xff] %v5216_v33 }
 0x2ea   : > { %v2518_v61 = vadd.f32 %v2517_v51, %v5191_v31  ;;  %v2650_v4 = vadd.f32 %v2649_v55, %v2587_v40  ;;  %v5221_v55 = vld [vmem:[#allocation2 + $0x190] sm:$0xff] }
 0x2eb   : > { %5993 = vst [vmem:[#allocation13_spill] sm:$0xff] %v5221_v55 }
 0x2ec   : > { %v2519_v9 = vadd.f32 %v2518_v61, %v5196_v45  ;;  %v2651_v17 = vadd.f32 %v2650_v4, %v2588_v52  ;;  %v2593_v61 = vmul.f32 %v5216_v33, %v5216_v33 }
 0x2ee   : > { %v2520_v24 = vadd.f32 %v2519_v9, %v5201_v60  ;;  %v2652_v29 = vadd.f32 %v2651_v17, %v2589_v1  ;;  %v5226_v9 = vld [vmem:[#allocation2 + $0x198] sm:$0xff]  ;;  %v2594_v17 = vmul.f32 %v5221_v55, %v5221_v55 }
 0x2ef   : > { %5994 = vst [vmem:[#allocation14_spill] sm:$0xff] %v5226_v9 }
 0x2f0   : > { %v2521_v40 = vadd.f32 %v2520_v24, %v5206_v8  ;;  %v2653_v51 = vadd.f32 %v2652_v29, %v2590_v15  ;;  %v5231_v8 = vld [vmem:[#allocation2 + $0x1a0] sm:$0xff]  ;;  %v2595_v29 = vmul.f32 %v5226_v9, %v5226_v9 }
 0x2f1   : > { %5995 = vst [vmem:[#allocation15_spill] sm:$0xff] %v5231_v8 }
 0x2f2   : > { %v2522_v52 = vadd.f32 %v2521_v40, %v5211_v19  ;;  %v2654_v4 = vadd.f32 %v2653_v51, %v2591_v25  ;;  %v5236_v19 = vld [vmem:[#allocation2 + $0x1a8] sm:$0xff]  ;;  %v2596_v51 = vmul.f32 %v5231_v8, %v5231_v8 }
 0x2f3   : > { %5996 = vst [vmem:[#allocation16_spill] sm:$0xff] %v5236_v19 }
 0x2f4   : > { %v2523_v1 = vadd.f32 %v2522_v52, %v5216_v33  ;;  %v2655_v24 = vadd.f32 %v2654_v4, %v2592_v44  ;;  %v5241_v33 = vld [vmem:[#allocation2 + $0x1b0] sm:$0xff]  ;;  %v2597_v4 = vmul.f32 %v5236_v19, %v5236_v19 }
 0x2f5   : > { %5997 = vst [vmem:[#allocation17_spill] sm:$0xff] %v5241_v33 }
 0x2f6   : > { %v2524_v15 = vadd.f32 %v2523_v1, %v5221_v55  ;;  %v2656_v40 = vadd.f32 %v2655_v24, %v2593_v61  ;;  %v5246_v55 = vld [vmem:[#allocation2 + $0x1b8] sm:$0xff]  ;;  %v2598_v24 = vmul.f32 %v5241_v33, %v5241_v33 }
 0x2f7   : > { %5998 = vst [vmem:[#allocation18_spill] sm:$0xff] %v5246_v55 }
 0x2f8   : > { %v2525_v25 = vadd.f32 %v2524_v15, %v5226_v9  ;;  %v2657_v52 = vadd.f32 %v2656_v40, %v2594_v17  ;;  %v5251_v9 = vld [vmem:[#allocation2 + $0x1c0] sm:$0xff]  ;;  %v2599_v40 = vmul.f32 %v5246_v55, %v5246_v55 }
 0x2f9   : > { %5999 = vst [vmem:[#allocation19_spill] sm:$0xff] %v5251_v9 }
 0x2fa   : > { %v2526_v44 = vadd.f32 %v2525_v25, %v5231_v8  ;;  %v2658_v1 = vadd.f32 %v2657_v52, %v2595_v29  ;;  %v5256_v8 = vld [vmem:[#allocation2 + $0x1c8] sm:$0xff]  ;;  %v2600_v52 = vmul.f32 %v5251_v9, %v5251_v9 }
 0x2fb   : > { %6000 = vst [vmem:[#allocation20_spill] sm:$0xff] %v5256_v8 }
 0x2fc   : > { %v2527_v61 = vadd.f32 %v2526_v44, %v5236_v19  ;;  %v2659_v15 = vadd.f32 %v2658_v1, %v2596_v51  ;;  %v5261_v19 = vld [vmem:[#allocation2 + $0x1d0] sm:$0xff]  ;;  %v2601_v1 = vmul.f32 %v5256_v8, %v5256_v8 }
 0x2fd   : > { %6001 = vst [vmem:[#allocation21_spill] sm:$0xff] %v5261_v19 }
 0x2fe   : > { %v2528_v17 = vadd.f32 %v2527_v61, %v5241_v33  ;;  %v2660_v25 = vadd.f32 %v2659_v15, %v2597_v4  ;;  %v5266_v33 = vld [vmem:[#allocation2 + $0x1d8] sm:$0xff]  ;;  %v2602_v15 = vmul.f32 %v5261_v19, %v5261_v19 }
 0x2ff   : > { %6002 = vst [vmem:[#allocation22_spill] sm:$0xff] %v5266_v33 }
 0x300   : > { %v2529_v29 = vadd.f32 %v2528_v17, %v5246_v55  ;;  %v2661_v44 = vadd.f32 %v2660_v25, %v2598_v24  ;;  %v5271_v55 = vld [vmem:[#allocation2 + $0x1e0] sm:$0xff]  ;;  %v2603_v25 = vmul.f32 %v5266_v33, %v5266_v33 }
 0x301   : > { %6003 = vst [vmem:[#allocation23_spill] sm:$0xff] %v5271_v55 }
 0x302   : > { %v2530_v51 = vadd.f32 %v2529_v29, %v5251_v9  ;;  %v2662_v61 = vadd.f32 %v2661_v44, %v2599_v40  ;;  %v5276_v9 = vld [vmem:[#allocation2 + $0x1e8] sm:$0xff]  ;;  %v2604_v44 = vmul.f32 %v5271_v55, %v5271_v55 }
 0x303   : > { %6004 = vst [vmem:[#allocation24_spill] sm:$0xff] %v5276_v9 }
 0x304   : > { %v2531_v4 = vadd.f32 %v2530_v51, %v5256_v8  ;;  %v2663_v17 = vadd.f32 %v2662_v61, %v2600_v52  ;;  %v5281_v8 = vld [vmem:[#allocation2 + $0x1f0] sm:$0xff]  ;;  %v2605_v61 = vmul.f32 %v5276_v9, %v5276_v9 }
 0x305   : > { %6005 = vst [vmem:[#allocation25_spill] sm:$0xff] %v5281_v8 }
 0x306   : > { %v2532_v24 = vadd.f32 %v2531_v4, %v5261_v19  ;;  %v2664_v29 = vadd.f32 %v2663_v17, %v2601_v1  ;;  %v5286_v19 = vld [vmem:[#allocation2 + $0x1f8] sm:$0xff]  ;;  %v2606_v17 = vmul.f32 %v5281_v8, %v5281_v8 }
 0x307   : > { %6006 = vst [vmem:[#allocation26_spill] sm:$0xff] %v5286_v19 }
 0x308   : > { %v2533_v40 = vadd.f32 %v2532_v24, %v5266_v33  ;;  %v2665_v51 = vadd.f32 %v2664_v29, %v2602_v15  ;;  %v2607_v15 = vmul.f32 %v5286_v19, %v5286_v19 }
 0x30a   : > { %v2534_v52 = vadd.f32 %v2533_v40, %v5271_v55  ;;  %v2666_v4 = vadd.f32 %v2665_v51, %v2603_v25 }
 0x30c   : > { %v2535_v1 = vadd.f32 %v2534_v52, %v5276_v9  ;;  %v2667_v24 = vadd.f32 %v2666_v4, %v2604_v44 }
 0x30e   : > { %v2536_v33 = vadd.f32 %v2535_v1, %v5281_v8  ;;  %v2668_v29 = vadd.f32 %v2667_v24, %v2605_v61 }
 0x310   : > { %v2537_v40 = vadd.f32 %v2536_v33, %v5286_v19  ;;  %v2669_v55 = vadd.f32 %v2668_v29, %v2606_v17 }
 0x312   : > { %v2538_v60 = vrot.slane %v2537_v40, 4  ;;  %v2670_v45 = vadd.f32 %v2669_v55, %v2607_v15  ;;  %v5424_v55 = vld [vmem:[%s5936_s2] ss:$0 sm:$0xff] }
 0x314   : > { %v2539_v25 = vadd.f32 %v2538_v60, %v2537_v40  ;;  %v2671_v51 = vrot.slane %v2670_v45, 4 }
 0x316   : > { %v2540_v31 = vrot.slane %v2539_v25, 2  ;;  %v2672_v23 = vadd.f32 %v2671_v51, %v2670_v45 }
 0x318   : > { %v2541_v52 = vadd.f32 %v2540_v31, %v2539_v25  ;;  %v2673_v9 = vrot.slane %v2672_v23, 2 }
 0x31a   : > { %v2542_v12 = vrot.slane %v2541_v52, 1  ;;  %v2674_v3 = vadd.f32 %v2673_v9, %v2672_v23 }
 0x31c   : > { %v2543_v44 = vadd.f32 %v2542_v12, %v2541_v52  ;;  %v2675_v4 = vrot.slane %v2674_v3, 1  ;;  %v6008_v52 = vld [vmem:[#allocation5_spill] sm:$0xff] }
 0x31e   : > { %v5295_v1 = vmul.f32 0.001953125, %v2543_v44  ;;  %v2676_v8 = vadd.f32 %v2675_v4, %v2674_v3  ;;  %v6009_v44 = vld [vmem:[#allocation6_spill] sm:$0xff]  ;;  %v6010_v4 = vld [vmem:[#allocation7_spill] sm:$0xff] }
 0x320   : > { %v2679_v61 = vmul.f32 %v5295_v1, %v5295_v1  ;;  %v2678_v33 = vmul.f32 0.001953125, %v2676_v8  ;;  %v6029_v24 = vsub.f32 %v4975_v34, %v5295_v1  ;;  %v6030_v12 = vsub.f32 %v4977_v35, %v5295_v1  ;;  %v5453_v34 = vld [vmem:[%s5937_s3] ss:$0 sm:$0xff] }
 0x321   : > { %v6031_v60 = vsub.f32 %v4979_v36, %v5295_v1  ;;  %v6032_v23 = vsub.f32 %v4981_v37, %v5295_v1  ;;  %v6033_v35 = vsub.f32 %v4991_v42, %v5295_v1  ;;  %v6034_v36 = vsub.f32 %v4996_v46, %v5295_v1 }
 0x322   : > { %v2680_v8 = vsub.f32 %v2678_v33, %v2679_v61  ;;  %v6035_v37 = vsub.f32 %v5001_v50, %v5295_v1 }
 0x324   : > { %v2745_v51 = vadd.f32 1e-05, %v2680_v8 }
 0x326   : > { %4334 = vrsqrt.f32 %v2745_v51  ;;  %v6007_v51 = vld [vmem:[#allocation4_spill] sm:$0xff] }
 0x330   : > { %v5419_v40 = vpop.eup %4334 }
 0x331   : > { %v2747_v31 = vmul.f32 %v5419_v40, %v6029_v24  ;;  %v2748_v45 = vmul.f32 %v5419_v40, %v6030_v12  ;;  %v2749_v3 = vmul.f32 %v5419_v40, %v6031_v60  ;;  %v2750_v15 = vmul.f32 %v5419_v40, %v6032_v23 }
 0x332   : > { %v2751_v12 = vmul.f32 %v5419_v40, %v6033_v35  ;;  %v2752_v60 = vmul.f32 %v5419_v40, %v6034_v36  ;;  %v2753_v23 = vmul.f32 %v5419_v40, %v6035_v37  ;;  %v6036_v24 = vsub.f32 %v5006_v54, %v5295_v1 }
 0x333   : > { %v2818_v29 = vmul.f32 %v5424_v55, %v2747_v31  ;;  %v2819_v42 = vmul.f32 %v5424_v55, %v2748_v45  ;;  %v2820_v35 = vmul.f32 %v5424_v55, %v2749_v3  ;;  %v2821_v46 = vmul.f32 %v5424_v55, %v2750_v15 }
 0x334   : > { %v2754_v19 = vmul.f32 %v5419_v40, %v6036_v24  ;;  %v2822_v36 = vmul.f32 %v5424_v55, %v2751_v12  ;;  %v2823_v25 = vmul.f32 %v5424_v55, %v2752_v60  ;;  %v2824_v50 = vmul.f32 %v5424_v55, %v2753_v23 }
 0x335   : > { %v2889_v54 = vadd.f32 %v5453_v34, %v2818_v29  ;;  %v2890_v24 = vadd.f32 %v5453_v34, %v2819_v42  ;;  %v2891_v31 = vadd.f32 %v5453_v34, %v2820_v35  ;;  %v2892_v45 = vadd.f32 %v5453_v34, %v2821_v46 }
 0x336   : > { %v2825_v37 = vmul.f32 %v5424_v55, %v2754_v19  ;;  %v2893_v3 = vadd.f32 %v5453_v34, %v2822_v36  ;;  %v2894_v15 = vadd.f32 %v5453_v34, %v2823_v25  ;;  %v2895_v12 = vadd.f32 %v5453_v34, %v2824_v50 }
 0x337   : > { %vm2953_vm0 = vcmp.gt.f32.partialorder %v2889_v54, 0.0  ;;  %vm2954_vm1 = vcmp.gt.f32.partialorder %v2890_v24, 0.0  ;;  %v3017_v23 = vmul.f32 0.2, %v2889_v54  ;;  %v3018_v19 = vmul.f32 0.2, %v2890_v24 }
 0x338   : > { %v2896_v60 = vadd.f32 %v5453_v34, %v2825_v37  ;;  %vm2955_vm2 = vcmp.gt.f32.partialorder %v2891_v31, 0.0  ;;  %vm2956_vm3 = vcmp.gt.f32.partialorder %v2892_v45, 0.0  ;;  %v3019_v29 = vmul.f32 0.2, %v2891_v31 }
 0x339   : > { %v3020_v42 = vmul.f32 0.2, %v2892_v45  ;;  %v3081_v8 = vsel %vm2953_vm0, %v2889_v54, %v3017_v23  ;;  %v3082_v35 = vsel %vm2954_vm1, %v2890_v24, %v3018_v19  ;;  %vm2957_vm4 = vcmp.gt.f32.partialorder %v2893_v3, 0.0 }
 0x33a   : > { %vm2958_vm5 = vcmp.gt.f32.partialorder %v2894_v15, 0.0  ;;  %v3880_v46 = vpack.c.bf16 %v3082_v35, %v3081_v8  ;;  %v3083_v36 = vsel %vm2955_vm2, %v2891_v31, %v3019_v29  ;;  %v3021_v25 = vmul.f32 0.2, %v2893_v3 }
 0x33b   : > { %v3084_v9 = vsel %vm2956_vm3, %v2892_v45, %v3020_v42  ;;  %v3022_v50 = vmul.f32 0.2, %v2894_v15  ;;  %vm2959_vm6 = vcmp.gt.f32.partialorder %v2895_v12, 0.0  ;;  %vm2960_vm7 = vcmp.gt.f32.partialorder %v2896_v60, 0.0 }
 0x33c   : > { %v3885_v17 = vpack.c.bf16 %v3084_v9, %v3083_v36  ;;  %3881 = vst [vmem:[%s5938_s4] sm:$0xff] %v3880_v46   ;;  %v3085_v37 = vsel %vm2957_vm4, %v2893_v3, %v3021_v25  ;;  %v3023_v33 = vmul.f32 0.2, %v2895_v12  ;;  %v3024_v61 = vmul.f32 0.2, %v2896_v60 }
 0x33d   : > { %v6037_v54 = vsub.f32 %v5011_v58, %v5295_v1  ;;  %v3086_v9 = vsel %vm2958_vm5, %v2894_v15, %v3022_v50  ;;  %v6038_v8 = vsub.f32 %v5016_v62, %v5295_v1  ;;  %v6039_v45 = vsub.f32 %v5021_v2, %v5295_v1 }
 0x33e   : > { %4037 = vst [vmem:[%s5938_s4 + $0x8] sm:$0xff] %v3885_v17   ;;  %v6040_v58 = vsub.f32 %v5026_v6, %v5295_v1  ;;  %v3890_v19 = vpack.c.bf16 %v3086_v9, %v3085_v37  ;;  %v3087_v29 = vsel %vm2959_vm6, %v2895_v12, %v3023_v33  ;;  %v3088_v42 = vsel %vm2960_vm7, %v2896_v60, %v3024_v61 }
 0x33f   : > { %v2755_v24 = vmul.f32 %v5419_v40, %v6037_v54  ;;  %v2756_v31 = vmul.f32 %v5419_v40, %v6038_v8  ;;  %v2757_v3 = vmul.f32 %v5419_v40, %v6039_v45  ;;  %v3895_v15 = vpack.c.bf16 %v3088_v42, %v3087_v29 }
 0x340   : > { %v2758_v23 = vmul.f32 %v5419_v40, %v6040_v58  ;;  %4038 = vst [vmem:[%s5938_s4 + $0x10] sm:$0xff] %v3890_v19   ;;  %v6041_v6 = vsub.f32 %v5031_v10, %v5295_v1  ;;  %v6042_v33 = vsub.f32 %v5036_v14, %v5295_v1  ;;  %v6043_v60 = vsub.f32 %v5041_v18, %v5295_v1 }
 0x341   : > { %v2826_v17 = vmul.f32 %v5424_v55, %v2755_v24  ;;  %v2827_v62 = vmul.f32 %v5424_v55, %v2756_v31  ;;  %v2828_v35 = vmul.f32 %v5424_v55, %v2757_v3  ;;  %4039 = vst [vmem:[%s5938_s4 + $0x18] sm:$0xff] %v3895_v15   ;;  %v6044_v14 = vsub.f32 %v5046_v22, %v5295_v1 }
 0x342   : > { %v2829_v46 = vmul.f32 %v5424_v55, %v2758_v23  ;;  %v2759_v61 = vmul.f32 %v5419_v40, %v6041_v6  ;;  %v2760_v12 = vmul.f32 %v5419_v40, %v6042_v33  ;;  %v2761_v36 = vmul.f32 %v5419_v40, %v6043_v60 }
 0x343   : > { %v2897_v2 = vadd.f32 %v5453_v34, %v2826_v17  ;;  %v2898_v25 = vadd.f32 %v5453_v34, %v2827_v62  ;;  %v2899_v10 = vadd.f32 %v5453_v34, %v2828_v35  ;;  %v2762_v37 = vmul.f32 %v5419_v40, %v6044_v14 }
 0x344   : > { %v2900_v50 = vadd.f32 %v5453_v34, %v2829_v46  ;;  %v2830_v18 = vmul.f32 %v5424_v55, %v2759_v61  ;;  %v2831_v24 = vmul.f32 %v5424_v55, %v2760_v12  ;;  %v2832_v23 = vmul.f32 %v5424_v55, %v2761_v36 }
 0x345   : > { %vm2961_vm8 = vcmp.gt.f32.partialorder %v2897_v2, 0.0  ;;  %v3025_v54 = vmul.f32 0.2, %v2897_v2  ;;  %vm2962_vm9 = vcmp.gt.f32.partialorder %v2898_v25, 0.0  ;;  %v3026_v9 = vmul.f32 0.2, %v2898_v25 }
 0x346   : > { %vm2963_vm10 = vcmp.gt.f32.partialorder %v2899_v10, 0.0  ;;  %vm2964_vm11 = vcmp.gt.f32.partialorder %v2900_v50, 0.0  ;;  %v3027_v31 = vmul.f32 0.2, %v2899_v10  ;;  %v3028_v45 = vmul.f32 0.2, %v2900_v50 }
 0x347   : > { %v3089_v8 = vsel %vm2961_vm8, %v2897_v2, %v3025_v54  ;;  %v2901_v3 = vadd.f32 %v5453_v34, %v2830_v18  ;;  %v3090_v58 = vsel %vm2962_vm9, %v2898_v25, %v3026_v9  ;;  %v2902_v22 = vadd.f32 %v5453_v34, %v2831_v24 }
 0x348   : > { %v2833_v19 = vmul.f32 %v5424_v55, %v2762_v37  ;;  %v3900_v29 = vpack.c.bf16 %v3090_v58, %v3089_v8  ;;  %v3091_v42 = vsel %vm2963_vm10, %v2899_v10, %v3027_v31  ;;  %v3092_v17 = vsel %vm2964_vm11, %v2900_v50, %v3028_v45 }
 0x349   : > { %vm2965_vm12 = vcmp.gt.f32.partialorder %v2901_v3, 0.0  ;;  %v3905_v15 = vpack.c.bf16 %v3092_v17, %v3091_v42  ;;  %vm2966_vm13 = vcmp.gt.f32.partialorder %v2902_v22, 0.0  ;;  %v3029_v62 = vmul.f32 0.2, %v2901_v3 }
 0x34a   : > { %v3030_v35 = vmul.f32 0.2, %v2902_v22  ;;  %4040 = vst [vmem:[%s5938_s4 + $0x20] sm:$0xff] %v3900_v29   ;;  %v2903_v46 = vadd.f32 %v5453_v34, %v2832_v23  ;;  %v2904_v2 = vadd.f32 %v5453_v34, %v2833_v19  ;;  %v6045_v6 = vsub.f32 %v5051_v26, %v5295_v1 }
 0x34b   : > { %v6046_v33 = vsub.f32 %v5056_v30, %v5295_v1  ;;  %4041 = vst [vmem:[%s5938_s4 + $0x28] sm:$0xff] %v3905_v15   ;;  %v3093_v60 = vsel %vm2965_vm12, %v2901_v3, %v3029_v62  ;;  %v6047_v25 = vsub.f32 %v5061_v38, %v5295_v1  ;;  %v6048_v26 = vsub.f32 %v5066_v43, %v5295_v1 }
 0x34c   : > { %v2763_v61 = vmul.f32 %v5419_v40, %v6045_v6  ;;  %v3094_v36 = vsel %vm2966_vm13, %v2902_v22, %v3030_v35  ;;  %vm2967_vm14 = vcmp.gt.f32.partialorder %v2903_v46, 0.0  ;;  %vm2968_vm15 = vcmp.gt.f32.partialorder %v2904_v2, 0.0 }
 0x34d   : > { %v2764_v12 = vmul.f32 %v5419_v40, %v6046_v33  ;;  %v2765_v10 = vmul.f32 %v5419_v40, %v6047_v25  ;;  %v2766_v50 = vmul.f32 %v5419_v40, %v6048_v26  ;;  %v3910_v14 = vpack.c.bf16 %v3094_v36, %v3093_v60 }
 0x34e   : > { %v3031_v30 = vmul.f32 0.2, %v2903_v46  ;;  %v3032_v37 = vmul.f32 0.2, %v2904_v2  ;;  %v2834_v54 = vmul.f32 %v5424_v55, %v2763_v61  ;;  %v6049_v9 = vsub.f32 %v5071_v48, %v5295_v1 }
 0x34f   : > { %v2835_v18 = vmul.f32 %v5424_v55, %v2764_v12  ;;  %v2836_v24 = vmul.f32 %v5424_v55, %v2765_v10  ;;  %4042 = vst [vmem:[%s5938_s4 + $0x30] sm:$0xff] %v3910_v14   ;;  %v2837_v43 = vmul.f32 %v5424_v55, %v2766_v50  ;;  %v6050_v31 = vsub.f32 %v5076_v53, %v5295_v1 }
 0x350   : > { %v3095_v38 = vsel %vm2967_vm14, %v2903_v46, %v3031_v30  ;;  %v2767_v8 = vmul.f32 %v5419_v40, %v6049_v9  ;;  %v3096_v3 = vsel %vm2968_vm15, %v2904_v2, %v3032_v37  ;;  %v2905_v58 = vadd.f32 %v5453_v34, %v2834_v54 }
 0x351   : > { %v2768_v45 = vmul.f32 %v5419_v40, %v6050_v31  ;;  %v2906_v22 = vadd.f32 %v5453_v34, %v2835_v18  ;;  %v2907_v23 = vadd.f32 %v5453_v34, %v2836_v24  ;;  %v3915_v19 = vpack.c.bf16 %v3096_v3, %v3095_v38 }
 0x352   : > { %v2908_v29 = vadd.f32 %v5453_v34, %v2837_v43  ;;  %v2838_v42 = vmul.f32 %v5424_v55, %v2767_v8  ;;  %vm2969_vm0 = vcmp.gt.f32.partialorder %v2905_v58, 0.0  ;;  %v3033_v17 = vmul.f32 0.2, %v2905_v58 }
 0x353   : > { %v2839_v48 = vmul.f32 %v5424_v55, %v2768_v45  ;;  %vm2970_vm1 = vcmp.gt.f32.partialorder %v2906_v22, 0.0  ;;  %v3034_v53 = vmul.f32 0.2, %v2906_v22  ;;  %4043 = vst [vmem:[%s5938_s4 + $0x38] sm:$0xff] %v3915_v19   ;;  %vm2971_vm2 = vcmp.gt.f32.partialorder %v2907_v23, 0.0 }
 0x354   : > { %vm2972_vm3 = vcmp.gt.f32.partialorder %v2908_v29, 0.0  ;;  %v3035_v15 = vmul.f32 0.2, %v2907_v23  ;;  %v3036_v62 = vmul.f32 0.2, %v2908_v29  ;;  %v3097_v35 = vsel %vm2969_vm0, %v2905_v58, %v3033_v17 }
 0x355   : > { %v3098_v46 = vsel %vm2970_vm1, %v2906_v22, %v3034_v53  ;;  %v2909_v2 = vadd.f32 %v5453_v34, %v2838_v42  ;;  %v2910_v6 = vadd.f32 %v5453_v34, %v2839_v48  ;;  %v6051_v60 = vsub.f32 %v5081_v59, %v5295_v1 }
 0x356   : > { %v3920_v61 = vpack.c.bf16 %v3098_v46, %v3097_v35  ;;  %v3099_v33 = vsel %vm2971_vm2, %v2907_v23, %v3035_v15  ;;  %v3100_v12 = vsel %vm2972_vm3, %v2908_v29, %v3036_v62  ;;  %v6052_v50 = vsub.f32 %v5086_v0, %v5295_v1 }
 0x357   : > { %v2769_v36 = vmul.f32 %v5419_v40, %v6051_v60  ;;  %v3925_v25 = vpack.c.bf16 %v3100_v12, %v3099_v33  ;;  %vm2973_vm4 = vcmp.gt.f32.partialorder %v2909_v2, 0.0  ;;  %vm2974_vm5 = vcmp.gt.f32.partialorder %v2910_v6, 0.0 }
 0x358   : > { %v3037_v10 = vmul.f32 0.2, %v2909_v2  ;;  %4044 = vst [vmem:[%s5938_s4 + $0x40] sm:$0xff] %v3920_v61   ;;  %v3038_v26 = vmul.f32 0.2, %v2910_v6  ;;  %v2770_v14 = vmul.f32 %v5419_v40, %v6052_v50  ;;  %v6053_v59 = vsub.f32 %v5091_v5, %v5295_v1 }
 0x359   : > { %v2840_v30 = vmul.f32 %v5424_v55, %v2769_v36  ;;  %4045 = vst [vmem:[%s5938_s4 + $0x48] sm:$0xff] %v3925_v25   ;;  %v6054_v18 = vsub.f32 %v5096_v11, %v5295_v1  ;;  %v6055_v0 = vsub.f32 %v5101_v16, %v5295_v1  ;;  %v6056_v5 = vsub.f32 %v5106_v21, %v5295_v1 }
 0x35a   : > { %v2771_v37 = vmul.f32 %v5419_v40, %v6053_v59  ;;  %v3101_v54 = vsel %vm2973_vm4, %v2909_v2, %v3037_v10  ;;  %v3102_v9 = vsel %vm2974_vm5, %v2910_v6, %v3038_v26  ;;  %v2841_v8 = vmul.f32 %v5424_v55, %v2770_v14 }
 0x35b   : > { %v2772_v24 = vmul.f32 %v5419_v40, %v6054_v18  ;;  %v2773_v38 = vmul.f32 %v5419_v40, %v6055_v0  ;;  %v2774_v43 = vmul.f32 %v5419_v40, %v6056_v5  ;;  %v2911_v31 = vadd.f32 %v5453_v34, %v2840_v30 }
 0x35c   : > { %v2842_v45 = vmul.f32 %v5424_v55, %v2771_v37  ;;  %v3930_v11 = vpack.c.bf16 %v3102_v9, %v3101_v54  ;;  %v2912_v22 = vadd.f32 %v5453_v34, %v2841_v8  ;;  %v6057_v48 = vsub.f32 %v5111_v27, %v5295_v1 }
 0x35d   : > { %v2843_v3 = vmul.f32 %v5424_v55, %v2772_v24  ;;  %v2844_v58 = vmul.f32 %v5424_v55, %v2773_v38  ;;  %v2845_v16 = vmul.f32 %v5424_v55, %v2774_v43  ;;  %vm2975_vm6 = vcmp.gt.f32.partialorder %v2911_v31, 0.0 }
 0x35e   : > { %v3039_v21 = vmul.f32 0.2, %v2911_v31  ;;  %v2913_v23 = vadd.f32 %v5453_v34, %v2842_v45  ;;  %4046 = vst [vmem:[%s5938_s4 + $0x50] sm:$0xff] %v3930_v11   ;;  %v2775_v17 = vmul.f32 %v5419_v40, %v6057_v48  ;;  %vm2976_vm7 = vcmp.gt.f32.partialorder %v2912_v22, 0.0 }
 0x35f   : > { %v2914_v19 = vadd.f32 %v5453_v34, %v2843_v3  ;;  %v2915_v29 = vadd.f32 %v5453_v34, %v2844_v58  ;;  %v2916_v42 = vadd.f32 %v5453_v34, %v2845_v16  ;;  %v3040_v53 = vmul.f32 0.2, %v2912_v22 }
 0x360   : > { %v3103_v15 = vsel %vm2975_vm6, %v2911_v31, %v3039_v21  ;;  %vm2977_vm8 = vcmp.gt.f32.partialorder %v2913_v23, 0.0  ;;  %v3041_v62 = vmul.f32 0.2, %v2913_v23  ;;  %v6058_v27 = vsub.f32 %v5116_v32, %v5295_v1 }
 0x361   : > { %vm2978_vm9 = vcmp.gt.f32.partialorder %v2914_v19, 0.0  ;;  %v3042_v35 = vmul.f32 0.2, %v2914_v19  ;;  %vm2979_vm10 = vcmp.gt.f32.partialorder %v2915_v29, 0.0  ;;  %v3104_v46 = vsel %vm2976_vm7, %v2912_v22, %v3040_v53 }
 0x362   : > { %vm2980_vm11 = vcmp.gt.f32.partialorder %v2916_v42, 0.0  ;;  %v3043_v2 = vmul.f32 0.2, %v2915_v29  ;;  %v3044_v6 = vmul.f32 0.2, %v2916_v42  ;;  %v3935_v61 = vpack.c.bf16 %v3104_v46, %v3103_v15 }
 0x363   : > { %v3105_v33 = vsel %vm2977_vm8, %v2913_v23, %v3041_v62  ;;  %v3106_v12 = vsel %vm2978_vm9, %v2914_v19, %v3042_v35  ;;  %v2776_v60 = vmul.f32 %v5419_v40, %v6058_v27  ;;  %v2846_v26 = vmul.f32 %v5424_v55, %v2775_v17 }
 0x364   : > { %v3940_v36 = vpack.c.bf16 %v3106_v12, %v3105_v33  ;;  %v3107_v25 = vsel %vm2979_vm10, %v2915_v29, %v3043_v2  ;;  %v3108_v10 = vsel %vm2980_vm11, %v2916_v42, %v3044_v6  ;;  %4047 = vst [vmem:[%s5938_s4 + $0x58] sm:$0xff] %v3935_v61   ;;  %v6059_v30 = vsub.f32 %v5121_v41, %v5295_v1 }
 0x365   : > { %v3945_v50 = vpack.c.bf16 %v3108_v10, %v3107_v25  ;;  %v2847_v14 = vmul.f32 %v5424_v55, %v2776_v60  ;;  %v6060_v32 = vsub.f32 %v5126_v49, %v5295_v1  ;;  %v2917_v54 = vadd.f32 %v5453_v34, %v2846_v26 }
 0x366   : > { %v2777_v59 = vmul.f32 %v5419_v40, %v6059_v30  ;;  %4048 = vst [vmem:[%s5938_s4 + $0x60] sm:$0xff] %v3940_v36   ;;  %v6061_v18 = vsub.f32 %v5131_v56, %v5295_v1  ;;  %v6062_v41 = vsub.f32 %v5136_v63, %v5295_v1  ;;  %v6063_v49 = vsub.f32 %v5141_v7, %v5295_v1 }
 0x367   : > { %v2778_v37 = vmul.f32 %v5419_v40, %v6060_v32  ;;  %4049 = vst [vmem:[%s5938_s4 + $0x68] sm:$0xff] %v3945_v50   ;;  %v2918_v5 = vadd.f32 %v5453_v34, %v2847_v14  ;;  %v6064_v63 = vsub.f32 %v5146_v13, %v5295_v1  ;;  %vm2981_vm12 = vcmp.gt.f32.partialorder %v2917_v54, 0.0 }
 0x368   : > { %v2779_v24 = vmul.f32 %v5419_v40, %v6061_v18  ;;  %v2780_v0 = vmul.f32 %v5419_v40, %v6062_v41  ;;  %v2781_v38 = vmul.f32 %v5419_v40, %v6063_v49  ;;  %v2848_v56 = vmul.f32 %v5424_v55, %v2777_v59 }
 0x369   : > { %v2849_v43 = vmul.f32 %v5424_v55, %v2778_v37  ;;  %v2782_v9 = vmul.f32 %v5419_v40, %v6064_v63  ;;  %v3045_v8 = vmul.f32 0.2, %v2917_v54  ;;  %vm2982_vm13 = vcmp.gt.f32.partialorder %v2918_v5, 0.0 }
 0x36a   : > { %v2850_v7 = vmul.f32 %v5424_v55, %v2779_v24  ;;  %v2851_v31 = vmul.f32 %v5424_v55, %v2780_v0  ;;  %v3046_v45 = vmul.f32 0.2, %v2918_v5  ;;  %v2919_v11 = vadd.f32 %v5453_v34, %v2848_v56 }
 0x36b   : > { %v2920_v3 = vadd.f32 %v5453_v34, %v2849_v43  ;;  %v3109_v58 = vsel %vm2981_vm12, %v2917_v54, %v3045_v8  ;;  %v2852_v13 = vmul.f32 %v5424_v55, %v2781_v38  ;;  %v2853_v53 = vmul.f32 %v5424_v55, %v2782_v9 }
 0x36c   : > { %v2921_v16 = vadd.f32 %v5453_v34, %v2850_v7  ;;  %v2922_v22 = vadd.f32 %v5453_v34, %v2851_v31  ;;  %v3110_v21 = vsel %vm2982_vm13, %v2918_v5, %v3046_v45  ;;  %vm2983_vm14 = vcmp.gt.f32.partialorder %v2919_v11, 0.0 }
 0x36d   : > { %vm2984_vm15 = vcmp.gt.f32.partialorder %v2920_v3, 0.0  ;;  %v3047_v23 = vmul.f32 0.2, %v2919_v11  ;;  %v3950_v19 = vpack.c.bf16 %v3110_v21, %v3109_v58  ;;  %v3048_v29 = vmul.f32 0.2, %v2920_v3 }
 0x36e   : > { %vm2985_vm0 = vcmp.gt.f32.partialorder %v2921_v16, 0.0  ;;  %vm2986_vm1 = vcmp.gt.f32.partialorder %v2922_v22, 0.0  ;;  %v3049_v48 = vmul.f32 0.2, %v2921_v16  ;;  %v3050_v17 = vmul.f32 0.2, %v2922_v22 }
 0x36f   : > { %v3111_v42 = vsel %vm2983_vm14, %v2919_v11, %v3047_v23  ;;  %4050 = vst [vmem:[%s5938_s4 + $0x70] sm:$0xff] %v3950_v19   ;;  %v3112_v15 = vsel %vm2984_vm15, %v2920_v3, %v3048_v29  ;;  %v2923_v62 = vadd.f32 %v5453_v34, %v2852_v13  ;;  %v6065_v35 = vsub.f32 %v5151_v20, %v5295_v1 }
 0x370   : > { %v6066_v2 = vsub.f32 %v5156_v28, %v5295_v1  ;;  %v3955_v61 = vpack.c.bf16 %v3112_v15, %v3111_v42  ;;  %v3113_v33 = vsel %vm2985_vm0, %v2921_v16, %v3049_v48  ;;  %v3114_v12 = vsel %vm2986_vm1, %v2922_v22, %v3050_v17  ;;  %v6074_v15 = vld [vmem:[#allocation8_spill] sm:$0xff] }
 0x371   : > { %v2783_v46 = vmul.f32 %v5419_v40, %v6065_v35  ;;  %v2924_v27 = vadd.f32 %v5453_v34, %v2853_v53  ;;  %v3960_v60 = vpack.c.bf16 %v3114_v12, %v3113_v33  ;;  %vm2987_vm2 = vcmp.gt.f32.partialorder %v2923_v62, 0.0  ;;  %v6078_v12 = vld [vmem:[#allocation10_spill] sm:$0xff] }
 0x372   : > { %v2784_v6 = vmul.f32 %v5419_v40, %v6066_v2  ;;  %v3051_v36 = vmul.f32 0.2, %v2923_v62  ;;  %4051 = vst [vmem:[%s5938_s4 + $0x78] sm:$0xff] %v3955_v61   ;;  %v6067_v10 = vsub.f32 %v5161_v39, %v5295_v1  ;;  %v6068_v30 = vsub.f32 %v5166_v47, %v5295_v1 }
 0x373   : > { %v2854_v25 = vmul.f32 %v5424_v55, %v2783_v46  ;;  %vm2988_vm3 = vcmp.gt.f32.partialorder %v2924_v27, 0.0  ;;  %v3052_v20 = vmul.f32 0.2, %v2924_v27  ;;  %4052 = vst [vmem:[%s5938_s4 + $0x80] sm:$0xff] %v3960_v60   ;;  %v6069_v32 = vsub.f32 %v5171_v57, %v5295_v1  ;;  %v6076_v46 = vld [vmem:[#allocation9_spill] sm:$0xff] }
 0x374   : > { %v2855_v28 = vmul.f32 %v5424_v55, %v2784_v6  ;;  %v2785_v26 = vmul.f32 %v5419_v40, %v6067_v10  ;;  %v3115_v50 = vsel %vm2987_vm2, %v2923_v62, %v3051_v36  ;;  %v2786_v59 = vmul.f32 %v5419_v40, %v6068_v30 }
 0x375   : > { %v2925_v14 = vadd.f32 %v5453_v34, %v2854_v25  ;;  %v2787_v37 = vmul.f32 %v5419_v40, %v6069_v32  ;;  %v3116_v39 = vsel %vm2988_vm3, %v2924_v27, %v3052_v20  ;;  %v6070_v24 = vsub.f32 %v6007_v51, %v5295_v1 }
 0x376   : > { %v2926_v54 = vadd.f32 %v5453_v34, %v2855_v28  ;;  %v2856_v18 = vmul.f32 %v5424_v55, %v2785_v26  ;;  %v3965_v0 = vpack.c.bf16 %v3116_v39, %v3115_v50  ;;  %v2857_v49 = vmul.f32 %v5424_v55, %v2786_v59  ;;  %v6080_v59 = vld [vmem:[#allocation11_spill] sm:$0xff] }
 0x377   : > { %v2788_v41 = vmul.f32 %v5419_v40, %v6070_v24  ;;  %vm2989_vm4 = vcmp.gt.f32.partialorder %v2925_v14, 0.0  ;;  %v3053_v47 = vmul.f32 0.2, %v2925_v14  ;;  %v2858_v5 = vmul.f32 %v5424_v55, %v2787_v37 }
 0x378   : > { %vm2990_vm5 = vcmp.gt.f32.partialorder %v2926_v54, 0.0  ;;  %v3054_v38 = vmul.f32 0.2, %v2926_v54  ;;  %v2927_v57 = vadd.f32 %v5453_v34, %v2856_v18  ;;  %4053 = vst [vmem:[%s5938_s4 + $0x88] sm:$0xff] %v3965_v0   ;;  %v2928_v51 = vadd.f32 %v5453_v34, %v2857_v49 }
 0x379   : > { %v3117_v56 = vsel %vm2989_vm4, %v2925_v14, %v3053_v47  ;;  %v2859_v43 = vmul.f32 %v5424_v55, %v2788_v41  ;;  %v6071_v63 = vsub.f32 %v6008_v52, %v5295_v1  ;;  %v2929_v31 = vadd.f32 %v5453_v34, %v2858_v5 }
 0x37a   : > { %v3118_v8 = vsel %vm2990_vm5, %v2926_v54, %v3054_v38  ;;  %vm2991_vm6 = vcmp.gt.f32.partialorder %v2927_v57, 0.0  ;;  %v3055_v7 = vmul.f32 0.2, %v2927_v57  ;;  %vm2992_vm7 = vcmp.gt.f32.partialorder %v2928_v51, 0.0 }
 0x37b   : > { %v2789_v9 = vmul.f32 %v5419_v40, %v6071_v63  ;;  %v3970_v45 = vpack.c.bf16 %v3118_v8, %v3117_v56  ;;  %v3056_v11 = vmul.f32 0.2, %v2928_v51  ;;  %v2930_v3 = vadd.f32 %v5453_v34, %v2859_v43  ;;  %v6084_v43 = vld [vmem:[#allocation13_spill] sm:$0xff] }
 0x37c   : > { %v3119_v58 = vsel %vm2991_vm6, %v2927_v57, %v3055_v7  ;;  %vm2993_vm8 = vcmp.gt.f32.partialorder %v2929_v31, 0.0  ;;  %v3057_v16 = vmul.f32 0.2, %v2929_v31  ;;  %v6072_v22 = vsub.f32 %v6009_v44, %v5295_v1  ;;  %v6082_v57 = vld [vmem:[#allocation12_spill] sm:$0xff] }
 0x37d   : > { %4054 = vst [vmem:[%s5938_s4 + $0x90] sm:$0xff] %v3970_v45   ;;  %v3120_v13 = vsel %vm2992_vm7, %v2928_v51, %v3056_v11  ;;  %vm2994_vm9 = vcmp.gt.f32.partialorder %v2930_v3, 0.0  ;;  %v3058_v21 = vmul.f32 0.2, %v2930_v3  ;;  %v2860_v23 = vmul.f32 %v5424_v55, %v2789_v9  ;;  %v6086_v45 = vld [vmem:[#allocation14_spill] sm:$0xff] }
 0x37e   : > { %v2790_v52 = vmul.f32 %v5419_v40, %v6072_v22  ;;  %v3975_v19 = vpack.c.bf16 %v3120_v13, %v3119_v58  ;;  %v3121_v29 = vsel %vm2993_vm8, %v2929_v31, %v3057_v16  ;;  %v6073_v48 = vsub.f32 %v6010_v4, %v5295_v1 }
 0x37f   : > { %v3122_v17 = vsel %vm2994_vm9, %v2930_v3, %v3058_v21  ;;  %v2931_v53 = vadd.f32 %v5453_v34, %v2860_v23  ;;  %v6075_v62 = vsub.f32 %v6074_v15, %v5295_v1  ;;  %v6077_v2 = vsub.f32 %v6076_v46, %v5295_v1  ;;  %v6088_v21 = vld [vmem:[#allocation15_spill] sm:$0xff] }
 0x380   : > { %v2861_v42 = vmul.f32 %v5424_v55, %v2790_v52  ;;  %v2791_v44 = vmul.f32 %v5419_v40, %v6073_v48  ;;  %4055 = vst [vmem:[%s5938_s4 + $0x98] sm:$0xff] %v3975_v19   ;;  %v3980_v4 = vpack.c.bf16 %v3122_v17, %v3121_v29  ;;  %v6079_v27 = vsub.f32 %v6078_v12, %v5295_v1  ;;  %v6090_v29 = vld [vmem:[#allocation16_spill] sm:$0xff] }
 0x381   : > { %v2792_v35 = vmul.f32 %v5419_v40, %v6075_v62  ;;  %v2793_v6 = vmul.f32 %v5419_v40, %v6077_v2  ;;  %vm2995_vm10 = vcmp.gt.f32.partialorder %v2931_v53, 0.0  ;;  %v3059_v36 = vmul.f32 0.2, %v2931_v53 }
 0x382   : > { %v2932_v61 = vadd.f32 %v5453_v34, %v2861_v42  ;;  %v2862_v33 = vmul.f32 %v5424_v55, %v2791_v44  ;;  %v2794_v60 = vmul.f32 %v5419_v40, %v6079_v27  ;;  %4056 = vst [vmem:[%s5938_s4 + $0xa0] sm:$0xff] %v3980_v4   ;;  %v6081_v32 = vsub.f32 %v6080_v59, %v5295_v1  ;;  %v6092_v44 = vld [vmem:[#allocation17_spill] sm:$0xff]  ;;  %v6094_v4 = vld [vmem:[#allocation18_spill] sm:$0xff] }
 0x383   : > { %v2863_v25 = vmul.f32 %v5424_v55, %v2792_v35  ;;  %v2864_v20 = vmul.f32 %v5424_v55, %v2793_v6  ;;  %v3123_v50 = vsel %vm2995_vm10, %v2931_v53, %v3059_v36  ;;  %v6083_v5 = vsub.f32 %v6082_v57, %v5295_v1 }
 0x384   : > { %vm2996_vm11 = vcmp.gt.f32.partialorder %v2932_v61, 0.0  ;;  %v3060_v28 = vmul.f32 0.2, %v2932_v61  ;;  %v2933_v10 = vadd.f32 %v5453_v34, %v2862_v33  ;;  %v2865_v26 = vmul.f32 %v5424_v55, %v2794_v60 }
 0x385   : > { %v2934_v14 = vadd.f32 %v5453_v34, %v2863_v25  ;;  %v2935_v30 = vadd.f32 %v5453_v34, %v2864_v20  ;;  %v2795_v37 = vmul.f32 %v5419_v40, %v6081_v32  ;;  %v2796_v56 = vmul.f32 %v5419_v40, %v6083_v5  ;;  %v6100_v5 = vld [vmem:[#allocation21_spill] sm:$0xff] }
 0x386   : > { %v3124_v39 = vsel %vm2996_vm11, %v2932_v61, %v3060_v28  ;;  %vm2997_vm12 = vcmp.gt.f32.partialorder %v2933_v10, 0.0  ;;  %v3061_v54 = vmul.f32 0.2, %v2933_v10  ;;  %v2936_v18 = vadd.f32 %v5453_v34, %v2865_v26 }
 0x387   : > { %v3985_v24 = vpack.c.bf16 %v3124_v39, %v3123_v50  ;;  %vm2998_vm13 = vcmp.gt.f32.partialorder %v2934_v14, 0.0  ;;  %v3062_v41 = vmul.f32 0.2, %v2934_v14  ;;  %vm2999_vm14 = vcmp.gt.f32.partialorder %v2935_v30, 0.0 }
 0x388   : > { %v3125_v0 = vsel %vm2997_vm12, %v2933_v10, %v3061_v54  ;;  %vm3000_vm15 = vcmp.gt.f32.partialorder %v2936_v18, 0.0  ;;  %v3063_v47 = vmul.f32 0.2, %v2935_v30  ;;  %v3064_v49 = vmul.f32 0.2, %v2936_v18 }
 0x389   : > { %4057 = vst [vmem:[%s5938_s4 + $0xa8] sm:$0xff] %v3985_v24   ;;  %v3126_v38 = vsel %vm2998_vm13, %v2934_v14, %v3062_v41  ;;  %v2866_v51 = vmul.f32 %v5424_v55, %v2795_v37  ;;  %v6085_v63 = vsub.f32 %v6084_v43, %v5295_v1  ;;  %v6087_v11 = vsub.f32 %v6086_v45, %v5295_v1  ;;  %v6102_v43 = vld [vmem:[#allocation22_spill] sm:$0xff] }
 0x38a   : > { %v3990_v8 = vpack.c.bf16 %v3126_v38, %v3125_v0  ;;  %v3127_v7 = vsel %vm2999_vm14, %v2935_v30, %v3063_v47  ;;  %v3128_v31 = vsel %vm3000_vm15, %v2936_v18, %v3064_v49  ;;  %v2867_v16 = vmul.f32 %v5424_v55, %v2796_v56  ;;  %v6096_v18 = vld [vmem:[#allocation19_spill] sm:$0xff]  ;;  %v6098_v0 = vld [vmem:[#allocation20_spill] sm:$0xff] }
 0x38b   : > { %v2797_v9 = vmul.f32 %v5419_v40, %v6085_v63  ;;  %v2798_v3 = vmul.f32 %v5419_v40, %v6087_v11  ;;  %v3995_v58 = vpack.c.bf16 %v3128_v31, %v3127_v7  ;;  %v2937_v22 = vadd.f32 %v5453_v34, %v2866_v51 }
 0x38c   : > { %4058 = vst [vmem:[%s5938_s4 + $0xb0] sm:$0xff] %v3990_v8   ;;  %v6089_v23 = vsub.f32 %v6088_v21, %v5295_v1  ;;  %v6091_v42 = vsub.f32 %v6090_v29, %v5295_v1  ;;  %v6093_v17 = vsub.f32 %v6092_v44, %v5295_v1  ;;  %v2938_v15 = vadd.f32 %v5453_v34, %v2867_v16  ;;  %v6106_v21 = vld [vmem:[#allocation24_spill] sm:$0xff] }
 0x38d   : > { %v2868_v52 = vmul.f32 %v5424_v55, %v2797_v9  ;;  %v2869_v13 = vmul.f32 %v5424_v55, %v2798_v3  ;;  %4059 = vst [vmem:[%s5938_s4 + $0xb8] sm:$0xff] %v3995_v58   ;;  %vm3001_vm0 = vcmp.gt.f32.partialorder %v2937_v22, 0.0  ;;  %v3065_v62 = vmul.f32 0.2, %v2937_v22 }
 0x38e   : > { %v2799_v19 = vmul.f32 %v5419_v40, %v6089_v23  ;;  %v2800_v48 = vmul.f32 %v5419_v40, %v6091_v42  ;;  %v2801_v53 = vmul.f32 %v5419_v40, %v6093_v17  ;;  %v6095_v61 = vsub.f32 %v6094_v4, %v5295_v1 }
 0x38f   : > { %v2939_v35 = vadd.f32 %v5453_v34, %v2868_v52  ;;  %v2940_v46 = vadd.f32 %v5453_v34, %v2869_v13  ;;  %vm3002_vm1 = vcmp.gt.f32.partialorder %v2938_v15, 0.0  ;;  %v3066_v12 = vmul.f32 0.2, %v2938_v15 }
 0x390   : > { %v2870_v2 = vmul.f32 %v5424_v55, %v2799_v19  ;;  %v2871_v6 = vmul.f32 %v5424_v55, %v2800_v48  ;;  %v2802_v33 = vmul.f32 %v5419_v40, %v6095_v61  ;;  %v3129_v27 = vsel %vm3001_vm0, %v2937_v22, %v3065_v62  ;;  %v6104_v22 = vld [vmem:[#allocation23_spill] sm:$0xff] }
 0x391   : > { %vm3003_vm2 = vcmp.gt.f32.partialorder %v2939_v35, 0.0  ;;  %vm3004_vm3 = vcmp.gt.f32.partialorder %v2940_v46, 0.0  ;;  %v3067_v60 = vmul.f32 0.2, %v2939_v35  ;;  %v3068_v36 = vmul.f32 0.2, %v2940_v46 }
 0x392   : > { %v2941_v25 = vadd.f32 %v5453_v34, %v2870_v2  ;;  %v3130_v20 = vsel %vm3002_vm1, %v2938_v15, %v3066_v12  ;;  %v2942_v28 = vadd.f32 %v5453_v34, %v2871_v6  ;;  %v2872_v10 = vmul.f32 %v5424_v55, %v2801_v53 }
 0x393   : > { %v2873_v26 = vmul.f32 %v5424_v55, %v2802_v33  ;;  %v4000_v50 = vpack.c.bf16 %v3130_v20, %v3129_v27  ;;  %v3131_v14 = vsel %vm3003_vm2, %v2939_v35, %v3067_v60  ;;  %v3132_v30 = vsel %vm3004_vm3, %v2940_v46, %v3068_v36 }
 0x394   : > { %vm3005_vm4 = vcmp.gt.f32.partialorder %v2941_v25, 0.0  ;;  %v4005_v59 = vpack.c.bf16 %v3132_v30, %v3131_v14  ;;  %vm3006_vm5 = vcmp.gt.f32.partialorder %v2942_v28, 0.0  ;;  %v3069_v32 = vmul.f32 0.2, %v2941_v25  ;;  %v6110_v14 = vld [vmem:[#allocation26_spill] sm:$0xff] }
 0x395   : > { %v3070_v37 = vmul.f32 0.2, %v2942_v28  ;;  %4060 = vst [vmem:[%s5938_s4 + $0xc0] sm:$0xff] %v4000_v50   ;;  %v2943_v39 = vadd.f32 %v5453_v34, %v2872_v10  ;;  %v2944_v54 = vadd.f32 %v5453_v34, %v2873_v26  ;;  %v6097_v24 = vsub.f32 %v6096_v18, %v5295_v1 }
 0x396   : > { %v6099_v47 = vsub.f32 %v6098_v0, %v5295_v1  ;;  %4061 = vst [vmem:[%s5938_s4 + $0xc8] sm:$0xff] %v4005_v59   ;;  %v3133_v38 = vsel %vm3005_vm4, %v2941_v25, %v3069_v32  ;;  %v6101_v56 = vsub.f32 %v6100_v5, %v5295_v1  ;;  %v6103_v63 = vsub.f32 %v6102_v43, %v5295_v1  ;;  %v6108_v25 = vld [vmem:[#allocation25_spill] sm:$0xff] }
 0x397   : > { %v2803_v41 = vmul.f32 %v5419_v40, %v6097_v24  ;;  %v3134_v57 = vsel %vm3006_vm5, %v2942_v28, %v3070_v37  ;;  %vm3007_vm6 = vcmp.gt.f32.partialorder %v2943_v39, 0.0  ;;  %vm3008_vm7 = vcmp.gt.f32.partialorder %v2944_v54, 0.0 }
 0x398   : > { %v2804_v49 = vmul.f32 %v5419_v40, %v6099_v47  ;;  %v2805_v51 = vmul.f32 %v5419_v40, %v6101_v56  ;;  %v2806_v9 = vmul.f32 %v5419_v40, %v6103_v63  ;;  %v4010_v8 = vpack.c.bf16 %v3134_v57, %v3133_v38 }
 0x399   : > { %v3071_v7 = vmul.f32 0.2, %v2943_v39  ;;  %v3072_v31 = vmul.f32 0.2, %v2944_v54  ;;  %v2874_v45 = vmul.f32 %v5424_v55, %v2803_v41  ;;  %v6105_v52 = vsub.f32 %v6104_v22, %v5295_v1 }
 0x39a   : > { %v2875_v11 = vmul.f32 %v5424_v55, %v2804_v49  ;;  %v2876_v3 = vmul.f32 %v5424_v55, %v2805_v51  ;;  %4062 = vst [vmem:[%s5938_s4 + $0xd0] sm:$0xff] %v4010_v8   ;;  %v2877_v16 = vmul.f32 %v5424_v55, %v2806_v9  ;;  %v6107_v23 = vsub.f32 %v6106_v21, %v5295_v1 }
 0x39b   : > { %v3135_v58 = vsel %vm3007_vm6, %v2943_v39, %v3071_v7  ;;  %v2807_v13 = vmul.f32 %v5419_v40, %v6105_v52  ;;  %v3136_v29 = vsel %vm3008_vm7, %v2944_v54, %v3072_v31  ;;  %v2945_v42 = vadd.f32 %v5453_v34, %v2874_v45 }
 0x39c   : > { %v2808_v19 = vmul.f32 %v5419_v40, %v6107_v23  ;;  %v2946_v48 = vadd.f32 %v5453_v34, %v2875_v11  ;;  %v2947_v44 = vadd.f32 %v5453_v34, %v2876_v3  ;;  %v4015_v17 = vpack.c.bf16 %v3136_v29, %v3135_v58 }
 0x39d   : > { %v2948_v53 = vadd.f32 %v5453_v34, %v2877_v16  ;;  %v2878_v15 = vmul.f32 %v5424_v55, %v2807_v13  ;;  %vm3009_vm8 = vcmp.gt.f32.partialorder %v2945_v42, 0.0  ;;  %v3073_v35 = vmul.f32 0.2, %v2945_v42 }
 0x39e   : > { %v2879_v62 = vmul.f32 %v5424_v55, %v2808_v19  ;;  %vm3010_vm9 = vcmp.gt.f32.partialorder %v2946_v48, 0.0  ;;  %v3074_v46 = vmul.f32 0.2, %v2946_v48  ;;  %4063 = vst [vmem:[%s5938_s4 + $0xd8] sm:$0xff] %v4015_v17   ;;  %vm3011_vm10 = vcmp.gt.f32.partialorder %v2947_v44, 0.0 }
 0x39f   : > { %vm3012_vm11 = vcmp.gt.f32.partialorder %v2948_v53, 0.0  ;;  %v3075_v2 = vmul.f32 0.2, %v2947_v44  ;;  %v3076_v6 = vmul.f32 0.2, %v2948_v53  ;;  %v3137_v4 = vsel %vm3009_vm8, %v2945_v42, %v3073_v35 }
 0x3a0   : > { %v3138_v61 = vsel %vm3010_vm9, %v2946_v48, %v3074_v46  ;;  %v2949_v33 = vadd.f32 %v5453_v34, %v2878_v15  ;;  %v2950_v12 = vadd.f32 %v5453_v34, %v2879_v62  ;;  %v6109_v20 = vsub.f32 %v6108_v25, %v5295_v1 }
 0x3a1   : > { %v4020_v27 = vpack.c.bf16 %v3138_v61, %v3137_v4  ;;  %v3139_v60 = vsel %vm3011_vm10, %v2947_v44, %v3075_v2  ;;  %v3140_v36 = vsel %vm3012_vm11, %v2948_v53, %v3076_v6  ;;  %v6111_v30 = vsub.f32 %v6110_v14, %v5295_v1 }
 0x3a2   : > { %v2809_v28 = vmul.f32 %v5419_v40, %v6109_v20  ;;  %v4025_v10 = vpack.c.bf16 %v3140_v36, %v3139_v60  ;;  %vm3013_vm12 = vcmp.gt.f32.partialorder %v2949_v33, 0.0  ;;  %vm3014_vm13 = vcmp.gt.f32.partialorder %v2950_v12, 0.0 }
 0x3a3   : > { %v3077_v26 = vmul.f32 0.2, %v2949_v33  ;;  %4064 = vst [vmem:[%s5938_s4 + $0xe0] sm:$0xff] %v4020_v27   ;;  %v3078_v50 = vmul.f32 0.2, %v2950_v12  ;;  %v2810_v59 = vmul.f32 %v5419_v40, %v6111_v30 }
 0x3a4   : > { %v2880_v32 = vmul.f32 %v5424_v55, %v2809_v28  ;;  %4065 = vst [vmem:[%s5938_s4 + $0xe8] sm:$0xff] %v4025_v10  }
 0x3a5   : > { %v3141_v37 = vsel %vm3013_vm12, %v2949_v33, %v3077_v26  ;;  %v3142_v39 = vsel %vm3014_vm13, %v2950_v12, %v3078_v50  ;;  %v2881_v54 = vmul.f32 %v5424_v55, %v2810_v59 }
 0x3a6   : > { %v2951_v18 = vadd.f32 %v5453_v34, %v2880_v32  ;;  %v4030_v24 = vpack.c.bf16 %v3142_v39, %v3141_v37 }
 0x3a7   : > { %v2952_v41 = vadd.f32 %v5453_v34, %v2881_v54 }
 0x3a8   : > { %vm3015_vm14 = vcmp.gt.f32.partialorder %v2951_v18, 0.0  ;;  %v3079_v0 = vmul.f32 0.2, %v2951_v18  ;;  %4066 = vst [vmem:[%s5938_s4 + $0xf0] sm:$0xff] %v4030_v24  }
 0x3a9   : > { %vm3016_vm15 = vcmp.gt.f32.partialorder %v2952_v41, 0.0  ;;  %v3080_v1 = vmul.f32 0.2, %v2952_v41 }
 0x3aa   : > { %v3143_v40 = vsel %vm3015_vm14, %v2951_v18, %v3079_v0 }
 0x3ab   : > { %v3144_v47 = vsel %vm3016_vm15, %v2952_v41, %v3080_v1 }
 0x3ac   : > { %v4035_v49 = vpack.c.bf16 %v3144_v47, %v3143_v40 }
 0x3ae   : > { %4067 = vst [vmem:[%s5938_s4 + $0xf8] sm:$0xff] %v4035_v49  }
 0x3af PF: > { %s14_s19 = sadd.s32 1, %s4374_s19   ;;  %s6112_s15 = smov %s4362_s16 }
 0x3b0   : > { %p11_p12 = scmp.ge.s32.totalorder %s14_s19, 4   ;;  %s6113_s16 = smov %s4438_s23 }
 0x3b1   : > { %s6114_s17 = smov %s4370_s18  ;;  %s6115_s18 = smov %s6117_s20 }
 0x3b2   :  { %13 = sbr.rel (!%p11_p12) target bundleno = 3 (0x3), region = 111 }

// kernel: discriminator_forward.7
= control target key start
LH: loop header
LB: loop body
LE: loop exit
PB: predicated region body
PF: predicated region fallthrough
CT: control target
= control target key end

     0   :  { %s3088_s0 = inlined_call_operand.vmem [shape: bf16[128,2048], index: 0, kind: input, shape index: {}]   ;;  %s3089_s1 = inlined_call_operand.vmem [shape: bf16[2048,256], index: 1, kind: input, shape index: {}]   ;;  %s3090_s2 = inlined_call_operand.vmem [shape: f32[1,256], index: 2, kind: input, shape index: {}]   ;;  %s3091_s3 = inlined_call_operand.vmem [shape: f32[1,256], index: 3, kind: input, shape index: {}]   ;;  %s3092_s4 = inlined_call_operand.vmem [shape: bf16[128,256], index: 4, kind: output, shape index: {}]  }
   0x1   :  { %3096 = sst [smem:[#allocation9_spill]] %s3088_s0 }
   0x2   :  { %3097 = sst [smem:[#allocation10_spill]] %s3089_s1 }
   0x3   :  { %s2430_s15 = smov 0   ;;  %s2432_s16 = smov 0  }
   0x4   :  { %s2434_s17 = smov 0   ;;  %s2436_s18 = smov 0  }
   0x5   :  { %s2438_s19 = smov 0   ;;  %s2440_s20 = smov 0  }
   0x6   :  { %s2442_s21 = smov 0   ;;  %s2444_s22 = smov 0  }
   0x7   :  { %s2446_s23 = smov 0   ;;  %s2448_s24 = smov 0  }
   0x8   :  { %s2450_s25 = smov 0  }
   0x9 LB: > { %3098 = sst [smem:[#allocation6_spill]] %s2398_s24  ;;  %s1849_s26 = sadd.s32 4294967295, %s2402_s25   ;;  %s2402_s25 = sphi %s2450_s25, %s14_s25   ;;  %s2398_s24 = sphi %s2448_s24, %s3108_s24   ;;  %s2394_s23 = sphi %s2446_s23, %s3116_s23   ;;  %s2390_s22 = sphi %s2444_s22, %s3106_s22   ;;  %s2386_s21 = sphi %s2442_s21, %s3115_s21   ;;  %s2382_s20 = sphi %s2440_s20, %s3114_s20   ;;  %s2378_s19 = sphi %s2438_s19, %s3113_s19   ;;  %s2374_s18 = sphi %s2436_s18, %s3112_s18   ;;  %s2370_s17 = sphi %s2434_s17, %s3111_s17   ;;  %s2366_s16 = sphi %s2432_s16, %s3110_s16   ;;  %s2362_s15 = sphi %s2430_s15, %s3109_s15  }
   0xa   : > { %s23_s27 = sadd.s32 1, %s2394_s23  ;;  %s26_s28 = sadd.s32 1, %s2398_s24 }
   0xb   : > { %p24_p0 = scmp.ge.s32.totalorder %s23_s27, 4  ;;  %s33_s29 = sadd.s32 1, %s2382_s20 }
   0xc   : > { %p40_p1 = scmp.ne.s32.totalorder %s2382_s20, %s2378_s19  ;;  %p41_p2 = scmp.eq.s32.totalorder %s2402_s25, 0 }
   0xd   : > { %s3118_s27 = smov (%p24_p0, %s23_s27), 0  ;;  %s3120_s28 = smov (!%p24_p0, %s26_s28), %s2398_s24 }
   0xe   : > { %3099 = sst [smem:[#allocation7_spill]] %s3118_s27  ;;  %s30_s30 = ssub.s32 %s2394_s23, %s3118_s27 }
   0xf   : > { %p28_p3 = scmp.ge.s32.totalorder %s3120_s28, 2  ;;  %p31_p4 = scmp.eq.s32.totalorder %s30_s30, 0 }
  0x10   : > { %p2497_p5 = por %p41_p2, %p40_p1  ;;  %s61_s6 = sadd.s32 1, %s2374_s18 }
  0x11   : > { %s3122_s28 = smov (%p28_p3, %s3120_s28), 0  ;;  %p68_p6 = scmp.ne.s32.totalorder %s2374_s18, %s2370_s17 }
  0x12   : > { %3101 = sst [smem:[#allocation8_spill]] %s3122_s28  ;;  %s57_s8 = ssub.s32 %s2398_s24, %s3122_s28 }
  0x13   : > { %s2505_s7 = scalar_select %p31_p4, %s2382_s20, %s33_s29  }
  0x14   : > { %s58_s9 = sor.u32 %s57_s8, %s30_s30  ;;  %p137_p7 = scmp.eq.s32.totalorder %s57_s8, 0 }
  0x15   : > { %p59_p8 = scmp.eq.s32.totalorder %s58_s9, 0  ;;  %p2511_p9 = por %p68_p6, %p41_p2 }
  0x16   : > { %s139_s11 = sadd.s32 1, %s2366_s16  ;;  %p149_p10 = scmp.ne.s32.totalorder %s2366_s16, %s2362_s15 }
  0x17   : > { %s2519_s12 = scalar_select %p59_p8, %s2374_s18, %s61_s6  }
  0x18   : > { %s2522_s13 = scalar_select %p137_p7, %s2366_s16, %s139_s11  }
  0x19   : > { %p150_p11 = scmp.eq.s32.totalorder %s1849_s26, 7  ;;  %p1852_p13 = scmp.ge.s32.totalorder %s2402_s25, 8 }
  0x1b   : > { %p2524_p12 = por %p150_p11, %p149_p10  ;;  %172 = sbr.rel (%p1852_p13) target bundleno = 112 (0x70), region = 16 }
  0x22   : > { %175 = sbr.rel (!%p2497_p5) target bundleno = 60 (0x3c), region = 20  ;;  %s177_s29 = sand.u32 (%p2497_p5), 1, %s2382_s20  }
  0x23   : > { %s1952_s30 = sshll.u32 (%p2497_p5), %s2394_s23, 4  ;;  %s1853_s8 = sshll.u32 (%p2497_p5), %s177_s29, 8 }
  0x24   : > { %s3104_s0 = sld [smem:[#allocation9_spill]] (%p2497_p5)  ;;  %s2541_s26 = scalar_lea.vmem (%p2497_p5), [#allocation3], %s1853_s8 }
  0x2a   : > { %s2536_s11 = scalar_lea.vmem %s3104_s0, %s1952_s30 }
  0x2b   : > { %v195_v0 = vld [vmem:[%s2536_s11] sm:$0xff]  ;;  %v197_v1 = vld [vmem:[%s2536_s11 + $0x8] sm:$0xff] }
  0x2c   : > { %v199_v2 = vld [vmem:[%s2536_s11 + $0x40] sm:$0xff]  ;;  %196 = vst [vmem:[%s2541_s26] sm:$0xff] %v195_v0  ;;  %198 = vst [vmem:[%s2541_s26 + $0x8] sm:$0xff] %v197_v1  ;;  %v201_v3 = vld [vmem:[%s2536_s11 + $0x48] sm:$0xff] }
  0x2d   : > { %200 = vst [vmem:[%s2541_s26 + $0x10] sm:$0xff] %v199_v2  ;;  %v203_v4 = vld [vmem:[%s2536_s11 + $0x80] sm:$0xff]  ;;  %v205_v5 = vld [vmem:[%s2536_s11 + $0x88] sm:$0xff]  ;;  %202 = vst [vmem:[%s2541_s26 + $0x18] sm:$0xff] %v201_v3 }
  0x2e   : > { %204 = vst [vmem:[%s2541_s26 + $0x20] sm:$0xff] %v203_v4  ;;  %206 = vst [vmem:[%s2541_s26 + $0x28] sm:$0xff] %v205_v5  ;;  %v207_v6 = vld [vmem:[%s2536_s11 + $0xc0] sm:$0xff]  ;;  %v209_v7 = vld [vmem:[%s2536_s11 + $0xc8] sm:$0xff] }
  0x2f   : > { %v211_v8 = vld [vmem:[%s2536_s11 + $0x100] sm:$0xff]  ;;  %208 = vst [vmem:[%s2541_s26 + $0x30] sm:$0xff] %v207_v6  ;;  %210 = vst [vmem:[%s2541_s26 + $0x38] sm:$0xff] %v209_v7  ;;  %v213_v9 = vld [vmem:[%s2536_s11 + $0x108] sm:$0xff] }
  0x30   : > { %212 = vst [vmem:[%s2541_s26 + $0x40] sm:$0xff] %v211_v8  ;;  %v215_v10 = vld [vmem:[%s2536_s11 + $0x140] sm:$0xff]  ;;  %v217_v11 = vld [vmem:[%s2536_s11 + $0x148] sm:$0xff]  ;;  %214 = vst [vmem:[%s2541_s26 + $0x48] sm:$0xff] %v213_v9 }
  0x31   : > { %216 = vst [vmem:[%s2541_s26 + $0x50] sm:$0xff] %v215_v10  ;;  %218 = vst [vmem:[%s2541_s26 + $0x58] sm:$0xff] %v217_v11  ;;  %v219_v12 = vld [vmem:[%s2536_s11 + $0x180] sm:$0xff]  ;;  %v221_v13 = vld [vmem:[%s2536_s11 + $0x188] sm:$0xff] }
  0x32   : > { %v223_v14 = vld [vmem:[%s2536_s11 + $0x1c0] sm:$0xff]  ;;  %220 = vst [vmem:[%s2541_s26 + $0x60] sm:$0xff] %v219_v12  ;;  %222 = vst [vmem:[%s2541_s26 + $0x68] sm:$0xff] %v221_v13  ;;  %v225_v15 = vld [vmem:[%s2536_s11 + $0x1c8] sm:$0xff] }
  0x33   : > { %224 = vst [vmem:[%s2541_s26 + $0x70] sm:$0xff] %v223_v14  ;;  %v227_v16 = vld [vmem:[%s2536_s11 + $0x200] sm:$0xff]  ;;  %v229_v17 = vld [vmem:[%s2536_s11 + $0x208] sm:$0xff]  ;;  %226 = vst [vmem:[%s2541_s26 + $0x78] sm:$0xff] %v225_v15 }
  0x34   : > { %228 = vst [vmem:[%s2541_s26 + $0x80] sm:$0xff] %v227_v16  ;;  %230 = vst [vmem:[%s2541_s26 + $0x88] sm:$0xff] %v229_v17  ;;  %v231_v18 = vld [vmem:[%s2536_s11 + $0x240] sm:$0xff]  ;;  %v233_v19 = vld [vmem:[%s2536_s11 + $0x248] sm:$0xff] }
  0x35   : > { %v235_v20 = vld [vmem:[%s2536_s11 + $0x280] sm:$0xff]  ;;  %232 = vst [vmem:[%s2541_s26 + $0x90] sm:$0xff] %v231_v18  ;;  %234 = vst [vmem:[%s2541_s26 + $0x98] sm:$0xff] %v233_v19  ;;  %v237_v21 = vld [vmem:[%s2536_s11 + $0x288] sm:$0xff] }
  0x36   : > { %236 = vst [vmem:[%s2541_s26 + $0xa0] sm:$0xff] %v235_v20  ;;  %v239_v22 = vld [vmem:[%s2536_s11 + $0x2c0] sm:$0xff]  ;;  %v241_v23 = vld [vmem:[%s2536_s11 + $0x2c8] sm:$0xff]  ;;  %238 = vst [vmem:[%s2541_s26 + $0xa8] sm:$0xff] %v237_v21 }
  0x37   : > { %240 = vst [vmem:[%s2541_s26 + $0xb0] sm:$0xff] %v239_v22  ;;  %242 = vst [vmem:[%s2541_s26 + $0xb8] sm:$0xff] %v241_v23  ;;  %v243_v24 = vld [vmem:[%s2536_s11 + $0x300] sm:$0xff]  ;;  %v245_v25 = vld [vmem:[%s2536_s11 + $0x308] sm:$0xff] }
  0x38   : > { %v247_v26 = vld [vmem:[%s2536_s11 + $0x340] sm:$0xff]  ;;  %244 = vst [vmem:[%s2541_s26 + $0xc0] sm:$0xff] %v243_v24  ;;  %246 = vst [vmem:[%s2541_s26 + $0xc8] sm:$0xff] %v245_v25  ;;  %v249_v27 = vld [vmem:[%s2536_s11 + $0x348] sm:$0xff] }
  0x39   : > { %248 = vst [vmem:[%s2541_s26 + $0xd0] sm:$0xff] %v247_v26  ;;  %v251_v28 = vld [vmem:[%s2536_s11 + $0x380] sm:$0xff]  ;;  %v253_v29 = vld [vmem:[%s2536_s11 + $0x388] sm:$0xff]  ;;  %250 = vst [vmem:[%s2541_s26 + $0xd8] sm:$0xff] %v249_v27 }
  0x3a   : > { %252 = vst [vmem:[%s2541_s26 + $0xe0] sm:$0xff] %v251_v28  ;;  %254 = vst [vmem:[%s2541_s26 + $0xe8] sm:$0xff] %v253_v29  ;;  %v255_v30 = vld [vmem:[%s2536_s11 + $0x3c0] sm:$0xff]  ;;  %v257_v31 = vld [vmem:[%s2536_s11 + $0x3c8] sm:$0xff] }
  0x3b   : > { %256 = vst [vmem:[%s2541_s26 + $0xf0] sm:$0xff] %v255_v30  ;;  %258 = vst [vmem:[%s2541_s26 + $0xf8] sm:$0xff] %v257_v31 }
  0x3c PF: > { %264 = sbr.rel (!%p2511_p9) target bundleno = 112 (0x70), region = 43  ;;  %s266_s5 = sand.u32 (%p2511_p9), 1, %s2374_s18  }
  0x3d   : > { %s1953_s29 = sshll.u32 (%p2511_p9), %s2394_s23, 7  ;;  %s1856_s30 = sshll.u32 (%p2511_p9), %s266_s5, 8 }
  0x3e   : > { %s271_s8 = sadd.s32 (%p2511_p9), %s2398_s24, %s1953_s29  ;;  %s3105_s1 = sld [smem:[#allocation10_spill]] (%p2511_p9) }
  0x3f   : > { %s1859_s6 = sshll.u32 (%p2511_p9), %s271_s8, 2  ;;  %s2617_s10 = scalar_lea.vmem (%p2511_p9), [#allocation4], %s1856_s30 }
  0x44   : > { %s2612_s28 = scalar_lea.vmem %s3105_s1, %s1859_s6 }
  0x45   : > { %v289_v32 = vld [vmem:[%s2612_s28] sm:$0xf]  ;;  %v291_v33 = vld [vmem:[%s2612_s28 + $0x8] sm:$0xf]  ;;  %v293_v34 = vld [vmem:[%s2612_s28 + $0x10] sm:$0xf] }
  0x46   : > { %290 = vst [vmem:[%s2617_s10] sm:$0xf] %v289_v32  ;;  %292 = vst [vmem:[%s2617_s10 + $0x4] sm:$0xf] %v291_v33  ;;  %v295_v35 = vld [vmem:[%s2612_s28 + $0x18] sm:$0xf] }
  0x47   : > { %294 = vst [vmem:[%s2617_s10 + $0x8] sm:$0xf] %v293_v34  ;;  %v297_v36 = vld [vmem:[%s2612_s28 + $0x20] sm:$0xf]  ;;  %v299_v37 = vld [vmem:[%s2612_s28 + $0x28] sm:$0xf] }
  0x48   : > { %296 = vst [vmem:[%s2617_s10 + $0xc] sm:$0xf] %v295_v35  ;;  %298 = vst [vmem:[%s2617_s10 + $0x10] sm:$0xf] %v297_v36  ;;  %v301_v38 = vld [vmem:[%s2612_s28 + $0x30] sm:$0xf] }
  0x49   : > { %300 = vst [vmem:[%s2617_s10 + $0x14] sm:$0xf] %v299_v37  ;;  %v303_v39 = vld [vmem:[%s2612_s28 + $0x38] sm:$0xf]  ;;  %v305_v40 = vld [vmem:[%s2612_s28 + $0x40] sm:$0xf] }
  0x4a   : > { %302 = vst [vmem:[%s2617_s10 + $0x18] sm:$0xf] %v301_v38  ;;  %304 = vst [vmem:[%s2617_s10 + $0x1c] sm:$0xf] %v303_v39  ;;  %v307_v41 = vld [vmem:[%s2612_s28 + $0x48] sm:$0xf] }
  0x4b   : > { %306 = vst [vmem:[%s2617_s10 + $0x20] sm:$0xf] %v305_v40  ;;  %v309_v42 = vld [vmem:[%s2612_s28 + $0x50] sm:$0xf]  ;;  %v311_v43 = vld [vmem:[%s2612_s28 + $0x58] sm:$0xf] }
  0x4c   : > { %308 = vst [vmem:[%s2617_s10 + $0x24] sm:$0xf] %v307_v41  ;;  %310 = vst [vmem:[%s2617_s10 + $0x28] sm:$0xf] %v309_v42  ;;  %v313_v44 = vld [vmem:[%s2612_s28 + $0x60] sm:$0xf] }
  0x4d   : > { %312 = vst [vmem:[%s2617_s10 + $0x2c] sm:$0xf] %v311_v43  ;;  %v315_v45 = vld [vmem:[%s2612_s28 + $0x68] sm:$0xf]  ;;  %v317_v46 = vld [vmem:[%s2612_s28 + $0x70] sm:$0xf] }
  0x4e   : > { %314 = vst [vmem:[%s2617_s10 + $0x30] sm:$0xf] %v313_v44  ;;  %316 = vst [vmem:[%s2617_s10 + $0x34] sm:$0xf] %v315_v45  ;;  %v319_v47 = vld [vmem:[%s2612_s28 + $0x78] sm:$0xf] }
  0x4f   : > { %318 = vst [vmem:[%s2617_s10 + $0x38] sm:$0xf] %v317_v46  ;;  %v321_v48 = vld [vmem:[%s2612_s28 + $0x80] sm:$0xf]  ;;  %v323_v49 = vld [vmem:[%s2612_s28 + $0x88] sm:$0xf] }
  0x50   : > { %320 = vst [vmem:[%s2617_s10 + $0x3c] sm:$0xf] %v319_v47  ;;  %322 = vst [vmem:[%s2617_s10 + $0x40] sm:$0xf] %v321_v48  ;;  %v325_v50 = vld [vmem:[%s2612_s28 + $0x90] sm:$0xf] }
  0x51   : > { %324 = vst [vmem:[%s2617_s10 + $0x44] sm:$0xf] %v323_v49  ;;  %v327_v51 = vld [vmem:[%s2612_s28 + $0x98] sm:$0xf]  ;;  %v329_v52 = vld [vmem:[%s2612_s28 + $0xa0] sm:$0xf] }
  0x52   : > { %326 = vst [vmem:[%s2617_s10 + $0x48] sm:$0xf] %v325_v50  ;;  %328 = vst [vmem:[%s2617_s10 + $0x4c] sm:$0xf] %v327_v51  ;;  %v331_v53 = vld [vmem:[%s2612_s28 + $0xa8] sm:$0xf] }
  0x53   : > { %330 = vst [vmem:[%s2617_s10 + $0x50] sm:$0xf] %v329_v52  ;;  %v333_v54 = vld [vmem:[%s2612_s28 + $0xb0] sm:$0xf]  ;;  %v335_v55 = vld [vmem:[%s2612_s28 + $0xb8] sm:$0xf] }
  0x54   : > { %332 = vst [vmem:[%s2617_s10 + $0x54] sm:$0xf] %v331_v53  ;;  %334 = vst [vmem:[%s2617_s10 + $0x58] sm:$0xf] %v333_v54  ;;  %v337_v56 = vld [vmem:[%s2612_s28 + $0xc0] sm:$0xf] }
  0x55   : > { %336 = vst [vmem:[%s2617_s10 + $0x5c] sm:$0xf] %v335_v55  ;;  %v339_v57 = vld [vmem:[%s2612_s28 + $0xc8] sm:$0xf]  ;;  %v341_v58 = vld [vmem:[%s2612_s28 + $0xd0] sm:$0xf] }
  0x56   : > { %338 = vst [vmem:[%s2617_s10 + $0x60] sm:$0xf] %v337_v56  ;;  %340 = vst [vmem:[%s2617_s10 + $0x64] sm:$0xf] %v339_v57  ;;  %v343_v59 = vld [vmem:[%s2612_s28 + $0xd8] sm:$0xf] }
  0x57   : > { %342 = vst [vmem:[%s2617_s10 + $0x68] sm:$0xf] %v341_v58  ;;  %v345_v60 = vld [vmem:[%s2612_s28 + $0xe0] sm:$0xf]  ;;  %v347_v61 = vld [vmem:[%s2612_s28 + $0xe8] sm:$0xf] }
  0x58   : > { %344 = vst [vmem:[%s2617_s10 + $0x6c] sm:$0xf] %v343_v59  ;;  %346 = vst [vmem:[%s2617_s10 + $0x70] sm:$0xf] %v345_v60  ;;  %v349_v62 = vld [vmem:[%s2612_s28 + $0xf0] sm:$0xf] }
  0x59   : > { %348 = vst [vmem:[%s2617_s10 + $0x74] sm:$0xf] %v347_v61  ;;  %v351_v63 = vld [vmem:[%s2612_s28 + $0xf8] sm:$0xf]  ;;  %v353_v0 = vld [vmem:[%s2612_s28 + $0x100] sm:$0xf] }
  0x5a   : > { %350 = vst [vmem:[%s2617_s10 + $0x78] sm:$0xf] %v349_v62  ;;  %352 = vst [vmem:[%s2617_s10 + $0x7c] sm:$0xf] %v351_v63  ;;  %v355_v1 = vld [vmem:[%s2612_s28 + $0x108] sm:$0xf] }
  0x5b   : > { %354 = vst [vmem:[%s2617_s10 + $0x80] sm:$0xf] %v353_v0  ;;  %v357_v2 = vld [vmem:[%s2612_s28 + $0x110] sm:$0xf]  ;;  %v359_v3 = vld [vmem:[%s2612_s28 + $0x118] sm:$0xf] }
  0x5c   : > { %356 = vst [vmem:[%s2617_s10 + $0x84] sm:$0xf] %v355_v1  ;;  %358 = vst [vmem:[%s2617_s10 + $0x88] sm:$0xf] %v357_v2  ;;  %v361_v4 = vld [vmem:[%s2612_s28 + $0x120] sm:$0xf] }
  0x5d   : > { %360 = vst [vmem:[%s2617_s10 + $0x8c] sm:$0xf] %v359_v3  ;;  %v363_v5 = vld [vmem:[%s2612_s28 + $0x128] sm:$0xf]  ;;  %v365_v6 = vld [vmem:[%s2612_s28 + $0x130] sm:$0xf] }
  0x5e   : > { %362 = vst [vmem:[%s2617_s10 + $0x90] sm:$0xf] %v361_v4  ;;  %364 = vst [vmem:[%s2617_s10 + $0x94] sm:$0xf] %v363_v5  ;;  %v367_v7 = vld [vmem:[%s2612_s28 + $0x138] sm:$0xf] }
  0x5f   : > { %366 = vst [vmem:[%s2617_s10 + $0x98] sm:$0xf] %v365_v6  ;;  %v369_v8 = vld [vmem:[%s2612_s28 + $0x140] sm:$0xf]  ;;  %v371_v9 = vld [vmem:[%s2612_s28 + $0x148] sm:$0xf] }
  0x60   : > { %368 = vst [vmem:[%s2617_s10 + $0x9c] sm:$0xf] %v367_v7  ;;  %370 = vst [vmem:[%s2617_s10 + $0xa0] sm:$0xf] %v369_v8  ;;  %v373_v10 = vld [vmem:[%s2612_s28 + $0x150] sm:$0xf] }
  0x61   : > { %372 = vst [vmem:[%s2617_s10 + $0xa4] sm:$0xf] %v371_v9  ;;  %v375_v11 = vld [vmem:[%s2612_s28 + $0x158] sm:$0xf]  ;;  %v377_v12 = vld [vmem:[%s2612_s28 + $0x160] sm:$0xf] }
  0x62   : > { %374 = vst [vmem:[%s2617_s10 + $0xa8] sm:$0xf] %v373_v10  ;;  %376 = vst [vmem:[%s2617_s10 + $0xac] sm:$0xf] %v375_v11  ;;  %v379_v13 = vld [vmem:[%s2612_s28 + $0x168] sm:$0xf] }
  0x63   : > { %378 = vst [vmem:[%s2617_s10 + $0xb0] sm:$0xf] %v377_v12  ;;  %v381_v14 = vld [vmem:[%s2612_s28 + $0x170] sm:$0xf]  ;;  %v383_v15 = vld [vmem:[%s2612_s28 + $0x178] sm:$0xf] }
  0x64   : > { %380 = vst [vmem:[%s2617_s10 + $0xb4] sm:$0xf] %v379_v13  ;;  %382 = vst [vmem:[%s2617_s10 + $0xb8] sm:$0xf] %v381_v14  ;;  %v385_v16 = vld [vmem:[%s2612_s28 + $0x180] sm:$0xf] }
  0x65   : > { %384 = vst [vmem:[%s2617_s10 + $0xbc] sm:$0xf] %v383_v15  ;;  %v387_v17 = vld [vmem:[%s2612_s28 + $0x188] sm:$0xf]  ;;  %v389_v18 = vld [vmem:[%s2612_s28 + $0x190] sm:$0xf] }
  0x66   : > { %386 = vst [vmem:[%s2617_s10 + $0xc0] sm:$0xf] %v385_v16  ;;  %388 = vst [vmem:[%s2617_s10 + $0xc4] sm:$0xf] %v387_v17  ;;  %v391_v19 = vld [vmem:[%s2612_s28 + $0x198] sm:$0xf] }
  0x67   : > { %390 = vst [vmem:[%s2617_s10 + $0xc8] sm:$0xf] %v389_v18  ;;  %v393_v20 = vld [vmem:[%s2612_s28 + $0x1a0] sm:$0xf]  ;;  %v395_v21 = vld [vmem:[%s2612_s28 + $0x1a8] sm:$0xf] }
  0x68   : > { %392 = vst [vmem:[%s2617_s10 + $0xcc] sm:$0xf] %v391_v19  ;;  %394 = vst [vmem:[%s2617_s10 + $0xd0] sm:$0xf] %v393_v20  ;;  %v397_v22 = vld [vmem:[%s2612_s28 + $0x1b0] sm:$0xf] }
  0x69   : > { %396 = vst [vmem:[%s2617_s10 + $0xd4] sm:$0xf] %v395_v21  ;;  %v399_v23 = vld [vmem:[%s2612_s28 + $0x1b8] sm:$0xf]  ;;  %v401_v24 = vld [vmem:[%s2612_s28 + $0x1c0] sm:$0xf] }
  0x6a   : > { %398 = vst [vmem:[%s2617_s10 + $0xd8] sm:$0xf] %v397_v22  ;;  %400 = vst [vmem:[%s2617_s10 + $0xdc] sm:$0xf] %v399_v23  ;;  %v403_v25 = vld [vmem:[%s2612_s28 + $0x1c8] sm:$0xf] }
  0x6b   : > { %402 = vst [vmem:[%s2617_s10 + $0xe0] sm:$0xf] %v401_v24  ;;  %v405_v26 = vld [vmem:[%s2612_s28 + $0x1d0] sm:$0xf]  ;;  %v407_v27 = vld [vmem:[%s2612_s28 + $0x1d8] sm:$0xf] }
  0x6c   : > { %404 = vst [vmem:[%s2617_s10 + $0xe4] sm:$0xf] %v403_v25  ;;  %406 = vst [vmem:[%s2617_s10 + $0xe8] sm:$0xf] %v405_v26  ;;  %v409_v28 = vld [vmem:[%s2612_s28 + $0x1e0] sm:$0xf] }
  0x6d   : > { %408 = vst [vmem:[%s2617_s10 + $0xec] sm:$0xf] %v407_v27  ;;  %v411_v29 = vld [vmem:[%s2612_s28 + $0x1e8] sm:$0xf]  ;;  %v413_v30 = vld [vmem:[%s2612_s28 + $0x1f0] sm:$0xf] }
  0x6e   : > { %410 = vst [vmem:[%s2617_s10 + $0xf0] sm:$0xf] %v409_v28  ;;  %412 = vst [vmem:[%s2617_s10 + $0xf4] sm:$0xf] %v411_v29  ;;  %v415_v31 = vld [vmem:[%s2612_s28 + $0x1f8] sm:$0xf] }
  0x6f   : > { %414 = vst [vmem:[%s2617_s10 + $0xf8] sm:$0xf] %v413_v30  ;;  %416 = vst [vmem:[%s2617_s10 + $0xfc] sm:$0xf] %v415_v31 }
  0x70 PF: > { %p1860_p0 = scmp.ge.s32.totalorder %s2402_s25, 1  ;;  %p578_p1 = scmp.lt.s32.totalorder %s2402_s25, 9 }
  0x72   : > { %p579_p2 = pnand %p1860_p0, %p578_p1 }
  0x73   : > { %s585_s0 = sand.u32 (!%p579_p2), 1, %s2378_s19   ;;  %s592_s11 = sand.u32 (!%p579_p2), 1, %s2370_s17  }
  0x74   : > { %582 = sbr.rel (%p579_p2) target bundleno = 530 (0x212), region = 92  ;;  %s1861_s26 = sshll.u32 (!%p579_p2), %s585_s0, 8 }
  0x75   : > { %s1862_s5 = sshll.u32 (!%p579_p2), %s592_s11, 8  ;;  %s623_s29 = sand.u32 (!%p579_p2), 1, %s2362_s15  }
  0x76   : > { %p628_p3 = scmp.lt.s32.totalorder (!%p579_p2), %s2390_s22, 1  ;;  %s1863_s28 = sshll.u32 (!%p579_p2), %s623_s29, 6 }
  0x77   : > { %s2761_s24 = scalar_lea.vmem (!%p579_p2), [#allocation3], %s1861_s26  ;;  %s2763_s17 = scalar_lea.vmem (!%p579_p2), [#allocation4], %s1862_s5 }
  0x78   : > { %s2765_s19 = scalar_lea.vmem (!%p579_p2), [#allocation5], %s1863_s28  ;;  %p1864_p4 = scmp.ne.s32.totalorder (!%p579_p2), %s2386_s21, 0 }
  0x7b   : > { %s2751_s30 = scalar_select %p628_p3, %s2390_s22, 1 }
  0x7c   : > { %638 = sbr.rel (%p1864_p4) target bundleno = 133 (0x85), region = 104  ;;  %v2404_v32 = vmov (!%p1864_p4), 0.0  }
  0x7d   : > { %s630_s9 = scalar_lea.vmem %s3090_s2, %s2751_s30  ;;  %s633_s27 = scalar_lea.vmem %s3091_s3, %s2751_s30  ;;  %639 = vst [vmem:[#allocation2] sm:$0xff] (!%p1864_p4), %v2404_v32  ;;  %640 = vst [vmem:[#allocation2 + $0x8] sm:$0xff] (!%p1864_p4), %v2404_v32 }
  0x7e   : > { %641 = vst [vmem:[#allocation2 + $0x10] sm:$0xff] (!%p1864_p4), %v2404_v32  ;;  %642 = vst [vmem:[#allocation2 + $0x18] sm:$0xff] (!%p1864_p4), %v2404_v32 }
  0x7f   : > { %643 = vst [vmem:[#allocation2 + $0x20] sm:$0xff] (!%p1864_p4), %v2404_v32  ;;  %644 = vst [vmem:[#allocation2 + $0x28] sm:$0xff] (!%p1864_p4), %v2404_v32 }
  0x80   : > { %645 = vst [vmem:[#allocation2 + $0x30] sm:$0xff] (!%p1864_p4), %v2404_v32  ;;  %646 = vst [vmem:[#allocation2 + $0x38] sm:$0xff] (!%p1864_p4), %v2404_v32 }
  0x81   : > { %647 = vst [vmem:[#allocation2 + $0x40] sm:$0xff] (!%p1864_p4), %v2404_v32  ;;  %648 = vst [vmem:[#allocation2 + $0x48] sm:$0xff] (!%p1864_p4), %v2404_v32 }
  0x82   : > { %649 = vst [vmem:[#allocation2 + $0x50] sm:$0xff] (!%p1864_p4), %v2404_v32  ;;  %650 = vst [vmem:[#allocation2 + $0x58] sm:$0xff] (!%p1864_p4), %v2404_v32 }
  0x83   : > { %651 = vst [vmem:[#allocation2 + $0x60] sm:$0xff] %v2404_v32  ;;  %652 = vst [vmem:[#allocation2 + $0x68] sm:$0xff] %v2404_v32 }
  0x84   : > { %653 = vst [vmem:[#allocation2 + $0x70] sm:$0xff] %v2404_v32  ;;  %654 = vst [vmem:[#allocation2 + $0x78] sm:$0xff] %v2404_v32 }
  0x85 PF: > { %v2234_v33 = vld [vmem:[%s2763_s17 + $0x40] sm:$0xff]   ;;  %v2238_v37 = vld [vmem:[%s2763_s17 + $0x48] sm:$0xff]   ;;  %v2242_v41 = vld [vmem:[%s2763_s17 + $0x50] sm:$0xff]   ;;  %p1929_p5 = scmp.ne.s32.totalorder %s2386_s21, 3 }
  0x86   : > { %v2235_v34 = vld [vmem:[%s2763_s17 + $0xc0] sm:$0xff]   ;;  %2017 = vmatprep.subr.bf16.mxu0 %v2234_v33  ;;  %v2239_v38 = vld [vmem:[%s2763_s17 + $0xc8] sm:$0xff]   ;;  %v2243_v42 = vld [vmem:[%s2763_s17 + $0xd0] sm:$0xff]  }
  0x87   : > { %v2236_v35 = vld [vmem:[%s2763_s17] sm:$0xff]   ;;  %2081 = vmatprep.subr.bf16.mxu1 %v2235_v34  ;;  %v2240_v39 = vld [vmem:[%s2763_s17 + $0x8] sm:$0xff]   ;;  %v2244_v43 = vld [vmem:[%s2763_s17 + $0x10] sm:$0xff]  }
  0x88   : > { %v2237_v36 = vld [vmem:[%s2763_s17 + $0x80] sm:$0xff]   ;;  %2018 = vmatpush3.bf16.msra.mxu0 %v2236_v35  ;;  %v2241_v40 = vld [vmem:[%s2763_s17 + $0x88] sm:$0xff]   ;;  %v2245_v44 = vld [vmem:[%s2763_s17 + $0x90] sm:$0xff]  }
  0x89   : > { %2082 = vmatpush3.bf16.msra.mxu1 %v2237_v36  ;;  %2019 = vmatprep.subr.bf16.mxu0 %v2238_v37  ;;  %v2246_v45 = vld [vmem:[%s2763_s17 + $0x58] sm:$0xff]   ;;  %v2250_v49 = vld [vmem:[%s2763_s17 + $0x60] sm:$0xff]   ;;  %v2254_v53 = vld [vmem:[%s2763_s17 + $0x68] sm:$0xff]  }
  0x8a   : > { %2083 = vmatprep.subr.bf16.mxu1 %v2239_v38  ;;  %v2247_v46 = vld [vmem:[%s2763_s17 + $0xd8] sm:$0xff]   ;;  %v2251_v50 = vld [vmem:[%s2763_s17 + $0xe0] sm:$0xff]   ;;  %v2255_v54 = vld [vmem:[%s2763_s17 + $0xe8] sm:$0xff]  }
  0x8b   : > { %v2248_v47 = vld [vmem:[%s2763_s17 + $0x18] sm:$0xff]   ;;  %v2252_v51 = vld [vmem:[%s2763_s17 + $0x20] sm:$0xff]   ;;  %v2256_v55 = vld [vmem:[%s2763_s17 + $0x28] sm:$0xff]  }
  0x8c   : > { %2020 = vmatpush3.bf16.msra.mxu0 %v2240_v39  ;;  %v2249_v48 = vld [vmem:[%s2763_s17 + $0x98] sm:$0xff]   ;;  %v2253_v52 = vld [vmem:[%s2763_s17 + $0xa0] sm:$0xff]   ;;  %v2257_v56 = vld [vmem:[%s2763_s17 + $0xa8] sm:$0xff]  }
  0x8d   : > { %2084 = vmatpush3.bf16.msra.mxu1 %v2241_v40  ;;  %2021 = vmatprep.subr.bf16.mxu0 %v2242_v41  ;;  %v2258_v57 = vld [vmem:[%s2763_s17 + $0x70] sm:$0xff]   ;;  %v2262_v61 = vld [vmem:[%s2763_s17 + $0x78] sm:$0xff]  }
  0x8e   : > { %2085 = vmatprep.subr.bf16.mxu1 %v2243_v42  ;;  %v2259_v58 = vld [vmem:[%s2763_s17 + $0xf0] sm:$0xff]   ;;  %v2263_v62 = vld [vmem:[%s2763_s17 + $0xf8] sm:$0xff]   ;;  %v655_v42 = vld [vmem:[#allocation2] sm:$0xff] }
  0x8f   : > { %v2260_v59 = vld [vmem:[%s2763_s17 + $0x30] sm:$0xff]   ;;  %v2264_v63 = vld [vmem:[%s2763_s17 + $0x38] sm:$0xff]  }
  0x90   : > { %2022 = vmatpush3.bf16.msra.mxu0 %v2244_v43  ;;  %v2261_v60 = vld [vmem:[%s2763_s17 + $0xb0] sm:$0xff]   ;;  %v2265_v0 = vld [vmem:[%s2763_s17 + $0xb8] sm:$0xff]  }
  0x91   : > { %2086 = vmatpush3.bf16.msra.mxu1 %v2245_v44  ;;  %2023 = vmatprep.subr.bf16.mxu0 %v2246_v45  ;;  %v2266_v1 = vld [vmem:[%s2761_s24] ss:$16 sps:$4 sm:$0xff]   ;;  %v2268_v2 = vld [vmem:[%s2761_s24 + $0x4] ss:$16 sps:$4 sm:$0xff]   ;;  %v2269_v3 = vld [vmem:[%s2761_s24 + $0x8] ss:$16 sps:$4 sm:$0xff]  }
  0x92   : > { %2087 = vmatprep.subr.bf16.mxu1 %v2247_v46  ;;  %v2271_v4 = vld [vmem:[%s2761_s24 + $0xc] ss:$16 sps:$4 sm:$0xff]   ;;  %1151 = vmatprep.mubr.bf16.mxu0 %v2268_v2  ;;  %v2272_v5 = vld [vmem:[%s2761_s24 + $0x24] ss:$16 sps:$4 sm:$0xff]   ;;  %v2276_v7 = vld [vmem:[%s2761_s24 + $0x20] ss:$16 sps:$4 sm:$0xff]  }
  0x93   : > { %1248 = vmatprep.mubr.bf16.mxu1 %v2271_v4  ;;  %v2274_v6 = vld [vmem:[%s2761_s24 + $0x2c] ss:$16 sps:$4 sm:$0xff]   ;;  %v2277_v8 = vld [vmem:[%s2761_s24 + $0x28] ss:$16 sps:$4 sm:$0xff]   ;;  %v2278_v9 = vld [vmem:[%s2761_s24 + $0x44] ss:$16 sps:$4 sm:$0xff]  }
  0x94   : > { %2024 = vmatpush3.bf16.msra.mxu0 %v2248_v47  ;;  %v2280_v10 = vld [vmem:[%s2761_s24 + $0x4c] ss:$16 sps:$4 sm:$0xff]   ;;  %v2282_v11 = vld [vmem:[%s2761_s24 + $0x40] ss:$16 sps:$4 sm:$0xff]   ;;  %v2283_v12 = vld [vmem:[%s2761_s24 + $0x48] ss:$16 sps:$4 sm:$0xff]  }
  0x95   : > { %2088 = vmatpush3.bf16.msra.mxu1 %v2249_v48  ;;  %2025 = vmatprep.subr.bf16.mxu0 %v2250_v49  ;;  %v2284_v13 = vld [vmem:[%s2761_s24 + $0x64] ss:$16 sps:$4 sm:$0xff]   ;;  %v2286_v14 = vld [vmem:[%s2761_s24 + $0x6c] ss:$16 sps:$4 sm:$0xff]   ;;  %v2288_v15 = vld [vmem:[%s2761_s24 + $0x60] ss:$16 sps:$4 sm:$0xff]  }
  0x96   : > { %2089 = vmatprep.subr.bf16.mxu1 %v2251_v50  ;;  %v2289_v16 = vld [vmem:[%s2761_s24 + $0x68] ss:$16 sps:$4 sm:$0xff]   ;;  %v2290_v17 = vld [vmem:[%s2761_s24 + $0x84] ss:$16 sps:$4 sm:$0xff]   ;;  %v2292_v18 = vld [vmem:[%s2761_s24 + $0x8c] ss:$16 sps:$4 sm:$0xff]  }
  0x97   : > { %v2294_v19 = vld [vmem:[%s2761_s24 + $0x80] ss:$16 sps:$4 sm:$0xff]   ;;  %v2295_v20 = vld [vmem:[%s2761_s24 + $0x88] ss:$16 sps:$4 sm:$0xff]   ;;  %v2296_v21 = vld [vmem:[%s2761_s24 + $0xa4] ss:$16 sps:$4 sm:$0xff]  }
  0x98   : > { %2026 = vmatpush3.bf16.msra.mxu0 %v2252_v51  ;;  %v2298_v22 = vld [vmem:[%s2761_s24 + $0xac] ss:$16 sps:$4 sm:$0xff]   ;;  %v2300_v23 = vld [vmem:[%s2761_s24 + $0xa0] ss:$16 sps:$4 sm:$0xff]   ;;  %v2301_v24 = vld [vmem:[%s2761_s24 + $0xa8] ss:$16 sps:$4 sm:$0xff]  }
  0x99   : > { %2090 = vmatpush3.bf16.msra.mxu1 %v2253_v52  ;;  %2027 = vmatprep.subr.bf16.mxu0 %v2254_v53  ;;  %v2302_v25 = vld [vmem:[%s2761_s24 + $0xc4] ss:$16 sps:$4 sm:$0xff]   ;;  %v2304_v26 = vld [vmem:[%s2761_s24 + $0xcc] ss:$16 sps:$4 sm:$0xff]   ;;  %v2306_v27 = vld [vmem:[%s2761_s24 + $0xc0] ss:$16 sps:$4 sm:$0xff]  }
  0x9a   : > { %2091 = vmatprep.subr.bf16.mxu1 %v2255_v54  ;;  %v2307_v28 = vld [vmem:[%s2761_s24 + $0xc8] ss:$16 sps:$4 sm:$0xff]   ;;  %v2308_v29 = vld [vmem:[%s2761_s24 + $0xe4] ss:$16 sps:$4 sm:$0xff]   ;;  %v2310_v30 = vld [vmem:[%s2761_s24 + $0xec] ss:$16 sps:$4 sm:$0xff]  }
  0x9b   : > { %v2312_v31 = vld [vmem:[%s2761_s24 + $0xe0] ss:$16 sps:$4 sm:$0xff]   ;;  %v2313_v32 = vld [vmem:[%s2761_s24 + $0xe8] ss:$16 sps:$4 sm:$0xff]  }
  0x9c   : > { %2028 = vmatpush3.bf16.msra.mxu0 %v2256_v55  ;;  %v656_v47 = vld [vmem:[#allocation2 + $0x8] sm:$0xff] }
  0x9d   : > { %2092 = vmatpush3.bf16.msra.mxu1 %v2257_v56  ;;  %2029 = vmatprep.subr.bf16.mxu0 %v2258_v57 }
  0x9e   : > { %2093 = vmatprep.subr.bf16.mxu1 %v2259_v58 }
  0xa0   : > { %2030 = vmatpush3.bf16.msra.mxu0 %v2260_v59 }
  0xa1   : > { %2094 = vmatpush3.bf16.msra.mxu1 %v2261_v60  ;;  %2031 = vmatprep.subr.bf16.mxu0 %v2262_v61  ;;  %v657_v60 = vld [vmem:[#allocation2 + $0x10] sm:$0xff] }
  0xa2   : > { %2095 = vmatprep.subr.bf16.mxu1 %v2263_v62 }
  0xa4   : > { %2032 = vmatpush3.bf16.msra.mxu0 %v2264_v63 }
  0xa5   : > { %2096 = vmatpush3.bf16.msra.mxu1 %v2265_v0 }
  0xa7   : > { %1152 = vmatmul.mubr.bf16.vlgmr.msra.gmra.mrb[0].mxu0 %v2266_v1  ;;  %v658_v1 = vld [vmem:[#allocation2 + $0x18] sm:$0xff] }
  0xa8   : > { %1249 = vmatmul.mubr.bf16.vlgmr.msra.gmra.mrb[0].mxu1 %v2269_v3  ;;  %1159 = vmatprep.mubr.bf16.mxu0 %v2272_v5 }
  0xa9   : > { %1256 = vmatprep.mubr.bf16.mxu1 %v2274_v6 }
  0xaf   : > { %1160 = vmatmul.mubr.bf16.gmra.mrb[4].mxu0 %v2276_v7 }
  0xb0   : > { %1257 = vmatmul.mubr.bf16.gmra.mrb[4].mxu1 %v2277_v8  ;;  %1167 = vmatprep.mubr.bf16.mxu0 %v2278_v9 }
  0xb1   : > { %1264 = vmatprep.mubr.bf16.mxu1 %v2280_v10 }
  0xb7   : > { %1168 = vmatmul.mubr.bf16.gmra.mrb[8].mxu0 %v2282_v11 }
  0xb8   : > { %1265 = vmatmul.mubr.bf16.gmra.mrb[8].mxu1 %v2283_v12  ;;  %1175 = vmatprep.mubr.bf16.mxu0 %v2284_v13 }
  0xb9   : > { %1272 = vmatprep.mubr.bf16.mxu1 %v2286_v14  ;;  %v659_v14 = vld [vmem:[#allocation2 + $0x20] sm:$0xff] }
  0xbf   : > { %1176 = vmatmul.mubr.bf16.gmra.mrb[12].mxu0 %v2288_v15 }
  0xc0   : > { %1273 = vmatmul.mubr.bf16.gmra.mrb[12].mxu1 %v2289_v16  ;;  %1183 = vmatprep.mubr.bf16.mxu0 %v2290_v17 }
  0xc1   : > { %1280 = vmatprep.mubr.bf16.mxu1 %v2292_v18 }
  0xc7   : > { %1184 = vmatmul.mubr.bf16.gmra.mrb[16].mxu0 %v2294_v19  ;;  %v660_v19 = vld [vmem:[#allocation2 + $0x28] sm:$0xff] }
  0xc8   : > { %1281 = vmatmul.mubr.bf16.gmra.mrb[16].mxu1 %v2295_v20  ;;  %1191 = vmatprep.mubr.bf16.mxu0 %v2296_v21 }
  0xc9   : > { %1288 = vmatprep.mubr.bf16.mxu1 %v2298_v22 }
  0xcf   : > { %1192 = vmatmul.mubr.bf16.gmra.mrb[20].mxu0 %v2300_v23 }
  0xd0   : > { %1289 = vmatmul.mubr.bf16.gmra.mrb[20].mxu1 %v2301_v24  ;;  %1199 = vmatprep.mubr.bf16.mxu0 %v2302_v25 }
  0xd1   : > { %1296 = vmatprep.mubr.bf16.mxu1 %v2304_v26 }
  0xd7   : > { %1200 = vmatmul.mubr.bf16.gmra.mrb[24].mxu0 %v2306_v27 }
  0xd8   : > { %1297 = vmatmul.mubr.bf16.gmra.mrb[24].mxu1 %v2307_v28  ;;  %1207 = vmatprep.mubr.bf16.mxu0 %v2308_v29 }
  0xd9   : > { %1304 = vmatprep.mubr.bf16.mxu1 %v2310_v30 }
  0xdf   : > { %1208 = vmatmul.mubr.bf16.gmra.mrb[28].mxu0 %v2312_v31 }
  0xe0   : > { %1305 = vmatmul.mubr.bf16.gmra.mrb[28].mxu1 %v2313_v32  ;;  %v661_v32 = vld [vmem:[#allocation2 + $0x30] sm:$0xff] }
 0x17a   : > { %v2033_v33 = vpop.f32.mrb[0].mxu0 }
 0x17b   : > { %v2097_v34 = vpop.f32.mrb[0].mxu1  ;;  %v2034_v35 = vpop.f32.mrb[1].mxu0 }
 0x17c   : > { %v2035_v36 = vadd.f32 %v2034_v35, %v2033_v33  ;;  %v2098_v37 = vpop.f32.mrb[1].mxu1  ;;  %v2036_v38 = vpop.f32.mrb[2].mxu0 }
 0x17d   : > { %v2099_v39 = vadd.f32 %v2098_v37, %v2097_v34  ;;  %v2100_v40 = vpop.f32.mrb[2].mxu1  ;;  %v2037_v41 = vpop.f32.mrb[3].mxu0  ;;  %v662_v37 = vld [vmem:[#allocation2 + $0x38] sm:$0xff] }
 0x17e   : > { %v2038_v43 = vadd.f32 %v2037_v41, %v2036_v38  ;;  %v2101_v44 = vpop.f32.mrb[3].mxu1 }
 0x17f   : > { %v1251_v45 = vadd.f32 %v2099_v39, %v2035_v36  ;;  %v2102_v46 = vadd.f32 %v2101_v44, %v2100_v40 }
 0x181   : > { %v1313_v48 = vadd.f32 %v1251_v45, %v655_v42  ;;  %v1254_v49 = vadd.f32 %v2102_v46, %v2038_v43 }
 0x182   : > { %v2039_v50 = vpop.f32.mrb[4].mxu0 }
 0x183   : > { %1329 = vst [vmem:[#allocation2] sm:$0xff] %v1313_v48  ;;  %v1314_v51 = vadd.f32 %v1254_v49, %v656_v47  ;;  %v2103_v52 = vpop.f32.mrb[4].mxu1  ;;  %v2040_v53 = vpop.f32.mrb[5].mxu0 }
 0x184   : > { %v2041_v54 = vadd.f32 %v2040_v53, %v2039_v50  ;;  %v2104_v55 = vpop.f32.mrb[5].mxu1  ;;  %v2042_v56 = vpop.f32.mrb[6].mxu0  ;;  %v663_v50 = vld [vmem:[#allocation2 + $0x40] sm:$0xff] }
 0x185   : > { %1330 = vst [vmem:[#allocation2 + $0x8] sm:$0xff] %v1314_v51  ;;  %v2105_v57 = vadd.f32 %v2104_v55, %v2103_v52  ;;  %v2106_v58 = vpop.f32.mrb[6].mxu1  ;;  %v2043_v59 = vpop.f32.mrb[7].mxu0  ;;  %v664_v55 = vld [vmem:[#allocation2 + $0x48] sm:$0xff] }
 0x186   : > { %v2044_v61 = vadd.f32 %v2043_v59, %v2042_v56  ;;  %v2107_v62 = vpop.f32.mrb[7].mxu1 }
 0x187   : > { %v1259_v63 = vadd.f32 %v2105_v57, %v2041_v54  ;;  %v2108_v0 = vadd.f32 %v2107_v62, %v2106_v58 }
 0x189   : > { %v1315_v2 = vadd.f32 %v1259_v63, %v657_v60  ;;  %v1262_v3 = vadd.f32 %v2108_v0, %v2044_v61 }
 0x18a   : > { %v2045_v4 = vpop.f32.mrb[8].mxu0 }
 0x18b   : > { %1331 = vst [vmem:[#allocation2 + $0x10] sm:$0xff] %v1315_v2  ;;  %v1316_v5 = vadd.f32 %v1262_v3, %v658_v1  ;;  %v2109_v6 = vpop.f32.mrb[8].mxu1  ;;  %v2046_v7 = vpop.f32.mrb[9].mxu0 }
 0x18c   : > { %v2047_v8 = vadd.f32 %v2046_v7, %v2045_v4  ;;  %v2110_v9 = vpop.f32.mrb[9].mxu1  ;;  %v2048_v10 = vpop.f32.mrb[10].mxu0  ;;  %v665_v4 = vld [vmem:[#allocation2 + $0x50] sm:$0xff] }
 0x18d   : > { %1332 = vst [vmem:[#allocation2 + $0x18] sm:$0xff] %v1316_v5  ;;  %v2111_v11 = vadd.f32 %v2110_v9, %v2109_v6  ;;  %v2112_v12 = vpop.f32.mrb[10].mxu1  ;;  %v2049_v13 = vpop.f32.mrb[11].mxu0  ;;  %v666_v9 = vld [vmem:[#allocation2 + $0x58] sm:$0xff] }
 0x18e   : > { %v2050_v15 = vadd.f32 %v2049_v13, %v2048_v10  ;;  %v2113_v16 = vpop.f32.mrb[11].mxu1 }
 0x18f   : > { %v1267_v17 = vadd.f32 %v2111_v11, %v2047_v8  ;;  %v2114_v18 = vadd.f32 %v2113_v16, %v2112_v12 }
 0x191   : > { %v1317_v20 = vadd.f32 %v1267_v17, %v659_v14  ;;  %v1270_v21 = vadd.f32 %v2114_v18, %v2050_v15 }
 0x192   : > { %v2051_v22 = vpop.f32.mrb[12].mxu0 }
 0x193   : > { %1333 = vst [vmem:[#allocation2 + $0x20] sm:$0xff] %v1317_v20  ;;  %v1318_v23 = vadd.f32 %v1270_v21, %v660_v19  ;;  %v2115_v24 = vpop.f32.mrb[12].mxu1  ;;  %v2052_v25 = vpop.f32.mrb[13].mxu0 }
 0x194   : > { %v2053_v26 = vadd.f32 %v2052_v25, %v2051_v22  ;;  %v2116_v27 = vpop.f32.mrb[13].mxu1  ;;  %v2054_v28 = vpop.f32.mrb[14].mxu0  ;;  %v667_v22 = vld [vmem:[#allocation2 + $0x60] sm:$0xff] }
 0x195   : > { %1334 = vst [vmem:[#allocation2 + $0x28] sm:$0xff] %v1318_v23  ;;  %v2117_v29 = vadd.f32 %v2116_v27, %v2115_v24  ;;  %v2118_v30 = vpop.f32.mrb[14].mxu1  ;;  %v2055_v31 = vpop.f32.mrb[15].mxu0  ;;  %v668_v27 = vld [vmem:[#allocation2 + $0x68] sm:$0xff] }
 0x196   : > { %v2056_v33 = vadd.f32 %v2055_v31, %v2054_v28  ;;  %v2119_v34 = vpop.f32.mrb[15].mxu1 }
 0x197   : > { %v1275_v35 = vadd.f32 %v2117_v29, %v2053_v26  ;;  %v2120_v36 = vadd.f32 %v2119_v34, %v2118_v30 }
 0x199   : > { %v1319_v38 = vadd.f32 %v1275_v35, %v661_v32  ;;  %v1278_v39 = vadd.f32 %v2120_v36, %v2056_v33 }
 0x19a   : > { %v2057_v40 = vpop.f32.mrb[16].mxu0 }
 0x19b   : > { %1335 = vst [vmem:[#allocation2 + $0x30] sm:$0xff] %v1319_v38  ;;  %v1320_v41 = vadd.f32 %v1278_v39, %v662_v37  ;;  %v2121_v42 = vpop.f32.mrb[16].mxu1  ;;  %v2058_v43 = vpop.f32.mrb[17].mxu0 }
 0x19c   : > { %v2059_v44 = vadd.f32 %v2058_v43, %v2057_v40  ;;  %v2122_v45 = vpop.f32.mrb[17].mxu1  ;;  %v2060_v46 = vpop.f32.mrb[18].mxu0  ;;  %v669_v40 = vld [vmem:[#allocation2 + $0x70] sm:$0xff] }
 0x19d   : > { %1336 = vst [vmem:[#allocation2 + $0x38] sm:$0xff] %v1320_v41  ;;  %v2123_v47 = vadd.f32 %v2122_v45, %v2121_v42  ;;  %v2124_v48 = vpop.f32.mrb[18].mxu1  ;;  %v2061_v49 = vpop.f32.mrb[19].mxu0  ;;  %v670_v45 = vld [vmem:[#allocation2 + $0x78] sm:$0xff] }
 0x19e   : > { %v2062_v51 = vadd.f32 %v2061_v49, %v2060_v46  ;;  %v2125_v52 = vpop.f32.mrb[19].mxu1  ;;  %v2833_v49 = vld [vmem:[#allocation2] sm:$0xff] (!%p1929_p5) }
 0x19f   : > { %v1283_v53 = vadd.f32 %v2123_v47, %v2059_v44  ;;  %v2126_v54 = vadd.f32 %v2125_v52, %v2124_v48  ;;  %v2839_v52 = vld [vmem:[#allocation2 + $0x18] sm:$0xff] (!%p1929_p5) }
 0x1a1   : > { %v1321_v56 = vadd.f32 %v1283_v53, %v663_v50  ;;  %v1286_v57 = vadd.f32 %v2126_v54, %v2062_v51  ;;  %v2835_v50 = vld [vmem:[#allocation2 + $0x8] sm:$0xff] (!%p1929_p5)  ;;  %v2837_v51 = vld [vmem:[#allocation2 + $0x10] sm:$0xff] (!%p1929_p5)  ;;  %v1386_v54 = vmul.f32 (!%p1929_p5), %v2833_v49, %v2833_v49 }
 0x1a2   : > { %v2063_v58 = vpop.f32.mrb[20].mxu0  ;;  %v1365_v53 = vadd.f32 (!%p1929_p5), %v2835_v50, %v2833_v49 }
 0x1a3   : > { %1337 = vst [vmem:[#allocation2 + $0x40] sm:$0xff] %v1321_v56  ;;  %v1322_v59 = vadd.f32 %v1286_v57, %v664_v55  ;;  %v2127_v60 = vpop.f32.mrb[20].mxu1  ;;  %v2064_v61 = vpop.f32.mrb[21].mxu0  ;;  %v1387_v55 = vmul.f32 (!%p1929_p5), %v2835_v50, %v2835_v50  ;;  %v1388_v56 = vmul.f32 (!%p1929_p5), %v2837_v51, %v2837_v51  ;;  %v2849_v57 = vld [vmem:[#allocation2 + $0x20] sm:$0xff] (!%p1929_p5) }
 0x1a4   : > { %v2065_v62 = vadd.f32 %v2064_v61, %v2063_v58  ;;  %v2128_v63 = vpop.f32.mrb[21].mxu1  ;;  %v2066_v0 = vpop.f32.mrb[22].mxu0  ;;  %v1366_v58 = vadd.f32 (!%p1929_p5), %v1365_v53, %v2837_v51  ;;  %v2854_v61 = vld [vmem:[#allocation2 + $0x28] sm:$0xff] (!%p1929_p5) }
 0x1a5   : > { %1338 = vst [vmem:[#allocation2 + $0x48] sm:$0xff] %v1322_v59  ;;  %v2129_v1 = vadd.f32 %v2128_v63, %v2127_v60  ;;  %v2130_v2 = vpop.f32.mrb[22].mxu1  ;;  %v2067_v3 = vpop.f32.mrb[23].mxu0  ;;  %v1389_v59 = vmul.f32 (!%p1929_p5), %v2839_v52, %v2839_v52  ;;  %v1402_v60 = vadd.f32 (!%p1929_p5), %v1387_v55, %v1386_v54  ;;  %v1390_v63 = vmul.f32 (!%p1929_p5), %v2849_v57, %v2849_v57 }
 0x1a6   : > { %v2068_v5 = vadd.f32 %v2067_v3, %v2066_v0  ;;  %v2131_v6 = vpop.f32.mrb[23].mxu1  ;;  %v1391_v3 = vmul.f32 (!%p1929_p5), %v2854_v61, %v2854_v61 }
 0x1a7   : > { %v1291_v7 = vadd.f32 %v2129_v1, %v2065_v62  ;;  %v2132_v8 = vadd.f32 %v2131_v6, %v2130_v2  ;;  %v1367_v62 = vadd.f32 (!%p1929_p5), %v1366_v58, %v2839_v52  ;;  %v1403_v0 = vadd.f32 (!%p1929_p5), %v1402_v60, %v1388_v56  ;;  %v2859_v1 = vld [vmem:[#allocation2 + $0x30] sm:$0xff] (!%p1929_p5) }
 0x1a9   : > { %v1323_v10 = vadd.f32 %v1291_v7, %v665_v4  ;;  %v1294_v11 = vadd.f32 %v2132_v8, %v2068_v5  ;;  %v1368_v2 = vadd.f32 (!%p1929_p5), %v1367_v62, %v2849_v57  ;;  %v1404_v4 = vadd.f32 (!%p1929_p5), %v1403_v0, %v1389_v59  ;;  %v2864_v5 = vld [vmem:[#allocation2 + $0x38] sm:$0xff] (!%p1929_p5) }
 0x1aa   : > { %v2069_v12 = vpop.f32.mrb[24].mxu0  ;;  %v1392_v7 = vmul.f32 (!%p1929_p5), %v2859_v1, %v2859_v1 }
 0x1ab   : > { %1339 = vst [vmem:[#allocation2 + $0x50] sm:$0xff] %v1323_v10  ;;  %v1324_v13 = vadd.f32 %v1294_v11, %v666_v9  ;;  %v2133_v14 = vpop.f32.mrb[24].mxu1  ;;  %v2070_v15 = vpop.f32.mrb[25].mxu0  ;;  %v1369_v6 = vadd.f32 (!%p1929_p5), %v1368_v2, %v2854_v61  ;;  %v1405_v8 = vadd.f32 (!%p1929_p5), %v1404_v4, %v1390_v63  ;;  %v2869_v9 = vld [vmem:[#allocation2 + $0x40] sm:$0xff] (!%p1929_p5)  ;;  %v1393_v11 = vmul.f32 (!%p1929_p5), %v2864_v5, %v2864_v5 }
 0x1ac   : > { %v2071_v16 = vadd.f32 %v2070_v15, %v2069_v12  ;;  %v2134_v17 = vpop.f32.mrb[25].mxu1  ;;  %v2072_v18 = vpop.f32.mrb[26].mxu0  ;;  %v1394_v15 = vmul.f32 (!%p1929_p5), %v2869_v9, %v2869_v9 }
 0x1ad   : > { %1340 = vst [vmem:[#allocation2 + $0x58] sm:$0xff] %v1324_v13  ;;  %v2135_v19 = vadd.f32 %v2134_v17, %v2133_v14  ;;  %v2136_v20 = vpop.f32.mrb[26].mxu1  ;;  %v2073_v21 = vpop.f32.mrb[27].mxu0  ;;  %v1370_v10 = vadd.f32 (!%p1929_p5), %v1369_v6, %v2859_v1  ;;  %v1406_v12 = vadd.f32 (!%p1929_p5), %v1405_v8, %v1391_v3  ;;  %v2874_v13 = vld [vmem:[#allocation2 + $0x48] sm:$0xff] (!%p1929_p5) }
 0x1ae   : > { %v2074_v23 = vadd.f32 %v2073_v21, %v2072_v18  ;;  %v2137_v24 = vpop.f32.mrb[27].mxu1 }
 0x1af   : > { %v1299_v25 = vadd.f32 %v2135_v19, %v2071_v16  ;;  %v2138_v26 = vadd.f32 %v2137_v24, %v2136_v20  ;;  %v1371_v14 = vadd.f32 (!%p1929_p5), %v1370_v10, %v2864_v5  ;;  %v1407_v16 = vadd.f32 (!%p1929_p5), %v1406_v12, %v1392_v7 }
 0x1b0   : > { %v1395_v19 = vmul.f32 (!%p1929_p5), %v2874_v13, %v2874_v13 }
 0x1b1   : > { %v1325_v28 = vadd.f32 %v1299_v25, %v667_v22  ;;  %v1302_v29 = vadd.f32 %v2138_v26, %v2074_v23  ;;  %v1372_v18 = vadd.f32 (!%p1929_p5), %v1371_v14, %v2869_v9  ;;  %v1408_v20 = vadd.f32 (!%p1929_p5), %v1407_v16, %v1393_v11 }
 0x1b2   : > { %v2075_v30 = vpop.f32.mrb[28].mxu0  ;;  %v2879_v17 = vld [vmem:[#allocation2 + $0x50] sm:$0xff] (!%p1929_p5) }
 0x1b3   : > { %1341 = vst [vmem:[#allocation2 + $0x60] sm:$0xff] %v1325_v28  ;;  %v1326_v31 = vadd.f32 %v1302_v29, %v668_v27  ;;  %v2139_v32 = vpop.f32.mrb[28].mxu1  ;;  %v2076_v33 = vpop.f32.mrb[29].mxu0  ;;  %v1373_v22 = vadd.f32 (!%p1929_p5), %v1372_v18, %v2874_v13  ;;  %v1396_v23 = vmul.f32 (!%p1929_p5), %v2879_v17, %v2879_v17  ;;  %v1409_v24 = vadd.f32 (!%p1929_p5), %v1408_v20, %v1394_v15 }
 0x1b4   : > { %v2077_v34 = vadd.f32 %v2076_v33, %v2075_v30  ;;  %v2140_v35 = vpop.f32.mrb[29].mxu1  ;;  %v2078_v36 = vpop.f32.mrb[30].mxu0  ;;  %v2884_v21 = vld [vmem:[#allocation2 + $0x58] sm:$0xff] (!%p1929_p5) }
 0x1b5   : > { %1342 = vst [vmem:[#allocation2 + $0x68] sm:$0xff] %v1326_v31  ;;  %v2141_v37 = vadd.f32 %v2140_v35, %v2139_v32  ;;  %v2142_v38 = vpop.f32.mrb[30].mxu1  ;;  %v2079_v39 = vpop.f32.mrb[31].mxu0  ;;  %v1374_v26 = vadd.f32 (!%p1929_p5), %v1373_v22, %v2879_v17  ;;  %v1397_v27 = vmul.f32 (!%p1929_p5), %v2884_v21, %v2884_v21  ;;  %v1410_v28 = vadd.f32 (!%p1929_p5), %v1409_v24, %v1395_v19  ;;  %v2967_v22 = vld [vmem:[%s633_s27] ss:$0 sm:$0xff] (!%p1929_p5) }
 0x1b6   : > { %v2080_v41 = vadd.f32 %v2079_v39, %v2078_v36  ;;  %v2143_v42 = vpop.f32.mrb[31].mxu1 }
 0x1b7   : > { %v1307_v43 = vadd.f32 %v2141_v37, %v2077_v34  ;;  %v2144_v44 = vadd.f32 %v2143_v42, %v2142_v38  ;;  %1348 = sbr.rel (%p1929_p5) target bundleno = 518 (0x206), region = 108  ;;  %v1375_v30 = vadd.f32 (!%p1929_p5), %v1374_v26, %v2884_v21  ;;  %v1411_v32 = vadd.f32 (!%p1929_p5), %v1410_v28, %v1396_v23 }
 0x1b9   : > { %v1327_v46 = vadd.f32 %v1307_v43, %v669_v40  ;;  %v1310_v47 = vadd.f32 %v2144_v44, %v2080_v41  ;;  %v1412_v36 = vadd.f32 (!%p1929_p5), %v1411_v32, %v1397_v27 }
 0x1ba   : > { %v2889_v25 = vld [vmem:[#allocation2 + $0x60] sm:$0xff] (!%p1929_p5) }
 0x1bb   : > { %1343 = vst [vmem:[#allocation2 + $0x70] sm:$0xff] %v1327_v46  ;;  %v1328_v48 = vadd.f32 %v1310_v47, %v670_v45  ;;  %v1398_v31 = vmul.f32 (!%p1929_p5), %v2889_v25, %v2889_v25  ;;  %v1376_v34 = vadd.f32 (!%p1929_p5), %v1375_v30, %v2889_v25 }
 0x1bc   : > { %v2894_v29 = vld [vmem:[#allocation2 + $0x68] sm:$0xff] (!%p1929_p5) }
 0x1bd   : > { %1344 = vst [vmem:[#allocation2 + $0x78] sm:$0xff] %v1328_v48  ;;  %v1399_v35 = vmul.f32 (!%p1929_p5), %v2894_v29, %v2894_v29  ;;  %v1377_v38 = vadd.f32 (!%p1929_p5), %v1376_v34, %v2894_v29  ;;  %v1413_v40 = vadd.f32 (!%p1929_p5), %v1412_v36, %v1398_v31 }
 0x1bf   : > { %v1414_v43 = vadd.f32 %v1413_v40, %v1399_v35 }
 0x1c2   : > { %v2899_v33 = vld [vmem:[#allocation2 + $0x70] sm:$0xff] }
 0x1c3   : > { %v1400_v39 = vmul.f32 %v2899_v33, %v2899_v33  ;;  %v1378_v41 = vadd.f32 %v1377_v38, %v2899_v33 }
 0x1c4   : > { %v2904_v37 = vld [vmem:[#allocation2 + $0x78] sm:$0xff] }
 0x1c5   : > { %v1401_v42 = vmul.f32 %v2904_v37, %v2904_v37  ;;  %v1379_v44 = vadd.f32 %v1378_v41, %v2904_v37  ;;  %v1415_v45 = vadd.f32 %v1414_v43, %v1400_v39 }
 0x1c7   : > { %v1380_v46 = vrot.slane %v1379_v44, 4  ;;  %v1416_v47 = vadd.f32 %v1415_v45, %v1401_v42 }
 0x1c9   : > { %v1381_v48 = vadd.f32 %v1380_v46, %v1379_v44  ;;  %v1417_v53 = vrot.slane %v1416_v47, 4 }
 0x1cb   : > { %v1382_v54 = vrot.slane %v1381_v48, 2  ;;  %v1418_v55 = vadd.f32 %v1417_v53, %v1416_v47 }
 0x1cd   : > { %v1383_v56 = vadd.f32 %v1382_v54, %v1381_v48  ;;  %v1419_v58 = vrot.slane %v1418_v55, 2 }
 0x1cf   : > { %v1384_v59 = vrot.slane %v1383_v56, 1  ;;  %v1420_v60 = vadd.f32 %v1419_v58, %v1418_v55 }
 0x1d1   : > { %v1385_v62 = vadd.f32 %v1384_v59, %v1383_v56  ;;  %v1421_v63 = vrot.slane %v1420_v60, 1 }
 0x1d3   : > { %v2913_v0 = vmul.f32 0.0078125, %v1385_v62  ;;  %v1422_v2 = vadd.f32 %v1421_v63, %v1420_v60 }
 0x1d5   : > { %v1425_v3 = vmul.f32 %v2913_v0, %v2913_v0  ;;  %v1424_v4 = vmul.f32 0.0078125, %v1422_v2  ;;  %v1427_v8 = vsub.f32 %v2833_v49, %v2913_v0  ;;  %v1428_v10 = vsub.f32 %v2835_v50, %v2913_v0 }
 0x1d6   : > { %v1429_v11 = vsub.f32 %v2837_v51, %v2913_v0  ;;  %v1430_v12 = vsub.f32 %v2839_v52, %v2913_v0  ;;  %v1431_v14 = vsub.f32 %v2849_v57, %v2913_v0  ;;  %v1432_v15 = vsub.f32 %v2854_v61, %v2913_v0 }
 0x1d7   : > { %v1426_v6 = vsub.f32 %v1424_v4, %v1425_v3  ;;  %v1433_v16 = vsub.f32 %v2859_v1, %v2913_v0  ;;  %v1434_v49 = vsub.f32 %v2864_v5, %v2913_v0  ;;  %v1435_v50 = vsub.f32 %v2869_v9, %v2913_v0  ;;  %v2948_v1 = vld [vmem:[%s630_s9] ss:$0 sm:$0xff] }
 0x1d8   : > { %v1436_v51 = vsub.f32 %v2874_v13, %v2913_v0  ;;  %v1437_v52 = vsub.f32 %v2879_v17, %v2913_v0  ;;  %v1438_v57 = vsub.f32 %v2884_v21, %v2913_v0  ;;  %v1439_v5 = vsub.f32 %v2889_v25, %v2913_v0 }
 0x1d9   : > { %v1443_v7 = vadd.f32 1e-05, %v1426_v6  ;;  %v1440_v9 = vsub.f32 %v2894_v29, %v2913_v0  ;;  %v1441_v13 = vsub.f32 %v2899_v33, %v2913_v0  ;;  %v1442_v17 = vsub.f32 %v2904_v37, %v2913_v0 }
 0x1db   : > { %2314 = vrsqrt.f32 %v1443_v7 }
 0x1e5   : > { %v2941_v61 = vpop.eup %2314 }
 0x1e6   : > { %v1445_v18 = vmul.f32 %v2941_v61, %v1427_v8  ;;  %v1446_v19 = vmul.f32 %v2941_v61, %v1428_v10  ;;  %v1447_v20 = vmul.f32 %v2941_v61, %v1429_v11  ;;  %v1448_v21 = vmul.f32 %v2941_v61, %v1430_v12 }
 0x1e7   : > { %v1449_v23 = vmul.f32 %v2941_v61, %v1431_v14  ;;  %v1450_v24 = vmul.f32 %v2941_v61, %v1432_v15  ;;  %v1451_v26 = vmul.f32 %v2941_v61, %v1433_v16  ;;  %v1452_v27 = vmul.f32 %v2941_v61, %v1434_v49 }
 0x1e8   : > { %v1468_v28 = vmul.f32 %v2948_v1, %v1445_v18  ;;  %v1469_v30 = vmul.f32 %v2948_v1, %v1446_v19  ;;  %v1470_v31 = vmul.f32 %v2948_v1, %v1447_v20  ;;  %v1471_v32 = vmul.f32 %v2948_v1, %v1448_v21 }
 0x1e9   : > { %v1472_v34 = vmul.f32 %v2948_v1, %v1449_v23  ;;  %v1473_v35 = vmul.f32 %v2948_v1, %v1450_v24  ;;  %v1474_v36 = vmul.f32 %v2948_v1, %v1451_v26  ;;  %v1475_v38 = vmul.f32 %v2948_v1, %v1452_v27 }
 0x1ea   : > { %v1491_v39 = vadd.f32 %v2967_v22, %v1468_v28  ;;  %v1492_v40 = vadd.f32 %v2967_v22, %v1469_v30  ;;  %v1493_v41 = vadd.f32 %v2967_v22, %v1470_v31  ;;  %v1494_v42 = vadd.f32 %v2967_v22, %v1471_v32 }
 0x1eb   : > { %v1495_v43 = vadd.f32 %v2967_v22, %v1472_v34  ;;  %v1496_v44 = vadd.f32 %v2967_v22, %v1473_v35  ;;  %v1497_v45 = vadd.f32 %v2967_v22, %v1474_v36  ;;  %v1498_v46 = vadd.f32 %v2967_v22, %v1475_v38 }
 0x1ec   : > { %vm1507_vm0 = vcmp.gt.f32.partialorder %v1491_v39, 0.0  ;;  %vm1508_vm1 = vcmp.gt.f32.partialorder %v1492_v40, 0.0  ;;  %v1523_v47 = vmul.f32 0.2, %v1491_v39  ;;  %v1524_v48 = vmul.f32 0.2, %v1492_v40 }
 0x1ed   : > { %vm1509_vm2 = vcmp.gt.f32.partialorder %v1493_v41, 0.0  ;;  %vm1510_vm3 = vcmp.gt.f32.partialorder %v1494_v42, 0.0  ;;  %v1525_v53 = vmul.f32 0.2, %v1493_v41  ;;  %v1526_v54 = vmul.f32 0.2, %v1494_v42 }
 0x1ee   : > { %v1539_v55 = vsel %vm1507_vm0, %v1491_v39, %v1523_v47  ;;  %v1540_v56 = vsel %vm1508_vm1, %v1492_v40, %v1524_v48  ;;  %vm1511_vm4 = vcmp.gt.f32.partialorder %v1495_v43, 0.0  ;;  %vm1512_vm5 = vcmp.gt.f32.partialorder %v1496_v44, 0.0 }
 0x1ef   : > { %v1973_v58 = vpack.c.bf16 %v1540_v56, %v1539_v55  ;;  %v1541_v59 = vsel %vm1509_vm2, %v1493_v41, %v1525_v53  ;;  %v1542_v60 = vsel %vm1510_vm3, %v1494_v42, %v1526_v54  ;;  %v1527_v62 = vmul.f32 0.2, %v1495_v43 }
 0x1f0   : > { %v1978_v63 = vpack.c.bf16 %v1542_v60, %v1541_v59  ;;  %v1528_v2 = vmul.f32 0.2, %v1496_v44  ;;  %vm1513_vm6 = vcmp.gt.f32.partialorder %v1497_v45, 0.0  ;;  %vm1514_vm7 = vcmp.gt.f32.partialorder %v1498_v46, 0.0 }
 0x1f1   : > { %1974 = vst [vmem:[%s2765_s19] sm:$0xff] %v1973_v58   ;;  %v1543_v3 = vsel %vm1511_vm4, %v1495_v43, %v1527_v62  ;;  %v1529_v4 = vmul.f32 0.2, %v1497_v45  ;;  %v1530_v6 = vmul.f32 0.2, %v1498_v46  ;;  %v1453_v7 = vmul.f32 %v2941_v61, %v1435_v50 }
 0x1f2   : > { %2010 = vst [vmem:[%s2765_s19 + $0x8] sm:$0xff] %v1978_v63   ;;  %v1544_v8 = vsel %vm1512_vm5, %v1496_v44, %v1528_v2  ;;  %v1454_v10 = vmul.f32 %v2941_v61, %v1436_v51  ;;  %v1455_v11 = vmul.f32 %v2941_v61, %v1437_v52  ;;  %v1456_v12 = vmul.f32 %v2941_v61, %v1438_v57 }
 0x1f3   : > { %v1983_v14 = vpack.c.bf16 %v1544_v8, %v1543_v3  ;;  %v1545_v15 = vsel %vm1513_vm6, %v1497_v45, %v1529_v4  ;;  %v1546_v16 = vsel %vm1514_vm7, %v1498_v46, %v1530_v6  ;;  %v1476_v49 = vmul.f32 %v2948_v1, %v1453_v7 }
 0x1f4   : > { %v1988_v18 = vpack.c.bf16 %v1546_v16, %v1545_v15  ;;  %v1477_v19 = vmul.f32 %v2948_v1, %v1454_v10  ;;  %v1478_v20 = vmul.f32 %v2948_v1, %v1455_v11  ;;  %v1479_v50 = vmul.f32 %v2948_v1, %v1456_v12 }
 0x1f5   : > { %2011 = vst [vmem:[%s2765_s19 + $0x10] sm:$0xff] %v1983_v14   ;;  %v1499_v51 = vadd.f32 %v2967_v22, %v1476_v49  ;;  %v1457_v52 = vmul.f32 %v2941_v61, %v1439_v5  ;;  %v1458_v57 = vmul.f32 %v2941_v61, %v1440_v9  ;;  %v1459_v21 = vmul.f32 %v2941_v61, %v1441_v13 }
 0x1f6   : > { %2012 = vst [vmem:[%s2765_s19 + $0x18] sm:$0xff] %v1988_v18   ;;  %v1500_v23 = vadd.f32 %v2967_v22, %v1477_v19  ;;  %v1501_v24 = vadd.f32 %v2967_v22, %v1478_v20  ;;  %v1502_v26 = vadd.f32 %v2967_v22, %v1479_v50  ;;  %v1460_v25 = vmul.f32 %v2941_v61, %v1442_v17 }
 0x1f7   : > { %vm1515_vm8 = vcmp.gt.f32.partialorder %v1499_v51, 0.0  ;;  %v1531_v29 = vmul.f32 0.2, %v1499_v51  ;;  %v1480_v5 = vmul.f32 %v2948_v1, %v1457_v52  ;;  %v1481_v33 = vmul.f32 %v2948_v1, %v1458_v57 }
 0x1f8   : > { %vm1516_vm9 = vcmp.gt.f32.partialorder %v1500_v23, 0.0  ;;  %v1532_v9 = vmul.f32 0.2, %v1500_v23  ;;  %vm1517_vm10 = vcmp.gt.f32.partialorder %v1501_v24, 0.0  ;;  %vm1518_vm11 = vcmp.gt.f32.partialorder %v1502_v26, 0.0 }
 0x1f9   : > { %v1547_v13 = vsel %vm1515_vm8, %v1499_v51, %v1531_v29  ;;  %v1533_v27 = vmul.f32 0.2, %v1501_v24  ;;  %v1534_v28 = vmul.f32 0.2, %v1502_v26  ;;  %v1503_v30 = vadd.f32 %v2967_v22, %v1480_v5 }
 0x1fa   : > { %v1548_v37 = vsel %vm1516_vm9, %v1500_v23, %v1532_v9  ;;  %v1504_v0 = vadd.f32 %v2967_v22, %v1481_v33  ;;  %v1482_v61 = vmul.f32 %v2948_v1, %v1459_v21  ;;  %v1483_v17 = vmul.f32 %v2948_v1, %v1460_v25 }
 0x1fb   : > { %v1993_v31 = vpack.c.bf16 %v1548_v37, %v1547_v13  ;;  %v1549_v32 = vsel %vm1517_vm10, %v1501_v24, %v1533_v27  ;;  %v1550_v34 = vsel %vm1518_vm11, %v1502_v26, %v1534_v28  ;;  %vm1519_vm12 = vcmp.gt.f32.partialorder %v1503_v30, 0.0 }
 0x1fc   : > { %v1998_v35 = vpack.c.bf16 %v1550_v34, %v1549_v32  ;;  %vm1520_vm13 = vcmp.gt.f32.partialorder %v1504_v0, 0.0  ;;  %v1535_v36 = vmul.f32 0.2, %v1503_v30  ;;  %v1536_v38 = vmul.f32 0.2, %v1504_v0 }
 0x1fd   : > { %2013 = vst [vmem:[%s2765_s19 + $0x20] sm:$0xff] %v1993_v31   ;;  %v1505_v39 = vadd.f32 %v2967_v22, %v1482_v61  ;;  %v1506_v40 = vadd.f32 %v2967_v22, %v1483_v17 }
 0x1fe   : > { %2014 = vst [vmem:[%s2765_s19 + $0x28] sm:$0xff] %v1998_v35   ;;  %v1551_v41 = vsel %vm1519_vm12, %v1503_v30, %v1535_v36  ;;  %v1552_v42 = vsel %vm1520_vm13, %v1504_v0, %v1536_v38 }
 0x1ff   : > { %v2003_v43 = vpack.c.bf16 %v1552_v42, %v1551_v41  ;;  %vm1521_vm14 = vcmp.gt.f32.partialorder %v1505_v39, 0.0  ;;  %vm1522_vm15 = vcmp.gt.f32.partialorder %v1506_v40, 0.0  ;;  %v1537_v1 = vmul.f32 0.2, %v1505_v39 }
 0x200   : > { %v1538_v44 = vmul.f32 0.2, %v1506_v40 }
 0x201   : > { %2015 = vst [vmem:[%s2765_s19 + $0x30] sm:$0xff] %v2003_v43   ;;  %v1553_v45 = vsel %vm1521_vm14, %v1505_v39, %v1537_v1 }
 0x202   : > { %v1554_v46 = vsel %vm1522_vm15, %v1506_v40, %v1538_v44 }
 0x203   : > { %v2008_v47 = vpack.c.bf16 %v1554_v46, %v1553_v45 }
 0x205   : > { %2016 = vst [vmem:[%s2765_s19 + $0x38] sm:$0xff] %v2008_v47  }
 0x206 PF: > { %1641 = sbr.rel (!%p2524_p12) target bundleno = 530 (0x212), region = 112  ;;  %s1949_s27 = sshll.u32 (%p2524_p12), %s2390_s22, 2  ;;  %v1659_v22 = vld [vmem:[%s2765_s19] sm:$0xf] (%p2524_p12)  ;;  %v1661_v48 = vld [vmem:[%s2765_s19 + $0x4] sm:$0xf] (%p2524_p12) }
 0x207   : > { %s1643_s26 = scalar_lea.vmem (%p2524_p12), %s3092_s4, %s1949_s27  ;;  %v1663_v53 = vld [vmem:[%s2765_s19 + $0x8] sm:$0xf] (%p2524_p12)  ;;  %v1665_v54 = vld [vmem:[%s2765_s19 + $0xc] sm:$0xf] (%p2524_p12)  ;;  %v1667_v55 = vld [vmem:[%s2765_s19 + $0x10] sm:$0xf] (%p2524_p12) }
 0x208   : > { %1660 = vst [vmem:[%s1643_s26] sm:$0xf] (%p2524_p12), %v1659_v22  ;;  %1662 = vst [vmem:[%s1643_s26 + $0x8] sm:$0xf] (%p2524_p12), %v1661_v48  ;;  %v1669_v56 = vld [vmem:[%s2765_s19 + $0x14] sm:$0xf] (%p2524_p12) }
 0x209   : > { %1664 = vst [vmem:[%s1643_s26 + $0x10] sm:$0xf] (%p2524_p12), %v1663_v53  ;;  %1666 = vst [vmem:[%s1643_s26 + $0x18] sm:$0xf] (%p2524_p12), %v1665_v54  ;;  %v1671_v58 = vld [vmem:[%s2765_s19 + $0x18] sm:$0xf] (%p2524_p12) }
 0x20a   : > { %1668 = vst [vmem:[%s1643_s26 + $0x20] sm:$0xf] (%p2524_p12), %v1667_v55  ;;  %v1673_v59 = vld [vmem:[%s2765_s19 + $0x1c] sm:$0xf] (%p2524_p12)  ;;  %1670 = vst [vmem:[%s1643_s26 + $0x28] sm:$0xf] (%p2524_p12), %v1669_v56 }
 0x20b   : > { %1672 = vst [vmem:[%s1643_s26 + $0x30] sm:$0xf] (%p2524_p12), %v1671_v58  ;;  %1674 = vst [vmem:[%s1643_s26 + $0x38] sm:$0xf] (%p2524_p12), %v1673_v59  ;;  %v1675_v60 = vld [vmem:[%s2765_s19 + $0x20] sm:$0xf] (%p2524_p12) }
 0x20c   : > { %v1677_v62 = vld [vmem:[%s2765_s19 + $0x24] sm:$0xf] (%p2524_p12)  ;;  %v1679_v63 = vld [vmem:[%s2765_s19 + $0x28] sm:$0xf] (%p2524_p12)  ;;  %1676 = vst [vmem:[%s1643_s26 + $0x40] sm:$0xf] (%p2524_p12), %v1675_v60 }
 0x20d   : > { %1678 = vst [vmem:[%s1643_s26 + $0x48] sm:$0xf] %v1677_v62  ;;  %1680 = vst [vmem:[%s1643_s26 + $0x50] sm:$0xf] %v1679_v63  ;;  %v1681_v2 = vld [vmem:[%s2765_s19 + $0x2c] sm:$0xf] }
 0x20e   : > { %v1683_v3 = vld [vmem:[%s2765_s19 + $0x30] sm:$0xf]  ;;  %v1685_v4 = vld [vmem:[%s2765_s19 + $0x34] sm:$0xf]  ;;  %1682 = vst [vmem:[%s1643_s26 + $0x58] sm:$0xf] %v1681_v2 }
 0x20f   : > { %1684 = vst [vmem:[%s1643_s26 + $0x60] sm:$0xf] %v1683_v3  ;;  %1686 = vst [vmem:[%s1643_s26 + $0x68] sm:$0xf] %v1685_v4  ;;  %v1687_v6 = vld [vmem:[%s2765_s19 + $0x38] sm:$0xf] }
 0x210   : > { %v1689_v7 = vld [vmem:[%s2765_s19 + $0x3c] sm:$0xf]  ;;  %1688 = vst [vmem:[%s1643_s26 + $0x70] sm:$0xf] %v1687_v6 }
 0x211   : > { %1690 = vst [vmem:[%s1643_s26 + $0x78] sm:$0xf] %v1689_v7 }
 0x212 PF: > { %s14_s25 = sadd.s32 1, %s2402_s25   ;;  %s3106_s22 = sld [smem:[#allocation6_spill]] }
 0x213   : > { %p11_p6 = scmp.ge.s32.totalorder %s14_s25, 10   ;;  %s3107_s14 = sld [smem:[#allocation7_spill]] }
 0x214   : > { %s3108_s24 = sld [smem:[#allocation8_spill]]  ;;  %s3109_s15 = smov %s2366_s16 }
 0x215   : > { %s3110_s16 = smov %s2522_s13  ;;  %s3111_s17 = smov %s2374_s18 }
 0x216   : > { %s3112_s18 = smov %s2519_s12  ;;  %s3113_s19 = smov %s2382_s20 }
 0x217   : > { %s3114_s20 = smov %s2505_s7  ;;  %s3115_s21 = smov %s2394_s23 }
 0x218   :  { %13 = sbr.rel (!%p11_p6) target bundleno = 9 (0x9), region = 198 }
 0x219   : > { %s3116_s23 = smov %s3107_s14 }

// kernel: discriminator_forward.8
= control target key start
LH: loop header
LB: loop body
LE: loop exit
PB: predicated region body
PF: predicated region fallthrough
CT: control target
= control target key end

     0   :  { %s2028_s0 = inlined_call_operand.vmem [shape: bf16[32,4096], index: 0, kind: input, shape index: {}]   ;;  %s2029_s1 = inlined_call_operand.vmem [shape: bf16[4096,512], index: 1, kind: input, shape index: {}]   ;;  %s2030_s2 = inlined_call_operand.vmem [shape: f32[1,512], index: 2, kind: input, shape index: {}]   ;;  %s2031_s3 = inlined_call_operand.vmem [shape: f32[1,512], index: 3, kind: input, shape index: {}]   ;;  %s2032_s4 = inlined_call_operand.vmem [shape: bf16[32,512], index: 4, kind: output, shape index: {}]  }
   0x1   :  { %2036 = sst [smem:[#allocation9_spill]] %s2028_s0 }
   0x2   :  { %2037 = sst [smem:[#allocation10_spill]] %s2029_s1 }
   0x3   :  { %s1662_s15 = smov 0   ;;  %s1664_s16 = smov 0  }
   0x4   :  { %s1666_s17 = smov 0   ;;  %s1668_s18 = smov 0  }
   0x5   :  { %s1670_s19 = smov 0   ;;  %s1672_s20 = smov 0  }
   0x6   :  { %s1674_s21 = smov 0   ;;  %s1676_s22 = smov 0  }
   0x7   :  { %s1678_s23 = smov 0   ;;  %s1680_s24 = smov 0  }
   0x8   :  { %s1682_s25 = smov 0  }
   0x9 LB: > { %2038 = sst [smem:[#allocation6_spill]] %s1630_s24  ;;  %s1273_s26 = sadd.s32 4294967295, %s1634_s25   ;;  %s1634_s25 = sphi %s1682_s25, %s14_s25   ;;  %s1630_s24 = sphi %s1680_s24, %s2048_s24   ;;  %s1626_s23 = sphi %s1678_s23, %s2056_s23   ;;  %s1622_s22 = sphi %s1676_s22, %s2046_s22   ;;  %s1618_s21 = sphi %s1674_s21, %s2055_s21   ;;  %s1614_s20 = sphi %s1672_s20, %s2054_s20   ;;  %s1610_s19 = sphi %s1670_s19, %s2053_s19   ;;  %s1606_s18 = sphi %s1668_s18, %s2052_s18   ;;  %s1602_s17 = sphi %s1666_s17, %s2051_s17   ;;  %s1598_s16 = sphi %s1664_s16, %s2050_s16   ;;  %s1594_s15 = sphi %s1662_s15, %s2049_s15  }
   0xa   : > { %s23_s27 = sadd.s32 1, %s1626_s23  ;;  %s26_s28 = sadd.s32 1, %s1630_s24 }
   0xb   : > { %p24_p0 = scmp.ge.s32.totalorder %s23_s27, 8  ;;  %s33_s29 = sadd.s32 1, %s1614_s20 }
   0xc   : > { %p40_p1 = scmp.ne.s32.totalorder %s1614_s20, %s1610_s19  ;;  %p41_p2 = scmp.eq.s32.totalorder %s1634_s25, 0 }
   0xd   : > { %s2058_s27 = smov (%p24_p0, %s23_s27), 0  ;;  %s2060_s28 = smov (!%p24_p0, %s26_s28), %s1630_s24 }
   0xe   : > { %2039 = sst [smem:[#allocation7_spill]] %s2058_s27  ;;  %s30_s30 = ssub.s32 %s1626_s23, %s2058_s27 }
   0xf   : > { %p28_p3 = scmp.ge.s32.totalorder %s2060_s28, 4  ;;  %p31_p4 = scmp.eq.s32.totalorder %s30_s30, 0 }
  0x10   : > { %p1729_p5 = por %p41_p2, %p40_p1  ;;  %s61_s6 = sadd.s32 1, %s1606_s18 }
  0x11   : > { %s2062_s28 = smov (%p28_p3, %s2060_s28), 0  ;;  %p68_p6 = scmp.ne.s32.totalorder %s1606_s18, %s1602_s17 }
  0x12   : > { %2041 = sst [smem:[#allocation8_spill]] %s2062_s28  ;;  %s57_s8 = ssub.s32 %s1630_s24, %s2062_s28 }
  0x13   : > { %s1737_s7 = scalar_select %p31_p4, %s1614_s20, %s33_s29  }
  0x14   : > { %s58_s9 = sor.u32 %s57_s8, %s30_s30  ;;  %p137_p7 = scmp.eq.s32.totalorder %s57_s8, 0 }
  0x15   : > { %p59_p8 = scmp.eq.s32.totalorder %s58_s9, 0  ;;  %p1743_p9 = por %p68_p6, %p41_p2 }
  0x16   : > { %s139_s11 = sadd.s32 1, %s1598_s16  ;;  %p149_p10 = scmp.ne.s32.totalorder %s1598_s16, %s1594_s15 }
  0x17   : > { %s1751_s12 = scalar_select %p59_p8, %s1606_s18, %s61_s6  }
  0x18   : > { %s1754_s13 = scalar_select %p137_p7, %s1598_s16, %s139_s11  }
  0x19   : > { %p150_p11 = scmp.eq.s32.totalorder %s1273_s26, 31  ;;  %p1276_p13 = scmp.ge.s32.totalorder %s1634_s25, 32 }
  0x1b   : > { %p1756_p12 = por %p150_p11, %p149_p10  ;;  %172 = sbr.rel (%p1276_p13) target bundleno = 101 (0x65), region = 16 }
  0x22   : > { %175 = sbr.rel (!%p1729_p5) target bundleno = 48 (0x30), region = 20  ;;  %s177_s29 = sand.u32 (%p1729_p5), 1, %s1614_s20  }
  0x23   : > { %s1340_s30 = sshll.u32 (%p1729_p5), %s1626_s23, 4  ;;  %s1277_s8 = sshll.u32 (%p1729_p5), %s177_s29, 6 }
  0x24   : > { %s2044_s0 = sld [smem:[#allocation9_spill]] (%p1729_p5)  ;;  %s179_s26 = scalar_lea.vmem (%p1729_p5), [#allocation3], %s1277_s8 }
  0x2a   : > { %s182_s11 = scalar_lea.vmem %s2044_s0, %s1340_s30 }
  0x2b   : > { %v195_v0 = vld [vmem:[%s182_s11] sm:$0xff]  ;;  %v197_v1 = vld [vmem:[%s182_s11 + $0x8] sm:$0xff] }
  0x2c   : > { %v199_v2 = vld [vmem:[%s182_s11 + $0x80] sm:$0xff]  ;;  %196 = vst [vmem:[%s179_s26] sm:$0xff] %v195_v0  ;;  %198 = vst [vmem:[%s179_s26 + $0x8] sm:$0xff] %v197_v1  ;;  %v201_v3 = vld [vmem:[%s182_s11 + $0x88] sm:$0xff] }
  0x2d   : > { %200 = vst [vmem:[%s179_s26 + $0x10] sm:$0xff] %v199_v2  ;;  %v203_v4 = vld [vmem:[%s182_s11 + $0x100] sm:$0xff]  ;;  %v205_v5 = vld [vmem:[%s182_s11 + $0x108] sm:$0xff]  ;;  %202 = vst [vmem:[%s179_s26 + $0x18] sm:$0xff] %v201_v3 }
  0x2e   : > { %204 = vst [vmem:[%s179_s26 + $0x20] sm:$0xff] %v203_v4  ;;  %206 = vst [vmem:[%s179_s26 + $0x28] sm:$0xff] %v205_v5  ;;  %v207_v6 = vld [vmem:[%s182_s11 + $0x180] sm:$0xff]  ;;  %v209_v7 = vld [vmem:[%s182_s11 + $0x188] sm:$0xff] }
  0x2f   : > { %208 = vst [vmem:[%s179_s26 + $0x30] sm:$0xff] %v207_v6  ;;  %210 = vst [vmem:[%s179_s26 + $0x38] sm:$0xff] %v209_v7 }
  0x30 PF: > { %216 = sbr.rel (!%p1743_p9) target bundleno = 101 (0x65), region = 43  ;;  %s218_s5 = sand.u32 (%p1743_p9), 1, %s1606_s18  }
  0x31   : > { %s1341_s29 = sshll.u32 (%p1743_p9), %s1626_s23, 8  ;;  %s1280_s30 = sshll.u32 (%p1743_p9), %s218_s5, 8 }
  0x32   : > { %s223_s8 = sadd.s32 (%p1743_p9), %s1630_s24, %s1341_s29  ;;  %s2045_s1 = sld [smem:[#allocation10_spill]] (%p1743_p9) }
  0x33   : > { %s1283_s6 = sshll.u32 (%p1743_p9), %s223_s8, 2  ;;  %s1781_s10 = scalar_lea.vmem (%p1743_p9), [#allocation4], %s1280_s30 }
  0x38   : > { %s1776_s28 = scalar_lea.vmem %s2045_s1, %s1283_s6 }
  0x39   : > { %v241_v8 = vld [vmem:[%s1776_s28] sm:$0xf]  ;;  %v243_v9 = vld [vmem:[%s1776_s28 + $0x10] sm:$0xf] }
  0x3a   : > { %v245_v10 = vld [vmem:[%s1776_s28 + $0x20] sm:$0xf]  ;;  %242 = vst [vmem:[%s1781_s10] sm:$0xf] %v241_v8  ;;  %244 = vst [vmem:[%s1781_s10 + $0x4] sm:$0xf] %v243_v9 }
  0x3b   : > { %246 = vst [vmem:[%s1781_s10 + $0x8] sm:$0xf] %v245_v10  ;;  %v247_v11 = vld [vmem:[%s1776_s28 + $0x30] sm:$0xf]  ;;  %v249_v12 = vld [vmem:[%s1776_s28 + $0x40] sm:$0xf] }
  0x3c   : > { %v251_v13 = vld [vmem:[%s1776_s28 + $0x50] sm:$0xf]  ;;  %248 = vst [vmem:[%s1781_s10 + $0xc] sm:$0xf] %v247_v11  ;;  %250 = vst [vmem:[%s1781_s10 + $0x10] sm:$0xf] %v249_v12 }
  0x3d   : > { %252 = vst [vmem:[%s1781_s10 + $0x14] sm:$0xf] %v251_v13  ;;  %v253_v14 = vld [vmem:[%s1776_s28 + $0x60] sm:$0xf]  ;;  %v255_v15 = vld [vmem:[%s1776_s28 + $0x70] sm:$0xf] }
  0x3e   : > { %v257_v16 = vld [vmem:[%s1776_s28 + $0x80] sm:$0xf]  ;;  %254 = vst [vmem:[%s1781_s10 + $0x18] sm:$0xf] %v253_v14  ;;  %256 = vst [vmem:[%s1781_s10 + $0x1c] sm:$0xf] %v255_v15 }
  0x3f   : > { %258 = vst [vmem:[%s1781_s10 + $0x20] sm:$0xf] %v257_v16  ;;  %v259_v17 = vld [vmem:[%s1776_s28 + $0x90] sm:$0xf]  ;;  %v261_v18 = vld [vmem:[%s1776_s28 + $0xa0] sm:$0xf] }
  0x40   : > { %v263_v19 = vld [vmem:[%s1776_s28 + $0xb0] sm:$0xf]  ;;  %260 = vst [vmem:[%s1781_s10 + $0x24] sm:$0xf] %v259_v17  ;;  %262 = vst [vmem:[%s1781_s10 + $0x28] sm:$0xf] %v261_v18 }
  0x41   : > { %264 = vst [vmem:[%s1781_s10 + $0x2c] sm:$0xf] %v263_v19  ;;  %v265_v20 = vld [vmem:[%s1776_s28 + $0xc0] sm:$0xf]  ;;  %v267_v21 = vld [vmem:[%s1776_s28 + $0xd0] sm:$0xf] }
  0x42   : > { %v269_v22 = vld [vmem:[%s1776_s28 + $0xe0] sm:$0xf]  ;;  %266 = vst [vmem:[%s1781_s10 + $0x30] sm:$0xf] %v265_v20  ;;  %268 = vst [vmem:[%s1781_s10 + $0x34] sm:$0xf] %v267_v21 }
  0x43   : > { %270 = vst [vmem:[%s1781_s10 + $0x38] sm:$0xf] %v269_v22  ;;  %v271_v23 = vld [vmem:[%s1776_s28 + $0xf0] sm:$0xf]  ;;  %v273_v24 = vld [vmem:[%s1776_s28 + $0x100] sm:$0xf] }
  0x44   : > { %v275_v25 = vld [vmem:[%s1776_s28 + $0x110] sm:$0xf]  ;;  %272 = vst [vmem:[%s1781_s10 + $0x3c] sm:$0xf] %v271_v23  ;;  %274 = vst [vmem:[%s1781_s10 + $0x40] sm:$0xf] %v273_v24 }
  0x45   : > { %276 = vst [vmem:[%s1781_s10 + $0x44] sm:$0xf] %v275_v25  ;;  %v277_v26 = vld [vmem:[%s1776_s28 + $0x120] sm:$0xf]  ;;  %v279_v27 = vld [vmem:[%s1776_s28 + $0x130] sm:$0xf] }
  0x46   : > { %v281_v28 = vld [vmem:[%s1776_s28 + $0x140] sm:$0xf]  ;;  %278 = vst [vmem:[%s1781_s10 + $0x48] sm:$0xf] %v277_v26  ;;  %280 = vst [vmem:[%s1781_s10 + $0x4c] sm:$0xf] %v279_v27 }
  0x47   : > { %282 = vst [vmem:[%s1781_s10 + $0x50] sm:$0xf] %v281_v28  ;;  %v283_v29 = vld [vmem:[%s1776_s28 + $0x150] sm:$0xf]  ;;  %v285_v30 = vld [vmem:[%s1776_s28 + $0x160] sm:$0xf] }
  0x48   : > { %v287_v31 = vld [vmem:[%s1776_s28 + $0x170] sm:$0xf]  ;;  %284 = vst [vmem:[%s1781_s10 + $0x54] sm:$0xf] %v283_v29  ;;  %286 = vst [vmem:[%s1781_s10 + $0x58] sm:$0xf] %v285_v30 }
  0x49   : > { %288 = vst [vmem:[%s1781_s10 + $0x5c] sm:$0xf] %v287_v31  ;;  %v289_v32 = vld [vmem:[%s1776_s28 + $0x180] sm:$0xf]  ;;  %v291_v33 = vld [vmem:[%s1776_s28 + $0x190] sm:$0xf] }
  0x4a   : > { %v293_v34 = vld [vmem:[%s1776_s28 + $0x1a0] sm:$0xf]  ;;  %290 = vst [vmem:[%s1781_s10 + $0x60] sm:$0xf] %v289_v32  ;;  %292 = vst [vmem:[%s1781_s10 + $0x64] sm:$0xf] %v291_v33 }
  0x4b   : > { %294 = vst [vmem:[%s1781_s10 + $0x68] sm:$0xf] %v293_v34  ;;  %v295_v35 = vld [vmem:[%s1776_s28 + $0x1b0] sm:$0xf]  ;;  %v297_v36 = vld [vmem:[%s1776_s28 + $0x1c0] sm:$0xf] }
  0x4c   : > { %v299_v37 = vld [vmem:[%s1776_s28 + $0x1d0] sm:$0xf]  ;;  %296 = vst [vmem:[%s1781_s10 + $0x6c] sm:$0xf] %v295_v35  ;;  %298 = vst [vmem:[%s1781_s10 + $0x70] sm:$0xf] %v297_v36 }
  0x4d   : > { %300 = vst [vmem:[%s1781_s10 + $0x74] sm:$0xf] %v299_v37  ;;  %v301_v38 = vld [vmem:[%s1776_s28 + $0x1e0] sm:$0xf]  ;;  %v303_v39 = vld [vmem:[%s1776_s28 + $0x1f0] sm:$0xf] }
  0x4e   : > { %v305_v40 = vld [vmem:[%s1776_s28 + $0x200] sm:$0xf]  ;;  %302 = vst [vmem:[%s1781_s10 + $0x78] sm:$0xf] %v301_v38  ;;  %304 = vst [vmem:[%s1781_s10 + $0x7c] sm:$0xf] %v303_v39 }
  0x4f   : > { %306 = vst [vmem:[%s1781_s10 + $0x80] sm:$0xf] %v305_v40  ;;  %v307_v41 = vld [vmem:[%s1776_s28 + $0x210] sm:$0xf]  ;;  %v309_v42 = vld [vmem:[%s1776_s28 + $0x220] sm:$0xf] }
  0x50   : > { %v311_v43 = vld [vmem:[%s1776_s28 + $0x230] sm:$0xf]  ;;  %308 = vst [vmem:[%s1781_s10 + $0x84] sm:$0xf] %v307_v41  ;;  %310 = vst [vmem:[%s1781_s10 + $0x88] sm:$0xf] %v309_v42 }
  0x51   : > { %312 = vst [vmem:[%s1781_s10 + $0x8c] sm:$0xf] %v311_v43  ;;  %v313_v44 = vld [vmem:[%s1776_s28 + $0x240] sm:$0xf]  ;;  %v315_v45 = vld [vmem:[%s1776_s28 + $0x250] sm:$0xf] }
  0x52   : > { %v317_v46 = vld [vmem:[%s1776_s28 + $0x260] sm:$0xf]  ;;  %314 = vst [vmem:[%s1781_s10 + $0x90] sm:$0xf] %v313_v44  ;;  %316 = vst [vmem:[%s1781_s10 + $0x94] sm:$0xf] %v315_v45 }
  0x53   : > { %318 = vst [vmem:[%s1781_s10 + $0x98] sm:$0xf] %v317_v46  ;;  %v319_v47 = vld [vmem:[%s1776_s28 + $0x270] sm:$0xf]  ;;  %v321_v48 = vld [vmem:[%s1776_s28 + $0x280] sm:$0xf] }
  0x54   : > { %v323_v49 = vld [vmem:[%s1776_s28 + $0x290] sm:$0xf]  ;;  %320 = vst [vmem:[%s1781_s10 + $0x9c] sm:$0xf] %v319_v47  ;;  %322 = vst [vmem:[%s1781_s10 + $0xa0] sm:$0xf] %v321_v48 }
  0x55   : > { %324 = vst [vmem:[%s1781_s10 + $0xa4] sm:$0xf] %v323_v49  ;;  %v325_v50 = vld [vmem:[%s1776_s28 + $0x2a0] sm:$0xf]  ;;  %v327_v51 = vld [vmem:[%s1776_s28 + $0x2b0] sm:$0xf] }
  0x56   : > { %v329_v52 = vld [vmem:[%s1776_s28 + $0x2c0] sm:$0xf]  ;;  %326 = vst [vmem:[%s1781_s10 + $0xa8] sm:$0xf] %v325_v50  ;;  %328 = vst [vmem:[%s1781_s10 + $0xac] sm:$0xf] %v327_v51 }
  0x57   : > { %330 = vst [vmem:[%s1781_s10 + $0xb0] sm:$0xf] %v329_v52  ;;  %v331_v53 = vld [vmem:[%s1776_s28 + $0x2d0] sm:$0xf]  ;;  %v333_v54 = vld [vmem:[%s1776_s28 + $0x2e0] sm:$0xf] }
  0x58   : > { %v335_v55 = vld [vmem:[%s1776_s28 + $0x2f0] sm:$0xf]  ;;  %332 = vst [vmem:[%s1781_s10 + $0xb4] sm:$0xf] %v331_v53  ;;  %334 = vst [vmem:[%s1781_s10 + $0xb8] sm:$0xf] %v333_v54 }
  0x59   : > { %336 = vst [vmem:[%s1781_s10 + $0xbc] sm:$0xf] %v335_v55  ;;  %v337_v56 = vld [vmem:[%s1776_s28 + $0x300] sm:$0xf]  ;;  %v339_v57 = vld [vmem:[%s1776_s28 + $0x310] sm:$0xf] }
  0x5a   : > { %v341_v58 = vld [vmem:[%s1776_s28 + $0x320] sm:$0xf]  ;;  %338 = vst [vmem:[%s1781_s10 + $0xc0] sm:$0xf] %v337_v56  ;;  %340 = vst [vmem:[%s1781_s10 + $0xc4] sm:$0xf] %v339_v57 }
  0x5b   : > { %342 = vst [vmem:[%s1781_s10 + $0xc8] sm:$0xf] %v341_v58  ;;  %v343_v59 = vld [vmem:[%s1776_s28 + $0x330] sm:$0xf]  ;;  %v345_v60 = vld [vmem:[%s1776_s28 + $0x340] sm:$0xf] }
  0x5c   : > { %v347_v61 = vld [vmem:[%s1776_s28 + $0x350] sm:$0xf]  ;;  %344 = vst [vmem:[%s1781_s10 + $0xcc] sm:$0xf] %v343_v59  ;;  %346 = vst [vmem:[%s1781_s10 + $0xd0] sm:$0xf] %v345_v60 }
  0x5d   : > { %348 = vst [vmem:[%s1781_s10 + $0xd4] sm:$0xf] %v347_v61  ;;  %v349_v62 = vld [vmem:[%s1776_s28 + $0x360] sm:$0xf]  ;;  %v351_v63 = vld [vmem:[%s1776_s28 + $0x370] sm:$0xf] }
  0x5e   : > { %v353_v0 = vld [vmem:[%s1776_s28 + $0x380] sm:$0xf]  ;;  %350 = vst [vmem:[%s1781_s10 + $0xd8] sm:$0xf] %v349_v62  ;;  %352 = vst [vmem:[%s1781_s10 + $0xdc] sm:$0xf] %v351_v63 }
  0x5f   : > { %354 = vst [vmem:[%s1781_s10 + $0xe0] sm:$0xf] %v353_v0  ;;  %v355_v1 = vld [vmem:[%s1776_s28 + $0x390] sm:$0xf]  ;;  %v357_v2 = vld [vmem:[%s1776_s28 + $0x3a0] sm:$0xf] }
  0x60   : > { %v359_v3 = vld [vmem:[%s1776_s28 + $0x3b0] sm:$0xf]  ;;  %356 = vst [vmem:[%s1781_s10 + $0xe4] sm:$0xf] %v355_v1  ;;  %358 = vst [vmem:[%s1781_s10 + $0xe8] sm:$0xf] %v357_v2 }
  0x61   : > { %360 = vst [vmem:[%s1781_s10 + $0xec] sm:$0xf] %v359_v3  ;;  %v361_v4 = vld [vmem:[%s1776_s28 + $0x3c0] sm:$0xf]  ;;  %v363_v5 = vld [vmem:[%s1776_s28 + $0x3d0] sm:$0xf] }
  0x62   : > { %v365_v6 = vld [vmem:[%s1776_s28 + $0x3e0] sm:$0xf]  ;;  %362 = vst [vmem:[%s1781_s10 + $0xf0] sm:$0xf] %v361_v4  ;;  %364 = vst [vmem:[%s1781_s10 + $0xf4] sm:$0xf] %v363_v5 }
  0x63   : > { %366 = vst [vmem:[%s1781_s10 + $0xf8] sm:$0xf] %v365_v6  ;;  %v367_v7 = vld [vmem:[%s1776_s28 + $0x3f0] sm:$0xf] }
  0x64   : > { %368 = vst [vmem:[%s1781_s10 + $0xfc] sm:$0xf] %v367_v7 }
  0x65 PF: > { %p1284_p0 = scmp.ge.s32.totalorder %s1634_s25, 1  ;;  %p530_p1 = scmp.lt.s32.totalorder %s1634_s25, 33 }
  0x67   : > { %p531_p2 = pnand %p1284_p0, %p530_p1 }
  0x68   : > { %s537_s0 = sand.u32 (!%p531_p2), 1, %s1610_s19   ;;  %s544_s11 = sand.u32 (!%p531_p2), 1, %s1602_s17  }
  0x69   : > { %534 = sbr.rel (%p531_p2) target bundleno = 447 (0x1bf), region = 92  ;;  %s1285_s26 = sshll.u32 (!%p531_p2), %s537_s0, 6 }
  0x6a   : > { %s1286_s5 = sshll.u32 (!%p531_p2), %s544_s11, 8  ;;  %s575_s29 = sand.u32 (!%p531_p2), 1, %s1594_s15  }
  0x6b   : > { %p580_p3 = scmp.lt.s32.totalorder (!%p531_p2), %s1622_s22, 3  ;;  %s1287_s28 = sshll.u32 (!%p531_p2), %s575_s29, 4 }
  0x6c   : > { %s1925_s24 = scalar_lea.vmem (!%p531_p2), [#allocation3], %s1285_s26  ;;  %s1927_s17 = scalar_lea.vmem (!%p531_p2), [#allocation4], %s1286_s5 }
  0x6d   : > { %s1929_s19 = scalar_lea.vmem (!%p531_p2), [#allocation5], %s1287_s28  ;;  %p1288_p4 = scmp.ne.s32.totalorder (!%p531_p2), %s1618_s21, 0 }
  0x70   : > { %s1915_s30 = scalar_select %p580_p3, %s1622_s22, 3 }
  0x71   : > { %590 = sbr.rel (%p1288_p4) target bundleno = 120 (0x78), region = 104  ;;  %v1636_v8 = vmov (!%p1288_p4), 0.0  }
  0x72   : > { %s582_s9 = scalar_lea.vmem %s2030_s2, %s1915_s30  ;;  %s585_s27 = scalar_lea.vmem %s2031_s3, %s1915_s30  ;;  %591 = vst [vmem:[#allocation2] sm:$0xff] (!%p1288_p4), %v1636_v8  ;;  %592 = vst [vmem:[#allocation2 + $0x8] sm:$0xff] (!%p1288_p4), %v1636_v8 }
  0x73   : > { %593 = vst [vmem:[#allocation2 + $0x10] sm:$0xff] (!%p1288_p4), %v1636_v8  ;;  %594 = vst [vmem:[#allocation2 + $0x18] sm:$0xff] (!%p1288_p4), %v1636_v8 }
  0x78 PF: > { %v1502_v9 = vld [vmem:[%s1927_s17 + $0x40] sm:$0xff]   ;;  %v1506_v13 = vld [vmem:[%s1927_s17 + $0x48] sm:$0xff]   ;;  %v1510_v17 = vld [vmem:[%s1927_s17 + $0x50] sm:$0xff]   ;;  %p1329_p5 = scmp.ne.s32.totalorder %s1618_s21, 7 }
  0x79   : > { %v1503_v10 = vld [vmem:[%s1927_s17 + $0xc0] sm:$0xff]   ;;  %1357 = vmatprep.subr.bf16.mxu0 %v1502_v9  ;;  %v1507_v14 = vld [vmem:[%s1927_s17 + $0xc8] sm:$0xff]   ;;  %v1511_v18 = vld [vmem:[%s1927_s17 + $0xd0] sm:$0xff]  }
  0x7a   : > { %v1504_v11 = vld [vmem:[%s1927_s17] sm:$0xff]   ;;  %1385 = vmatprep.subr.bf16.mxu1 %v1503_v10  ;;  %v1508_v15 = vld [vmem:[%s1927_s17 + $0x8] sm:$0xff]   ;;  %v1512_v19 = vld [vmem:[%s1927_s17 + $0x10] sm:$0xff]  }
  0x7b   : > { %v1505_v12 = vld [vmem:[%s1927_s17 + $0x80] sm:$0xff]   ;;  %1358 = vmatpush3.bf16.msra.mxu0 %v1504_v11  ;;  %v1509_v16 = vld [vmem:[%s1927_s17 + $0x88] sm:$0xff]   ;;  %v1513_v20 = vld [vmem:[%s1927_s17 + $0x90] sm:$0xff]  }
  0x7c   : > { %1386 = vmatpush3.bf16.msra.mxu1 %v1505_v12  ;;  %1359 = vmatprep.subr.bf16.mxu0 %v1506_v13  ;;  %v1514_v21 = vld [vmem:[%s1927_s17 + $0x58] sm:$0xff]   ;;  %v1518_v25 = vld [vmem:[%s1927_s17 + $0x60] sm:$0xff]   ;;  %v1522_v29 = vld [vmem:[%s1927_s17 + $0x68] sm:$0xff]  }
  0x7d   : > { %1387 = vmatprep.subr.bf16.mxu1 %v1507_v14  ;;  %v1515_v22 = vld [vmem:[%s1927_s17 + $0xd8] sm:$0xff]   ;;  %v1519_v26 = vld [vmem:[%s1927_s17 + $0xe0] sm:$0xff]   ;;  %v1523_v30 = vld [vmem:[%s1927_s17 + $0xe8] sm:$0xff]  }
  0x7e   : > { %v1516_v23 = vld [vmem:[%s1927_s17 + $0x18] sm:$0xff]   ;;  %v1520_v27 = vld [vmem:[%s1927_s17 + $0x20] sm:$0xff]   ;;  %v1524_v31 = vld [vmem:[%s1927_s17 + $0x28] sm:$0xff]  }
  0x7f   : > { %1360 = vmatpush3.bf16.msra.mxu0 %v1508_v15  ;;  %v1517_v24 = vld [vmem:[%s1927_s17 + $0x98] sm:$0xff]   ;;  %v1521_v28 = vld [vmem:[%s1927_s17 + $0xa0] sm:$0xff]   ;;  %v1525_v32 = vld [vmem:[%s1927_s17 + $0xa8] sm:$0xff]  }
  0x80   : > { %1388 = vmatpush3.bf16.msra.mxu1 %v1509_v16  ;;  %1361 = vmatprep.subr.bf16.mxu0 %v1510_v17  ;;  %v1526_v33 = vld [vmem:[%s1927_s17 + $0x70] sm:$0xff]   ;;  %v1530_v37 = vld [vmem:[%s1927_s17 + $0x78] sm:$0xff]   ;;  %v595_v58 = vld [vmem:[#allocation2] sm:$0xff] }
  0x81   : > { %1389 = vmatprep.subr.bf16.mxu1 %v1511_v18  ;;  %v1527_v34 = vld [vmem:[%s1927_s17 + $0xf0] sm:$0xff]   ;;  %v1531_v38 = vld [vmem:[%s1927_s17 + $0xf8] sm:$0xff]   ;;  %v596_v63 = vld [vmem:[#allocation2 + $0x8] sm:$0xff] }
  0x82   : > { %v1528_v35 = vld [vmem:[%s1927_s17 + $0x30] sm:$0xff]   ;;  %v1532_v39 = vld [vmem:[%s1927_s17 + $0x38] sm:$0xff]  }
  0x83   : > { %1362 = vmatpush3.bf16.msra.mxu0 %v1512_v19  ;;  %v1529_v36 = vld [vmem:[%s1927_s17 + $0xb0] sm:$0xff]   ;;  %v1533_v40 = vld [vmem:[%s1927_s17 + $0xb8] sm:$0xff]  }
  0x84   : > { %1390 = vmatpush3.bf16.msra.mxu1 %v1513_v20  ;;  %1363 = vmatprep.subr.bf16.mxu0 %v1514_v21  ;;  %v1534_v41 = vld [vmem:[%s1925_s24] ss:$16 sps:$4 sm:$0xff]   ;;  %v1536_v42 = vld [vmem:[%s1925_s24 + $0x4] ss:$16 sps:$4 sm:$0xff]   ;;  %v1537_v43 = vld [vmem:[%s1925_s24 + $0x8] ss:$16 sps:$4 sm:$0xff]  }
  0x85   : > { %1391 = vmatprep.subr.bf16.mxu1 %v1515_v22  ;;  %v1539_v44 = vld [vmem:[%s1925_s24 + $0xc] ss:$16 sps:$4 sm:$0xff]   ;;  %935 = vmatprep.mubr.bf16.mxu0 %v1536_v42  ;;  %v1540_v45 = vld [vmem:[%s1925_s24 + $0x24] ss:$16 sps:$4 sm:$0xff]   ;;  %v1544_v47 = vld [vmem:[%s1925_s24 + $0x20] ss:$16 sps:$4 sm:$0xff]  }
  0x86   : > { %984 = vmatprep.mubr.bf16.mxu1 %v1539_v44  ;;  %v1542_v46 = vld [vmem:[%s1925_s24 + $0x2c] ss:$16 sps:$4 sm:$0xff]   ;;  %v1545_v48 = vld [vmem:[%s1925_s24 + $0x28] ss:$16 sps:$4 sm:$0xff]   ;;  %v597_v12 = vld [vmem:[#allocation2 + $0x10] sm:$0xff] }
  0x87   : > { %1364 = vmatpush3.bf16.msra.mxu0 %v1516_v23  ;;  %v598_v17 = vld [vmem:[#allocation2 + $0x18] sm:$0xff] }
  0x88   : > { %1392 = vmatpush3.bf16.msra.mxu1 %v1517_v24  ;;  %1365 = vmatprep.subr.bf16.mxu0 %v1518_v25 }
  0x89   : > { %1393 = vmatprep.subr.bf16.mxu1 %v1519_v26 }
  0x8b   : > { %1366 = vmatpush3.bf16.msra.mxu0 %v1520_v27 }
  0x8c   : > { %1394 = vmatpush3.bf16.msra.mxu1 %v1521_v28  ;;  %1367 = vmatprep.subr.bf16.mxu0 %v1522_v29 }
  0x8d   : > { %1395 = vmatprep.subr.bf16.mxu1 %v1523_v30 }
  0x8f   : > { %1368 = vmatpush3.bf16.msra.mxu0 %v1524_v31 }
  0x90   : > { %1396 = vmatpush3.bf16.msra.mxu1 %v1525_v32  ;;  %1369 = vmatprep.subr.bf16.mxu0 %v1526_v33 }
  0x91   : > { %1397 = vmatprep.subr.bf16.mxu1 %v1527_v34 }
  0x93   : > { %1370 = vmatpush3.bf16.msra.mxu0 %v1528_v35 }
  0x94   : > { %1398 = vmatpush3.bf16.msra.mxu1 %v1529_v36  ;;  %1371 = vmatprep.subr.bf16.mxu0 %v1530_v37 }
  0x95   : > { %1399 = vmatprep.subr.bf16.mxu1 %v1531_v38 }
  0x97   : > { %1372 = vmatpush3.bf16.msra.mxu0 %v1532_v39 }
  0x98   : > { %1400 = vmatpush3.bf16.msra.mxu1 %v1533_v40 }
  0x9a   : > { %936 = vmatmul.mubr.bf16.vlgmr.msra.gmra.mrb[0].mxu0 %v1534_v41 }
  0x9b   : > { %985 = vmatmul.mubr.bf16.vlgmr.msra.gmra.mrb[0].mxu1 %v1537_v43  ;;  %943 = vmatprep.mubr.bf16.mxu0 %v1540_v45 }
  0x9c   : > { %992 = vmatprep.mubr.bf16.mxu1 %v1542_v46 }
  0xa2   : > { %944 = vmatmul.mubr.bf16.gmra.mrb[4].mxu0 %v1544_v47 }
  0xa3   : > { %993 = vmatmul.mubr.bf16.gmra.mrb[4].mxu1 %v1545_v48 }
 0x16d   : > { %v1373_v49 = vpop.f32.mrb[0].mxu0 }
 0x16e   : > { %v1401_v50 = vpop.f32.mrb[0].mxu1  ;;  %v1374_v51 = vpop.f32.mrb[1].mxu0 }
 0x16f   : > { %v1375_v52 = vadd.f32 %v1374_v51, %v1373_v49  ;;  %v1402_v53 = vpop.f32.mrb[1].mxu1  ;;  %v1376_v54 = vpop.f32.mrb[2].mxu0 }
 0x170   : > { %v1403_v55 = vadd.f32 %v1402_v53, %v1401_v50  ;;  %v1404_v56 = vpop.f32.mrb[2].mxu1  ;;  %v1377_v57 = vpop.f32.mrb[3].mxu0 }
 0x171   : > { %v1378_v59 = vadd.f32 %v1377_v57, %v1376_v54  ;;  %v1405_v60 = vpop.f32.mrb[3].mxu1  ;;  %v1330_v57 = vld [vmem:[%s582_s9] ss:$0 sm:$0xff] (!%p1329_p5) }
 0x172   : > { %v987_v61 = vadd.f32 %v1403_v55, %v1375_v52  ;;  %v1406_v62 = vadd.f32 %v1405_v60, %v1404_v56 }
 0x174   : > { %v1001_v0 = vadd.f32 %v987_v61, %v595_v58  ;;  %v990_v1 = vadd.f32 %v1406_v62, %v1378_v59  ;;  %v1331_v62 = vld [vmem:[%s585_s27] ss:$0 sm:$0xff] (!%p1329_p5) }
 0x175   : > { %v1379_v2 = vpop.f32.mrb[4].mxu0 }
 0x176   : > { %1005 = vst [vmem:[#allocation2] sm:$0xff] %v1001_v0  ;;  %v1002_v3 = vadd.f32 %v990_v1, %v596_v63  ;;  %v1407_v4 = vpop.f32.mrb[4].mxu1  ;;  %v1380_v5 = vpop.f32.mrb[5].mxu0 }
 0x177   : > { %v1381_v6 = vadd.f32 %v1380_v5, %v1379_v2  ;;  %v1408_v7 = vpop.f32.mrb[5].mxu1  ;;  %v1382_v8 = vpop.f32.mrb[6].mxu0 }
 0x178   : > { %1006 = vst [vmem:[#allocation2 + $0x8] sm:$0xff] %v1002_v3  ;;  %v1409_v9 = vadd.f32 %v1408_v7, %v1407_v4  ;;  %v1410_v10 = vpop.f32.mrb[6].mxu1  ;;  %v1383_v11 = vpop.f32.mrb[7].mxu0 }
 0x179   : > { %v1384_v13 = vadd.f32 %v1383_v11, %v1382_v8  ;;  %v1411_v14 = vpop.f32.mrb[7].mxu1 }
 0x17a   : > { %v995_v15 = vadd.f32 %v1409_v9, %v1381_v6  ;;  %v1412_v16 = vadd.f32 %v1411_v14, %v1410_v10  ;;  %1012 = sbr.rel (%p1329_p5) target bundleno = 438 (0x1b6), region = 108 }
 0x17c   : > { %v1003_v18 = vadd.f32 %v995_v15, %v597_v12  ;;  %v998_v19 = vadd.f32 %v1412_v16, %v1384_v13 }
 0x17d   : > { %v1013_v21 = vld [vmem:[#allocation2] sm:$0xff] (!%p1329_p5) }
 0x17e   : > { %1007 = vst [vmem:[#allocation2 + $0x10] sm:$0xff] %v1003_v18  ;;  %v1004_v20 = vadd.f32 %v998_v19, %v598_v17  ;;  %v1026_v26 = vmul.f32 (!%p1329_p5), %v1013_v21, %v1013_v21 }
 0x17f   : > { %v1014_v22 = vld [vmem:[#allocation2 + $0x8] sm:$0xff] (!%p1329_p5) }
 0x180   : > { %1008 = vst [vmem:[#allocation2 + $0x18] sm:$0xff] %v1004_v20  ;;  %v1017_v25 = vadd.f32 (!%p1329_p5), %v1014_v22, %v1013_v21  ;;  %v1027_v27 = vmul.f32 (!%p1329_p5), %v1014_v22, %v1014_v22 }
 0x182   : > { %v1030_v31 = vadd.f32 %v1027_v27, %v1026_v26 }
 0x185   : > { %v1015_v23 = vld [vmem:[#allocation2 + $0x10] sm:$0xff] }
 0x186   : > { %v1028_v28 = vmul.f32 %v1015_v23, %v1015_v23  ;;  %v1018_v29 = vadd.f32 %v1017_v25, %v1015_v23 }
 0x187   : > { %v1016_v24 = vld [vmem:[#allocation2 + $0x18] sm:$0xff] }
 0x188   : > { %v1029_v30 = vmul.f32 %v1016_v24, %v1016_v24  ;;  %v1019_v32 = vadd.f32 %v1018_v29, %v1016_v24  ;;  %v1031_v33 = vadd.f32 %v1030_v31, %v1028_v28 }
 0x18a   : > { %v1020_v34 = vrot.slane %v1019_v32, 4  ;;  %v1032_v35 = vadd.f32 %v1031_v33, %v1029_v30 }
 0x18c   : > { %v1021_v36 = vadd.f32 %v1020_v34, %v1019_v32  ;;  %v1033_v37 = vrot.slane %v1032_v35, 4 }
 0x18e   : > { %v1022_v38 = vrot.slane %v1021_v36, 2  ;;  %v1034_v39 = vadd.f32 %v1033_v37, %v1032_v35 }
 0x190   : > { %v1023_v40 = vadd.f32 %v1022_v38, %v1021_v36  ;;  %v1035_v41 = vrot.slane %v1034_v39, 2 }
 0x192   : > { %v1024_v42 = vrot.slane %v1023_v40, 1  ;;  %v1036_v43 = vadd.f32 %v1035_v41, %v1034_v39 }
 0x194   : > { %v1025_v44 = vadd.f32 %v1024_v42, %v1023_v40  ;;  %v1037_v45 = vrot.slane %v1036_v43, 1 }
 0x196   : > { %v1038_v46 = vadd.f32 %v1037_v45, %v1036_v43  ;;  %v1039_v47 = vmul.f32 0.03125, %v1025_v44 }
 0x198   : > { %v1040_v48 = vmul.f32 0.03125, %v1038_v46  ;;  %v1041_v49 = vmul.f32 %v1039_v47, %v1039_v47  ;;  %v1043_v52 = vsub.f32 %v1013_v21, %v1039_v47  ;;  %v1044_v53 = vsub.f32 %v1014_v22, %v1039_v47 }
 0x199   : > { %v1045_v54 = vsub.f32 %v1015_v23, %v1039_v47  ;;  %v1046_v55 = vsub.f32 %v1016_v24, %v1039_v47 }
 0x19a   : > { %v1042_v50 = vsub.f32 %v1040_v48, %v1041_v49 }
 0x19c   : > { %v1047_v51 = vadd.f32 1e-05, %v1042_v50 }
 0x19e   : > { %1546 = vrsqrt.f32 %v1047_v51 }
 0x1a8   : > { %v1547_v56 = vpop.eup %1546 }
 0x1a9   : > { %v1049_v58 = vmul.f32 %v1547_v56, %v1043_v52  ;;  %v1050_v59 = vmul.f32 %v1547_v56, %v1044_v53  ;;  %v1051_v60 = vmul.f32 %v1547_v56, %v1045_v54  ;;  %v1052_v61 = vmul.f32 %v1547_v56, %v1046_v55 }
 0x1ab   : > { %v1060_v63 = vmul.f32 %v1330_v57, %v1049_v58  ;;  %v1061_v0 = vmul.f32 %v1330_v57, %v1050_v59  ;;  %v1062_v1 = vmul.f32 %v1330_v57, %v1051_v60  ;;  %v1063_v2 = vmul.f32 %v1330_v57, %v1052_v61 }
 0x1ad   : > { %v1071_v3 = vadd.f32 %v1331_v62, %v1060_v63  ;;  %v1072_v4 = vadd.f32 %v1331_v62, %v1061_v0  ;;  %v1073_v5 = vadd.f32 %v1331_v62, %v1062_v1  ;;  %v1074_v6 = vadd.f32 %v1331_v62, %v1063_v2 }
 0x1af   : > { %vm1075_vm0 = vcmp.gt.f32.partialorder %v1071_v3, 0.0  ;;  %vm1076_vm1 = vcmp.gt.f32.partialorder %v1072_v4, 0.0  ;;  %v1079_v7 = vmul.f32 0.2, %v1071_v3  ;;  %v1080_v8 = vmul.f32 0.2, %v1072_v4 }
 0x1b0   : > { %vm1077_vm2 = vcmp.gt.f32.partialorder %v1073_v5, 0.0  ;;  %vm1078_vm3 = vcmp.gt.f32.partialorder %v1074_v6, 0.0  ;;  %v1081_v9 = vmul.f32 0.2, %v1073_v5  ;;  %v1082_v10 = vmul.f32 0.2, %v1074_v6 }
 0x1b1   : > { %v1083_v11 = vsel %vm1075_vm0, %v1071_v3, %v1079_v7  ;;  %v1084_v12 = vsel %vm1076_vm1, %v1072_v4, %v1080_v8 }
 0x1b2   : > { %v1349_v13 = vpack.c.bf16 %v1084_v12, %v1083_v11  ;;  %v1085_v14 = vsel %vm1077_vm2, %v1073_v5, %v1081_v9  ;;  %v1086_v15 = vsel %vm1078_vm3, %v1074_v6, %v1082_v10 }
 0x1b3   : > { %v1354_v16 = vpack.c.bf16 %v1086_v15, %v1085_v14 }
 0x1b4   : > { %1350 = vst [vmem:[%s1929_s19] sm:$0xff] %v1349_v13  }
 0x1b5   : > { %1356 = vst [vmem:[%s1929_s19 + $0x8] sm:$0xff] %v1354_v16  }
 0x1b6 PF: > { %1113 = sbr.rel (!%p1756_p12) target bundleno = 447 (0x1bf), region = 112  ;;  %s1337_s27 = sshll.u32 (%p1756_p12), %s1622_s22, 2 }
 0x1b7   : > { %s1115_s26 = scalar_lea.vmem (%p1756_p12), %s2032_s4, %s1337_s27 }
 0x1bb   : > { %v1131_v17 = vld [vmem:[%s1929_s19] sm:$0xf] (%p1756_p12)  ;;  %v1133_v18 = vld [vmem:[%s1929_s19 + $0x4] sm:$0xf] (%p1756_p12) }
 0x1bc   : > { %v1135_v19 = vld [vmem:[%s1929_s19 + $0x8] sm:$0xf] (%p1756_p12)  ;;  %v1137_v20 = vld [vmem:[%s1929_s19 + $0xc] sm:$0xf] (%p1756_p12)  ;;  %1132 = vst [vmem:[%s1115_s26] sm:$0xf] (%p1756_p12), %v1131_v17 }
 0x1bd   : > { %1134 = vst [vmem:[%s1115_s26 + $0x10] sm:$0xf] %v1133_v18  ;;  %1136 = vst [vmem:[%s1115_s26 + $0x20] sm:$0xf] %v1135_v19 }
 0x1be   : > { %1138 = vst [vmem:[%s1115_s26 + $0x30] sm:$0xf] %v1137_v20 }
 0x1bf PF: > { %s14_s25 = sadd.s32 1, %s1634_s25   ;;  %s2046_s22 = sld [smem:[#allocation6_spill]] }
 0x1c0   : > { %p11_p6 = scmp.ge.s32.totalorder %s14_s25, 34   ;;  %s2047_s14 = sld [smem:[#allocation7_spill]] }
 0x1c1   : > { %s2048_s24 = sld [smem:[#allocation8_spill]]  ;;  %s2049_s15 = smov %s1598_s16 }
 0x1c2   : > { %s2050_s16 = smov %s1754_s13  ;;  %s2051_s17 = smov %s1606_s18 }
 0x1c3   : > { %s2052_s18 = smov %s1751_s12  ;;  %s2053_s19 = smov %s1614_s20 }
 0x1c4   : > { %s2054_s20 = smov %s1737_s7  ;;  %s2055_s21 = smov %s1626_s23 }
 0x1c5   :  { %13 = sbr.rel (!%p11_p6) target bundleno = 9 (0x9), region = 198 }
 0x1c6   : > { %s2056_s23 = smov %s2047_s14 }

// kernel: discriminator_forward.9
= control target key start
LH: loop header
LB: loop body
LE: loop exit
PB: predicated region body
PF: predicated region fallthrough
CT: control target
= control target key end

     0   :  { %v7613_v22 = vmov 1966171168   ;;  %v1056_v24 = vlaneseq  ;;  %vm5866_vm0 = vcmask 58368   ;;  %s9306_s1 = inlined_call_operand.vmem [shape: bf16[8192,8], index: 1, kind: input, shape index: {}]   ;;  %s9307_s0 = inlined_call_operand.vmem [shape: bf16[2,8192], index: 0, kind: input, shape index: {}]   ;;  %s9308_s2 = inlined_call_operand.vmem [shape: f32[2,8], index: 2, kind: output, shape index: {}]  }
   0x1   :  { %v7089_v0 = vld [vmem:[%s9306_s1 + $0x40] sm:$0xff]   ;;  %v7093_v4 = vld [vmem:[%s9306_s1 + $0x48] sm:$0xff]   ;;  %v7097_v8 = vld [vmem:[%s9306_s1 + $0x50] sm:$0xff]   ;;  %v1054_v23 = vunpack.c.l.s4 %v7613_v22 }
   0x2   :  { %v7090_v1 = vld [vmem:[%s9306_s1 + $0xc0] sm:$0xff]   ;;  %6384 = vmatprep.subr.bf16.mxu0 %v7089_v0  ;;  %v7094_v5 = vld [vmem:[%s9306_s1 + $0xc8] sm:$0xff]   ;;  %v7098_v9 = vld [vmem:[%s9306_s1 + $0xd0] sm:$0xff]   ;;  %v1057_v30 = vshrl.u32 %v1056_v24, 7 }
   0x3   :  { %v7091_v2 = vld [vmem:[%s9306_s1] sm:$0xff]   ;;  %6406 = vmatprep.subr.bf16.mxu1 %v7090_v1  ;;  %v7095_v6 = vld [vmem:[%s9306_s1 + $0x8] sm:$0xff]   ;;  %v7099_v10 = vld [vmem:[%s9306_s1 + $0x10] sm:$0xff]   ;;  %v1055_v29 = vunpack.c.0.s8 %v1054_v23 }
   0x4   :  { %v7092_v3 = vld [vmem:[%s9306_s1 + $0x80] sm:$0xff]   ;;  %6385 = vmatpush3.bf16.msra.mxu0 %v7091_v2  ;;  %v7096_v7 = vld [vmem:[%s9306_s1 + $0x88] sm:$0xff]   ;;  %v7100_v11 = vld [vmem:[%s9306_s1 + $0x90] sm:$0xff]  }
   0x5   :  { %6407 = vmatpush3.bf16.msra.mxu1 %v7092_v3  ;;  %6386 = vmatprep.subr.bf16.mxu0 %v7093_v4  ;;  %v7101_v12 = vld [vmem:[%s9306_s1 + $0x58] sm:$0xff]   ;;  %v7105_v16 = vld [vmem:[%s9306_s1 + $0x60] sm:$0xff]   ;;  %v7109_v20 = vld [vmem:[%s9306_s1 + $0x68] sm:$0xff]   ;;  %v7719_v35 = vsub.s32 %v1055_v29, %v1057_v30 }
   0x6   :  { %6408 = vmatprep.subr.bf16.mxu1 %v7094_v5  ;;  %v7102_v13 = vld [vmem:[%s9306_s1 + $0xd8] sm:$0xff]   ;;  %v7106_v17 = vld [vmem:[%s9306_s1 + $0xe0] sm:$0xff]   ;;  %v7110_v21 = vld [vmem:[%s9306_s1 + $0xe8] sm:$0xff]  }
   0x7   :  { %v7103_v14 = vld [vmem:[%s9306_s1 + $0x18] sm:$0xff]   ;;  %v7107_v18 = vld [vmem:[%s9306_s1 + $0x20] sm:$0xff]   ;;  %v7111_v25 = vld [vmem:[%s9306_s1 + $0x28] sm:$0xff]  }
   0x8   :  { %6387 = vmatpush3.bf16.msra.mxu0 %v7095_v6  ;;  %v7104_v15 = vld [vmem:[%s9306_s1 + $0x98] sm:$0xff]   ;;  %v7108_v19 = vld [vmem:[%s9306_s1 + $0xa0] sm:$0xff]   ;;  %v7112_v26 = vld [vmem:[%s9306_s1 + $0xa8] sm:$0xff]  }
   0x9   :  { %6409 = vmatpush3.bf16.msra.mxu1 %v7096_v7  ;;  %6388 = vmatprep.subr.bf16.mxu0 %v7097_v8  ;;  %v7113_v27 = vld [vmem:[%s9306_s1 + $0x70] sm:$0xff]   ;;  %v7117_v33 = vld [vmem:[%s9306_s1 + $0x78] sm:$0xff]   ;;  %v12_v38 = vld [vmem:[%s9307_s0] sm:$0xff] }
   0xa   :  { %6410 = vmatprep.subr.bf16.mxu1 %v7098_v9  ;;  %v7114_v28 = vld [vmem:[%s9306_s1 + $0xf0] sm:$0xff]   ;;  %v7118_v34 = vld [vmem:[%s9306_s1 + $0xf8] sm:$0xff]   ;;  %v1052_v39 = vcombine.high %v12_v38, %v12_v38  ;;  %v1059_v40 = vrot.slane %v12_v38, %v7719_v35  ;;  %v7122_v41 = vld [vmem:[%s9306_s1 + $0x140] sm:$0xff]  }
   0xb   :  { %v7115_v31 = vld [vmem:[%s9306_s1 + $0x30] sm:$0xff]   ;;  %v7119_v36 = vld [vmem:[%s9306_s1 + $0x38] sm:$0xff]   ;;  %v7123_v42 = vld [vmem:[%s9306_s1 + $0x1c0] sm:$0xff]  }
   0xc   :  { %6389 = vmatpush3.bf16.msra.mxu0 %v7099_v10  ;;  %v7116_v32 = vld [vmem:[%s9306_s1 + $0xb0] sm:$0xff]   ;;  %v7120_v37 = vld [vmem:[%s9306_s1 + $0xb8] sm:$0xff]   ;;  %v1067_v43 = vcombine.high %v1059_v40, %v1059_v40  ;;  %v1075_v44 = vrot.slane %v1059_v40, %v7719_v35  ;;  %v7739_v45 = vrot.slane %v1052_v39, %v7719_v35  ;;  %v7124_v46 = vld [vmem:[%s9306_s1 + $0x100] sm:$0xff]  }
   0xd   :  { %6411 = vmatpush3.bf16.msra.mxu1 %v7100_v11  ;;  %6390 = vmatprep.subr.bf16.mxu0 %v7101_v12  ;;  %v7125_v48 = vld [vmem:[%s9306_s1 + $0x180] sm:$0xff]   ;;  %v7126_v51 = vld [vmem:[%s9306_s1 + $0x148] sm:$0xff]   ;;  %v7130_v58 = vld [vmem:[%s9306_s1 + $0x150] sm:$0xff]  }
   0xe   :  { %6412 = vmatprep.subr.bf16.mxu1 %v7102_v13  ;;  %v1089_v47 = vrot.slane %v1067_v43, %v7719_v35  ;;  %v1068_v49 = vcombine.high %v7739_v45, %v7739_v45  ;;  %v1097_v50 = vcombine.high %v1075_v44, %v1075_v44  ;;  %v7127_v53 = vld [vmem:[%s9306_s1 + $0x1c8] sm:$0xff]   ;;  %v7131_v59 = vld [vmem:[%s9306_s1 + $0x1d0] sm:$0xff]   ;;  %v7134_v62 = vld [vmem:[%s9306_s1 + $0x158] sm:$0xff]  }
   0xf   :  { %v7128_v55 = vld [vmem:[%s9306_s1 + $0x108] sm:$0xff]   ;;  %v7132_v60 = vld [vmem:[%s9306_s1 + $0x110] sm:$0xff]   ;;  %v7135_v63 = vld [vmem:[%s9306_s1 + $0x1d8] sm:$0xff]  }
  0x10   :  { %6391 = vmatpush3.bf16.msra.mxu0 %v7103_v14  ;;  %4612 = vmatprep.mubr.bf16.mxu0 %v1089_v47  ;;  %v1099_v52 = vcombine.high %v1089_v47, %v1089_v47  ;;  %v1096_v54 = vrot.slane %v1068_v49, %v7719_v35  ;;  %v7129_v56 = vld [vmem:[%s9306_s1 + $0x188] sm:$0xff]   ;;  %v7133_v61 = vld [vmem:[%s9306_s1 + $0x190] sm:$0xff]   ;;  %v7136_v0 = vld [vmem:[%s9306_s1 + $0x118] sm:$0xff]  }
  0x11   :  { %6413 = vmatpush3.bf16.msra.mxu1 %v7104_v15  ;;  %6392 = vmatprep.subr.bf16.mxu0 %v7105_v16  ;;  %v7137_v1 = vld [vmem:[%s9306_s1 + $0x198] sm:$0xff]   ;;  %v7138_v2 = vld [vmem:[%s9306_s1 + $0x160] sm:$0xff]   ;;  %v7142_v6 = vld [vmem:[%s9306_s1 + $0x168] sm:$0xff]  }
  0x12   :  { %6414 = vmatprep.subr.bf16.mxu1 %v7106_v17  ;;  %4652 = vmatprep.mubr.bf16.mxu1 %v1099_v52  ;;  %v1100_v57 = vcombine.high %v1096_v54, %v1096_v54  ;;  %v7139_v3 = vld [vmem:[%s9306_s1 + $0x1e0] sm:$0xff]   ;;  %v7143_v7 = vld [vmem:[%s9306_s1 + $0x1e8] sm:$0xff]   ;;  %v7146_v10 = vld [vmem:[%s9306_s1 + $0x170] sm:$0xff]  }
  0x13   :  { %v7140_v4 = vld [vmem:[%s9306_s1 + $0x120] sm:$0xff]   ;;  %v7144_v8 = vld [vmem:[%s9306_s1 + $0x128] sm:$0xff]   ;;  %v7147_v11 = vld [vmem:[%s9306_s1 + $0x1f0] sm:$0xff]  }
  0x14   :  { %6393 = vmatpush3.bf16.msra.mxu0 %v7107_v18  ;;  %v7141_v5 = vld [vmem:[%s9306_s1 + $0x1a0] sm:$0xff]   ;;  %v7145_v9 = vld [vmem:[%s9306_s1 + $0x1a8] sm:$0xff]   ;;  %v7148_v12 = vld [vmem:[%s9306_s1 + $0x130] sm:$0xff]   ;;  %v1082_v18 = vrot.slane %v7739_v45, %v7719_v35 }
  0x15   :  { %6415 = vmatpush3.bf16.msra.mxu1 %v7108_v19  ;;  %6394 = vmatprep.subr.bf16.mxu0 %v7109_v20  ;;  %v7149_v13 = vld [vmem:[%s9306_s1 + $0x1b0] sm:$0xff]   ;;  %v7150_v14 = vld [vmem:[%s9306_s1 + $0x178] sm:$0xff]   ;;  %v7154_v19 = vld [vmem:[%s9306_s1 + $0x240] sm:$0xff]  }
  0x16   :  { %6416 = vmatprep.subr.bf16.mxu1 %v7110_v21  ;;  %v7151_v15 = vld [vmem:[%s9306_s1 + $0x1f8] sm:$0xff]   ;;  %v7155_v20 = vld [vmem:[%s9306_s1 + $0x2c0] sm:$0xff]   ;;  %v1098_v23 = vcombine.high %v1082_v18, %v1082_v18  ;;  %v7158_v24 = vld [vmem:[%s9306_s1 + $0x248] sm:$0xff]  }
  0x17   :  { %v7152_v16 = vld [vmem:[%s9306_s1 + $0x138] sm:$0xff]   ;;  %v7156_v21 = vld [vmem:[%s9306_s1 + $0x200] sm:$0xff]   ;;  %v7163_v29 = vld [vmem:[%s9306_s1 + $0x2d0] sm:$0xff]  }
  0x18   :  { %6395 = vmatpush3.bf16.msra.mxu0 %v7111_v25  ;;  %v7153_v17 = vld [vmem:[%s9306_s1 + $0x1b8] sm:$0xff]   ;;  %v7157_v22 = vld [vmem:[%s9306_s1 + $0x280] sm:$0xff]   ;;  %v7159_v25 = vld [vmem:[%s9306_s1 + $0x2c8] sm:$0xff]  }
  0x19   :  { %6417 = vmatpush3.bf16.msra.mxu1 %v7112_v26  ;;  %6396 = vmatprep.subr.bf16.mxu0 %v7113_v27  ;;  %v7160_v26 = vld [vmem:[%s9306_s1 + $0x208] sm:$0xff]   ;;  %v7164_v30 = vld [vmem:[%s9306_s1 + $0x210] sm:$0xff]   ;;  %v7171_v38 = vld [vmem:[%s9306_s1 + $0x2e0] sm:$0xff]  }
  0x1a   :  { %6418 = vmatprep.subr.bf16.mxu1 %v7114_v28  ;;  %v7161_v27 = vld [vmem:[%s9306_s1 + $0x288] sm:$0xff]   ;;  %v7162_v28 = vld [vmem:[%s9306_s1 + $0x250] sm:$0xff]   ;;  %v7172_v39 = vld [vmem:[%s9306_s1 + $0x220] sm:$0xff]  }
  0x1b   :  { %v7173_v40 = vld [vmem:[%s9306_s1 + $0x2a0] sm:$0xff]   ;;  %v7176_v43 = vld [vmem:[%s9306_s1 + $0x228] sm:$0xff]   ;;  %v7178_v45 = vld [vmem:[%s9306_s1 + $0x270] sm:$0xff]  }
  0x1c   :  { %6397 = vmatpush3.bf16.msra.mxu0 %v7115_v31  ;;  %v7165_v31 = vld [vmem:[%s9306_s1 + $0x290] sm:$0xff]   ;;  %v7182_v49 = vld [vmem:[%s9306_s1 + $0x278] sm:$0xff]   ;;  %v13_v52 = vld [vmem:[%s9307_s0 + $0x8] sm:$0xff] }
  0x1d   :  { %6419 = vmatpush3.bf16.msra.mxu1 %v7116_v32  ;;  %6398 = vmatprep.subr.bf16.mxu0 %v7117_v33  ;;  %v7166_v32 = vld [vmem:[%s9306_s1 + $0x258] sm:$0xff]   ;;  %v7180_v47 = vld [vmem:[%s9306_s1 + $0x230] sm:$0xff]  }
  0x1e   :  { %6420 = vmatprep.subr.bf16.mxu1 %v7118_v34  ;;  %v7167_v33 = vld [vmem:[%s9306_s1 + $0x2d8] sm:$0xff]  }
  0x1f   :  { %v7168_v34 = vld [vmem:[%s9306_s1 + $0x218] sm:$0xff]  }
  0x20   :  { %6399 = vmatpush3.bf16.msra.mxu0 %v7119_v36  ;;  %v7169_v36 = vld [vmem:[%s9306_s1 + $0x298] sm:$0xff]  }
  0x21   :  { %6421 = vmatpush3.bf16.msra.mxu1 %v7120_v37  ;;  %6428 = vmatprep.subr.bf16.mxu0 %v7122_v41  ;;  %v7170_v37 = vld [vmem:[%s9306_s1 + $0x260] sm:$0xff]   ;;  %v7174_v41 = vld [vmem:[%s9306_s1 + $0x268] sm:$0xff]  }
  0x22   :  { %6450 = vmatprep.subr.bf16.mxu1 %v7123_v42  ;;  %v7175_v42 = vld [vmem:[%s9306_s1 + $0x2e8] sm:$0xff]  }
  0x23   :  { %4613 = vmatmul.mubr.bf16.vlgmr.msra.gmra.mrb[0].mxu0 %v1075_v44  ;;  %v7177_v44 = vld [vmem:[%s9306_s1 + $0x2a8] sm:$0xff]  }
  0x24   :  { %6429 = vmatpush3.bf16.msra.mxu0 %v7124_v46  ;;  %4653 = vmatmul.mubr.bf16.vlgmr.msra.gmra.mrb[0].mxu1 %v1097_v50  ;;  %v7179_v46 = vld [vmem:[%s9306_s1 + $0x2f0] sm:$0xff]   ;;  %v7183_v50 = vld [vmem:[%s9306_s1 + $0x2f8] sm:$0xff]  }
  0x25   :  { %6430 = vmatprep.subr.bf16.mxu0 %v7126_v51  ;;  %6451 = vmatpush3.bf16.msra.mxu1 %v7125_v48  ;;  %v7181_v48 = vld [vmem:[%s9306_s1 + $0x2b0] sm:$0xff]   ;;  %v7184_v51 = vld [vmem:[%s9306_s1 + $0x238] sm:$0xff]  }
  0x26   :  { %4692 = vmatprep.mubr.bf16.mxu0 %v1096_v54  ;;  %6452 = vmatprep.subr.bf16.mxu1 %v7127_v53  ;;  %v7185_v53 = vld [vmem:[%s9306_s1 + $0x2b8] sm:$0xff]   ;;  %v1108_v54 = vrot.slane %v13_v52, %v7719_v35 }
  0x27   :  { %4732 = vmatprep.mubr.bf16.mxu1 %v1100_v57 }
  0x28   :  { %6431 = vmatpush3.bf16.msra.mxu0 %v7128_v55  ;;  %v1101_v55 = vcombine.high %v13_v52, %v13_v52  ;;  %v1116_v57 = vcombine.high %v1108_v54, %v1108_v54  ;;  %v7235_v52 = vld [vmem:[%s9306_s1 + $0x460] sm:$0xff]  }
  0x29   :  { %6432 = vmatprep.subr.bf16.mxu0 %v7130_v58  ;;  %6453 = vmatpush3.bf16.msra.mxu1 %v7129_v56  ;;  %v7186_v56 = vld [vmem:[%s9306_s1 + $0x340] sm:$0xff]   ;;  %v1124_v58 = vrot.slane %v1108_v54, %v7719_v35 }
  0x2a   :  { %6454 = vmatprep.subr.bf16.mxu1 %v7131_v59  ;;  %v7187_v59 = vld [vmem:[%s9306_s1 + $0x3c0] sm:$0xff]  }
  0x2b   :  { %v7237_v54 = vld [vmem:[%s9306_s1 + $0x420] sm:$0xff]  }
  0x2c   :  { %6433 = vmatpush3.bf16.msra.mxu0 %v7132_v60  ;;  %v7945_v60 = vrot.slane %v1101_v55, %v7719_v35  ;;  %v7238_v55 = vld [vmem:[%s9306_s1 + $0x4a0] sm:$0xff]  }
  0x2d   :  { %6434 = vmatprep.subr.bf16.mxu0 %v7134_v62  ;;  %6455 = vmatpush3.bf16.msra.mxu1 %v7133_v61  ;;  %v7188_v61 = vld [vmem:[%s9306_s1 + $0x300] sm:$0xff]   ;;  %v1138_v62 = vrot.slane %v1116_v57, %v7719_v35  ;;  %v7240_v57 = vld [vmem:[%s9306_s1 + $0x4e8] sm:$0xff]  }
  0x2e   :  { %6456 = vmatprep.subr.bf16.mxu1 %v7135_v63  ;;  %v7189_v63 = vld [vmem:[%s9306_s1 + $0x380] sm:$0xff]  }
  0x30   :  { %6435 = vmatpush3.bf16.msra.mxu0 %v7136_v0  ;;  %v1117_v0 = vcombine.high %v7945_v60, %v7945_v60 }
  0x31   :  { %6436 = vmatprep.subr.bf16.mxu0 %v7138_v2  ;;  %6457 = vmatpush3.bf16.msra.mxu1 %v7137_v1  ;;  %v1146_v1 = vcombine.high %v1124_v58, %v1124_v58  ;;  %v7190_v2 = vld [vmem:[%s9306_s1 + $0x348] sm:$0xff]  }
  0x32   :  { %6458 = vmatprep.subr.bf16.mxu1 %v7139_v3  ;;  %v1148_v3 = vcombine.high %v1138_v62, %v1138_v62 }
  0x34   :  { %6437 = vmatpush3.bf16.msra.mxu0 %v7140_v4  ;;  %v7191_v4 = vld [vmem:[%s9306_s1 + $0x3c8] sm:$0xff]  }
  0x35   :  { %6438 = vmatprep.subr.bf16.mxu0 %v7142_v6  ;;  %6459 = vmatpush3.bf16.msra.mxu1 %v7141_v5  ;;  %v1145_v5 = vrot.slane %v1117_v0, %v7719_v35  ;;  %v7192_v6 = vld [vmem:[%s9306_s1 + $0x308] sm:$0xff]   ;;  %v7247_v0 = vld [vmem:[%s9306_s1 + $0x478] sm:$0xff]  }
  0x36   :  { %6460 = vmatprep.subr.bf16.mxu1 %v7143_v7  ;;  %v7193_v7 = vld [vmem:[%s9306_s1 + $0x388] sm:$0xff]  }
  0x38   :  { %6439 = vmatpush3.bf16.msra.mxu0 %v7144_v8  ;;  %v1149_v8 = vcombine.high %v1145_v5, %v1145_v5 }
  0x39   :  { %6440 = vmatprep.subr.bf16.mxu0 %v7146_v10  ;;  %6461 = vmatpush3.bf16.msra.mxu1 %v7145_v9  ;;  %v7194_v9 = vld [vmem:[%s9306_s1 + $0x350] sm:$0xff]  }
  0x3a   :  { %6462 = vmatprep.subr.bf16.mxu1 %v7147_v11  ;;  %v7195_v10 = vld [vmem:[%s9306_s1 + $0x3d0] sm:$0xff]  }
  0x3b   :  { %v7196_v11 = vld [vmem:[%s9306_s1 + $0x310] sm:$0xff]  }
  0x3c   :  { %6441 = vmatpush3.bf16.msra.mxu0 %v7148_v12  ;;  %v7197_v12 = vld [vmem:[%s9306_s1 + $0x390] sm:$0xff]  }
  0x3d   :  { %6442 = vmatprep.subr.bf16.mxu0 %v7150_v14  ;;  %6463 = vmatpush3.bf16.msra.mxu1 %v7149_v13  ;;  %v7198_v13 = vld [vmem:[%s9306_s1 + $0x358] sm:$0xff]  }
  0x3e   :  { %6464 = vmatprep.subr.bf16.mxu1 %v7151_v15  ;;  %v7199_v14 = vld [vmem:[%s9306_s1 + $0x3d8] sm:$0xff]  }
  0x3f   :  { %v7200_v15 = vld [vmem:[%s9306_s1 + $0x318] sm:$0xff]  }
  0x40   :  { %6443 = vmatpush3.bf16.msra.mxu0 %v7152_v16  ;;  %v7201_v16 = vld [vmem:[%s9306_s1 + $0x398] sm:$0xff]  }
  0x41   :  { %6472 = vmatprep.subr.bf16.mxu0 %v7154_v19  ;;  %6465 = vmatpush3.bf16.msra.mxu1 %v7153_v17  ;;  %v7202_v17 = vld [vmem:[%s9306_s1 + $0x360] sm:$0xff]  }
  0x42   :  { %6494 = vmatprep.subr.bf16.mxu1 %v7155_v20  ;;  %v7204_v19 = vld [vmem:[%s9306_s1 + $0x320] sm:$0xff]  }
  0x43   :  { %4693 = vmatmul.mubr.bf16.vlgmr.msra.gmra.mrb[4].mxu0 %v1082_v18  ;;  %v7203_v18 = vld [vmem:[%s9306_s1 + $0x3e0] sm:$0xff]  }
  0x44   :  { %6473 = vmatpush3.bf16.msra.mxu0 %v7156_v21  ;;  %4733 = vmatmul.mubr.bf16.vlgmr.msra.gmra.mrb[4].mxu1 %v1098_v23  ;;  %v7205_v20 = vld [vmem:[%s9306_s1 + $0x3a0] sm:$0xff]   ;;  %v7206_v21 = vld [vmem:[%s9306_s1 + $0x368] sm:$0xff]  }
  0x45   :  { %6474 = vmatprep.subr.bf16.mxu0 %v7158_v24  ;;  %6495 = vmatpush3.bf16.msra.mxu1 %v7157_v22  ;;  %v7207_v22 = vld [vmem:[%s9306_s1 + $0x3e8] sm:$0xff]  }
  0x46   :  { %6496 = vmatprep.subr.bf16.mxu1 %v7159_v25  ;;  %4772 = vmatprep.mubr.bf16.mxu0 %v1138_v62  ;;  %v7208_v23 = vld [vmem:[%s9306_s1 + $0x328] sm:$0xff]   ;;  %v7210_v25 = vld [vmem:[%s9306_s1 + $0x370] sm:$0xff]  }
  0x47   :  { %4812 = vmatprep.mubr.bf16.mxu1 %v1148_v3  ;;  %v7209_v24 = vld [vmem:[%s9306_s1 + $0x3a8] sm:$0xff]   ;;  %v7245_v62 = vld [vmem:[%s9306_s1 + $0x430] sm:$0xff]  }
  0x48   :  { %6475 = vmatpush3.bf16.msra.mxu0 %v7160_v26  ;;  %v7211_v26 = vld [vmem:[%s9306_s1 + $0x3f0] sm:$0xff]  }
  0x49   :  { %6476 = vmatprep.subr.bf16.mxu0 %v7162_v28  ;;  %6497 = vmatpush3.bf16.msra.mxu1 %v7161_v27  ;;  %v7212_v27 = vld [vmem:[%s9306_s1 + $0x330] sm:$0xff]  }
  0x4a   :  { %6498 = vmatprep.subr.bf16.mxu1 %v7163_v29  ;;  %v7213_v28 = vld [vmem:[%s9306_s1 + $0x3b0] sm:$0xff]   ;;  %v7214_v29 = vld [vmem:[%s9306_s1 + $0x378] sm:$0xff]  }
  0x4b   :  { %v14_v3 = vld [vmem:[%s9307_s0 + $0x10] sm:$0xff] }
  0x4c   :  { %6477 = vmatpush3.bf16.msra.mxu0 %v7164_v30  ;;  %v7215_v30 = vld [vmem:[%s9306_s1 + $0x3f8] sm:$0xff]  }
  0x4d   :  { %6478 = vmatprep.subr.bf16.mxu0 %v7166_v32  ;;  %6499 = vmatpush3.bf16.msra.mxu1 %v7165_v31  ;;  %v7216_v31 = vld [vmem:[%s9306_s1 + $0x338] sm:$0xff]  }
  0x4e   :  { %6500 = vmatprep.subr.bf16.mxu1 %v7167_v33  ;;  %v7217_v32 = vld [vmem:[%s9306_s1 + $0x3b8] sm:$0xff]   ;;  %v1131_v33 = vrot.slane %v7945_v60, %v7719_v35  ;;  %v7243_v60 = vld [vmem:[%s9306_s1 + $0x470] sm:$0xff]  }
  0x50   :  { %6479 = vmatpush3.bf16.msra.mxu0 %v7168_v34  ;;  %v7219_v34 = vld [vmem:[%s9306_s1 + $0x440] sm:$0xff]  }
  0x51   :  { %6480 = vmatprep.subr.bf16.mxu0 %v7170_v37  ;;  %6501 = vmatpush3.bf16.msra.mxu1 %v7169_v36  ;;  %v7220_v36 = vld [vmem:[%s9306_s1 + $0x4c0] sm:$0xff]  }
  0x52   :  { %6502 = vmatprep.subr.bf16.mxu1 %v7171_v38  ;;  %v7221_v37 = vld [vmem:[%s9306_s1 + $0x400] sm:$0xff]  }
  0x53   :  { %v7222_v38 = vld [vmem:[%s9306_s1 + $0x480] sm:$0xff]  }
  0x54   :  { %6481 = vmatpush3.bf16.msra.mxu0 %v7172_v39  ;;  %v1147_v39 = vcombine.high %v1131_v33, %v1131_v33 }
  0x55   :  { %6482 = vmatprep.subr.bf16.mxu0 %v7174_v41  ;;  %6503 = vmatpush3.bf16.msra.mxu1 %v7173_v40  ;;  %v7223_v40 = vld [vmem:[%s9306_s1 + $0x448] sm:$0xff]  }
  0x56   :  { %6504 = vmatprep.subr.bf16.mxu1 %v7175_v42  ;;  %v7224_v41 = vld [vmem:[%s9306_s1 + $0x4c8] sm:$0xff]  }
  0x57   :  { %v7225_v42 = vld [vmem:[%s9306_s1 + $0x408] sm:$0xff]  }
  0x58   :  { %6483 = vmatpush3.bf16.msra.mxu0 %v7176_v43  ;;  %v7226_v43 = vld [vmem:[%s9306_s1 + $0x488] sm:$0xff]  }
  0x59   :  { %6484 = vmatprep.subr.bf16.mxu0 %v7178_v45  ;;  %6505 = vmatpush3.bf16.msra.mxu1 %v7177_v44  ;;  %v7227_v44 = vld [vmem:[%s9306_s1 + $0x450] sm:$0xff]  }
  0x5a   :  { %6506 = vmatprep.subr.bf16.mxu1 %v7179_v46  ;;  %v7228_v45 = vld [vmem:[%s9306_s1 + $0x4d0] sm:$0xff]  }
  0x5b   :  { %v7229_v46 = vld [vmem:[%s9306_s1 + $0x410] sm:$0xff]  }
  0x5c   :  { %6485 = vmatpush3.bf16.msra.mxu0 %v7180_v47  ;;  %v7230_v47 = vld [vmem:[%s9306_s1 + $0x490] sm:$0xff]  }
  0x5d   :  { %6486 = vmatprep.subr.bf16.mxu0 %v7182_v49  ;;  %6507 = vmatpush3.bf16.msra.mxu1 %v7181_v48  ;;  %v7231_v48 = vld [vmem:[%s9306_s1 + $0x458] sm:$0xff]  }
  0x5e   :  { %6508 = vmatprep.subr.bf16.mxu1 %v7183_v50  ;;  %v7232_v49 = vld [vmem:[%s9306_s1 + $0x4d8] sm:$0xff]  }
  0x5f   :  { %v7233_v50 = vld [vmem:[%s9306_s1 + $0x418] sm:$0xff]  }
  0x60   :  { %6487 = vmatpush3.bf16.msra.mxu0 %v7184_v51  ;;  %v7234_v51 = vld [vmem:[%s9306_s1 + $0x498] sm:$0xff]  }
  0x61   :  { %6516 = vmatprep.subr.bf16.mxu0 %v7186_v56  ;;  %6509 = vmatpush3.bf16.msra.mxu1 %v7185_v53  ;;  %v7236_v53 = vld [vmem:[%s9306_s1 + $0x4e0] sm:$0xff]   ;;  %v7239_v56 = vld [vmem:[%s9306_s1 + $0x468] sm:$0xff]  }
  0x62   :  { %6538 = vmatprep.subr.bf16.mxu1 %v7187_v59  ;;  %v7242_v59 = vld [vmem:[%s9306_s1 + $0x4a8] sm:$0xff]  }
  0x63   :  { %4773 = vmatmul.mubr.bf16.vlgmr.msra.gmra.mrb[8].mxu0 %v1124_v58  ;;  %v7241_v58 = vld [vmem:[%s9306_s1 + $0x428] sm:$0xff]  }
  0x64   :  { %6517 = vmatpush3.bf16.msra.mxu0 %v7188_v61  ;;  %4813 = vmatmul.mubr.bf16.vlgmr.msra.gmra.mrb[8].mxu1 %v1146_v1  ;;  %v7244_v61 = vld [vmem:[%s9306_s1 + $0x4f0] sm:$0xff]   ;;  %v7248_v1 = vld [vmem:[%s9306_s1 + $0x4f8] sm:$0xff]  }
  0x65   :  { %6518 = vmatprep.subr.bf16.mxu0 %v7190_v2  ;;  %6539 = vmatpush3.bf16.msra.mxu1 %v7189_v63  ;;  %v7246_v63 = vld [vmem:[%s9306_s1 + $0x4b0] sm:$0xff]   ;;  %v7249_v2 = vld [vmem:[%s9306_s1 + $0x438] sm:$0xff]  }
  0x66   :  { %4852 = vmatprep.mubr.bf16.mxu0 %v1145_v5  ;;  %6540 = vmatprep.subr.bf16.mxu1 %v7191_v4  ;;  %v7250_v4 = vld [vmem:[%s9306_s1 + $0x4b8] sm:$0xff]   ;;  %v1157_v5 = vrot.slane %v14_v3, %v7719_v35 }
  0x67   :  { %4892 = vmatprep.mubr.bf16.mxu1 %v1149_v8 }
  0x68   :  { %6519 = vmatpush3.bf16.msra.mxu0 %v7192_v6  ;;  %v1150_v6 = vcombine.high %v14_v3, %v14_v3  ;;  %v1165_v8 = vcombine.high %v1157_v5, %v1157_v5  ;;  %v7300_v3 = vld [vmem:[%s9306_s1 + $0x660] sm:$0xff]  }
  0x69   :  { %6520 = vmatprep.subr.bf16.mxu0 %v7194_v9  ;;  %6541 = vmatpush3.bf16.msra.mxu1 %v7193_v7  ;;  %v7251_v7 = vld [vmem:[%s9306_s1 + $0x540] sm:$0xff]   ;;  %v1173_v9 = vrot.slane %v1157_v5, %v7719_v35 }
  0x6a   :  { %6542 = vmatprep.subr.bf16.mxu1 %v7195_v10  ;;  %v7252_v10 = vld [vmem:[%s9306_s1 + $0x5c0] sm:$0xff]  }
  0x6b   :  { %v7302_v5 = vld [vmem:[%s9306_s1 + $0x620] sm:$0xff]  }
  0x6c   :  { %6521 = vmatpush3.bf16.msra.mxu0 %v7196_v11  ;;  %v8151_v11 = vrot.slane %v1150_v6, %v7719_v35  ;;  %v7303_v6 = vld [vmem:[%s9306_s1 + $0x6a0] sm:$0xff]  }
  0x6d   :  { %6522 = vmatprep.subr.bf16.mxu0 %v7198_v13  ;;  %6543 = vmatpush3.bf16.msra.mxu1 %v7197_v12  ;;  %v7253_v12 = vld [vmem:[%s9306_s1 + $0x500] sm:$0xff]   ;;  %v1187_v13 = vrot.slane %v1165_v8, %v7719_v35  ;;  %v7305_v8 = vld [vmem:[%s9306_s1 + $0x6e8] sm:$0xff]  }
  0x6e   :  { %6544 = vmatprep.subr.bf16.mxu1 %v7199_v14  ;;  %v7254_v14 = vld [vmem:[%s9306_s1 + $0x580] sm:$0xff]  }
  0x70   :  { %6523 = vmatpush3.bf16.msra.mxu0 %v7200_v15  ;;  %v1166_v15 = vcombine.high %v8151_v11, %v8151_v11 }
  0x71   :  { %6524 = vmatprep.subr.bf16.mxu0 %v7202_v17  ;;  %6545 = vmatpush3.bf16.msra.mxu1 %v7201_v16  ;;  %v1195_v16 = vcombine.high %v1173_v9, %v1173_v9  ;;  %v7255_v17 = vld [vmem:[%s9306_s1 + $0x548] sm:$0xff]  }
  0x72   :  { %6546 = vmatprep.subr.bf16.mxu1 %v7203_v18  ;;  %v1197_v18 = vcombine.high %v1187_v13, %v1187_v13 }
  0x74   :  { %6525 = vmatpush3.bf16.msra.mxu0 %v7204_v19  ;;  %v7256_v19 = vld [vmem:[%s9306_s1 + $0x5c8] sm:$0xff]  }
  0x75   :  { %6526 = vmatprep.subr.bf16.mxu0 %v7206_v21  ;;  %6547 = vmatpush3.bf16.msra.mxu1 %v7205_v20  ;;  %v1194_v20 = vrot.slane %v1166_v15, %v7719_v35  ;;  %v7257_v21 = vld [vmem:[%s9306_s1 + $0x508] sm:$0xff]   ;;  %v7312_v15 = vld [vmem:[%s9306_s1 + $0x678] sm:$0xff]  }
  0x76   :  { %6548 = vmatprep.subr.bf16.mxu1 %v7207_v22  ;;  %v7258_v22 = vld [vmem:[%s9306_s1 + $0x588] sm:$0xff]  }
  0x78   :  { %6527 = vmatpush3.bf16.msra.mxu0 %v7208_v23  ;;  %v1198_v23 = vcombine.high %v1194_v20, %v1194_v20 }
  0x79   :  { %6528 = vmatprep.subr.bf16.mxu0 %v7210_v25  ;;  %6549 = vmatpush3.bf16.msra.mxu1 %v7209_v24  ;;  %v7259_v24 = vld [vmem:[%s9306_s1 + $0x550] sm:$0xff]  }
  0x7a   :  { %6550 = vmatprep.subr.bf16.mxu1 %v7211_v26  ;;  %v7260_v25 = vld [vmem:[%s9306_s1 + $0x5d0] sm:$0xff]  }
  0x7b   :  { %v7261_v26 = vld [vmem:[%s9306_s1 + $0x510] sm:$0xff]  }
  0x7c   :  { %6529 = vmatpush3.bf16.msra.mxu0 %v7212_v27  ;;  %v7262_v27 = vld [vmem:[%s9306_s1 + $0x590] sm:$0xff]  }
  0x7d   :  { %6530 = vmatprep.subr.bf16.mxu0 %v7214_v29  ;;  %6551 = vmatpush3.bf16.msra.mxu1 %v7213_v28  ;;  %v7263_v28 = vld [vmem:[%s9306_s1 + $0x558] sm:$0xff]  }
  0x7e   :  { %6552 = vmatprep.subr.bf16.mxu1 %v7215_v30  ;;  %v7264_v29 = vld [vmem:[%s9306_s1 + $0x5d8] sm:$0xff]  }
  0x7f   :  { %v7265_v30 = vld [vmem:[%s9306_s1 + $0x518] sm:$0xff]  }
  0x80   :  { %6531 = vmatpush3.bf16.msra.mxu0 %v7216_v31  ;;  %v7266_v31 = vld [vmem:[%s9306_s1 + $0x598] sm:$0xff]  }
  0x81   :  { %6560 = vmatprep.subr.bf16.mxu0 %v7219_v34  ;;  %6553 = vmatpush3.bf16.msra.mxu1 %v7217_v32  ;;  %v7267_v32 = vld [vmem:[%s9306_s1 + $0x560] sm:$0xff]  }
  0x82   :  { %6582 = vmatprep.subr.bf16.mxu1 %v7220_v36  ;;  %v7269_v34 = vld [vmem:[%s9306_s1 + $0x520] sm:$0xff]  }
  0x83   :  { %4853 = vmatmul.mubr.bf16.vlgmr.msra.gmra.mrb[12].mxu0 %v1131_v33  ;;  %v7268_v33 = vld [vmem:[%s9306_s1 + $0x5e0] sm:$0xff]  }
  0x84   :  { %6561 = vmatpush3.bf16.msra.mxu0 %v7221_v37  ;;  %4893 = vmatmul.mubr.bf16.vlgmr.msra.gmra.mrb[12].mxu1 %v1147_v39  ;;  %v7270_v36 = vld [vmem:[%s9306_s1 + $0x5a0] sm:$0xff]   ;;  %v7271_v37 = vld [vmem:[%s9306_s1 + $0x568] sm:$0xff]  }
  0x85   :  { %6562 = vmatprep.subr.bf16.mxu0 %v7223_v40  ;;  %6583 = vmatpush3.bf16.msra.mxu1 %v7222_v38  ;;  %v7272_v38 = vld [vmem:[%s9306_s1 + $0x5e8] sm:$0xff]  }
  0x86   :  { %6584 = vmatprep.subr.bf16.mxu1 %v7224_v41  ;;  %4932 = vmatprep.mubr.bf16.mxu0 %v1187_v13  ;;  %v7273_v39 = vld [vmem:[%s9306_s1 + $0x528] sm:$0xff]   ;;  %v7275_v41 = vld [vmem:[%s9306_s1 + $0x570] sm:$0xff]  }
  0x87   :  { %4972 = vmatprep.mubr.bf16.mxu1 %v1197_v18  ;;  %v7274_v40 = vld [vmem:[%s9306_s1 + $0x5a8] sm:$0xff]   ;;  %v7310_v13 = vld [vmem:[%s9306_s1 + $0x630] sm:$0xff]   ;;  %v15_v18 = vld [vmem:[%s9307_s0 + $0x18] sm:$0xff] }
  0x88   :  { %6563 = vmatpush3.bf16.msra.mxu0 %v7225_v42  ;;  %v7276_v42 = vld [vmem:[%s9306_s1 + $0x5f0] sm:$0xff]  }
  0x89   :  { %6564 = vmatprep.subr.bf16.mxu0 %v7227_v44  ;;  %6585 = vmatpush3.bf16.msra.mxu1 %v7226_v43  ;;  %v7277_v43 = vld [vmem:[%s9306_s1 + $0x530] sm:$0xff]  }
  0x8a   :  { %6586 = vmatprep.subr.bf16.mxu1 %v7228_v45  ;;  %v7278_v44 = vld [vmem:[%s9306_s1 + $0x5b0] sm:$0xff]   ;;  %v7279_v45 = vld [vmem:[%s9306_s1 + $0x578] sm:$0xff]  }
  0x8c   :  { %6565 = vmatpush3.bf16.msra.mxu0 %v7229_v46  ;;  %v7280_v46 = vld [vmem:[%s9306_s1 + $0x5f8] sm:$0xff]  }
  0x8d   :  { %6566 = vmatprep.subr.bf16.mxu0 %v7231_v48  ;;  %6587 = vmatpush3.bf16.msra.mxu1 %v7230_v47  ;;  %v7281_v47 = vld [vmem:[%s9306_s1 + $0x538] sm:$0xff]  }
  0x8e   :  { %6588 = vmatprep.subr.bf16.mxu1 %v7232_v49  ;;  %v7282_v48 = vld [vmem:[%s9306_s1 + $0x5b8] sm:$0xff]   ;;  %v1180_v49 = vrot.slane %v8151_v11, %v7719_v35  ;;  %v7308_v11 = vld [vmem:[%s9306_s1 + $0x670] sm:$0xff]  }
  0x90   :  { %6567 = vmatpush3.bf16.msra.mxu0 %v7233_v50  ;;  %v7284_v50 = vld [vmem:[%s9306_s1 + $0x640] sm:$0xff]  }
  0x91   :  { %6568 = vmatprep.subr.bf16.mxu0 %v7235_v52  ;;  %6589 = vmatpush3.bf16.msra.mxu1 %v7234_v51  ;;  %v7285_v51 = vld [vmem:[%s9306_s1 + $0x6c0] sm:$0xff]  }
  0x92   :  { %6590 = vmatprep.subr.bf16.mxu1 %v7236_v53  ;;  %v7286_v52 = vld [vmem:[%s9306_s1 + $0x600] sm:$0xff]  }
  0x93   :  { %v7287_v53 = vld [vmem:[%s9306_s1 + $0x680] sm:$0xff]  }
  0x94   :  { %6569 = vmatpush3.bf16.msra.mxu0 %v7237_v54  ;;  %v1196_v54 = vcombine.high %v1180_v49, %v1180_v49 }
  0x95   :  { %6570 = vmatprep.subr.bf16.mxu0 %v7239_v56  ;;  %6591 = vmatpush3.bf16.msra.mxu1 %v7238_v55  ;;  %v7288_v55 = vld [vmem:[%s9306_s1 + $0x648] sm:$0xff]  }
  0x96   :  { %6592 = vmatprep.subr.bf16.mxu1 %v7240_v57  ;;  %v7289_v56 = vld [vmem:[%s9306_s1 + $0x6c8] sm:$0xff]  }
  0x97   :  { %v7290_v57 = vld [vmem:[%s9306_s1 + $0x608] sm:$0xff]  }
  0x98   :  { %6571 = vmatpush3.bf16.msra.mxu0 %v7241_v58  ;;  %v7291_v58 = vld [vmem:[%s9306_s1 + $0x688] sm:$0xff]  }
  0x99   :  { %6572 = vmatprep.subr.bf16.mxu0 %v7243_v60  ;;  %6593 = vmatpush3.bf16.msra.mxu1 %v7242_v59  ;;  %v7292_v59 = vld [vmem:[%s9306_s1 + $0x650] sm:$0xff]  }
  0x9a   :  { %6594 = vmatprep.subr.bf16.mxu1 %v7244_v61  ;;  %v7293_v60 = vld [vmem:[%s9306_s1 + $0x6d0] sm:$0xff]  }
  0x9b   :  { %v7294_v61 = vld [vmem:[%s9306_s1 + $0x610] sm:$0xff]  }
  0x9c   :  { %6573 = vmatpush3.bf16.msra.mxu0 %v7245_v62  ;;  %v7295_v62 = vld [vmem:[%s9306_s1 + $0x690] sm:$0xff]  }
  0x9d   :  { %6574 = vmatprep.subr.bf16.mxu0 %v7247_v0  ;;  %6595 = vmatpush3.bf16.msra.mxu1 %v7246_v63  ;;  %v7296_v63 = vld [vmem:[%s9306_s1 + $0x658] sm:$0xff]  }
  0x9e   :  { %6596 = vmatprep.subr.bf16.mxu1 %v7248_v1  ;;  %v7297_v0 = vld [vmem:[%s9306_s1 + $0x6d8] sm:$0xff]  }
  0x9f   :  { %v7298_v1 = vld [vmem:[%s9306_s1 + $0x618] sm:$0xff]  }
  0xa0   :  { %6575 = vmatpush3.bf16.msra.mxu0 %v7249_v2  ;;  %v7299_v2 = vld [vmem:[%s9306_s1 + $0x698] sm:$0xff]  }
  0xa1   :  { %6604 = vmatprep.subr.bf16.mxu0 %v7251_v7  ;;  %6597 = vmatpush3.bf16.msra.mxu1 %v7250_v4  ;;  %v7301_v4 = vld [vmem:[%s9306_s1 + $0x6e0] sm:$0xff]   ;;  %v7304_v7 = vld [vmem:[%s9306_s1 + $0x668] sm:$0xff]  }
  0xa2   :  { %6626 = vmatprep.subr.bf16.mxu1 %v7252_v10  ;;  %v7307_v10 = vld [vmem:[%s9306_s1 + $0x6a8] sm:$0xff]  }
  0xa3   :  { %4933 = vmatmul.mubr.bf16.vlgmr.msra.gmra.mrb[16].mxu0 %v1173_v9  ;;  %v7306_v9 = vld [vmem:[%s9306_s1 + $0x628] sm:$0xff]  }
  0xa4   :  { %6605 = vmatpush3.bf16.msra.mxu0 %v7253_v12  ;;  %4973 = vmatmul.mubr.bf16.vlgmr.msra.gmra.mrb[16].mxu1 %v1195_v16  ;;  %v7309_v12 = vld [vmem:[%s9306_s1 + $0x6f0] sm:$0xff]   ;;  %v7313_v16 = vld [vmem:[%s9306_s1 + $0x6f8] sm:$0xff]  }
  0xa5   :  { %6606 = vmatprep.subr.bf16.mxu0 %v7255_v17  ;;  %6627 = vmatpush3.bf16.msra.mxu1 %v7254_v14  ;;  %v7311_v14 = vld [vmem:[%s9306_s1 + $0x6b0] sm:$0xff]   ;;  %v7314_v17 = vld [vmem:[%s9306_s1 + $0x638] sm:$0xff]  }
  0xa6   :  { %5012 = vmatprep.mubr.bf16.mxu0 %v1194_v20  ;;  %6628 = vmatprep.subr.bf16.mxu1 %v7256_v19  ;;  %v1206_v19 = vrot.slane %v15_v18, %v7719_v35  ;;  %v7316_v20 = vld [vmem:[%s9306_s1 + $0x740] sm:$0xff]  }
  0xa7   :  { %5052 = vmatprep.mubr.bf16.mxu1 %v1198_v23 }
  0xa8   :  { %6607 = vmatpush3.bf16.msra.mxu0 %v7257_v21  ;;  %v1199_v21 = vcombine.high %v15_v18, %v15_v18  ;;  %v1214_v23 = vcombine.high %v1206_v19, %v1206_v19  ;;  %v7354_v18 = vld [vmem:[%s9306_s1 + $0x8c8] sm:$0xff]  }
  0xa9   :  { %6608 = vmatprep.subr.bf16.mxu0 %v7259_v24  ;;  %6629 = vmatpush3.bf16.msra.mxu1 %v7258_v22  ;;  %v7315_v22 = vld [vmem:[%s9306_s1 + $0x6b8] sm:$0xff]   ;;  %v1222_v24 = vrot.slane %v1206_v19, %v7719_v35  ;;  %v7355_v19 = vld [vmem:[%s9306_s1 + $0x808] sm:$0xff]  }
  0xaa   :  { %6630 = vmatprep.subr.bf16.mxu1 %v7260_v25  ;;  %v7317_v25 = vld [vmem:[%s9306_s1 + $0x7c0] sm:$0xff]  }
  0xac   :  { %6609 = vmatpush3.bf16.msra.mxu0 %v7261_v26  ;;  %v8357_v26 = vrot.slane %v1199_v21, %v7719_v35  ;;  %v7356_v21 = vld [vmem:[%s9306_s1 + $0x888] sm:$0xff]  }
  0xad   :  { %6610 = vmatprep.subr.bf16.mxu0 %v7263_v28  ;;  %6631 = vmatpush3.bf16.msra.mxu1 %v7262_v27  ;;  %v1236_v27 = vrot.slane %v1214_v23, %v7719_v35  ;;  %v7318_v28 = vld [vmem:[%s9306_s1 + $0x700] sm:$0xff]   ;;  %v7359_v23 = vld [vmem:[%s9306_s1 + $0x810] sm:$0xff]  }
  0xae   :  { %6632 = vmatprep.subr.bf16.mxu1 %v7264_v29  ;;  %v1215_v29 = vcombine.high %v8357_v26, %v8357_v26 }
  0xb0   :  { %6611 = vmatpush3.bf16.msra.mxu0 %v7265_v30  ;;  %v1244_v30 = vcombine.high %v1222_v24, %v1222_v24 }
  0xb1   :  { %6612 = vmatprep.subr.bf16.mxu0 %v7267_v32  ;;  %6633 = vmatpush3.bf16.msra.mxu1 %v7266_v31  ;;  %v7320_v31 = vld [vmem:[%s9306_s1 + $0x748] sm:$0xff]   ;;  %v1246_v32 = vcombine.high %v1236_v27, %v1236_v27 }
  0xb2   :  { %6634 = vmatprep.subr.bf16.mxu1 %v7268_v33  ;;  %v7319_v33 = vld [vmem:[%s9306_s1 + $0x780] sm:$0xff]  }
  0xb4   :  { %6613 = vmatpush3.bf16.msra.mxu0 %v7269_v34  ;;  %v1243_v34 = vrot.slane %v1215_v29, %v7719_v35  ;;  %v7364_v29 = vld [vmem:[%s9306_s1 + $0x898] sm:$0xff]  }
  0xb5   :  { %6614 = vmatprep.subr.bf16.mxu0 %v7271_v37  ;;  %6635 = vmatpush3.bf16.msra.mxu1 %v7270_v36  ;;  %v7321_v36 = vld [vmem:[%s9306_s1 + $0x7c8] sm:$0xff]  }
  0xb6   :  { %6636 = vmatprep.subr.bf16.mxu1 %v7272_v38  ;;  %v7322_v37 = vld [vmem:[%s9306_s1 + $0x708] sm:$0xff]   ;;  %v1247_v38 = vcombine.high %v1243_v34, %v1243_v34 }
  0xb8   :  { %6615 = vmatpush3.bf16.msra.mxu0 %v7273_v39  ;;  %v7324_v39 = vld [vmem:[%s9306_s1 + $0x750] sm:$0xff]  }
  0xb9   :  { %6616 = vmatprep.subr.bf16.mxu0 %v7275_v41  ;;  %6637 = vmatpush3.bf16.msra.mxu1 %v7274_v40  ;;  %v7323_v40 = vld [vmem:[%s9306_s1 + $0x788] sm:$0xff]   ;;  %v7325_v41 = vld [vmem:[%s9306_s1 + $0x7d0] sm:$0xff]  }
  0xba   :  { %6638 = vmatprep.subr.bf16.mxu1 %v7276_v42  ;;  %v7326_v42 = vld [vmem:[%s9306_s1 + $0x710] sm:$0xff]  }
  0xbc   :  { %6617 = vmatpush3.bf16.msra.mxu0 %v7277_v43  ;;  %v7328_v43 = vld [vmem:[%s9306_s1 + $0x758] sm:$0xff]  }
  0xbd   :  { %6618 = vmatprep.subr.bf16.mxu0 %v7279_v45  ;;  %6639 = vmatpush3.bf16.msra.mxu1 %v7278_v44  ;;  %v7327_v44 = vld [vmem:[%s9306_s1 + $0x790] sm:$0xff]   ;;  %v7329_v45 = vld [vmem:[%s9306_s1 + $0x7d8] sm:$0xff]  }
  0xbe   :  { %6640 = vmatprep.subr.bf16.mxu1 %v7280_v46  ;;  %v7330_v46 = vld [vmem:[%s9306_s1 + $0x718] sm:$0xff]  }
  0xc0   :  { %6619 = vmatpush3.bf16.msra.mxu0 %v7281_v47  ;;  %v7332_v47 = vld [vmem:[%s9306_s1 + $0x760] sm:$0xff]  }
  0xc1   :  { %6648 = vmatprep.subr.bf16.mxu0 %v7284_v50  ;;  %6641 = vmatpush3.bf16.msra.mxu1 %v7282_v48  ;;  %v7331_v48 = vld [vmem:[%s9306_s1 + $0x798] sm:$0xff]   ;;  %v7334_v50 = vld [vmem:[%s9306_s1 + $0x720] sm:$0xff]  }
  0xc2   :  { %6670 = vmatprep.subr.bf16.mxu1 %v7285_v51  ;;  %v7336_v51 = vld [vmem:[%s9306_s1 + $0x768] sm:$0xff]  }
  0xc3   :  { %5013 = vmatmul.mubr.bf16.vlgmr.msra.gmra.mrb[20].mxu0 %v1180_v49  ;;  %v7333_v49 = vld [vmem:[%s9306_s1 + $0x7e0] sm:$0xff]  }
  0xc4   :  { %6649 = vmatpush3.bf16.msra.mxu0 %v7286_v52  ;;  %5053 = vmatmul.mubr.bf16.vlgmr.msra.gmra.mrb[20].mxu1 %v1196_v54  ;;  %v7335_v52 = vld [vmem:[%s9306_s1 + $0x7a0] sm:$0xff]   ;;  %v7338_v54 = vld [vmem:[%s9306_s1 + $0x728] sm:$0xff]  }
  0xc5   :  { %6650 = vmatprep.subr.bf16.mxu0 %v7288_v55  ;;  %6671 = vmatpush3.bf16.msra.mxu1 %v7287_v53  ;;  %v7337_v53 = vld [vmem:[%s9306_s1 + $0x7e8] sm:$0xff]  }
  0xc6   :  { %6672 = vmatprep.subr.bf16.mxu1 %v7289_v56  ;;  %5092 = vmatprep.mubr.bf16.mxu0 %v1236_v27  ;;  %v7340_v56 = vld [vmem:[%s9306_s1 + $0x770] sm:$0xff]   ;;  %v7363_v27 = vld [vmem:[%s9306_s1 + $0x818] sm:$0xff]  }
  0xc7   :  { %5132 = vmatprep.mubr.bf16.mxu1 %v1246_v32  ;;  %v7369_v32 = vld [vmem:[%s9306_s1 + $0x868] sm:$0xff]  }
  0xc8   :  { %6651 = vmatpush3.bf16.msra.mxu0 %v7290_v57 }
  0xc9   :  { %6652 = vmatprep.subr.bf16.mxu0 %v7292_v59  ;;  %6673 = vmatpush3.bf16.msra.mxu1 %v7291_v58  ;;  %v7339_v58 = vld [vmem:[%s9306_s1 + $0x7a8] sm:$0xff]  }
  0xca   :  { %6674 = vmatprep.subr.bf16.mxu1 %v7293_v60 }
  0xcc   :  { %6653 = vmatpush3.bf16.msra.mxu0 %v7294_v61 }
  0xcd   :  { %6654 = vmatprep.subr.bf16.mxu0 %v7296_v63  ;;  %6675 = vmatpush3.bf16.msra.mxu1 %v7295_v62  ;;  %v7341_v62 = vld [vmem:[%s9306_s1 + $0x7f0] sm:$0xff]  }
  0xce   :  { %6676 = vmatprep.subr.bf16.mxu1 %v7297_v0  ;;  %v7342_v63 = vld [vmem:[%s9306_s1 + $0x730] sm:$0xff]  }
  0xd0   :  { %6655 = vmatpush3.bf16.msra.mxu0 %v7298_v1 }
  0xd1   :  { %6656 = vmatprep.subr.bf16.mxu0 %v7300_v3  ;;  %6677 = vmatpush3.bf16.msra.mxu1 %v7299_v2 }
  0xd2   :  { %6678 = vmatprep.subr.bf16.mxu1 %v7301_v4  ;;  %v7344_v4 = vld [vmem:[%s9306_s1 + $0x778] sm:$0xff]  }
  0xd4   :  { %6657 = vmatpush3.bf16.msra.mxu0 %v7302_v5 }
  0xd5   :  { %6658 = vmatprep.subr.bf16.mxu0 %v7304_v7  ;;  %6679 = vmatpush3.bf16.msra.mxu1 %v7303_v6  ;;  %v7343_v6 = vld [vmem:[%s9306_s1 + $0x7b0] sm:$0xff]  }
  0xd6   :  { %6680 = vmatprep.subr.bf16.mxu1 %v7305_v8  ;;  %v7345_v8 = vld [vmem:[%s9306_s1 + $0x7f8] sm:$0xff]  }
  0xd8   :  { %6659 = vmatpush3.bf16.msra.mxu0 %v7306_v9  ;;  %v7346_v9 = vld [vmem:[%s9306_s1 + $0x738] sm:$0xff]  }
  0xd9   :  { %6660 = vmatprep.subr.bf16.mxu0 %v7308_v11  ;;  %6681 = vmatpush3.bf16.msra.mxu1 %v7307_v10  ;;  %v1229_v10 = vrot.slane %v8357_v26, %v7719_v35  ;;  %v7349_v11 = vld [vmem:[%s9306_s1 + $0x840] sm:$0xff]   ;;  %v7362_v26 = vld [vmem:[%s9306_s1 + $0x8d8] sm:$0xff]  }
  0xda   :  { %6682 = vmatprep.subr.bf16.mxu1 %v7309_v12  ;;  %v7347_v12 = vld [vmem:[%s9306_s1 + $0x7b8] sm:$0xff]  }
  0xdc   :  { %6661 = vmatpush3.bf16.msra.mxu0 %v7310_v13  ;;  %v7350_v13 = vld [vmem:[%s9306_s1 + $0x8c0] sm:$0xff]  }
  0xdd   :  { %6662 = vmatprep.subr.bf16.mxu0 %v7312_v15  ;;  %6683 = vmatpush3.bf16.msra.mxu1 %v7311_v14  ;;  %v7351_v14 = vld [vmem:[%s9306_s1 + $0x800] sm:$0xff]   ;;  %v1245_v15 = vcombine.high %v1229_v10, %v1229_v10 }
  0xde   :  { %6684 = vmatprep.subr.bf16.mxu1 %v7313_v16  ;;  %v7353_v16 = vld [vmem:[%s9306_s1 + $0x848] sm:$0xff]  }
  0xe0   :  { %6663 = vmatpush3.bf16.msra.mxu0 %v7314_v17  ;;  %v7352_v17 = vld [vmem:[%s9306_s1 + $0x880] sm:$0xff]  }
  0xe1   :  { %6692 = vmatprep.subr.bf16.mxu0 %v7316_v20  ;;  %6685 = vmatpush3.bf16.msra.mxu1 %v7315_v22  ;;  %v7357_v20 = vld [vmem:[%s9306_s1 + $0x850] sm:$0xff]  }
  0xe2   :  { %6714 = vmatprep.subr.bf16.mxu1 %v7317_v25  ;;  %v7358_v22 = vld [vmem:[%s9306_s1 + $0x8d0] sm:$0xff]  }
  0xe3   :  { %5093 = vmatmul.mubr.bf16.vlgmr.msra.gmra.mrb[24].mxu0 %v1222_v24  ;;  %v7361_v24 = vld [vmem:[%s9306_s1 + $0x858] sm:$0xff]   ;;  %v7360_v25 = vld [vmem:[%s9306_s1 + $0x890] sm:$0xff]  }
  0xe4   :  { %6693 = vmatpush3.bf16.msra.mxu0 %v7318_v28  ;;  %5133 = vmatmul.mubr.bf16.vlgmr.msra.gmra.mrb[24].mxu1 %v1244_v30  ;;  %v7365_v28 = vld [vmem:[%s9306_s1 + $0x860] sm:$0xff]  }
  0xe5   :  { %6694 = vmatprep.subr.bf16.mxu0 %v7320_v31  ;;  %6715 = vmatpush3.bf16.msra.mxu1 %v7319_v33  ;;  %v7366_v30 = vld [vmem:[%s9306_s1 + $0x8e0] sm:$0xff]  }
  0xe6   :  { %5172 = vmatprep.mubr.bf16.mxu0 %v1243_v34  ;;  %6716 = vmatprep.subr.bf16.mxu1 %v7321_v36  ;;  %v7367_v31 = vld [vmem:[%s9306_s1 + $0x820] sm:$0xff]   ;;  %v7370_v34 = vld [vmem:[%s9306_s1 + $0x8e8] sm:$0xff]  }
  0xe7   :  { %5212 = vmatprep.mubr.bf16.mxu1 %v1247_v38  ;;  %v7368_v33 = vld [vmem:[%s9306_s1 + $0x8a0] sm:$0xff]   ;;  %v7371_v36 = vld [vmem:[%s9306_s1 + $0x828] sm:$0xff]   ;;  %v7373_v38 = vld [vmem:[%s9306_s1 + $0x870] sm:$0xff]  }
  0xe8   :  { %6695 = vmatpush3.bf16.msra.mxu0 %v7322_v37 }
  0xe9   :  { %6696 = vmatprep.subr.bf16.mxu0 %v7324_v39  ;;  %6717 = vmatpush3.bf16.msra.mxu1 %v7323_v40  ;;  %v7372_v40 = vld [vmem:[%s9306_s1 + $0x8a8] sm:$0xff]  }
  0xea   :  { %6718 = vmatprep.subr.bf16.mxu1 %v7325_v41 }
  0xec   :  { %6697 = vmatpush3.bf16.msra.mxu0 %v7326_v42 }
  0xed   :  { %6698 = vmatprep.subr.bf16.mxu0 %v7328_v43  ;;  %6719 = vmatpush3.bf16.msra.mxu1 %v7327_v44  ;;  %v7374_v44 = vld [vmem:[%s9306_s1 + $0x8f0] sm:$0xff]  }
  0xee   :  { %6720 = vmatprep.subr.bf16.mxu1 %v7329_v45  ;;  %v7375_v45 = vld [vmem:[%s9306_s1 + $0x830] sm:$0xff]  }
  0xf0   :  { %6699 = vmatpush3.bf16.msra.mxu0 %v7330_v46 }
  0xf1   :  { %6700 = vmatprep.subr.bf16.mxu0 %v7332_v47  ;;  %6721 = vmatpush3.bf16.msra.mxu1 %v7331_v48  ;;  %v7376_v48 = vld [vmem:[%s9306_s1 + $0x8b0] sm:$0xff]  }
  0xf2   :  { %6722 = vmatprep.subr.bf16.mxu1 %v7333_v49 }
  0xf4   :  { %6701 = vmatpush3.bf16.msra.mxu0 %v7334_v50 }
  0xf5   :  { %6702 = vmatprep.subr.bf16.mxu0 %v7336_v51  ;;  %6723 = vmatpush3.bf16.msra.mxu1 %v7335_v52  ;;  %v7377_v52 = vld [vmem:[%s9306_s1 + $0x878] sm:$0xff]  }
  0xf6   :  { %v6400_v55 = vpop.f32.mrb[0].mxu0  ;;  %6724 = vmatprep.subr.bf16.mxu1 %v7337_v53 }
  0xf7   :  { %v6401_v57 = vpop.f32.mrb[1].mxu0  ;;  %v6422_v59 = vpop.f32.mrb[0].mxu1 }
  0xf8   :  { %v6402_v60 = vadd.f32 %v6401_v57, %v6400_v55  ;;  %v6403_v61 = vpop.f32.mrb[2].mxu0  ;;  %v6423_v0 = vpop.f32.mrb[1].mxu1  ;;  %6703 = vmatpush3.bf16.msra.mxu0 %v7338_v54  ;;  %v7378_v54 = vld [vmem:[%s9306_s1 + $0x8f8] sm:$0xff]   ;;  %v16_v57 = vld [vmem:[%s9307_s0 + $0x20] sm:$0xff] }
  0xf9   :  { %v6404_v1 = vpop.f32.mrb[3].mxu0  ;;  %v6424_v2 = vadd.f32 %v6423_v0, %v6422_v59  ;;  %v6425_v3 = vpop.f32.mrb[2].mxu1  ;;  %6704 = vmatprep.subr.bf16.mxu0 %v7340_v56  ;;  %6725 = vmatpush3.bf16.msra.mxu1 %v7339_v58  ;;  %v7379_v56 = vld [vmem:[%s9306_s1 + $0x838] sm:$0xff]   ;;  %v1255_v58 = vrot.slane %v16_v57, %v7719_v35  ;;  %v7381_v59 = vld [vmem:[%s9306_s1 + $0x940] sm:$0xff]  }
  0xfa   :  { %v6426_v5 = vpop.f32.mrb[3].mxu1  ;;  %6726 = vmatprep.subr.bf16.mxu1 %v7341_v62  ;;  %v7380_v61 = vld [vmem:[%s9306_s1 + $0x8b8] sm:$0xff]   ;;  %v7382_v0 = vld [vmem:[%s9306_s1 + $0x9c0] sm:$0xff]  }
  0xfb   :  { %v8444_v7 = vadd.f32 %v6424_v2, %v6402_v60  ;;  %v1248_v60 = vcombine.high %v16_v57, %v16_v57  ;;  %v1263_v62 = vcombine.high %v1255_v58, %v1255_v58  ;;  %v7383_v2 = vld [vmem:[%s9306_s1 + $0x900] sm:$0xff]   ;;  %v7418_v57 = vld [vmem:[%s9306_s1 + $0xa48] sm:$0xff]  }
  0xfc   :  { %6705 = vmatpush3.bf16.msra.mxu0 %v7342_v63  ;;  %v1271_v63 = vrot.slane %v1255_v58, %v7719_v35  ;;  %v7419_v58 = vld [vmem:[%s9306_s1 + $0xac8] sm:$0xff]  }
  0xfd   :  { %6706 = vmatprep.subr.bf16.mxu0 %v7344_v4  ;;  %6727 = vmatpush3.bf16.msra.mxu1 %v7343_v6  ;;  %v8568_v1 = vrot.slane %v1248_v60, %v7719_v35  ;;  %v1285_v3 = vrot.slane %v1263_v62, %v7719_v35  ;;  %v7384_v4 = vld [vmem:[%s9306_s1 + $0x980] sm:$0xff]   ;;  %v7421_v60 = vld [vmem:[%s9306_s1 + $0xa88] sm:$0xff]   ;;  %v7423_v62 = vld [vmem:[%s9306_s1 + $0xad0] sm:$0xff]  }
  0xfe   :  { %6728 = vmatprep.subr.bf16.mxu1 %v7345_v8  ;;  %v1293_v6 = vcombine.high %v1271_v63, %v1271_v63 }
  0xff   :  { %v1264_v5 = vcombine.high %v8568_v1, %v8568_v1  ;;  %v1295_v8 = vcombine.high %v1285_v3, %v1285_v3 }
 0x100   :  { %6707 = vmatpush3.bf16.msra.mxu0 %v7346_v9  ;;  %v7386_v9 = vld [vmem:[%s9306_s1 + $0x9c8] sm:$0xff]  }
 0x101   :  { %6736 = vmatprep.subr.bf16.mxu0 %v7349_v11  ;;  %6729 = vmatpush3.bf16.msra.mxu1 %v7347_v12  ;;  %v7387_v11 = vld [vmem:[%s9306_s1 + $0x908] sm:$0xff]  }
 0x102   :  { %6758 = vmatprep.subr.bf16.mxu1 %v7350_v13  ;;  %v7388_v12 = vld [vmem:[%s9306_s1 + $0x988] sm:$0xff]  }
 0x103   :  { %5173 = vmatmul.mubr.bf16.vlgmr.msra.gmra.mrb[28].mxu0 %v1229_v10  ;;  %v1292_v10 = vrot.slane %v1264_v5, %v7719_v35  ;;  %v7430_v5 = vld [vmem:[%s9306_s1 + $0xa60] sm:$0xff]  }
 0x104   :  { %6737 = vmatpush3.bf16.msra.mxu0 %v7351_v14  ;;  %5213 = vmatmul.mubr.bf16.vlgmr.msra.gmra.mrb[28].mxu1 %v1245_v15  ;;  %v7389_v14 = vld [vmem:[%s9306_s1 + $0x950] sm:$0xff]  }
 0x105   :  { %6738 = vmatprep.subr.bf16.mxu0 %v7353_v16  ;;  %6759 = vmatpush3.bf16.msra.mxu1 %v7352_v17  ;;  %v1296_v13 = vcombine.high %v1292_v10, %v1292_v10  ;;  %v7390_v15 = vld [vmem:[%s9306_s1 + $0x9d0] sm:$0xff]  }
 0x106   :  { %6760 = vmatprep.subr.bf16.mxu1 %v7354_v18  ;;  %5252 = vmatprep.mubr.bf16.mxu0 %v1285_v3  ;;  %v7391_v16 = vld [vmem:[%s9306_s1 + $0x910] sm:$0xff]   ;;  %v7393_v18 = vld [vmem:[%s9306_s1 + $0x958] sm:$0xff]  }
 0x107   :  { %5292 = vmatprep.mubr.bf16.mxu1 %v1295_v8  ;;  %v7392_v17 = vld [vmem:[%s9306_s1 + $0x990] sm:$0xff]   ;;  %v7428_v3 = vld [vmem:[%s9306_s1 + $0xa18] sm:$0xff]   ;;  %v7433_v8 = vld [vmem:[%s9306_s1 + $0xaa0] sm:$0xff]  }
 0x108   :  { %6739 = vmatpush3.bf16.msra.mxu0 %v7355_v19  ;;  %v7394_v19 = vld [vmem:[%s9306_s1 + $0x9d8] sm:$0xff]  }
 0x109   :  { %6740 = vmatprep.subr.bf16.mxu0 %v7357_v20  ;;  %6761 = vmatpush3.bf16.msra.mxu1 %v7356_v21  ;;  %v7395_v20 = vld [vmem:[%s9306_s1 + $0x918] sm:$0xff]  }
 0x10a   :  { %6762 = vmatprep.subr.bf16.mxu1 %v7358_v22  ;;  %v7396_v21 = vld [vmem:[%s9306_s1 + $0x998] sm:$0xff]   ;;  %v7397_v22 = vld [vmem:[%s9306_s1 + $0x960] sm:$0xff]  }
 0x10c   :  { %6741 = vmatpush3.bf16.msra.mxu0 %v7359_v23  ;;  %v7398_v23 = vld [vmem:[%s9306_s1 + $0x9e0] sm:$0xff]  }
 0x10d   :  { %6742 = vmatprep.subr.bf16.mxu0 %v7361_v24  ;;  %6763 = vmatpush3.bf16.msra.mxu1 %v7360_v25  ;;  %v7399_v24 = vld [vmem:[%s9306_s1 + $0x920] sm:$0xff]  }
 0x10e   :  { %6764 = vmatprep.subr.bf16.mxu1 %v7362_v26  ;;  %v7400_v25 = vld [vmem:[%s9306_s1 + $0x9a0] sm:$0xff]   ;;  %v7401_v26 = vld [vmem:[%s9306_s1 + $0x968] sm:$0xff]  }
 0x110   :  { %6743 = vmatpush3.bf16.msra.mxu0 %v7363_v27  ;;  %v7402_v27 = vld [vmem:[%s9306_s1 + $0x9e8] sm:$0xff]  }
 0x111   :  { %6744 = vmatprep.subr.bf16.mxu0 %v7365_v28  ;;  %6765 = vmatpush3.bf16.msra.mxu1 %v7364_v29  ;;  %v7403_v28 = vld [vmem:[%s9306_s1 + $0x928] sm:$0xff]  }
 0x112   :  { %6766 = vmatprep.subr.bf16.mxu1 %v7366_v30  ;;  %v7404_v30 = vld [vmem:[%s9306_s1 + $0x9a8] sm:$0xff]  }
 0x114   :  { %6745 = vmatpush3.bf16.msra.mxu0 %v7367_v31 }
 0x115   :  { %6746 = vmatprep.subr.bf16.mxu0 %v7369_v32  ;;  %6767 = vmatpush3.bf16.msra.mxu1 %v7368_v33  ;;  %v7405_v32 = vld [vmem:[%s9306_s1 + $0x970] sm:$0xff]  }
 0x116   :  { %v6444_v37 = vpop.f32.mrb[4].mxu0  ;;  %6768 = vmatprep.subr.bf16.mxu1 %v7370_v34 }
 0x117   :  { %v6445_v39 = vpop.f32.mrb[5].mxu0  ;;  %v6466_v41 = vpop.f32.mrb[4].mxu1 }
 0x118   :  { %v6446_v42 = vadd.f32 %v6445_v39, %v6444_v37  ;;  %v6447_v43 = vpop.f32.mrb[6].mxu0  ;;  %v6467_v46 = vpop.f32.mrb[5].mxu1  ;;  %6747 = vmatpush3.bf16.msra.mxu0 %v7371_v36  ;;  %v7406_v37 = vld [vmem:[%s9306_s1 + $0x9f0] sm:$0xff]  }
 0x119   :  { %v6448_v47 = vpop.f32.mrb[7].mxu0  ;;  %v6468_v50 = vadd.f32 %v6467_v46, %v6466_v41  ;;  %v6469_v51 = vpop.f32.mrb[6].mxu1  ;;  %6748 = vmatprep.subr.bf16.mxu0 %v7373_v38  ;;  %6769 = vmatpush3.bf16.msra.mxu1 %v7372_v40  ;;  %v7407_v38 = vld [vmem:[%s9306_s1 + $0x930] sm:$0xff]   ;;  %v7409_v46 = vld [vmem:[%s9306_s1 + $0x978] sm:$0xff]  }
 0x11a   :  { %v4695_v49 = vadd.f32 %v6446_v42, %v8444_v7  ;;  %v6470_v53 = vpop.f32.mrb[7].mxu1  ;;  %6770 = vmatprep.subr.bf16.mxu1 %v7374_v44  ;;  %v7385_v7 = vld [vmem:[%s9306_s1 + $0x948] sm:$0xff]   ;;  %v7408_v44 = vld [vmem:[%s9306_s1 + $0x9b0] sm:$0xff]   ;;  %v1278_v51 = vrot.slane %v8568_v1, %v7719_v35  ;;  %v7426_v1 = vld [vmem:[%s9306_s1 + $0xa58] sm:$0xff]  }
 0x11b   :  { %v7415_v53 = vld [vmem:[%s9306_s1 + $0xac0] sm:$0xff]  }
 0x11c   :  { %v8548_v55 = vadd.f32 %v6468_v50, %v4695_v49  ;;  %6749 = vmatpush3.bf16.msra.mxu0 %v7375_v45  ;;  %v7411_v49 = vld [vmem:[%s9306_s1 + $0x938] sm:$0xff]  }
 0x11d   :  { %6750 = vmatprep.subr.bf16.mxu0 %v7377_v52  ;;  %6771 = vmatpush3.bf16.msra.mxu1 %v7376_v48  ;;  %v7410_v48 = vld [vmem:[%s9306_s1 + $0x9f8] sm:$0xff]   ;;  %v7414_v52 = vld [vmem:[%s9306_s1 + $0xa40] sm:$0xff]  }
 0x11e   :  { %6772 = vmatprep.subr.bf16.mxu1 %v7378_v54  ;;  %v7412_v50 = vld [vmem:[%s9306_s1 + $0x9b8] sm:$0xff]   ;;  %v7416_v54 = vld [vmem:[%s9306_s1 + $0xa00] sm:$0xff]  }
 0x120   :  { %6751 = vmatpush3.bf16.msra.mxu0 %v7379_v56  ;;  %v1294_v56 = vcombine.high %v1278_v51, %v1278_v51 }
 0x121   :  { %6780 = vmatprep.subr.bf16.mxu0 %v7381_v59  ;;  %6773 = vmatpush3.bf16.msra.mxu1 %v7380_v61  ;;  %v7420_v59 = vld [vmem:[%s9306_s1 + $0xa08] sm:$0xff]   ;;  %v7422_v61 = vld [vmem:[%s9306_s1 + $0xa50] sm:$0xff]  }
 0x122   :  { %6802 = vmatprep.subr.bf16.mxu1 %v7382_v0  ;;  %v7425_v0 = vld [vmem:[%s9306_s1 + $0xa90] sm:$0xff]  }
 0x123   :  { %5253 = vmatmul.mubr.bf16.vlgmr.msra.gmra.mrb[32].mxu0 %v1271_v63  ;;  %v7424_v63 = vld [vmem:[%s9306_s1 + $0xa10] sm:$0xff]  }
 0x124   :  { %6781 = vmatpush3.bf16.msra.mxu0 %v7383_v2  ;;  %5293 = vmatmul.mubr.bf16.vlgmr.msra.gmra.mrb[32].mxu1 %v1293_v6  ;;  %v7427_v2 = vld [vmem:[%s9306_s1 + $0xad8] sm:$0xff]   ;;  %v7431_v6 = vld [vmem:[%s9306_s1 + $0xae0] sm:$0xff]  }
 0x125   :  { %6782 = vmatprep.subr.bf16.mxu0 %v7385_v7  ;;  %6803 = vmatpush3.bf16.msra.mxu1 %v7384_v4  ;;  %v7429_v4 = vld [vmem:[%s9306_s1 + $0xa98] sm:$0xff]   ;;  %v7432_v7 = vld [vmem:[%s9306_s1 + $0xa20] sm:$0xff]  }
 0x126   :  { %5332 = vmatprep.mubr.bf16.mxu0 %v1292_v10  ;;  %6804 = vmatprep.subr.bf16.mxu1 %v7386_v9  ;;  %v7434_v9 = vld [vmem:[%s9306_s1 + $0xa68] sm:$0xff]  }
 0x127   :  { %5372 = vmatprep.mubr.bf16.mxu1 %v1296_v13  ;;  %v7435_v10 = vld [vmem:[%s9306_s1 + $0xae8] sm:$0xff]  }
 0x128   :  { %6783 = vmatpush3.bf16.msra.mxu0 %v7387_v11  ;;  %v7436_v11 = vld [vmem:[%s9306_s1 + $0xa28] sm:$0xff]  }
 0x129   :  { %6784 = vmatprep.subr.bf16.mxu0 %v7389_v14  ;;  %6805 = vmatpush3.bf16.msra.mxu1 %v7388_v12  ;;  %v7437_v13 = vld [vmem:[%s9306_s1 + $0xaa8] sm:$0xff]  }
 0x12a   :  { %6806 = vmatprep.subr.bf16.mxu1 %v7390_v15  ;;  %v7438_v15 = vld [vmem:[%s9306_s1 + $0xa70] sm:$0xff]  }
 0x12c   :  { %6785 = vmatpush3.bf16.msra.mxu0 %v7391_v16 }
 0x12d   :  { %6786 = vmatprep.subr.bf16.mxu0 %v7393_v18  ;;  %6807 = vmatpush3.bf16.msra.mxu1 %v7392_v17 }
 0x12e   :  { %6808 = vmatprep.subr.bf16.mxu1 %v7394_v19  ;;  %v7439_v19 = vld [vmem:[%s9306_s1 + $0xaf0] sm:$0xff]  }
 0x130   :  { %6787 = vmatpush3.bf16.msra.mxu0 %v7395_v20  ;;  %v7440_v20 = vld [vmem:[%s9306_s1 + $0xa30] sm:$0xff]  }
 0x131   :  { %6788 = vmatprep.subr.bf16.mxu0 %v7397_v22  ;;  %6809 = vmatpush3.bf16.msra.mxu1 %v7396_v21 }
 0x132   :  { %6810 = vmatprep.subr.bf16.mxu1 %v7398_v23 }
 0x134   :  { %6789 = vmatpush3.bf16.msra.mxu0 %v7399_v24 }
 0x135   :  { %6790 = vmatprep.subr.bf16.mxu0 %v7401_v26  ;;  %6811 = vmatpush3.bf16.msra.mxu1 %v7400_v25  ;;  %v7441_v26 = vld [vmem:[%s9306_s1 + $0xab0] sm:$0xff]  }
 0x136   :  { %v6488_v29 = vpop.f32.mrb[8].mxu0  ;;  %6812 = vmatprep.subr.bf16.mxu1 %v7402_v27 }
 0x137   :  { %v6489_v31 = vpop.f32.mrb[9].mxu0  ;;  %v6510_v33 = vpop.f32.mrb[8].mxu1 }
 0x138   :  { %v6490_v34 = vadd.f32 %v6489_v31, %v6488_v29  ;;  %v6491_v36 = vpop.f32.mrb[10].mxu0  ;;  %v6511_v39 = vpop.f32.mrb[9].mxu1  ;;  %6791 = vmatpush3.bf16.msra.mxu0 %v7403_v28  ;;  %v7442_v28 = vld [vmem:[%s9306_s1 + $0xa78] sm:$0xff]  }
 0x139   :  { %v6492_v40 = vpop.f32.mrb[11].mxu0  ;;  %v6512_v42 = vadd.f32 %v6511_v39, %v6510_v33  ;;  %v6513_v43 = vpop.f32.mrb[10].mxu1  ;;  %6792 = vmatprep.subr.bf16.mxu0 %v7405_v32  ;;  %6813 = vmatpush3.bf16.msra.mxu1 %v7404_v30  ;;  %v7443_v30 = vld [vmem:[%s9306_s1 + $0xaf8] sm:$0xff]   ;;  %v17_v32 = vld [vmem:[%s9307_s0 + $0x28] sm:$0xff] }
 0x13a   :  { %v4775_v41 = vadd.f32 %v6490_v34, %v8548_v55  ;;  %v6514_v45 = vpop.f32.mrb[11].mxu1  ;;  %6814 = vmatprep.subr.bf16.mxu1 %v7406_v37  ;;  %v7417_v55 = vld [vmem:[%s9306_s1 + $0xa80] sm:$0xff]   ;;  %v7444_v31 = vld [vmem:[%s9306_s1 + $0xa38] sm:$0xff]   ;;  %v1304_v33 = vrot.slane %v17_v32, %v7719_v35  ;;  %v1297_v36 = vcombine.high %v17_v32, %v17_v32  ;;  %v7483_v32 = vld [vmem:[%s9306_s1 + $0xc48] sm:$0xff]  }
 0x13b   :  { %v7446_v34 = vld [vmem:[%s9306_s1 + $0xb40] sm:$0xff]   ;;  %v7445_v37 = vld [vmem:[%s9306_s1 + $0xab8] sm:$0xff]  }
 0x13c   :  { %v8656_v47 = vadd.f32 %v6512_v42, %v4775_v41  ;;  %6793 = vmatpush3.bf16.msra.mxu0 %v7407_v38  ;;  %v1312_v38 = vcombine.high %v1304_v33, %v1304_v33  ;;  %v1320_v39 = vrot.slane %v1304_v33, %v7719_v35  ;;  %v7447_v40 = vld [vmem:[%s9306_s1 + $0xbc0] sm:$0xff]   ;;  %v8780_v41 = vrot.slane %v1297_v36, %v7719_v35  ;;  %v7484_v33 = vld [vmem:[%s9306_s1 + $0xcc8] sm:$0xff]  }
 0x13d   :  { %6794 = vmatprep.subr.bf16.mxu0 %v7409_v46  ;;  %6815 = vmatpush3.bf16.msra.mxu1 %v7408_v44  ;;  %v7448_v42 = vld [vmem:[%s9306_s1 + $0xb00] sm:$0xff]   ;;  %v7486_v36 = vld [vmem:[%s9306_s1 + $0xc88] sm:$0xff]  }
 0x13e   :  { %6816 = vmatprep.subr.bf16.mxu1 %v7410_v48  ;;  %v1334_v43 = vrot.slane %v1312_v38, %v7719_v35  ;;  %v7449_v44 = vld [vmem:[%s9306_s1 + $0xb80] sm:$0xff]   ;;  %v1313_v45 = vcombine.high %v8780_v41, %v8780_v41  ;;  %v1342_v46 = vcombine.high %v1320_v39, %v1320_v39  ;;  %v7488_v38 = vld [vmem:[%s9306_s1 + $0xcd0] sm:$0xff]  }
 0x140   :  { %6795 = vmatpush3.bf16.msra.mxu0 %v7411_v49  ;;  %v1344_v48 = vcombine.high %v1334_v43, %v1334_v43  ;;  %v7451_v49 = vld [vmem:[%s9306_s1 + $0xbc8] sm:$0xff]  }
 0x141   :  { %6824 = vmatprep.subr.bf16.mxu0 %v7414_v52  ;;  %6817 = vmatpush3.bf16.msra.mxu1 %v7412_v50  ;;  %v1341_v50 = vrot.slane %v1313_v45, %v7719_v35  ;;  %v7453_v52 = vld [vmem:[%s9306_s1 + $0xb88] sm:$0xff]   ;;  %v7495_v45 = vld [vmem:[%s9306_s1 + $0xc60] sm:$0xff]  }
 0x142   :  { %6846 = vmatprep.subr.bf16.mxu1 %v7415_v53 }
 0x143   :  { %5333 = vmatmul.mubr.bf16.vlgmr.msra.gmra.mrb[36].mxu0 %v1278_v51  ;;  %v7452_v51 = vld [vmem:[%s9306_s1 + $0xb08] sm:$0xff]   ;;  %v1345_v53 = vcombine.high %v1341_v50, %v1341_v50 }
 0x144   :  { %6825 = vmatpush3.bf16.msra.mxu0 %v7416_v54  ;;  %5373 = vmatmul.mubr.bf16.vlgmr.msra.gmra.mrb[36].mxu1 %v1294_v56  ;;  %v7454_v54 = vld [vmem:[%s9306_s1 + $0xb50] sm:$0xff]  }
 0x145   :  { %6826 = vmatprep.subr.bf16.mxu0 %v7418_v57  ;;  %6847 = vmatpush3.bf16.msra.mxu1 %v7417_v55  ;;  %v7455_v55 = vld [vmem:[%s9306_s1 + $0xbd0] sm:$0xff]  }
 0x146   :  { %6848 = vmatprep.subr.bf16.mxu1 %v7419_v58  ;;  %5412 = vmatprep.mubr.bf16.mxu0 %v1334_v43  ;;  %v7456_v56 = vld [vmem:[%s9306_s1 + $0xb10] sm:$0xff]   ;;  %v7458_v58 = vld [vmem:[%s9306_s1 + $0xb58] sm:$0xff]  }
 0x147   :  { %5452 = vmatprep.mubr.bf16.mxu1 %v1344_v48  ;;  %v7457_v57 = vld [vmem:[%s9306_s1 + $0xb90] sm:$0xff]   ;;  %v7493_v43 = vld [vmem:[%s9306_s1 + $0xc18] sm:$0xff]   ;;  %v7498_v48 = vld [vmem:[%s9306_s1 + $0xca0] sm:$0xff]  }
 0x148   :  { %6827 = vmatpush3.bf16.msra.mxu0 %v7420_v59  ;;  %v7459_v59 = vld [vmem:[%s9306_s1 + $0xbd8] sm:$0xff]  }
 0x149   :  { %6828 = vmatprep.subr.bf16.mxu0 %v7422_v61  ;;  %6849 = vmatpush3.bf16.msra.mxu1 %v7421_v60  ;;  %v7460_v60 = vld [vmem:[%s9306_s1 + $0xb18] sm:$0xff]  }
 0x14a   :  { %6850 = vmatprep.subr.bf16.mxu1 %v7423_v62  ;;  %v7461_v61 = vld [vmem:[%s9306_s1 + $0xb98] sm:$0xff]   ;;  %v7462_v62 = vld [vmem:[%s9306_s1 + $0xb60] sm:$0xff]  }
 0x14c   :  { %6829 = vmatpush3.bf16.msra.mxu0 %v7424_v63  ;;  %v7463_v63 = vld [vmem:[%s9306_s1 + $0xbe0] sm:$0xff]  }
 0x14d   :  { %6830 = vmatprep.subr.bf16.mxu0 %v7426_v1  ;;  %6851 = vmatpush3.bf16.msra.mxu1 %v7425_v0  ;;  %v7464_v0 = vld [vmem:[%s9306_s1 + $0xb20] sm:$0xff]  }
 0x14e   :  { %6852 = vmatprep.subr.bf16.mxu1 %v7427_v2  ;;  %v7465_v1 = vld [vmem:[%s9306_s1 + $0xba0] sm:$0xff]   ;;  %v7466_v2 = vld [vmem:[%s9306_s1 + $0xb68] sm:$0xff]  }
 0x150   :  { %6831 = vmatpush3.bf16.msra.mxu0 %v7428_v3  ;;  %v7467_v3 = vld [vmem:[%s9306_s1 + $0xbe8] sm:$0xff]  }
 0x151   :  { %6832 = vmatprep.subr.bf16.mxu0 %v7430_v5  ;;  %6853 = vmatpush3.bf16.msra.mxu1 %v7429_v4  ;;  %v7468_v5 = vld [vmem:[%s9306_s1 + $0xb28] sm:$0xff]  }
 0x152   :  { %6854 = vmatprep.subr.bf16.mxu1 %v7431_v6 }
 0x154   :  { %6833 = vmatpush3.bf16.msra.mxu0 %v7432_v7  ;;  %v7469_v7 = vld [vmem:[%s9306_s1 + $0xba8] sm:$0xff]  }
 0x155   :  { %6834 = vmatprep.subr.bf16.mxu0 %v7434_v9  ;;  %6855 = vmatpush3.bf16.msra.mxu1 %v7433_v8 }
 0x156   :  { %v6532_v12 = vpop.f32.mrb[12].mxu0  ;;  %6856 = vmatprep.subr.bf16.mxu1 %v7435_v10 }
 0x157   :  { %v6533_v14 = vpop.f32.mrb[13].mxu0  ;;  %v6554_v16 = vpop.f32.mrb[12].mxu1 }
 0x158   :  { %v6534_v17 = vadd.f32 %v6533_v14, %v6532_v12  ;;  %v6535_v18 = vpop.f32.mrb[14].mxu0  ;;  %v6555_v21 = vpop.f32.mrb[13].mxu1  ;;  %6835 = vmatpush3.bf16.msra.mxu0 %v7436_v11  ;;  %v7470_v11 = vld [vmem:[%s9306_s1 + $0xb70] sm:$0xff]  }
 0x159   :  { %v6536_v22 = vpop.f32.mrb[15].mxu0  ;;  %v6556_v24 = vadd.f32 %v6555_v21, %v6554_v16  ;;  %v6557_v25 = vpop.f32.mrb[14].mxu1  ;;  %6836 = vmatprep.subr.bf16.mxu0 %v7438_v15  ;;  %6857 = vmatpush3.bf16.msra.mxu1 %v7437_v13  ;;  %v7471_v12 = vld [vmem:[%s9306_s1 + $0xbf0] sm:$0xff]  }
 0x15a   :  { %v4855_v23 = vadd.f32 %v6534_v17, %v8656_v47  ;;  %v6558_v27 = vpop.f32.mrb[15].mxu1  ;;  %6858 = vmatprep.subr.bf16.mxu1 %v7439_v19  ;;  %v7450_v47 = vld [vmem:[%s9306_s1 + $0xb48] sm:$0xff]   ;;  %v7472_v18 = vld [vmem:[%s9306_s1 + $0xb30] sm:$0xff]   ;;  %v7474_v22 = vld [vmem:[%s9306_s1 + $0xb78] sm:$0xff]  }
 0x15b   :  { %v7477_v25 = vld [vmem:[%s9306_s1 + $0xbb8] sm:$0xff]   ;;  %v7479_v27 = vld [vmem:[%s9306_s1 + $0xc40] sm:$0xff]  }
 0x15c   :  { %v8757_v29 = vadd.f32 %v6556_v24, %v4855_v23  ;;  %6837 = vmatpush3.bf16.msra.mxu0 %v7440_v20  ;;  %v7473_v20 = vld [vmem:[%s9306_s1 + $0xbb0] sm:$0xff]   ;;  %v7475_v23 = vld [vmem:[%s9306_s1 + $0xbf8] sm:$0xff]  }
 0x15d   :  { %6838 = vmatprep.subr.bf16.mxu0 %v7442_v28  ;;  %6859 = vmatpush3.bf16.msra.mxu1 %v7441_v26  ;;  %v7476_v24 = vld [vmem:[%s9306_s1 + $0xb38] sm:$0xff]   ;;  %v1327_v26 = vrot.slane %v8780_v41, %v7719_v35  ;;  %v7480_v28 = vld [vmem:[%s9306_s1 + $0xcc0] sm:$0xff]  }
 0x15e   :  { %6860 = vmatprep.subr.bf16.mxu1 %v7443_v30  ;;  %v7482_v30 = vld [vmem:[%s9306_s1 + $0xc80] sm:$0xff]   ;;  %v7491_v41 = vld [vmem:[%s9306_s1 + $0xc58] sm:$0xff]  }
 0x160   :  { %6839 = vmatpush3.bf16.msra.mxu0 %v7444_v31  ;;  %v1343_v31 = vcombine.high %v1327_v26, %v1327_v26 }
 0x161   :  { %6868 = vmatprep.subr.bf16.mxu0 %v7446_v34  ;;  %6861 = vmatpush3.bf16.msra.mxu1 %v7445_v37  ;;  %v7485_v34 = vld [vmem:[%s9306_s1 + $0xc08] sm:$0xff]   ;;  %v7487_v37 = vld [vmem:[%s9306_s1 + $0xc50] sm:$0xff]  }
 0x162   :  { %6890 = vmatprep.subr.bf16.mxu1 %v7447_v40  ;;  %v7490_v40 = vld [vmem:[%s9306_s1 + $0xc90] sm:$0xff]  }
 0x163   :  { %5413 = vmatmul.mubr.bf16.vlgmr.msra.gmra.mrb[40].mxu0 %v1320_v39  ;;  %v7489_v39 = vld [vmem:[%s9306_s1 + $0xc10] sm:$0xff]  }
 0x164   :  { %6869 = vmatpush3.bf16.msra.mxu0 %v7448_v42  ;;  %5453 = vmatmul.mubr.bf16.vlgmr.msra.gmra.mrb[40].mxu1 %v1342_v46  ;;  %v7492_v42 = vld [vmem:[%s9306_s1 + $0xcd8] sm:$0xff]   ;;  %v7496_v46 = vld [vmem:[%s9306_s1 + $0xce0] sm:$0xff]  }
 0x165   :  { %6870 = vmatprep.subr.bf16.mxu0 %v7450_v47  ;;  %6891 = vmatpush3.bf16.msra.mxu1 %v7449_v44  ;;  %v7494_v44 = vld [vmem:[%s9306_s1 + $0xc98] sm:$0xff]   ;;  %v7497_v47 = vld [vmem:[%s9306_s1 + $0xc20] sm:$0xff]  }
 0x166   :  { %5492 = vmatprep.mubr.bf16.mxu0 %v1341_v50  ;;  %6892 = vmatprep.subr.bf16.mxu1 %v7451_v49  ;;  %v7499_v49 = vld [vmem:[%s9306_s1 + $0xc68] sm:$0xff]  }
 0x167   :  { %5532 = vmatprep.mubr.bf16.mxu1 %v1345_v53  ;;  %v7500_v50 = vld [vmem:[%s9306_s1 + $0xce8] sm:$0xff]  }
 0x168   :  { %6871 = vmatpush3.bf16.msra.mxu0 %v7452_v51 }
 0x169   :  { %6872 = vmatprep.subr.bf16.mxu0 %v7454_v54  ;;  %6893 = vmatpush3.bf16.msra.mxu1 %v7453_v52  ;;  %v7501_v52 = vld [vmem:[%s9306_s1 + $0xc28] sm:$0xff]  }
 0x16a   :  { %6894 = vmatprep.subr.bf16.mxu1 %v7455_v55  ;;  %v7502_v54 = vld [vmem:[%s9306_s1 + $0xca8] sm:$0xff]  }
 0x16c   :  { %6873 = vmatpush3.bf16.msra.mxu0 %v7456_v56 }
 0x16d   :  { %6874 = vmatprep.subr.bf16.mxu0 %v7458_v58  ;;  %6895 = vmatpush3.bf16.msra.mxu1 %v7457_v57  ;;  %v7503_v58 = vld [vmem:[%s9306_s1 + $0xc70] sm:$0xff]  }
 0x16e   :  { %6896 = vmatprep.subr.bf16.mxu1 %v7459_v59  ;;  %v7504_v59 = vld [vmem:[%s9306_s1 + $0xcf0] sm:$0xff]  }
 0x170   :  { %6875 = vmatpush3.bf16.msra.mxu0 %v7460_v60 }
 0x171   :  { %6876 = vmatprep.subr.bf16.mxu0 %v7462_v62  ;;  %6897 = vmatpush3.bf16.msra.mxu1 %v7461_v61 }
 0x172   :  { %6898 = vmatprep.subr.bf16.mxu1 %v7463_v63 }
 0x174   :  { %6877 = vmatpush3.bf16.msra.mxu0 %v7464_v0 }
 0x175   :  { %6878 = vmatprep.subr.bf16.mxu0 %v7466_v2  ;;  %6899 = vmatpush3.bf16.msra.mxu1 %v7465_v1  ;;  %v7505_v1 = vld [vmem:[%s9306_s1 + $0xc30] sm:$0xff]  }
 0x176   :  { %v6576_v4 = vpop.f32.mrb[16].mxu0  ;;  %6900 = vmatprep.subr.bf16.mxu1 %v7467_v3  ;;  %v7506_v3 = vld [vmem:[%s9306_s1 + $0xcb0] sm:$0xff]  }
 0x177   :  { %v6577_v6 = vpop.f32.mrb[17].mxu0  ;;  %v6598_v8 = vpop.f32.mrb[16].mxu1 }
 0x178   :  { %v6578_v9 = vadd.f32 %v6577_v6, %v6576_v4  ;;  %v6579_v10 = vpop.f32.mrb[18].mxu0  ;;  %v6599_v13 = vpop.f32.mrb[17].mxu1  ;;  %6879 = vmatpush3.bf16.msra.mxu0 %v7468_v5  ;;  %v7507_v5 = vld [vmem:[%s9306_s1 + $0xc78] sm:$0xff]  }
 0x179   :  { %v6580_v14 = vpop.f32.mrb[19].mxu0  ;;  %v6600_v16 = vadd.f32 %v6599_v13, %v6598_v8  ;;  %v6601_v17 = vpop.f32.mrb[18].mxu1  ;;  %6880 = vmatprep.subr.bf16.mxu0 %v7470_v11  ;;  %6901 = vmatpush3.bf16.msra.mxu1 %v7469_v7  ;;  %v7508_v6 = vld [vmem:[%s9306_s1 + $0xcf8] sm:$0xff]   ;;  %v18_v8 = vld [vmem:[%s9307_s0 + $0x30] sm:$0xff]  ;;  %v7511_v10 = vld [vmem:[%s9306_s1 + $0xd40] sm:$0xff]  }
 0x17a   :  { %v4935_v15 = vadd.f32 %v6578_v9, %v8757_v29  ;;  %v6602_v19 = vpop.f32.mrb[19].mxu1  ;;  %6902 = vmatprep.subr.bf16.mxu1 %v7471_v12  ;;  %v7481_v29 = vld [vmem:[%s9306_s1 + $0xc00] sm:$0xff]   ;;  %v7509_v7 = vld [vmem:[%s9306_s1 + $0xc38] sm:$0xff]   ;;  %v1353_v9 = vrot.slane %v18_v8, %v7719_v35  ;;  %v1346_v11 = vcombine.high %v18_v8, %v18_v8  ;;  %v7548_v8 = vld [vmem:[%s9306_s1 + $0xe48] sm:$0xff]  }
 0x17b   :  { %v7510_v12 = vld [vmem:[%s9306_s1 + $0xcb8] sm:$0xff]   ;;  %v7513_v17 = vld [vmem:[%s9306_s1 + $0xd00] sm:$0xff]  }
 0x17c   :  { %v8865_v21 = vadd.f32 %v6600_v16, %v4935_v15  ;;  %6881 = vmatpush3.bf16.msra.mxu0 %v7472_v18  ;;  %v1361_v13 = vcombine.high %v1353_v9, %v1353_v9  ;;  %v1369_v14 = vrot.slane %v1353_v9, %v7719_v35  ;;  %v7512_v15 = vld [vmem:[%s9306_s1 + $0xdc0] sm:$0xff]   ;;  %v8992_v16 = vrot.slane %v1346_v11, %v7719_v35  ;;  %v7549_v9 = vld [vmem:[%s9306_s1 + $0xec8] sm:$0xff]  }
 0x17d   :  { %6882 = vmatprep.subr.bf16.mxu0 %v7474_v22  ;;  %6903 = vmatpush3.bf16.msra.mxu1 %v7473_v20  ;;  %v7514_v19 = vld [vmem:[%s9306_s1 + $0xd80] sm:$0xff]   ;;  %v7515_v22 = vld [vmem:[%s9306_s1 + $0xd48] sm:$0xff]  }
 0x17e   :  { %6904 = vmatprep.subr.bf16.mxu1 %v7475_v23  ;;  %v1383_v18 = vrot.slane %v1361_v13, %v7719_v35  ;;  %v1362_v20 = vcombine.high %v8992_v16, %v8992_v16  ;;  %v7551_v11 = vld [vmem:[%s9306_s1 + $0xe88] sm:$0xff]   ;;  %v7553_v13 = vld [vmem:[%s9306_s1 + $0xed0] sm:$0xff]  }
 0x180   :  { %6883 = vmatpush3.bf16.msra.mxu0 %v7476_v24  ;;  %v1393_v23 = vcombine.high %v1383_v18, %v1383_v18  ;;  %v7516_v24 = vld [vmem:[%s9306_s1 + $0xdc8] sm:$0xff]  }
 0x181   :  { %6912 = vmatprep.subr.bf16.mxu0 %v7479_v27  ;;  %6905 = vmatpush3.bf16.msra.mxu1 %v7477_v25  ;;  %v1390_v25 = vrot.slane %v1362_v20, %v7719_v35  ;;  %v7518_v27 = vld [vmem:[%s9306_s1 + $0xd88] sm:$0xff]   ;;  %v7560_v20 = vld [vmem:[%s9306_s1 + $0xe60] sm:$0xff]  }
 0x182   :  { %6934 = vmatprep.subr.bf16.mxu1 %v7480_v28 }
 0x183   :  { %5493 = vmatmul.mubr.bf16.vlgmr.msra.gmra.mrb[44].mxu0 %v1327_v26  ;;  %v7517_v26 = vld [vmem:[%s9306_s1 + $0xd08] sm:$0xff]   ;;  %v1394_v28 = vcombine.high %v1390_v25, %v1390_v25 }
 0x184   :  { %6913 = vmatpush3.bf16.msra.mxu0 %v7481_v29  ;;  %5533 = vmatmul.mubr.bf16.vlgmr.msra.gmra.mrb[44].mxu1 %v1343_v31  ;;  %v7519_v29 = vld [vmem:[%s9306_s1 + $0xd50] sm:$0xff]  }
 0x185   :  { %6914 = vmatprep.subr.bf16.mxu0 %v7483_v32  ;;  %6935 = vmatpush3.bf16.msra.mxu1 %v7482_v30  ;;  %v7520_v30 = vld [vmem:[%s9306_s1 + $0xdd0] sm:$0xff]  }
 0x186   :  { %6936 = vmatprep.subr.bf16.mxu1 %v7484_v33  ;;  %5572 = vmatprep.mubr.bf16.mxu0 %v1383_v18  ;;  %v7521_v31 = vld [vmem:[%s9306_s1 + $0xd10] sm:$0xff]   ;;  %v7523_v33 = vld [vmem:[%s9306_s1 + $0xd58] sm:$0xff]  }
 0x187   :  { %5612 = vmatprep.mubr.bf16.mxu1 %v1393_v23  ;;  %v7522_v32 = vld [vmem:[%s9306_s1 + $0xd90] sm:$0xff]   ;;  %v7558_v18 = vld [vmem:[%s9306_s1 + $0xe18] sm:$0xff]   ;;  %v7563_v23 = vld [vmem:[%s9306_s1 + $0xea0] sm:$0xff]  }
 0x188   :  { %6915 = vmatpush3.bf16.msra.mxu0 %v7485_v34  ;;  %v7524_v34 = vld [vmem:[%s9306_s1 + $0xdd8] sm:$0xff]  }
 0x189   :  { %6916 = vmatprep.subr.bf16.mxu0 %v7487_v37  ;;  %6937 = vmatpush3.bf16.msra.mxu1 %v7486_v36  ;;  %v7525_v36 = vld [vmem:[%s9306_s1 + $0xd18] sm:$0xff]  }
 0x18a   :  { %6938 = vmatprep.subr.bf16.mxu1 %v7488_v38  ;;  %v7526_v37 = vld [vmem:[%s9306_s1 + $0xd98] sm:$0xff]   ;;  %v7527_v38 = vld [vmem:[%s9306_s1 + $0xd60] sm:$0xff]  }
 0x18c   :  { %6917 = vmatpush3.bf16.msra.mxu0 %v7489_v39  ;;  %v7528_v39 = vld [vmem:[%s9306_s1 + $0xde0] sm:$0xff]  }
 0x18d   :  { %6918 = vmatprep.subr.bf16.mxu0 %v7491_v41  ;;  %6939 = vmatpush3.bf16.msra.mxu1 %v7490_v40  ;;  %v7529_v40 = vld [vmem:[%s9306_s1 + $0xd20] sm:$0xff]  }
 0x18e   :  { %6940 = vmatprep.subr.bf16.mxu1 %v7492_v42  ;;  %v7530_v41 = vld [vmem:[%s9306_s1 + $0xda0] sm:$0xff]   ;;  %v7531_v42 = vld [vmem:[%s9306_s1 + $0xd68] sm:$0xff]  }
 0x190   :  { %6919 = vmatpush3.bf16.msra.mxu0 %v7493_v43  ;;  %v7532_v43 = vld [vmem:[%s9306_s1 + $0xde8] sm:$0xff]  }
 0x191   :  { %6920 = vmatprep.subr.bf16.mxu0 %v7495_v45  ;;  %6941 = vmatpush3.bf16.msra.mxu1 %v7494_v44  ;;  %v7533_v45 = vld [vmem:[%s9306_s1 + $0xd28] sm:$0xff]  }
 0x192   :  { %6942 = vmatprep.subr.bf16.mxu1 %v7496_v46 }
 0x194   :  { %6921 = vmatpush3.bf16.msra.mxu0 %v7497_v47  ;;  %v7534_v47 = vld [vmem:[%s9306_s1 + $0xda8] sm:$0xff]  }
 0x195   :  { %6922 = vmatprep.subr.bf16.mxu0 %v7499_v49  ;;  %6943 = vmatpush3.bf16.msra.mxu1 %v7498_v48 }
 0x196   :  { %v6620_v51 = vpop.f32.mrb[20].mxu0  ;;  %6944 = vmatprep.subr.bf16.mxu1 %v7500_v50 }
 0x197   :  { %v6621_v53 = vpop.f32.mrb[21].mxu0  ;;  %v6642_v55 = vpop.f32.mrb[20].mxu1 }
 0x198   :  { %v6622_v56 = vadd.f32 %v6621_v53, %v6620_v51  ;;  %v6623_v57 = vpop.f32.mrb[22].mxu0  ;;  %v6643_v60 = vpop.f32.mrb[21].mxu1  ;;  %6923 = vmatpush3.bf16.msra.mxu0 %v7501_v52  ;;  %v7535_v51 = vld [vmem:[%s9306_s1 + $0xd70] sm:$0xff]  }
 0x199   :  { %v6624_v61 = vpop.f32.mrb[23].mxu0  ;;  %v6644_v63 = vadd.f32 %v6643_v60, %v6642_v55  ;;  %v6645_v0 = vpop.f32.mrb[22].mxu1  ;;  %6924 = vmatprep.subr.bf16.mxu0 %v7503_v58  ;;  %6945 = vmatpush3.bf16.msra.mxu1 %v7502_v54  ;;  %v7536_v52 = vld [vmem:[%s9306_s1 + $0xdf0] sm:$0xff]  }
 0x19a   :  { %v5015_v62 = vadd.f32 %v6622_v56, %v8865_v21  ;;  %v6646_v2 = vpop.f32.mrb[23].mxu1  ;;  %6946 = vmatprep.subr.bf16.mxu1 %v7504_v59  ;;  %v1391_v21 = vcombine.high %v1369_v14, %v1369_v14  ;;  %v7537_v58 = vld [vmem:[%s9306_s1 + $0xd30] sm:$0xff]   ;;  %v7541_v0 = vld [vmem:[%s9306_s1 + $0xd38] sm:$0xff]  }
 0x19b   :  { %v7538_v60 = vld [vmem:[%s9306_s1 + $0xdb0] sm:$0xff]   ;;  %v1376_v2 = vrot.slane %v8992_v16, %v7719_v35  ;;  %v7556_v16 = vld [vmem:[%s9306_s1 + $0xe58] sm:$0xff]  }
 0x19c   :  { %v8966_v4 = vadd.f32 %v6644_v63, %v5015_v62  ;;  %6925 = vmatpush3.bf16.msra.mxu0 %v7505_v1  ;;  %v7539_v62 = vld [vmem:[%s9306_s1 + $0xd78] sm:$0xff]  }
 0x19d   :  { %6926 = vmatprep.subr.bf16.mxu0 %v7507_v5  ;;  %6947 = vmatpush3.bf16.msra.mxu1 %v7506_v3  ;;  %v7540_v63 = vld [vmem:[%s9306_s1 + $0xdf8] sm:$0xff]   ;;  %v7544_v3 = vld [vmem:[%s9306_s1 + $0xe40] sm:$0xff]  }
 0x19e   :  { %6948 = vmatprep.subr.bf16.mxu1 %v7508_v6  ;;  %v7542_v1 = vld [vmem:[%s9306_s1 + $0xdb8] sm:$0xff]   ;;  %v7546_v5 = vld [vmem:[%s9306_s1 + $0xe00] sm:$0xff]  }
 0x19f   :  { %v7547_v6 = vld [vmem:[%s9306_s1 + $0xe80] sm:$0xff]  }
 0x1a0   :  { %6927 = vmatpush3.bf16.msra.mxu0 %v7509_v7  ;;  %v1392_v7 = vcombine.high %v1376_v2, %v1376_v2 }
 0x1a1   :  { %6956 = vmatprep.subr.bf16.mxu0 %v7511_v10  ;;  %6949 = vmatpush3.bf16.msra.mxu1 %v7510_v12  ;;  %v7550_v10 = vld [vmem:[%s9306_s1 + $0xe08] sm:$0xff]   ;;  %v7552_v12 = vld [vmem:[%s9306_s1 + $0xe50] sm:$0xff]  }
 0x1a2   :  { %6978 = vmatprep.subr.bf16.mxu1 %v7512_v15  ;;  %v7555_v15 = vld [vmem:[%s9306_s1 + $0xe90] sm:$0xff]  }
 0x1a3   :  { %5573 = vmatmul.mubr.bf16.vlgmr.msra.gmra.mrb[48].mxu0 %v1369_v14  ;;  %v7554_v14 = vld [vmem:[%s9306_s1 + $0xe10] sm:$0xff]  }
 0x1a4   :  { %6957 = vmatpush3.bf16.msra.mxu0 %v7513_v17  ;;  %5613 = vmatmul.mubr.bf16.vlgmr.msra.gmra.mrb[48].mxu1 %v1391_v21  ;;  %v7557_v17 = vld [vmem:[%s9306_s1 + $0xed8] sm:$0xff]   ;;  %v7561_v21 = vld [vmem:[%s9306_s1 + $0xee0] sm:$0xff]  }
 0x1a5   :  { %6958 = vmatprep.subr.bf16.mxu0 %v7515_v22  ;;  %6979 = vmatpush3.bf16.msra.mxu1 %v7514_v19  ;;  %v7559_v19 = vld [vmem:[%s9306_s1 + $0xe98] sm:$0xff]   ;;  %v7562_v22 = vld [vmem:[%s9306_s1 + $0xe20] sm:$0xff]  }
 0x1a6   :  { %5652 = vmatprep.mubr.bf16.mxu0 %v1390_v25  ;;  %6980 = vmatprep.subr.bf16.mxu1 %v7516_v24  ;;  %v7564_v24 = vld [vmem:[%s9306_s1 + $0xe68] sm:$0xff]  }
 0x1a7   :  { %5692 = vmatprep.mubr.bf16.mxu1 %v1394_v28  ;;  %v7565_v25 = vld [vmem:[%s9306_s1 + $0xee8] sm:$0xff]  }
 0x1a8   :  { %6959 = vmatpush3.bf16.msra.mxu0 %v7517_v26 }
 0x1a9   :  { %6960 = vmatprep.subr.bf16.mxu0 %v7519_v29  ;;  %6981 = vmatpush3.bf16.msra.mxu1 %v7518_v27  ;;  %v7566_v27 = vld [vmem:[%s9306_s1 + $0xe28] sm:$0xff]  }
 0x1aa   :  { %6982 = vmatprep.subr.bf16.mxu1 %v7520_v30  ;;  %v7567_v29 = vld [vmem:[%s9306_s1 + $0xea8] sm:$0xff]  }
 0x1ac   :  { %6961 = vmatpush3.bf16.msra.mxu0 %v7521_v31 }
 0x1ad   :  { %6962 = vmatprep.subr.bf16.mxu0 %v7523_v33  ;;  %6983 = vmatpush3.bf16.msra.mxu1 %v7522_v32  ;;  %v7568_v33 = vld [vmem:[%s9306_s1 + $0xe70] sm:$0xff]  }
 0x1ae   :  { %6984 = vmatprep.subr.bf16.mxu1 %v7524_v34  ;;  %v7569_v34 = vld [vmem:[%s9306_s1 + $0xef0] sm:$0xff]  }
 0x1b0   :  { %6963 = vmatpush3.bf16.msra.mxu0 %v7525_v36 }
 0x1b1   :  { %6964 = vmatprep.subr.bf16.mxu0 %v7527_v38  ;;  %6985 = vmatpush3.bf16.msra.mxu1 %v7526_v37 }
 0x1b2   :  { %6986 = vmatprep.subr.bf16.mxu1 %v7528_v39 }
 0x1b4   :  { %6965 = vmatpush3.bf16.msra.mxu0 %v7529_v40 }
 0x1b5   :  { %6966 = vmatprep.subr.bf16.mxu0 %v7531_v42  ;;  %6987 = vmatpush3.bf16.msra.mxu1 %v7530_v41  ;;  %v7570_v41 = vld [vmem:[%s9306_s1 + $0xe30] sm:$0xff]  }
 0x1b6   :  { %v6664_v44 = vpop.f32.mrb[24].mxu0  ;;  %6988 = vmatprep.subr.bf16.mxu1 %v7532_v43  ;;  %v7571_v43 = vld [vmem:[%s9306_s1 + $0xeb0] sm:$0xff]  }
 0x1b7   :  { %v6665_v46 = vpop.f32.mrb[25].mxu0  ;;  %v6686_v48 = vpop.f32.mrb[24].mxu1 }
 0x1b8   :  { %v6666_v49 = vadd.f32 %v6665_v46, %v6664_v44  ;;  %v6667_v50 = vpop.f32.mrb[26].mxu0  ;;  %v6687_v53 = vpop.f32.mrb[25].mxu1  ;;  %6967 = vmatpush3.bf16.msra.mxu0 %v7533_v45  ;;  %v7572_v45 = vld [vmem:[%s9306_s1 + $0xe78] sm:$0xff]  }
 0x1b9   :  { %v6668_v54 = vpop.f32.mrb[27].mxu0  ;;  %v6688_v56 = vadd.f32 %v6687_v53, %v6686_v48  ;;  %v6689_v57 = vpop.f32.mrb[26].mxu1  ;;  %6968 = vmatprep.subr.bf16.mxu0 %v7535_v51  ;;  %6989 = vmatpush3.bf16.msra.mxu1 %v7534_v47  ;;  %v7573_v46 = vld [vmem:[%s9306_s1 + $0xef8] sm:$0xff]   ;;  %v7576_v50 = vld [vmem:[%s9306_s1 + $0xf40] sm:$0xff]  }
 0x1ba   :  { %v5095_v55 = vadd.f32 %v6666_v49, %v8966_v4  ;;  %v6690_v59 = vpop.f32.mrb[27].mxu1  ;;  %6990 = vmatprep.subr.bf16.mxu1 %v7536_v52  ;;  %v7545_v4 = vld [vmem:[%s9306_s1 + $0xec0] sm:$0xff]   ;;  %v7574_v47 = vld [vmem:[%s9306_s1 + $0xe38] sm:$0xff]  }
 0x1bb   :  { %v19_v48 = vld [vmem:[%s9307_s0 + $0x38] sm:$0xff] }
 0x1bc   :  { %v9077_v61 = vadd.f32 %v6688_v56, %v5095_v55  ;;  %6969 = vmatpush3.bf16.msra.mxu0 %v7537_v58  ;;  %v1402_v49 = vrot.slane %v19_v48, %v7719_v35  ;;  %v1395_v51 = vcombine.high %v19_v48, %v19_v48  ;;  %v7575_v52 = vld [vmem:[%s9306_s1 + $0xeb8] sm:$0xff]   ;;  %v7577_v55 = vld [vmem:[%s9306_s1 + $0xfc0] sm:$0xff]  }
 0x1bd   :  { %6970 = vmatprep.subr.bf16.mxu0 %v7539_v62  ;;  %6991 = vmatpush3.bf16.msra.mxu1 %v7538_v60  ;;  %v7578_v58 = vld [vmem:[%s9306_s1 + $0xf00] sm:$0xff]  }
 0x1be   :  { %6992 = vmatprep.subr.bf16.mxu1 %v7540_v63  ;;  %v1410_v53 = vcombine.high %v1402_v49, %v1402_v49  ;;  %v1418_v54 = vrot.slane %v1402_v49, %v7719_v35  ;;  %v9204_v56 = vrot.slane %v1395_v51, %v7719_v35  ;;  %v7579_v63 = vld [vmem:[%s9306_s1 + $0xf80] sm:$0xff]  }
 0x1c0   :  { %6971 = vmatpush3.bf16.msra.mxu0 %v7541_v0  ;;  %v1432_v57 = vrot.slane %v1410_v53, %v7719_v35  ;;  %v1411_v59 = vcombine.high %v9204_v56, %v9204_v56  ;;  %v1440_v60 = vcombine.high %v1418_v54, %v1418_v54 }
 0x1c1   :  { %7000 = vmatprep.subr.bf16.mxu0 %v7544_v3  ;;  %6993 = vmatpush3.bf16.msra.mxu1 %v7542_v1  ;;  %v7581_v1 = vld [vmem:[%s9306_s1 + $0xfc8] sm:$0xff]  }
 0x1c2   :  { %7022 = vmatprep.subr.bf16.mxu1 %v7545_v4  ;;  %v1442_v62 = vcombine.high %v1432_v57, %v1432_v57  ;;  %v1439_v0 = vrot.slane %v1411_v59, %v7719_v35  ;;  %v7584_v4 = vld [vmem:[%s9306_s1 + $0xf50] sm:$0xff]  }
 0x1c3   :  { %5653 = vmatmul.mubr.bf16.vlgmr.msra.gmra.mrb[52].mxu0 %v1376_v2  ;;  %v7582_v2 = vld [vmem:[%s9306_s1 + $0xf08] sm:$0xff]  }
 0x1c4   :  { %7001 = vmatpush3.bf16.msra.mxu0 %v7546_v5  ;;  %5693 = vmatmul.mubr.bf16.vlgmr.msra.gmra.mrb[52].mxu1 %v1392_v7  ;;  %v1443_v3 = vcombine.high %v1439_v0, %v1439_v0  ;;  %v7583_v5 = vld [vmem:[%s9306_s1 + $0xf88] sm:$0xff]   ;;  %v7586_v7 = vld [vmem:[%s9306_s1 + $0xf10] sm:$0xff]  }
 0x1c5   :  { %7002 = vmatprep.subr.bf16.mxu0 %v7548_v8  ;;  %7023 = vmatpush3.bf16.msra.mxu1 %v7547_v6  ;;  %v7585_v6 = vld [vmem:[%s9306_s1 + $0xfd0] sm:$0xff]   ;;  %v7588_v8 = vld [vmem:[%s9306_s1 + $0xf58] sm:$0xff]  }
 0x1c6   :  { %7024 = vmatprep.subr.bf16.mxu1 %v7549_v9  ;;  %5732 = vmatprep.mubr.bf16.mxu0 %v1432_v57  ;;  %v7587_v9 = vld [vmem:[%s9306_s1 + $0xf90] sm:$0xff]  }
 0x1c7   :  { %5772 = vmatprep.mubr.bf16.mxu1 %v1442_v62 }
 0x1c8   :  { %7003 = vmatpush3.bf16.msra.mxu0 %v7550_v10  ;;  %v7589_v10 = vld [vmem:[%s9306_s1 + $0xfd8] sm:$0xff]  }
 0x1c9   :  { %7004 = vmatprep.subr.bf16.mxu0 %v7552_v12  ;;  %7025 = vmatpush3.bf16.msra.mxu1 %v7551_v11  ;;  %v7590_v11 = vld [vmem:[%s9306_s1 + $0xf18] sm:$0xff]   ;;  %v7592_v12 = vld [vmem:[%s9306_s1 + $0xf60] sm:$0xff]  }
 0x1ca   :  { %7026 = vmatprep.subr.bf16.mxu1 %v7553_v13  ;;  %v7591_v13 = vld [vmem:[%s9306_s1 + $0xf98] sm:$0xff]  }
 0x1cc   :  { %7005 = vmatpush3.bf16.msra.mxu0 %v7554_v14  ;;  %v7593_v14 = vld [vmem:[%s9306_s1 + $0xfe0] sm:$0xff]  }
 0x1cd   :  { %7006 = vmatprep.subr.bf16.mxu0 %v7556_v16  ;;  %7027 = vmatpush3.bf16.msra.mxu1 %v7555_v15  ;;  %v7594_v15 = vld [vmem:[%s9306_s1 + $0xf20] sm:$0xff]   ;;  %v7596_v16 = vld [vmem:[%s9306_s1 + $0xf68] sm:$0xff]  }
 0x1ce   :  { %7028 = vmatprep.subr.bf16.mxu1 %v7557_v17  ;;  %v7595_v17 = vld [vmem:[%s9306_s1 + $0xfa0] sm:$0xff]  }
 0x1d0   :  { %7007 = vmatpush3.bf16.msra.mxu0 %v7558_v18 }
 0x1d1   :  { %7008 = vmatprep.subr.bf16.mxu0 %v7560_v20  ;;  %7029 = vmatpush3.bf16.msra.mxu1 %v7559_v19  ;;  %v7597_v19 = vld [vmem:[%s9306_s1 + $0xfe8] sm:$0xff]  }
 0x1d2   :  { %7030 = vmatprep.subr.bf16.mxu1 %v7561_v21  ;;  %v7598_v21 = vld [vmem:[%s9306_s1 + $0xf28] sm:$0xff]  }
 0x1d4   :  { %7009 = vmatpush3.bf16.msra.mxu0 %v7562_v22 }
 0x1d5   :  { %7010 = vmatprep.subr.bf16.mxu0 %v7564_v24  ;;  %7031 = vmatpush3.bf16.msra.mxu1 %v7563_v23 }
 0x1d6   :  { %v6708_v26 = vpop.f32.mrb[28].mxu0  ;;  %7032 = vmatprep.subr.bf16.mxu1 %v7565_v25  ;;  %v7599_v25 = vld [vmem:[%s9306_s1 + $0xfa8] sm:$0xff]  }
 0x1d7   :  { %v6709_v28 = vpop.f32.mrb[29].mxu0  ;;  %v6730_v30 = vpop.f32.mrb[28].mxu1 }
 0x1d8   :  { %v6710_v31 = vadd.f32 %v6709_v28, %v6708_v26  ;;  %v6711_v32 = vpop.f32.mrb[30].mxu0  ;;  %v6731_v36 = vpop.f32.mrb[29].mxu1  ;;  %7011 = vmatpush3.bf16.msra.mxu0 %v7566_v27  ;;  %v7600_v26 = vld [vmem:[%s9306_s1 + $0xf70] sm:$0xff]  }
 0x1d9   :  { %v6712_v37 = vpop.f32.mrb[31].mxu0  ;;  %v6732_v39 = vadd.f32 %v6731_v36, %v6730_v30  ;;  %v6733_v40 = vpop.f32.mrb[30].mxu1  ;;  %7012 = vmatprep.subr.bf16.mxu0 %v7568_v33  ;;  %7033 = vmatpush3.bf16.msra.mxu1 %v7567_v29  ;;  %v7601_v32 = vld [vmem:[%s9306_s1 + $0xff0] sm:$0xff]  }
 0x1da   :  { %v5175_v38 = vadd.f32 %v6710_v31, %v9077_v61  ;;  %v6734_v42 = vpop.f32.mrb[31].mxu1  ;;  %7034 = vmatprep.subr.bf16.mxu1 %v7569_v34  ;;  %v7580_v61 = vld [vmem:[%s9306_s1 + $0xf48] sm:$0xff]   ;;  %v7602_v34 = vld [vmem:[%s9306_s1 + $0xf30] sm:$0xff]   ;;  %v7604_v37 = vld [vmem:[%s9306_s1 + $0xf78] sm:$0xff]  }
 0x1db   :  { %v7606_v40 = vld [vmem:[%s9306_s1 + $0xf38] sm:$0xff]  }
 0x1dc   :  { %v9178_v44 = vadd.f32 %v6732_v39, %v5175_v38  ;;  %7013 = vmatpush3.bf16.msra.mxu0 %v7570_v41  ;;  %v7603_v38 = vld [vmem:[%s9306_s1 + $0xfb0] sm:$0xff]   ;;  %v7605_v39 = vld [vmem:[%s9306_s1 + $0xff8] sm:$0xff]   ;;  %v1425_v41 = vrot.slane %v9204_v56, %v7719_v35 }
 0x1dd   :  { %7014 = vmatprep.subr.bf16.mxu0 %v7572_v45  ;;  %7035 = vmatpush3.bf16.msra.mxu1 %v7571_v43  ;;  %v7607_v42 = vld [vmem:[%s9306_s1 + $0xfb8] sm:$0xff]  }
 0x1de   :  { %7036 = vmatprep.subr.bf16.mxu1 %v7573_v46  ;;  %v1441_v43 = vcombine.high %v1425_v41, %v1425_v41 }
 0x1e0   :  { %7015 = vmatpush3.bf16.msra.mxu0 %v7574_v47 }
 0x1e1   :  { %7044 = vmatprep.subr.bf16.mxu0 %v7576_v50  ;;  %7037 = vmatpush3.bf16.msra.mxu1 %v7575_v52 }
 0x1e2   :  { %7066 = vmatprep.subr.bf16.mxu1 %v7577_v55 }
 0x1e3   :  { %5733 = vmatmul.mubr.bf16.vlgmr.msra.gmra.mrb[56].mxu0 %v1418_v54 }
 0x1e4   :  { %7045 = vmatpush3.bf16.msra.mxu0 %v7578_v58  ;;  %5773 = vmatmul.mubr.bf16.vlgmr.msra.gmra.mrb[56].mxu1 %v1440_v60 }
 0x1e5   :  { %7046 = vmatprep.subr.bf16.mxu0 %v7580_v61  ;;  %7067 = vmatpush3.bf16.msra.mxu1 %v7579_v63 }
 0x1e6   :  { %5812 = vmatprep.mubr.bf16.mxu0 %v1439_v0  ;;  %7068 = vmatprep.subr.bf16.mxu1 %v7581_v1 }
 0x1e7   :  { %5852 = vmatprep.mubr.bf16.mxu1 %v1443_v3 }
 0x1e8   :  { %7047 = vmatpush3.bf16.msra.mxu0 %v7582_v2 }
 0x1e9   :  { %7048 = vmatprep.subr.bf16.mxu0 %v7584_v4  ;;  %7069 = vmatpush3.bf16.msra.mxu1 %v7583_v5 }
 0x1ea   :  { %7070 = vmatprep.subr.bf16.mxu1 %v7585_v6 }
 0x1ec   :  { %7049 = vmatpush3.bf16.msra.mxu0 %v7586_v7 }
 0x1ed   :  { %7050 = vmatprep.subr.bf16.mxu0 %v7588_v8  ;;  %7071 = vmatpush3.bf16.msra.mxu1 %v7587_v9 }
 0x1ee   :  { %7072 = vmatprep.subr.bf16.mxu1 %v7589_v10 }
 0x1f0   :  { %7051 = vmatpush3.bf16.msra.mxu0 %v7590_v11 }
 0x1f1   :  { %7052 = vmatprep.subr.bf16.mxu0 %v7592_v12  ;;  %7073 = vmatpush3.bf16.msra.mxu1 %v7591_v13 }
 0x1f2   :  { %7074 = vmatprep.subr.bf16.mxu1 %v7593_v14 }
 0x1f4   :  { %7053 = vmatpush3.bf16.msra.mxu0 %v7594_v15 }
 0x1f5   :  { %7054 = vmatprep.subr.bf16.mxu0 %v7596_v16  ;;  %7075 = vmatpush3.bf16.msra.mxu1 %v7595_v17 }
 0x1f6   :  { %v6752_v18 = vpop.f32.mrb[32].mxu0  ;;  %7076 = vmatprep.subr.bf16.mxu1 %v7597_v19 }
 0x1f7   :  { %v6753_v20 = vpop.f32.mrb[33].mxu0  ;;  %v6774_v22 = vpop.f32.mrb[32].mxu1 }
 0x1f8   :  { %v6754_v23 = vadd.f32 %v6753_v20, %v6752_v18  ;;  %v6755_v24 = vpop.f32.mrb[34].mxu0  ;;  %v6775_v27 = vpop.f32.mrb[33].mxu1  ;;  %7055 = vmatpush3.bf16.msra.mxu0 %v7598_v21 }
 0x1f9   :  { %v6756_v28 = vpop.f32.mrb[35].mxu0  ;;  %v6776_v30 = vadd.f32 %v6775_v27, %v6774_v22  ;;  %v6777_v31 = vpop.f32.mrb[34].mxu1  ;;  %7056 = vmatprep.subr.bf16.mxu0 %v7600_v26  ;;  %7077 = vmatpush3.bf16.msra.mxu1 %v7599_v25 }
 0x1fa   :  { %v5255_v29 = vadd.f32 %v6754_v23, %v9178_v44  ;;  %v6778_v33 = vpop.f32.mrb[35].mxu1  ;;  %7078 = vmatprep.subr.bf16.mxu1 %v7601_v32 }
 0x1fc   :  { %v5295_v36 = vadd.f32 %v6776_v30, %v5255_v29  ;;  %7057 = vmatpush3.bf16.msra.mxu0 %v7602_v34 }
 0x1fd   :  { %7058 = vmatprep.subr.bf16.mxu0 %v7604_v37  ;;  %7079 = vmatpush3.bf16.msra.mxu1 %v7603_v38 }
 0x1fe   :  { %7080 = vmatprep.subr.bf16.mxu1 %v7605_v39 }
 0x200   :  { %7059 = vmatpush3.bf16.msra.mxu0 %v7606_v40 }
 0x201   :  { %7081 = vmatpush3.bf16.msra.mxu1 %v7607_v42 }
 0x203   :  { %5813 = vmatmul.mubr.bf16.vlgmr.msra.gmra.mrb[60].mxu0 %v1425_v41 }
 0x204   :  { %5853 = vmatmul.mubr.bf16.vlgmr.msra.gmra.mrb[60].mxu1 %v1441_v43 }
 0x216   :  { %v6796_v44 = vpop.f32.mrb[36].mxu0 }
 0x217   :  { %v6797_v45 = vpop.f32.mrb[37].mxu0  ;;  %v6818_v46 = vpop.f32.mrb[36].mxu1 }
 0x218   :  { %v6798_v47 = vadd.f32 %v6797_v45, %v6796_v44  ;;  %v6799_v48 = vpop.f32.mrb[38].mxu0  ;;  %v6819_v49 = vpop.f32.mrb[37].mxu1 }
 0x219   :  { %v6800_v50 = vpop.f32.mrb[39].mxu0  ;;  %v6820_v35 = vadd.f32 %v6819_v49, %v6818_v46  ;;  %v6821_v52 = vpop.f32.mrb[38].mxu1 }
 0x21a   :  { %v5335_v51 = vadd.f32 %v6798_v47, %v5295_v36  ;;  %v6822_v53 = vpop.f32.mrb[39].mxu1 }
 0x21c   :  { %v5375_v54 = vadd.f32 %v6820_v35, %v5335_v51 }
 0x236   :  { %v6840_v55 = vpop.f32.mrb[40].mxu0 }
 0x237   :  { %v6841_v56 = vpop.f32.mrb[41].mxu0  ;;  %v6862_v57 = vpop.f32.mrb[40].mxu1 }
 0x238   :  { %v6842_v58 = vadd.f32 %v6841_v56, %v6840_v55  ;;  %v6843_v59 = vpop.f32.mrb[42].mxu0  ;;  %v6863_v60 = vpop.f32.mrb[41].mxu1 }
 0x239   :  { %v6844_v61 = vpop.f32.mrb[43].mxu0  ;;  %v6864_v63 = vadd.f32 %v6863_v60, %v6862_v57  ;;  %v6865_v0 = vpop.f32.mrb[42].mxu1 }
 0x23a   :  { %v5415_v62 = vadd.f32 %v6842_v58, %v5375_v54  ;;  %v6866_v1 = vpop.f32.mrb[43].mxu1 }
 0x23c   :  { %v5455_v2 = vadd.f32 %v6864_v63, %v5415_v62 }
 0x256   :  { %v6884_v3 = vpop.f32.mrb[44].mxu0 }
 0x257   :  { %v6885_v4 = vpop.f32.mrb[45].mxu0  ;;  %v6906_v5 = vpop.f32.mrb[44].mxu1 }
 0x258   :  { %v6886_v6 = vadd.f32 %v6885_v4, %v6884_v3  ;;  %v6887_v7 = vpop.f32.mrb[46].mxu0  ;;  %v6907_v8 = vpop.f32.mrb[45].mxu1 }
 0x259   :  { %v6888_v9 = vpop.f32.mrb[47].mxu0  ;;  %v6908_v11 = vadd.f32 %v6907_v8, %v6906_v5  ;;  %v6909_v12 = vpop.f32.mrb[46].mxu1 }
 0x25a   :  { %v5495_v10 = vadd.f32 %v6886_v6, %v5455_v2  ;;  %v6910_v13 = vpop.f32.mrb[47].mxu1 }
 0x25c   :  { %v5535_v14 = vadd.f32 %v6908_v11, %v5495_v10 }
 0x276   :  { %v6928_v15 = vpop.f32.mrb[48].mxu0 }
 0x277   :  { %v6929_v16 = vpop.f32.mrb[49].mxu0  ;;  %v6950_v17 = vpop.f32.mrb[48].mxu1 }
 0x278   :  { %v6930_v18 = vadd.f32 %v6929_v16, %v6928_v15  ;;  %v6931_v19 = vpop.f32.mrb[50].mxu0  ;;  %v6951_v20 = vpop.f32.mrb[49].mxu1 }
 0x279   :  { %v6932_v21 = vpop.f32.mrb[51].mxu0  ;;  %v6952_v23 = vadd.f32 %v6951_v20, %v6950_v17  ;;  %v6953_v24 = vpop.f32.mrb[50].mxu1 }
 0x27a   :  { %v5575_v22 = vadd.f32 %v6930_v18, %v5535_v14  ;;  %v6954_v25 = vpop.f32.mrb[51].mxu1 }
 0x27c   :  { %v5615_v26 = vadd.f32 %v6952_v23, %v5575_v22 }
 0x296   :  { %v6972_v27 = vpop.f32.mrb[52].mxu0 }
 0x297   :  { %v6973_v28 = vpop.f32.mrb[53].mxu0  ;;  %v6994_v29 = vpop.f32.mrb[52].mxu1 }
 0x298   :  { %v6974_v30 = vadd.f32 %v6973_v28, %v6972_v27  ;;  %v6975_v31 = vpop.f32.mrb[54].mxu0  ;;  %v6995_v32 = vpop.f32.mrb[53].mxu1 }
 0x299   :  { %v6976_v33 = vpop.f32.mrb[55].mxu0  ;;  %v6996_v36 = vadd.f32 %v6995_v32, %v6994_v29  ;;  %v6997_v37 = vpop.f32.mrb[54].mxu1 }
 0x29a   :  { %v5655_v34 = vadd.f32 %v6974_v30, %v5615_v26  ;;  %v6998_v38 = vpop.f32.mrb[55].mxu1 }
 0x29c   :  { %v5695_v39 = vadd.f32 %v6996_v36, %v5655_v34 }
 0x2b6   :  { %v7016_v40 = vpop.f32.mrb[56].mxu0 }
 0x2b7   :  { %v7017_v41 = vpop.f32.mrb[57].mxu0  ;;  %v7038_v42 = vpop.f32.mrb[56].mxu1 }
 0x2b8   :  { %v7018_v43 = vadd.f32 %v7017_v41, %v7016_v40  ;;  %v7019_v44 = vpop.f32.mrb[58].mxu0  ;;  %v7039_v45 = vpop.f32.mrb[57].mxu1 }
 0x2b9   :  { %v7020_v46 = vpop.f32.mrb[59].mxu0  ;;  %v7040_v48 = vadd.f32 %v7039_v45, %v7038_v42  ;;  %v7041_v49 = vpop.f32.mrb[58].mxu1 }
 0x2ba   :  { %v5735_v47 = vadd.f32 %v7018_v43, %v5695_v39  ;;  %v7042_v50 = vpop.f32.mrb[59].mxu1 }
 0x2bc   :  { %v5775_v51 = vadd.f32 %v7040_v48, %v5735_v47 }
 0x2d6   :  { %v7060_v35 = vpop.f32.mrb[60].mxu0 }
 0x2d7   :  { %v7061_v52 = vpop.f32.mrb[61].mxu0  ;;  %v7082_v53 = vpop.f32.mrb[60].mxu1 }
 0x2d8   :  { %v7062_v54 = vadd.f32 %v7061_v52, %v7060_v35  ;;  %v7063_v55 = vpop.f32.mrb[62].mxu0  ;;  %v7083_v56 = vpop.f32.mrb[61].mxu1 }
 0x2d9   :  { %v7064_v57 = vpop.f32.mrb[63].mxu0  ;;  %v7084_v59 = vadd.f32 %v7083_v56, %v7082_v53  ;;  %v7085_v60 = vpop.f32.mrb[62].mxu1 }
 0x2da   :  { %v5815_v58 = vadd.f32 %v7062_v54, %v5775_v51  ;;  %v7086_v61 = vpop.f32.mrb[63].mxu1 }
 0x2dc   :  { %v5855_v62 = vadd.f32 %v7084_v59, %v5815_v58 }
 0x2de   :  { %v5860_v63 = vsub.f32 0.0, %v5855_v62 }
 0x2e0   :  { %v5861_v0 = vmul.f32 1.442695, %v5860_v63 }
 0x2e2   :  { %7609 = vpow2.f32 %v5861_v0 }
 0x2ec   :  { %v7610_v1 = vpop.eup %7609 }
 0x2ed   :  { %v5863_v2 = vadd.f32 1.0, %v7610_v1 }
 0x2ef   :  { %7611 = vrcp.f32 %v5863_v2 }
 0x2f9   :  { %v7612_v3 = vpop.eup %7611 }
 0x2fa   :  { %5867 = vst.msk [vmem:[%s9308_s2] sm:$0x3] %vm5866_vm0, %v7612_v3 }

</bundles_post_ra>
